<compile_context>
chip_gen: v6e
topology: v6e:2x2x1
jax: 0.10.0
libtpu: 0.0.40
codegen_flags: <defaults>
</compile_context>

<pallas_src>
import functools

import numpy as np

import jax
import jax.numpy as jnp
from jax import lax
from jax.experimental import pallas as pl
from jax.experimental.pallas import tpu as pltpu

BN_EPS = 1e-5          # PyTorch BatchNorm default eps
_HC = 12               # per-image zero-padded spatial canvas (12 x 12)
_SLACK = 16            # extra zero lanes so 2x2 tap shifts are plain slices
_TAPS = ((0, 0), (0, 1), (1, 0), (1, 1))
_SHIFTS = tuple(i * _HC + j for (i, j) in _TAPS)       # (0, 1, 12, 13)


# ----------------------------------------------------------------------------
# Kernel 1: conv1/conv2/conv3, each with per-pass train-mode BN + ReLU.
# ----------------------------------------------------------------------------
def _conv_kernel(patches_ref, masks_ref, w1_ref, a1_ref, w2_ref, a2_ref,
                 w3_ref, a3_ref, out_ref, *, n1, n2, n3):
    """Channel-major conv stack.  Activations are (C, W); W = columns over
    (pass, batch, canvas h, canvas w); 2x2 conv taps are static lane shifts
    fused into one K=4*Cin GEMM per layer."""
    dot = functools.partial(jnp.dot, preferred_element_type=jnp.float32)
    masks = masks_ref[...]                               # (6, W1)
    w_in = patches_ref.shape[1]
    w2_cols = w_in - _SLACK
    w3_cols = w_in - 2 * _SLACK

    def bn_relu(y, aff, m0, m1, n):
        # y: (C, W); aff: (C, 3) = [bias, gamma, beta]; m0/m1: (1, W) 0/1
        # masks selecting the valid columns of pass 0 / pass 1.
        y = y + aff[:, 0:1]
        inv_n = 1.0 / n

        def stats(m):
            ym = y * m
            mean = jnp.sum(ym, axis=1, keepdims=True) * inv_n
            ex2 = jnp.sum(ym * y, axis=1, keepdims=True) * inv_n
            return mean, lax.rsqrt(ex2 - mean * mean + BN_EPS)

        mu0, r0 = stats(m0)
        mu1, r1 = stats(m1)
        mean = m0 * mu0 + m1 * mu1
        rstd = m0 * r0 + m1 * r1
        return jnp.maximum((y - mean) * rstd * aff[:, 1:2] + aff[:, 2:3], 0.0)

    def taps(x, width):
        # 4 statically lane-shifted views of x, stacked on the sublane-aligned
        # channel axis -> one K=4*Cin GEMM instead of 4 matmul+add pairs.
        return jnp.concatenate([x[:, d:d + width] for d in _SHIFTS], axis=0)

    # conv1: im2col GEMM (patches pre-gathered by the wrapper).
    h = dot(w1_ref[...], patches_ref[...])                       # (16, W1)
    h = bn_relu(h, a1_ref[...], masks[0:1, :], masks[1:2, :], n1)
    h = h * (masks[0:1, :] + masks[1:2, :])    # zero ring = conv2's padding

    # conv2 (pad=1): one (16, 64) @ (64, W2) GEMM.
    h = dot(w2_ref[...], taps(h, w2_cols))                       # (16, W2)
    h = bn_relu(h, a2_ref[...], masks[2:3, :w2_cols], masks[3:4, :w2_cols], n2)

    # conv3 (pad=0): one (20, 64) @ (64, W3) GEMM.
    h = dot(w3_ref[...], taps(h, w3_cols))                       # (20, W3)
    h = bn_relu(h, a3_ref[...], masks[4:5, :w3_cols], masks[5:6, :w3_cols], n3)
    out_ref[...] = h


# ----------------------------------------------------------------------------
# Kernel 2: fc1/fc2/fc3, each with per-pass BatchNorm1d + ReLU.
# ----------------------------------------------------------------------------
def _fc_kernel(flat_ref, pmask_ref, w1_ref, a1_ref, w2_ref, a2_ref,
               w3_ref, a3_ref, out_ref, *, nb):
    """fc1 is a single (2B, 1620) @ (1620, 400) GEMM; rows = (pass, batch)."""
    dot = functools.partial(jnp.dot, preferred_element_type=jnp.float32)
    pm = pmask_ref[...]                                  # (2B, 2) pass masks
    m0 = pm[:, 0:1]
    m1 = pm[:, 1:2]

    def bn_relu(y, aff):
        # y: (2B, F); aff: (3, F) = [bias; gamma; beta]; BN over each pass's
        # B rows (train-mode, biased variance), exactly like PyTorch.
        y = y + aff[0:1, :]
        inv_n = 1.0 / nb

        def stats(m):
            ym = y * m
            mean = jnp.sum(ym, axis=0, keepdims=True) * inv_n
            ex2 = jnp.sum(ym * y, axis=0, keepdims=True) * inv_n
            return mean, lax.rsqrt(ex2 - mean * mean + BN_EPS)

        mu0, r0 = stats(m0)
        mu1, r1 = stats(m1)
        mean = m0 * mu0 + m1 * mu1
        rstd = m0 * r0 + m1 * r1
        return jnp.maximum((y - mean) * rstd * aff[1:2, :] + aff[2:3, :], 0.0)

    h = bn_relu(dot(flat_ref[...], w1_ref[...]), a1_ref[...])    # (2B, 400)
    h = bn_relu(dot(h, w2_ref[...]), a2_ref[...])                # (2B, 50)
    h = bn_relu(dot(h, w3_ref[...]), a3_ref[...])                # (2B, 16)
    out_ref[...] = h


# ----------------------------------------------------------------------------
# One-time host-side parameter prep.
# ----------------------------------------------------------------------------
def _valid_masks(batch_size):
    """(6, 2*B*144 + 3*SLACK) 0/1 masks of valid canvas columns per (stage, pass)."""
    B = batch_size
    width = 2 * B * _HC * _HC + 3 * _SLACK
    m = np.zeros((6, width), np.float32)
    for p in range(2):
        for b in range(B):
            base = (p * B + b) * _HC * _HC
            for hc in range(_HC):
                for wc in range(_HC):
                    r = base + hc * _HC + wc
                    if 1 <= hc <= 9 and 1 <= wc <= 9:
                        m[0 + p, r] = 1.0      # conv1 output: 9x9 at offset (1,1)
                    if hc <= 9 and wc <= 9:
                        m[2 + p, r] = 1.0      # conv2 output: 10x10 at (0,0)
                    if hc <= 8 and wc <= 8:
                        m[4 + p, r] = 1.0      # conv3 output: 9x9 at (0,0)
    return jnp.asarray(m)


def prepare_encoder(params, batch_size):
    def conv_aff(bias, gamma, beta):           # (C, 3)
        return jnp.stack([bias, gamma, beta], axis=1).astype(jnp.float32)

    def fc_aff(bias, gamma, beta):             # (3, F)
        return jnp.stack([bias, gamma, beta], axis=0).astype(jnp.float32)

    def tap_stack(w):                          # (Cout, 4*Cin), tap-major cols
        return jnp.concatenate([w[:, :, i, j] for (i, j) in _TAPS], axis=1)

    w1, b1, g1, e1 = params["conv1"]
    w2, b2, g2, e2 = params["conv2"]
    w3, b3, g3, e3 = params["conv3"]
    wf1, bf1, gf1, ef1 = params["fc1"]
    wf2, bf2, gf2, ef2 = params["fc2"]
    wf3, bf3, gf3, ef3 = params["fc3"]

    B = batch_size
    return {
        "w1": w1.reshape(w1.shape[0], -1),     # (16, 12), cols = (ci, kh, kw)
        "a1": conv_aff(b1, g1, e1),
        "w2": tap_stack(w2),                   # (16, 64)
        "a2": conv_aff(b2, g2, e2),
        "w3": tap_stack(w3),                   # (20, 64)
        "a3": conv_aff(b3, g3, e3),
        "masks": _valid_masks(B),              # (6, 2*B*144 + 48)
        "pmask": jnp.asarray(np.repeat(np.eye(2, dtype=np.float32), B, axis=0)),
        "wfc1": wf1, "afc1": fc_aff(bf1, gf1, ef1),
        "wfc2": wf2, "afc2": fc_aff(bf2, gf2, ef2),
        "wfc3": wf3, "afc3": fc_aff(bf3, gf3, ef3),
    }


# ----------------------------------------------------------------------------
# Wrapper: cheap XLA glue (conv1 im2col, conv->fc flatten) around the kernels.
# ----------------------------------------------------------------------------
def _conv1_patches(obs_pair):
    """im2col for conv1 on the canvas grid.  obs_pair: (2, B, 3, 8, 8).
    Returns (12, 2*B*144 + 3*SLACK); row = (ci, kh, kw), col = (pass,b,hc,wc)."""
    P, B = obs_pair.shape[0], obs_pair.shape[1]
    xp = jnp.pad(obs_pair, ((0, 0), (0, 0), (0, 0), (2, 3), (2, 3)))
    cols = [xp[:, :, :, i:i + _HC, j:j + _HC] for (i, j) in _TAPS]
    pat = jnp.stack(cols, axis=3)                        # (2, B, 3, 4, 12, 12)
    pat = pat.transpose(2, 3, 0, 1, 4, 5)                # (3, 4, 2, B, 12, 12)
    pat = pat.reshape(3 * 4, P * B * _HC * _HC)
    return jnp.pad(pat, ((0, 0), (0, 3 * _SLACK)))


_VMEM = pl.BlockSpec(memory_space=pltpu.MemorySpace.VMEM)


def encode_pair(prep, initial_obs, goal_obs):
    """Run state_encoder on both observations; returns (latent_init, latent_goal)."""
    B = initial_obs.shape[0]
    n_can = 2 * B * _HC * _HC
    obs = jnp.stack([initial_obs, goal_obs], axis=0)     # (2, B, 3, 8, 8)
    patches = _conv1_patches(obs)                        # (12, n_can + 48)

    conv_out = pl.pallas_call(
        functools.partial(_conv_kernel, n1=float(81 * B), n2=float(100 * B),
                          n3=float(81 * B)),
        out_shape=jax.ShapeDtypeStruct((20, patches.shape[1] - 2 * _SLACK),
                                       jnp.float32),
        in_specs=[_VMEM] * 8,
        out_specs=_VMEM,
    )(patches, prep["masks"], prep["w1"], prep["a1"], prep["w2"], prep["a2"],
      prep["w3"], prep["a3"])

    # conv -> fc flatten (torch's (c, h, w) order) is a pure layout permutation
    # left to XLA between the two fused kernels; this keeps fc1 one dense GEMM
    # and avoids unaligned in-kernel reshapes.
    a = conv_out[:, :n_can].reshape(20, 2, B, _HC, _HC)[:, :, :, :9, :9]
    flat = a.transpose(1, 2, 0, 3, 4).reshape(2 * B, 20 * 81)    # (2B, 1620)

    lat = pl.pallas_call(
        functools.partial(_fc_kernel, nb=float(B)),
        out_shape=jax.ShapeDtypeStruct((2 * B, 16), jnp.float32),
        in_specs=[_VMEM] * 8,
        out_specs=_VMEM,
    )(flat, prep["pmask"], prep["wfc1"], prep["afc1"], prep["wfc2"],
      prep["afc2"], prep["wfc3"], prep["afc3"])

    lat = lat.reshape(2, B, 16)
    return lat[0], lat[1]


# ----------------------------------------------------------------------------
# _next_state, rollout (lax.scan), SmoothL1 loss and planner-update loop —
# kept in plain JAX so jax.grad reproduces torch's loss.backward() w.r.t. plan.
# ----------------------------------------------------------------------------
def next_state_apply(p, x):
    w, b, gamma, beta = p
    y = x @ w + b
    mean = jnp.mean(y, axis=0, keepdims=True)
    var = jnp.mean(jnp.square(y - mean), axis=0, keepdims=True)   # biased var
    y = (y - mean) * lax.rsqrt(var + BN_EPS)
    return jnp.maximum(y * gamma + beta, 0.0)


def smooth_l1(pred, target):
    d = pred - target
    ad = jnp.abs(d)
    return jnp.where(ad < 1.0, 0.5 * d * d, ad - 0.5)


def rollout_loss(plan, latent_init, latent_goal, ns_params):
    soft_plan = jax.nn.softmax(plan, axis=2)               # nn.Softmax(2)

    def step(latent, action):
        cat = jnp.concatenate([latent, action], axis=1)    # (B, 20)
        return next_state_apply(ns_params, cat), None

    latent, _ = lax.scan(step, latent_init, soft_plan)
    return jnp.sum(smooth_l1(latent, latent_goal))


def net_forward(prep, ns_params, initial_obs, goal_obs, plan,
                n_planner_updates, learning_rate):
    # Encoders hoisted out of the update loop: their inputs never change, so
    # this is numerically identical to recomputing them every update.
    latent_init, latent_goal = encode_pair(prep, initial_obs, goal_obs)
    grad_fn = jax.grad(rollout_loss)

    def update(_, p):
        return p - learning_rate * grad_fn(p, latent_init, latent_goal, ns_params)

    return lax.fori_loop(0, n_planner_updates, update, plan)


# ----------------------------------------------------------------------------
# Deterministic synthetic parameters (shapes from Net.__init__).
# ----------------------------------------------------------------------------
def init_params(key):
    ks = jax.random.split(key, 8)

    def w(k, shape, scale):
        return jax.random.normal(k, shape, jnp.float32) * scale

    def bn(n):
        return jnp.ones((n,), jnp.float32), jnp.zeros((n,), jnp.float32)

    z = lambda n: jnp.zeros((n,), jnp.float32)
    params = {}
    g, b = bn(16); params["conv1"] = (w(ks[0], (16, 3, 2, 2), 0.2), z(16), g, b)
    g, b = bn(16); params["conv2"] = (w(ks[1], (16, 16, 2, 2), 0.1), z(16), g, b)
    g, b = bn(20); params["conv3"] = (w(ks[2], (20, 16, 2, 2), 0.1), z(20), g, b)
    g, b = bn(400); params["fc1"] = (w(ks[3], (1620, 400), 0.02), z(400), g, b)
    g, b = bn(50);  params["fc2"] = (w(ks[4], (400, 50), 0.05), z(50), g, b)
    g, b = bn(16);  params["fc3"] = (w(ks[5], (50, 16), 0.1), z(16), g, b)
    g, b = bn(16);  params["next_state"] = (w(ks[6], (20, 16), 0.2), z(16), g, b)
    return params


if __name__ == "__main__":
    batch = 2
    horizon = 10
    n_planner_updates = 2
    learning_rate = 0.1

    key = jax.random.PRNGKey(0)
    k_init, k_goal, k_plan, k_params = jax.random.split(key, 4)
    initial_obs = jax.random.normal(k_init, (batch, 3, 8, 8), jnp.float32)
    goal_obs = jax.random.normal(k_goal, (batch, 3, 8, 8), jnp.float32)
    plan = jax.random.normal(k_plan, (horizon, batch, 4), jnp.float32)

    params = init_params(k_params)
    prep = prepare_encoder(params, batch)      # one-time host-side prep

    fwd = jax.jit(functools.partial(
        net_forward,
        n_planner_updates=n_planner_updates,
        learning_rate=learning_rate))
    out = jax.block_until_ready(
        fwd(prep, params["next_state"], initial_obs, goal_obs, plan))

    assert out.shape == (horizon, batch, 4)
    assert out.dtype == jnp.float32
    assert bool(jnp.all(jnp.isfinite(out)))
    print("KERNEL_OK")
</pallas_src>

<mosaic_0001>
module attributes {stable_mosaic.version = 11 : i64} {
  func.func @_conv_kernel(%arg0: memref<12x624xf32, #tpu.memory_space<vmem>>, %arg1: memref<6x624xf32, #tpu.memory_space<vmem>>, %arg2: memref<16x12xf32, #tpu.memory_space<vmem>>, %arg3: memref<16x3xf32, #tpu.memory_space<vmem>>, %arg4: memref<16x64xf32, #tpu.memory_space<vmem>>, %arg5: memref<16x3xf32, #tpu.memory_space<vmem>>, %arg6: memref<20x64xf32, #tpu.memory_space<vmem>>, %arg7: memref<20x3xf32, #tpu.memory_space<vmem>>, %arg8: memref<20x592xf32, #tpu.memory_space<vmem>>) attributes {dimension_semantics = [], scalar_prefetch = 0 : i64, scratch_operands = 0 : i64, tpu.core_type = #tpu.core_type<tc>} {
    %c0 = arith.constant 0 : index
    %c0_0 = arith.constant 0 : index
    %0 = vector.load %arg1[%c0, %c0_0] : memref<6x624xf32, #tpu.memory_space<vmem>>, vector<6x624xf32>
    %c0_1 = arith.constant 0 : index
    %c0_2 = arith.constant 0 : index
    %1 = vector.load %arg2[%c0_1, %c0_2] : memref<16x12xf32, #tpu.memory_space<vmem>>, vector<16x12xf32>
    %c0_3 = arith.constant 0 : index
    %c0_4 = arith.constant 0 : index
    %2 = vector.load %arg0[%c0_3, %c0_4] : memref<12x624xf32, #tpu.memory_space<vmem>>, vector<12x624xf32>
    %cst = arith.constant dense<0.000000e+00> : vector<16x624xf32>
    %3 = tpu.matmul %1, %2, %cst {dimension_numbers = #tpu.dot_dimension_numbers<[1], [0], [0], [1], [0, 0, 1, 1], [], []>} : vector<16x12xf32>, vector<12x624xf32>, vector<16x624xf32> -> vector<16x624xf32>
    %c0_5 = arith.constant 0 : index
    %c0_6 = arith.constant 0 : index
    %4 = vector.load %arg3[%c0_5, %c0_6] : memref<16x3xf32, #tpu.memory_space<vmem>>, vector<16x3xf32>
    %5 = vector.extract_strided_slice %0 {offsets = [0, 0], sizes = [1, 624], strides = [1, 1]} : vector<6x624xf32> to vector<1x624xf32>
    %6 = vector.extract_strided_slice %0 {offsets = [1, 0], sizes = [1, 624], strides = [1, 1]} : vector<6x624xf32> to vector<1x624xf32>
    %7 = vector.extract_strided_slice %4 {offsets = [0, 0], sizes = [16, 1], strides = [1, 1]} : vector<16x3xf32> to vector<16x1xf32>
    %8 = vector.broadcast %7 : vector<16x1xf32> to vector<16x624xf32>
    %9 = arith.addf %3, %8 : vector<16x624xf32>
    %10 = vector.broadcast %5 : vector<1x624xf32> to vector<16x624xf32>
    %11 = arith.mulf %9, %10 : vector<16x624xf32>
    %cst_7 = arith.constant dense<0.000000e+00> : vector<16xf32>
    %12 = vector.multi_reduction <add>, %11, %cst_7 [1] : vector<16x624xf32> to vector<16xf32>
    %13 = vector.shape_cast %12 : vector<16xf32> to vector<16x1xf32>
    %cst_8 = arith.constant 0.00617283955 : f32
    %14 = vector.broadcast %cst_8 : f32 to vector<16x1xf32>
    %15 = arith.mulf %13, %14 : vector<16x1xf32>
    %16 = arith.mulf %11, %9 : vector<16x624xf32>
    %cst_9 = arith.constant dense<0.000000e+00> : vector<16xf32>
    %17 = vector.multi_reduction <add>, %16, %cst_9 [1] : vector<16x624xf32> to vector<16xf32>
    %18 = vector.shape_cast %17 : vector<16xf32> to vector<16x1xf32>
    %cst_10 = arith.constant 0.00617283955 : f32
    %19 = vector.broadcast %cst_10 : f32 to vector<16x1xf32>
    %20 = arith.mulf %18, %19 : vector<16x1xf32>
    %21 = arith.mulf %15, %15 : vector<16x1xf32>
    %22 = arith.subf %20, %21 : vector<16x1xf32>
    %cst_11 = arith.constant 9.99999974E-6 : f32
    %23 = vector.broadcast %cst_11 : f32 to vector<16x1xf32>
    %24 = arith.addf %22, %23 : vector<16x1xf32>
    %25 = math.rsqrt %24 : vector<16x1xf32>
    %26 = vector.broadcast %6 : vector<1x624xf32> to vector<16x624xf32>
    %27 = arith.mulf %9, %26 : vector<16x624xf32>
    %cst_12 = arith.constant dense<0.000000e+00> : vector<16xf32>
    %28 = vector.multi_reduction <add>, %27, %cst_12 [1] : vector<16x624xf32> to vector<16xf32>
    %29 = vector.shape_cast %28 : vector<16xf32> to vector<16x1xf32>
    %cst_13 = arith.constant 0.00617283955 : f32
    %30 = vector.broadcast %cst_13 : f32 to vector<16x1xf32>
    %31 = arith.mulf %29, %30 : vector<16x1xf32>
    %32 = arith.mulf %27, %9 : vector<16x624xf32>
    %cst_14 = arith.constant dense<0.000000e+00> : vector<16xf32>
    %33 = vector.multi_reduction <add>, %32, %cst_14 [1] : vector<16x624xf32> to vector<16xf32>
    %34 = vector.shape_cast %33 : vector<16xf32> to vector<16x1xf32>
    %cst_15 = arith.constant 0.00617283955 : f32
    %35 = vector.broadcast %cst_15 : f32 to vector<16x1xf32>
    %36 = arith.mulf %34, %35 : vector<16x1xf32>
    %37 = arith.mulf %31, %31 : vector<16x1xf32>
    %38 = arith.subf %36, %37 : vector<16x1xf32>
    %cst_16 = arith.constant 9.99999974E-6 : f32
    %39 = vector.broadcast %cst_16 : f32 to vector<16x1xf32>
    %40 = arith.addf %38, %39 : vector<16x1xf32>
    %41 = math.rsqrt %40 : vector<16x1xf32>
    %42 = vector.broadcast %5 : vector<1x624xf32> to vector<16x624xf32>
    %43 = vector.broadcast %15 : vector<16x1xf32> to vector<16x624xf32>
    %44 = arith.mulf %42, %43 : vector<16x624xf32>
    %45 = vector.broadcast %6 : vector<1x624xf32> to vector<16x624xf32>
    %46 = vector.broadcast %31 : vector<16x1xf32> to vector<16x624xf32>
    %47 = arith.mulf %45, %46 : vector<16x624xf32>
    %48 = arith.addf %44, %47 : vector<16x624xf32>
    %49 = vector.broadcast %5 : vector<1x624xf32> to vector<16x624xf32>
    %50 = vector.broadcast %25 : vector<16x1xf32> to vector<16x624xf32>
    %51 = arith.mulf %49, %50 : vector<16x624xf32>
    %52 = vector.broadcast %6 : vector<1x624xf32> to vector<16x624xf32>
    %53 = vector.broadcast %41 : vector<16x1xf32> to vector<16x624xf32>
    %54 = arith.mulf %52, %53 : vector<16x624xf32>
    %55 = arith.addf %51, %54 : vector<16x624xf32>
    %56 = arith.subf %9, %48 : vector<16x624xf32>
    %57 = arith.mulf %56, %55 : vector<16x624xf32>
    %58 = vector.extract_strided_slice %4 {offsets = [0, 1], sizes = [16, 1], strides = [1, 1]} : vector<16x3xf32> to vector<16x1xf32>
    %59 = vector.broadcast %58 : vector<16x1xf32> to vector<16x624xf32>
    %60 = arith.mulf %57, %59 : vector<16x624xf32>
    %61 = vector.extract_strided_slice %4 {offsets = [0, 2], sizes = [16, 1], strides = [1, 1]} : vector<16x3xf32> to vector<16x1xf32>
    %62 = vector.broadcast %61 : vector<16x1xf32> to vector<16x624xf32>
    %63 = arith.addf %60, %62 : vector<16x624xf32>
    %cst_17 = arith.constant 0.000000e+00 : f32
    %64 = vector.broadcast %cst_17 : f32 to vector<16x624xf32>
    %65 = arith.maximumf %63, %64 : vector<16x624xf32>
    %66 = vector.extract_strided_slice %0 {offsets = [0, 0], sizes = [1, 624], strides = [1, 1]} : vector<6x624xf32> to vector<1x624xf32>
    %67 = vector.extract_strided_slice %0 {offsets = [1, 0], sizes = [1, 624], strides = [1, 1]} : vector<6x624xf32> to vector<1x624xf32>
    %68 = arith.addf %66, %67 : vector<1x624xf32>
    %69 = vector.broadcast %68 : vector<1x624xf32> to vector<16x624xf32>
    %70 = arith.mulf %65, %69 : vector<16x624xf32>
    %c0_18 = arith.constant 0 : index
    %c0_19 = arith.constant 0 : index
    %71 = vector.load %arg4[%c0_18, %c0_19] : memref<16x64xf32, #tpu.memory_space<vmem>>, vector<16x64xf32>
    %72 = vector.extract_strided_slice %70 {offsets = [0, 0], sizes = [16, 608], strides = [1, 1]} : vector<16x624xf32> to vector<16x608xf32>
    %73 = vector.extract_strided_slice %70 {offsets = [0, 1], sizes = [16, 608], strides = [1, 1]} : vector<16x624xf32> to vector<16x608xf32>
    %74 = vector.extract_strided_slice %70 {offsets = [0, 12], sizes = [16, 608], strides = [1, 1]} : vector<16x624xf32> to vector<16x608xf32>
    %75 = vector.extract_strided_slice %70 {offsets = [0, 13], sizes = [16, 608], strides = [1, 1]} : vector<16x624xf32> to vector<16x608xf32>
    %76 = tpu.concatenate %72, %73, %74, %75 in 0 : vector<16x608xf32>, vector<16x608xf32>, vector<16x608xf32>, vector<16x608xf32> -> vector<64x608xf32>
    %cst_20 = arith.constant dense<0.000000e+00> : vector<16x608xf32>
    %77 = tpu.matmul %71, %76, %cst_20 {dimension_numbers = #tpu.dot_dimension_numbers<[1], [0], [0], [1], [0, 0, 1, 1], [], []>} : vector<16x64xf32>, vector<64x608xf32>, vector<16x608xf32> -> vector<16x608xf32>
    %c0_21 = arith.constant 0 : index
    %c0_22 = arith.constant 0 : index
    %78 = vector.load %arg5[%c0_21, %c0_22] : memref<16x3xf32, #tpu.memory_space<vmem>>, vector<16x3xf32>
    %79 = vector.extract_strided_slice %0 {offsets = [2, 0], sizes = [1, 608], strides = [1, 1]} : vector<6x624xf32> to vector<1x608xf32>
    %80 = vector.extract_strided_slice %0 {offsets = [3, 0], sizes = [1, 608], strides = [1, 1]} : vector<6x624xf32> to vector<1x608xf32>
    %81 = vector.extract_strided_slice %78 {offsets = [0, 0], sizes = [16, 1], strides = [1, 1]} : vector<16x3xf32> to vector<16x1xf32>
    %82 = vector.broadcast %81 : vector<16x1xf32> to vector<16x608xf32>
    %83 = arith.addf %77, %82 : vector<16x608xf32>
    %84 = vector.broadcast %79 : vector<1x608xf32> to vector<16x608xf32>
    %85 = arith.mulf %83, %84 : vector<16x608xf32>
    %cst_23 = arith.constant dense<0.000000e+00> : vector<16xf32>
    %86 = vector.multi_reduction <add>, %85, %cst_23 [1] : vector<16x608xf32> to vector<16xf32>
    %87 = vector.shape_cast %86 : vector<16xf32> to vector<16x1xf32>
    %cst_24 = arith.constant 5.000000e-03 : f32
    %88 = vector.broadcast %cst_24 : f32 to vector<16x1xf32>
    %89 = arith.mulf %87, %88 : vector<16x1xf32>
    %90 = arith.mulf %85, %83 : vector<16x608xf32>
    %cst_25 = arith.constant dense<0.000000e+00> : vector<16xf32>
    %91 = vector.multi_reduction <add>, %90, %cst_25 [1] : vector<16x608xf32> to vector<16xf32>
    %92 = vector.shape_cast %91 : vector<16xf32> to vector<16x1xf32>
    %cst_26 = arith.constant 5.000000e-03 : f32
    %93 = vector.broadcast %cst_26 : f32 to vector<16x1xf32>
    %94 = arith.mulf %92, %93 : vector<16x1xf32>
    %95 = arith.mulf %89, %89 : vector<16x1xf32>
    %96 = arith.subf %94, %95 : vector<16x1xf32>
    %cst_27 = arith.constant 9.99999974E-6 : f32
    %97 = vector.broadcast %cst_27 : f32 to vector<16x1xf32>
    %98 = arith.addf %96, %97 : vector<16x1xf32>
    %99 = math.rsqrt %98 : vector<16x1xf32>
    %100 = vector.broadcast %80 : vector<1x608xf32> to vector<16x608xf32>
    %101 = arith.mulf %83, %100 : vector<16x608xf32>
    %cst_28 = arith.constant dense<0.000000e+00> : vector<16xf32>
    %102 = vector.multi_reduction <add>, %101, %cst_28 [1] : vector<16x608xf32> to vector<16xf32>
    %103 = vector.shape_cast %102 : vector<16xf32> to vector<16x1xf32>
    %cst_29 = arith.constant 5.000000e-03 : f32
    %104 = vector.broadcast %cst_29 : f32 to vector<16x1xf32>
    %105 = arith.mulf %103, %104 : vector<16x1xf32>
    %106 = arith.mulf %101, %83 : vector<16x608xf32>
    %cst_30 = arith.constant dense<0.000000e+00> : vector<16xf32>
    %107 = vector.multi_reduction <add>, %106, %cst_30 [1] : vector<16x608xf32> to vector<16xf32>
    %108 = vector.shape_cast %107 : vector<16xf32> to vector<16x1xf32>
    %cst_31 = arith.constant 5.000000e-03 : f32
    %109 = vector.broadcast %cst_31 : f32 to vector<16x1xf32>
    %110 = arith.mulf %108, %109 : vector<16x1xf32>
    %111 = arith.mulf %105, %105 : vector<16x1xf32>
    %112 = arith.subf %110, %111 : vector<16x1xf32>
    %cst_32 = arith.constant 9.99999974E-6 : f32
    %113 = vector.broadcast %cst_32 : f32 to vector<16x1xf32>
    %114 = arith.addf %112, %113 : vector<16x1xf32>
    %115 = math.rsqrt %114 : vector<16x1xf32>
    %116 = vector.broadcast %79 : vector<1x608xf32> to vector<16x608xf32>
    %117 = vector.broadcast %89 : vector<16x1xf32> to vector<16x608xf32>
    %118 = arith.mulf %116, %117 : vector<16x608xf32>
    %119 = vector.broadcast %80 : vector<1x608xf32> to vector<16x608xf32>
    %120 = vector.broadcast %105 : vector<16x1xf32> to vector<16x608xf32>
    %121 = arith.mulf %119, %120 : vector<16x608xf32>
    %122 = arith.addf %118, %121 : vector<16x608xf32>
    %123 = vector.broadcast %79 : vector<1x608xf32> to vector<16x608xf32>
    %124 = vector.broadcast %99 : vector<16x1xf32> to vector<16x608xf32>
    %125 = arith.mulf %123, %124 : vector<16x608xf32>
    %126 = vector.broadcast %80 : vector<1x608xf32> to vector<16x608xf32>
    %127 = vector.broadcast %115 : vector<16x1xf32> to vector<16x608xf32>
    %128 = arith.mulf %126, %127 : vector<16x608xf32>
    %129 = arith.addf %125, %128 : vector<16x608xf32>
    %130 = arith.subf %83, %122 : vector<16x608xf32>
    %131 = arith.mulf %130, %129 : vector<16x608xf32>
    %132 = vector.extract_strided_slice %78 {offsets = [0, 1], sizes = [16, 1], strides = [1, 1]} : vector<16x3xf32> to vector<16x1xf32>
    %133 = vector.broadcast %132 : vector<16x1xf32> to vector<16x608xf32>
    %134 = arith.mulf %131, %133 : vector<16x608xf32>
    %135 = vector.extract_strided_slice %78 {offsets = [0, 2], sizes = [16, 1], strides = [1, 1]} : vector<16x3xf32> to vector<16x1xf32>
    %136 = vector.broadcast %135 : vector<16x1xf32> to vector<16x608xf32>
    %137 = arith.addf %134, %136 : vector<16x608xf32>
    %cst_33 = arith.constant 0.000000e+00 : f32
    %138 = vector.broadcast %cst_33 : f32 to vector<16x608xf32>
    %139 = arith.maximumf %137, %138 : vector<16x608xf32>
    %c0_34 = arith.constant 0 : index
    %c0_35 = arith.constant 0 : index
    %140 = vector.load %arg6[%c0_34, %c0_35] : memref<20x64xf32, #tpu.memory_space<vmem>>, vector<20x64xf32>
    %141 = vector.extract_strided_slice %139 {offsets = [0, 0], sizes = [16, 592], strides = [1, 1]} : vector<16x608xf32> to vector<16x592xf32>
    %142 = vector.extract_strided_slice %139 {offsets = [0, 1], sizes = [16, 592], strides = [1, 1]} : vector<16x608xf32> to vector<16x592xf32>
    %143 = vector.extract_strided_slice %139 {offsets = [0, 12], sizes = [16, 592], strides = [1, 1]} : vector<16x608xf32> to vector<16x592xf32>
    %144 = vector.extract_strided_slice %139 {offsets = [0, 13], sizes = [16, 592], strides = [1, 1]} : vector<16x608xf32> to vector<16x592xf32>
    %145 = tpu.concatenate %141, %142, %143, %144 in 0 : vector<16x592xf32>, vector<16x592xf32>, vector<16x592xf32>, vector<16x592xf32> -> vector<64x592xf32>
    %cst_36 = arith.constant dense<0.000000e+00> : vector<20x592xf32>
    %146 = tpu.matmul %140, %145, %cst_36 {dimension_numbers = #tpu.dot_dimension_numbers<[1], [0], [0], [1], [0, 0, 1, 1], [], []>} : vector<20x64xf32>, vector<64x592xf32>, vector<20x592xf32> -> vector<20x592xf32>
    %c0_37 = arith.constant 0 : index
    %c0_38 = arith.constant 0 : index
    %147 = vector.load %arg7[%c0_37, %c0_38] : memref<20x3xf32, #tpu.memory_space<vmem>>, vector<20x3xf32>
    %148 = vector.extract_strided_slice %0 {offsets = [4, 0], sizes = [1, 592], strides = [1, 1]} : vector<6x624xf32> to vector<1x592xf32>
    %149 = vector.extract_strided_slice %0 {offsets = [5, 0], sizes = [1, 592], strides = [1, 1]} : vector<6x624xf32> to vector<1x592xf32>
    %150 = vector.extract_strided_slice %147 {offsets = [0, 0], sizes = [20, 1], strides = [1, 1]} : vector<20x3xf32> to vector<20x1xf32>
    %151 = vector.broadcast %150 : vector<20x1xf32> to vector<20x592xf32>
    %152 = arith.addf %146, %151 : vector<20x592xf32>
    %153 = vector.broadcast %148 : vector<1x592xf32> to vector<20x592xf32>
    %154 = arith.mulf %152, %153 : vector<20x592xf32>
    %cst_39 = arith.constant dense<0.000000e+00> : vector<20xf32>
    %155 = vector.multi_reduction <add>, %154, %cst_39 [1] : vector<20x592xf32> to vector<20xf32>
    %156 = vector.shape_cast %155 : vector<20xf32> to vector<20x1xf32>
    %cst_40 = arith.constant 0.00617283955 : f32
    %157 = vector.broadcast %cst_40 : f32 to vector<20x1xf32>
    %158 = arith.mulf %156, %157 : vector<20x1xf32>
    %159 = arith.mulf %154, %152 : vector<20x592xf32>
    %cst_41 = arith.constant dense<0.000000e+00> : vector<20xf32>
    %160 = vector.multi_reduction <add>, %159, %cst_41 [1] : vector<20x592xf32> to vector<20xf32>
    %161 = vector.shape_cast %160 : vector<20xf32> to vector<20x1xf32>
    %cst_42 = arith.constant 0.00617283955 : f32
    %162 = vector.broadcast %cst_42 : f32 to vector<20x1xf32>
    %163 = arith.mulf %161, %162 : vector<20x1xf32>
    %164 = arith.mulf %158, %158 : vector<20x1xf32>
    %165 = arith.subf %163, %164 : vector<20x1xf32>
    %cst_43 = arith.constant 9.99999974E-6 : f32
    %166 = vector.broadcast %cst_43 : f32 to vector<20x1xf32>
    %167 = arith.addf %165, %166 : vector<20x1xf32>
    %168 = math.rsqrt %167 : vector<20x1xf32>
    %169 = vector.broadcast %149 : vector<1x592xf32> to vector<20x592xf32>
    %170 = arith.mulf %152, %169 : vector<20x592xf32>
    %cst_44 = arith.constant dense<0.000000e+00> : vector<20xf32>
    %171 = vector.multi_reduction <add>, %170, %cst_44 [1] : vector<20x592xf32> to vector<20xf32>
    %172 = vector.shape_cast %171 : vector<20xf32> to vector<20x1xf32>
    %cst_45 = arith.constant 0.00617283955 : f32
    %173 = vector.broadcast %cst_45 : f32 to vector<20x1xf32>
    %174 = arith.mulf %172, %173 : vector<20x1xf32>
    %175 = arith.mulf %170, %152 : vector<20x592xf32>
    %cst_46 = arith.constant dense<0.000000e+00> : vector<20xf32>
    %176 = vector.multi_reduction <add>, %175, %cst_46 [1] : vector<20x592xf32> to vector<20xf32>
    %177 = vector.shape_cast %176 : vector<20xf32> to vector<20x1xf32>
    %cst_47 = arith.constant 0.00617283955 : f32
    %178 = vector.broadcast %cst_47 : f32 to vector<20x1xf32>
    %179 = arith.mulf %177, %178 : vector<20x1xf32>
    %180 = arith.mulf %174, %174 : vector<20x1xf32>
    %181 = arith.subf %179, %180 : vector<20x1xf32>
    %cst_48 = arith.constant 9.99999974E-6 : f32
    %182 = vector.broadcast %cst_48 : f32 to vector<20x1xf32>
    %183 = arith.addf %181, %182 : vector<20x1xf32>
    %184 = math.rsqrt %183 : vector<20x1xf32>
    %185 = vector.broadcast %148 : vector<1x592xf32> to vector<20x592xf32>
    %186 = vector.broadcast %158 : vector<20x1xf32> to vector<20x592xf32>
    %187 = arith.mulf %185, %186 : vector<20x592xf32>
    %188 = vector.broadcast %149 : vector<1x592xf32> to vector<20x592xf32>
    %189 = vector.broadcast %174 : vector<20x1xf32> to vector<20x592xf32>
    %190 = arith.mulf %188, %189 : vector<20x592xf32>
    %191 = arith.addf %187, %190 : vector<20x592xf32>
    %192 = vector.broadcast %148 : vector<1x592xf32> to vector<20x592xf32>
    %193 = vector.broadcast %168 : vector<20x1xf32> to vector<20x592xf32>
    %194 = arith.mulf %192, %193 : vector<20x592xf32>
    %195 = vector.broadcast %149 : vector<1x592xf32> to vector<20x592xf32>
    %196 = vector.broadcast %184 : vector<20x1xf32> to vector<20x592xf32>
    %197 = arith.mulf %195, %196 : vector<20x592xf32>
    %198 = arith.addf %194, %197 : vector<20x592xf32>
    %199 = arith.subf %152, %191 : vector<20x592xf32>
    %200 = arith.mulf %199, %198 : vector<20x592xf32>
    %201 = vector.extract_strided_slice %147 {offsets = [0, 1], sizes = [20, 1], strides = [1, 1]} : vector<20x3xf32> to vector<20x1xf32>
    %202 = vector.broadcast %201 : vector<20x1xf32> to vector<20x592xf32>
    %203 = arith.mulf %200, %202 : vector<20x592xf32>
    %204 = vector.extract_strided_slice %147 {offsets = [0, 2], sizes = [20, 1], strides = [1, 1]} : vector<20x3xf32> to vector<20x1xf32>
    %205 = vector.broadcast %204 : vector<20x1xf32> to vector<20x592xf32>
    %206 = arith.addf %203, %205 : vector<20x592xf32>
    %cst_49 = arith.constant 0.000000e+00 : f32
    %207 = vector.broadcast %cst_49 : f32 to vector<20x592xf32>
    %208 = arith.maximumf %206, %207 : vector<20x592xf32>
    %c0_50 = arith.constant 0 : index
    %c0_51 = arith.constant 0 : index
    %209 = vector.load %arg8[%c0_50, %c0_51] : memref<20x592xf32, #tpu.memory_space<vmem>>, vector<20x592xf32>
    tpu.vector_store %arg8[%c0_50, %c0_51], %208 {strides = array<i32>} : memref<20x592xf32, #tpu.memory_space<vmem>>, vector<20x592xf32>,
    return
  }
}

module attributes {stable_mosaic.version = 11 : i64} {
  func.func @_fc_kernel(%arg0: memref<4x1620xf32, #tpu.memory_space<vmem>>, %arg1: memref<4x2xf32, #tpu.memory_space<vmem>>, %arg2: memref<1620x400xf32, #tpu.memory_space<vmem>>, %arg3: memref<3x400xf32, #tpu.memory_space<vmem>>, %arg4: memref<400x50xf32, #tpu.memory_space<vmem>>, %arg5: memref<3x50xf32, #tpu.memory_space<vmem>>, %arg6: memref<50x16xf32, #tpu.memory_space<vmem>>, %arg7: memref<3x16xf32, #tpu.memory_space<vmem>>, %arg8: memref<4x16xf32, #tpu.memory_space<vmem>>) attributes {dimension_semantics = [], scalar_prefetch = 0 : i64, scratch_operands = 0 : i64, tpu.core_type = #tpu.core_type<tc>} {
    %c0 = arith.constant 0 : index
    %c0_0 = arith.constant 0 : index
    %0 = vector.load %arg1[%c0, %c0_0] : memref<4x2xf32, #tpu.memory_space<vmem>>, vector<4x2xf32>
    %1 = vector.extract_strided_slice %0 {offsets = [0, 0], sizes = [4, 1], strides = [1, 1]} : vector<4x2xf32> to vector<4x1xf32>
    %2 = vector.extract_strided_slice %0 {offsets = [0, 1], sizes = [4, 1], strides = [1, 1]} : vector<4x2xf32> to vector<4x1xf32>
    %c0_1 = arith.constant 0 : index
    %c0_2 = arith.constant 0 : index
    %3 = vector.load %arg0[%c0_1, %c0_2] : memref<4x1620xf32, #tpu.memory_space<vmem>>, vector<4x1620xf32>
    %c0_3 = arith.constant 0 : index
    %c0_4 = arith.constant 0 : index
    %4 = vector.load %arg2[%c0_3, %c0_4] : memref<1620x400xf32, #tpu.memory_space<vmem>>, vector<1620x400xf32>
    %cst = arith.constant dense<0.000000e+00> : vector<4x400xf32>
    %5 = tpu.matmul %3, %4, %cst {dimension_numbers = #tpu.dot_dimension_numbers<[1], [0], [0], [1], [0, 0, 1, 1], [], []>} : vector<4x1620xf32>, vector<1620x400xf32>, vector<4x400xf32> -> vector<4x400xf32>
    %c0_5 = arith.constant 0 : index
    %c0_6 = arith.constant 0 : index
    %6 = vector.load %arg3[%c0_5, %c0_6] : memref<3x400xf32, #tpu.memory_space<vmem>>, vector<3x400xf32>
    %7 = vector.extract_strided_slice %6 {offsets = [0, 0], sizes = [1, 400], strides = [1, 1]} : vector<3x400xf32> to vector<1x400xf32>
    %8 = vector.broadcast %7 : vector<1x400xf32> to vector<4x400xf32>
    %9 = arith.addf %5, %8 : vector<4x400xf32>
    %10 = vector.broadcast %1 : vector<4x1xf32> to vector<4x400xf32>
    %11 = arith.mulf %9, %10 : vector<4x400xf32>
    %cst_7 = arith.constant dense<0.000000e+00> : vector<400xf32>
    %12 = vector.multi_reduction <add>, %11, %cst_7 [0] : vector<4x400xf32> to vector<400xf32>
    %13 = vector.shape_cast %12 : vector<400xf32> to vector<1x400xf32>
    %cst_8 = arith.constant 5.000000e-01 : f32
    %14 = vector.broadcast %cst_8 : f32 to vector<1x400xf32>
    %15 = arith.mulf %13, %14 : vector<1x400xf32>
    %16 = arith.mulf %11, %9 : vector<4x400xf32>
    %cst_9 = arith.constant dense<0.000000e+00> : vector<400xf32>
    %17 = vector.multi_reduction <add>, %16, %cst_9 [0] : vector<4x400xf32> to vector<400xf32>
    %18 = vector.shape_cast %17 : vector<400xf32> to vector<1x400xf32>
    %cst_10 = arith.constant 5.000000e-01 : f32
    %19 = vector.broadcast %cst_10 : f32 to vector<1x400xf32>
    %20 = arith.mulf %18, %19 : vector<1x400xf32>
    %21 = arith.mulf %15, %15 : vector<1x400xf32>
    %22 = arith.subf %20, %21 : vector<1x400xf32>
    %cst_11 = arith.constant 9.99999974E-6 : f32
    %23 = vector.broadcast %cst_11 : f32 to vector<1x400xf32>
    %24 = arith.addf %22, %23 : vector<1x400xf32>
    %25 = math.rsqrt %24 : vector<1x400xf32>
    %26 = vector.broadcast %2 : vector<4x1xf32> to vector<4x400xf32>
    %27 = arith.mulf %9, %26 : vector<4x400xf32>
    %cst_12 = arith.constant dense<0.000000e+00> : vector<400xf32>
    %28 = vector.multi_reduction <add>, %27, %cst_12 [0] : vector<4x400xf32> to vector<400xf32>
    %29 = vector.shape_cast %28 : vector<400xf32> to vector<1x400xf32>
    %cst_13 = arith.constant 5.000000e-01 : f32
    %30 = vector.broadcast %cst_13 : f32 to vector<1x400xf32>
    %31 = arith.mulf %29, %30 : vector<1x400xf32>
    %32 = arith.mulf %27, %9 : vector<4x400xf32>
    %cst_14 = arith.constant dense<0.000000e+00> : vector<400xf32>
    %33 = vector.multi_reduction <add>, %32, %cst_14 [0] : vector<4x400xf32> to vector<400xf32>
    %34 = vector.shape_cast %33 : vector<400xf32> to vector<1x400xf32>
    %cst_15 = arith.constant 5.000000e-01 : f32
    %35 = vector.broadcast %cst_15 : f32 to vector<1x400xf32>
    %36 = arith.mulf %34, %35 : vector<1x400xf32>
    %37 = arith.mulf %31, %31 : vector<1x400xf32>
    %38 = arith.subf %36, %37 : vector<1x400xf32>
    %cst_16 = arith.constant 9.99999974E-6 : f32
    %39 = vector.broadcast %cst_16 : f32 to vector<1x400xf32>
    %40 = arith.addf %38, %39 : vector<1x400xf32>
    %41 = math.rsqrt %40 : vector<1x400xf32>
    %42 = vector.broadcast %1 : vector<4x1xf32> to vector<4x400xf32>
    %43 = vector.broadcast %15 : vector<1x400xf32> to vector<4x400xf32>
    %44 = arith.mulf %42, %43 : vector<4x400xf32>
    %45 = vector.broadcast %2 : vector<4x1xf32> to vector<4x400xf32>
    %46 = vector.broadcast %31 : vector<1x400xf32> to vector<4x400xf32>
    %47 = arith.mulf %45, %46 : vector<4x400xf32>
    %48 = arith.addf %44, %47 : vector<4x400xf32>
    %49 = vector.broadcast %1 : vector<4x1xf32> to vector<4x400xf32>
    %50 = vector.broadcast %25 : vector<1x400xf32> to vector<4x400xf32>
    %51 = arith.mulf %49, %50 : vector<4x400xf32>
    %52 = vector.broadcast %2 : vector<4x1xf32> to vector<4x400xf32>
    %53 = vector.broadcast %41 : vector<1x400xf32> to vector<4x400xf32>
    %54 = arith.mulf %52, %53 : vector<4x400xf32>
    %55 = arith.addf %51, %54 : vector<4x400xf32>
    %56 = arith.subf %9, %48 : vector<4x400xf32>
    %57 = arith.mulf %56, %55 : vector<4x400xf32>
    %58 = vector.extract_strided_slice %6 {offsets = [1, 0], sizes = [1, 400], strides = [1, 1]} : vector<3x400xf32> to vector<1x400xf32>
    %59 = vector.broadcast %58 : vector<1x400xf32> to vector<4x400xf32>
    %60 = arith.mulf %57, %59 : vector<4x400xf32>
    %61 = vector.extract_strided_slice %6 {offsets = [2, 0], sizes = [1, 400], strides = [1, 1]} : vector<3x400xf32> to vector<1x400xf32>
    %62 = vector.broadcast %61 : vector<1x400xf32> to vector<4x400xf32>
    %63 = arith.addf %60, %62 : vector<4x400xf32>
    %cst_17 = arith.constant 0.000000e+00 : f32
    %64 = vector.broadcast %cst_17 : f32 to vector<4x400xf32>
    %65 = arith.maximumf %63, %64 : vector<4x400xf32>
    %c0_18 = arith.constant 0 : index
    %c0_19 = arith.constant 0 : index
    %66 = vector.load %arg4[%c0_18, %c0_19] : memref<400x50xf32, #tpu.memory_space<vmem>>, vector<400x50xf32>
    %cst_20 = arith.constant dense<0.000000e+00> : vector<4x50xf32>
    %67 = tpu.matmul %65, %66, %cst_20 {dimension_numbers = #tpu.dot_dimension_numbers<[1], [0], [0], [1], [0, 0, 1, 1], [], []>} : vector<4x400xf32>, vector<400x50xf32>, vector<4x50xf32> -> vector<4x50xf32>
    %c0_21 = arith.constant 0 : index
    %c0_22 = arith.constant 0 : index
    %68 = vector.load %arg5[%c0_21, %c0_22] : memref<3x50xf32, #tpu.memory_space<vmem>>, vector<3x50xf32>
    %69 = vector.extract_strided_slice %68 {offsets = [0, 0], sizes = [1, 50], strides = [1, 1]} : vector<3x50xf32> to vector<1x50xf32>
    %70 = vector.broadcast %69 : vector<1x50xf32> to vector<4x50xf32>
    %71 = arith.addf %67, %70 : vector<4x50xf32>
    %72 = vector.broadcast %1 : vector<4x1xf32> to vector<4x50xf32>
    %73 = arith.mulf %71, %72 : vector<4x50xf32>
    %cst_23 = arith.constant dense<0.000000e+00> : vector<50xf32>
    %74 = vector.multi_reduction <add>, %73, %cst_23 [0] : vector<4x50xf32> to vector<50xf32>
    %75 = vector.shape_cast %74 : vector<50xf32> to vector<1x50xf32>
    %cst_24 = arith.constant 5.000000e-01 : f32
    %76 = vector.broadcast %cst_24 : f32 to vector<1x50xf32>
    %77 = arith.mulf %75, %76 : vector<1x50xf32>
    %78 = arith.mulf %73, %71 : vector<4x50xf32>
    %cst_25 = arith.constant dense<0.000000e+00> : vector<50xf32>
    %79 = vector.multi_reduction <add>, %78, %cst_25 [0] : vector<4x50xf32> to vector<50xf32>
    %80 = vector.shape_cast %79 : vector<50xf32> to vector<1x50xf32>
    %cst_26 = arith.constant 5.000000e-01 : f32
    %81 = vector.broadcast %cst_26 : f32 to vector<1x50xf32>
    %82 = arith.mulf %80, %81 : vector<1x50xf32>
    %83 = arith.mulf %77, %77 : vector<1x50xf32>
    %84 = arith.subf %82, %83 : vector<1x50xf32>
    %cst_27 = arith.constant 9.99999974E-6 : f32
    %85 = vector.broadcast %cst_27 : f32 to vector<1x50xf32>
    %86 = arith.addf %84, %85 : vector<1x50xf32>
    %87 = math.rsqrt %86 : vector<1x50xf32>
    %88 = vector.broadcast %2 : vector<4x1xf32> to vector<4x50xf32>
    %89 = arith.mulf %71, %88 : vector<4x50xf32>
    %cst_28 = arith.constant dense<0.000000e+00> : vector<50xf32>
    %90 = vector.multi_reduction <add>, %89, %cst_28 [0] : vector<4x50xf32> to vector<50xf32>
    %91 = vector.shape_cast %90 : vector<50xf32> to vector<1x50xf32>
    %cst_29 = arith.constant 5.000000e-01 : f32
    %92 = vector.broadcast %cst_29 : f32 to vector<1x50xf32>
    %93 = arith.mulf %91, %92 : vector<1x50xf32>
    %94 = arith.mulf %89, %71 : vector<4x50xf32>
    %cst_30 = arith.constant dense<0.000000e+00> : vector<50xf32>
    %95 = vector.multi_reduction <add>, %94, %cst_30 [0] : vector<4x50xf32> to vector<50xf32>
    %96 = vector.shape_cast %95 : vector<50xf32> to vector<1x50xf32>
    %cst_31 = arith.constant 5.000000e-01 : f32
    %97 = vector.broadcast %cst_31 : f32 to vector<1x50xf32>
    %98 = arith.mulf %96, %97 : vector<1x50xf32>
    %99 = arith.mulf %93, %93 : vector<1x50xf32>
    %100 = arith.subf %98, %99 : vector<1x50xf32>
    %cst_32 = arith.constant 9.99999974E-6 : f32
    %101 = vector.broadcast %cst_32 : f32 to vector<1x50xf32>
    %102 = arith.addf %100, %101 : vector<1x50xf32>
    %103 = math.rsqrt %102 : vector<1x50xf32>
    %104 = vector.broadcast %1 : vector<4x1xf32> to vector<4x50xf32>
    %105 = vector.broadcast %77 : vector<1x50xf32> to vector<4x50xf32>
    %106 = arith.mulf %104, %105 : vector<4x50xf32>
    %107 = vector.broadcast %2 : vector<4x1xf32> to vector<4x50xf32>
    %108 = vector.broadcast %93 : vector<1x50xf32> to vector<4x50xf32>
    %109 = arith.mulf %107, %108 : vector<4x50xf32>
    %110 = arith.addf %106, %109 : vector<4x50xf32>
    %111 = vector.broadcast %1 : vector<4x1xf32> to vector<4x50xf32>
    %112 = vector.broadcast %87 : vector<1x50xf32> to vector<4x50xf32>
    %113 = arith.mulf %111, %112 : vector<4x50xf32>
    %114 = vector.broadcast %2 : vector<4x1xf32> to vector<4x50xf32>
    %115 = vector.broadcast %103 : vector<1x50xf32> to vector<4x50xf32>
    %116 = arith.mulf %114, %115 : vector<4x50xf32>
    %117 = arith.addf %113, %116 : vector<4x50xf32>
    %118 = arith.subf %71, %110 : vector<4x50xf32>
    %119 = arith.mulf %118, %117 : vector<4x50xf32>
    %120 = vector.extract_strided_slice %68 {offsets = [1, 0], sizes = [1, 50], strides = [1, 1]} : vector<3x50xf32> to vector<1x50xf32>
    %121 = vector.broadcast %120 : vector<1x50xf32> to vector<4x50xf32>
    %122 = arith.mulf %119, %121 : vector<4x50xf32>
    %123 = vector.extract_strided_slice %68 {offsets = [2, 0], sizes = [1, 50], strides = [1, 1]} : vector<3x50xf32> to vector<1x50xf32>
    %124 = vector.broadcast %123 : vector<1x50xf32> to vector<4x50xf32>
    %125 = arith.addf %122, %124 : vector<4x50xf32>
    %cst_33 = arith.constant 0.000000e+00 : f32
    %126 = vector.broadcast %cst_33 : f32 to vector<4x50xf32>
    %127 = arith.maximumf %125, %126 : vector<4x50xf32>
    %c0_34 = arith.constant 0 : index
    %c0_35 = arith.constant 0 : index
    %128 = vector.load %arg6[%c0_34, %c0_35] : memref<50x16xf32, #tpu.memory_space<vmem>>, vector<50x16xf32>
    %cst_36 = arith.constant dense<0.000000e+00> : vector<4x16xf32>
    %129 = tpu.matmul %127, %128, %cst_36 {dimension_numbers = #tpu.dot_dimension_numbers<[1], [0], [0], [1], [0, 0, 1, 1], [], []>} : vector<4x50xf32>, vector<50x16xf32>, vector<4x16xf32> -> vector<4x16xf32>
    %c0_37 = arith.constant 0 : index
    %c0_38 = arith.constant 0 : index
    %130 = vector.load %arg7[%c0_37, %c0_38] : memref<3x16xf32, #tpu.memory_space<vmem>>, vector<3x16xf32>
    %131 = vector.extract_strided_slice %130 {offsets = [0, 0], sizes = [1, 16], strides = [1, 1]} : vector<3x16xf32> to vector<1x16xf32>
    %132 = vector.broadcast %131 : vector<1x16xf32> to vector<4x16xf32>
    %133 = arith.addf %129, %132 : vector<4x16xf32>
    %134 = vector.broadcast %1 : vector<4x1xf32> to vector<4x16xf32>
    %135 = arith.mulf %133, %134 : vector<4x16xf32>
    %cst_39 = arith.constant dense<0.000000e+00> : vector<16xf32>
    %136 = vector.multi_reduction <add>, %135, %cst_39 [0] : vector<4x16xf32> to vector<16xf32>
    %137 = vector.shape_cast %136 : vector<16xf32> to vector<1x16xf32>
    %cst_40 = arith.constant 5.000000e-01 : f32
    %138 = vector.broadcast %cst_40 : f32 to vector<1x16xf32>
    %139 = arith.mulf %137, %138 : vector<1x16xf32>
    %140 = arith.mulf %135, %133 : vector<4x16xf32>
    %cst_41 = arith.constant dense<0.000000e+00> : vector<16xf32>
    %141 = vector.multi_reduction <add>, %140, %cst_41 [0] : vector<4x16xf32> to vector<16xf32>
    %142 = vector.shape_cast %141 : vector<16xf32> to vector<1x16xf32>
    %cst_42 = arith.constant 5.000000e-01 : f32
    %143 = vector.broadcast %cst_42 : f32 to vector<1x16xf32>
    %144 = arith.mulf %142, %143 : vector<1x16xf32>
    %145 = arith.mulf %139, %139 : vector<1x16xf32>
    %146 = arith.subf %144, %145 : vector<1x16xf32>
    %cst_43 = arith.constant 9.99999974E-6 : f32
    %147 = vector.broadcast %cst_43 : f32 to vector<1x16xf32>
    %148 = arith.addf %146, %147 : vector<1x16xf32>
    %149 = math.rsqrt %148 : vector<1x16xf32>
    %150 = vector.broadcast %2 : vector<4x1xf32> to vector<4x16xf32>
    %151 = arith.mulf %133, %150 : vector<4x16xf32>
    %cst_44 = arith.constant dense<0.000000e+00> : vector<16xf32>
    %152 = vector.multi_reduction <add>, %151, %cst_44 [0] : vector<4x16xf32> to vector<16xf32>
    %153 = vector.shape_cast %152 : vector<16xf32> to vector<1x16xf32>
    %cst_45 = arith.constant 5.000000e-01 : f32
    %154 = vector.broadcast %cst_45 : f32 to vector<1x16xf32>
    %155 = arith.mulf %153, %154 : vector<1x16xf32>
    %156 = arith.mulf %151, %133 : vector<4x16xf32>
    %cst_46 = arith.constant dense<0.000000e+00> : vector<16xf32>
    %157 = vector.multi_reduction <add>, %156, %cst_46 [0] : vector<4x16xf32> to vector<16xf32>
    %158 = vector.shape_cast %157 : vector<16xf32> to vector<1x16xf32>
    %cst_47 = arith.constant 5.000000e-01 : f32
    %159 = vector.broadcast %cst_47 : f32 to vector<1x16xf32>
    %160 = arith.mulf %158, %159 : vector<1x16xf32>
    %161 = arith.mulf %155, %155 : vector<1x16xf32>
    %162 = arith.subf %160, %161 : vector<1x16xf32>
    %cst_48 = arith.constant 9.99999974E-6 : f32
    %163 = vector.broadcast %cst_48 : f32 to vector<1x16xf32>
    %164 = arith.addf %162, %163 : vector<1x16xf32>
    %165 = math.rsqrt %164 : vector<1x16xf32>
    %166 = vector.broadcast %1 : vector<4x1xf32> to vector<4x16xf32>
    %167 = vector.broadcast %139 : vector<1x16xf32> to vector<4x16xf32>
    %168 = arith.mulf %166, %167 : vector<4x16xf32>
    %169 = vector.broadcast %2 : vector<4x1xf32> to vector<4x16xf32>
    %170 = vector.broadcast %155 : vector<1x16xf32> to vector<4x16xf32>
    %171 = arith.mulf %169, %170 : vector<4x16xf32>
    %172 = arith.addf %168, %171 : vector<4x16xf32>
    %173 = vector.broadcast %1 : vector<4x1xf32> to vector<4x16xf32>
    %174 = vector.broadcast %149 : vector<1x16xf32> to vector<4x16xf32>
    %175 = arith.mulf %173, %174 : vector<4x16xf32>
    %176 = vector.broadcast %2 : vector<4x1xf32> to vector<4x16xf32>
    %177 = vector.broadcast %165 : vector<1x16xf32> to vector<4x16xf32>
    %178 = arith.mulf %176, %177 : vector<4x16xf32>
    %179 = arith.addf %175, %178 : vector<4x16xf32>
    %180 = arith.subf %133, %172 : vector<4x16xf32>
    %181 = arith.mulf %180, %179 : vector<4x16xf32>
    %182 = vector.extract_strided_slice %130 {offsets = [1, 0], sizes = [1, 16], strides = [1, 1]} : vector<3x16xf32> to vector<1x16xf32>
    %183 = vector.broadcast %182 : vector<1x16xf32> to vector<4x16xf32>
    %184 = arith.mulf %181, %183 : vector<4x16xf32>
    %185 = vector.extract_strided_slice %130 {offsets = [2, 0], sizes = [1, 16], strides = [1, 1]} : vector<3x16xf32> to vector<1x16xf32>
    %186 = vector.broadcast %185 : vector<1x16xf32> to vector<4x16xf32>
    %187 = arith.addf %184, %186 : vector<4x16xf32>
    %cst_49 = arith.constant 0.000000e+00 : f32
    %188 = vector.broadcast %cst_49 : f32 to vector<4x16xf32>
    %189 = arith.maximumf %187, %188 : vector<4x16xf32>
    %c0_50 = arith.constant 0 : index
    %c0_51 = arith.constant 0 : index
    %190 = vector.load %arg8[%c0_50, %c0_51] : memref<4x16xf32, #tpu.memory_space<vmem>>, vector<4x16xf32>
    tpu.vector_store %arg8[%c0_50, %c0_51], %189 {strides = array<i32>} : memref<4x16xf32, #tpu.memory_space<vmem>>, vector<4x16xf32>,
    return
  }
}

</mosaic_0001>

<bundles_post_ra>
// kernel: net_forward.2
= control target key start
LH: loop header
LB: loop body
LE: loop exit
PB: predicated region body
PF: predicated region fallthrough
CT: control target
= control target key end

     0   :  { %13 = vsyncpa [#allocation3], 0  ;;  %s3897_s0 = inlined_call_operand.vmem [shape: f32[12,624], index: 0, kind: input, shape index: {}]   ;;  %s3898_s1 = inlined_call_operand.hbm [shape: f32[6,624], index: 1, kind: input, shape index: {}]   ;;  %s3899_s2 = inlined_call_operand.hbm [shape: f32[16,12], index: 2, kind: input, shape index: {}]   ;;  %s3900_s3 = inlined_call_operand.vmem [shape: f32[16,3], index: 3, kind: input, shape index: {}]   ;;  %s3901_s4 = inlined_call_operand.hbm [shape: f32[16,64], index: 4, kind: input, shape index: {}]   ;;  %s3902_s5 = inlined_call_operand.vmem [shape: f32[16,3], index: 5, kind: input, shape index: {}]   ;;  %s3903_s6 = inlined_call_operand.hbm [shape: f32[20,64], index: 6, kind: input, shape index: {}]   ;;  %s3904_s7 = inlined_call_operand.vmem [shape: f32[20,3], index: 7, kind: input, shape index: {}]   ;;  %s3905_s8 = inlined_call_operand.vmem [shape: f32[20,592], index: 8, kind: output, shape index: {}]  }
   0x1   :  { %14 = vsyncpa [#allocation5], 0 }
   0x2   :  { %15 = vsyncpa [#allocation8], 0  ;;  %s2467_s27 = smov [#allocation4]  }
   0x3   :  { %s33_s28 = sshll.u32 %s2467_s27, 4  ;;  %s34_s28 = int_to_ptr.vmem [resolvable:$true] %s33_s28 }
   0x4   :  { %s2389_s29 = scalar_lea.vmem %s34_s28, 256  ;;  %p2394_p1 = scmp.lt.s32.totalorder %s34_s28, %s34_s28 }
   0x5   :  { %p2390_p0 = scmp.ne.s32.totalorder %s34_s28, %s2389_s29  ;;  %p2395_p2 = scmp.lt.s32.totalorder %s2389_s29, %s2389_s29 }
   0x7   :  { %p2396_p3 = por %p2395_p2, %p2394_p1 }
   0x9   :  { %p2397_p4 = pnand %p2396_p3, %p2390_p0 }
   0xb   :  { %2400 = shalt.err (!%p2397_p4)
}
   0xc   :  { %s2468_s30 = smov 128   ;;  %s2469_s9 = smov 8  }
   0xd   :  { %39 = dma.hbm_to_vmem [thread:$0]  %s3899_s2, 256, %s34_s28, [#allocation5], %s2468_s30, %s2468_s30, %s2469_s9  }
   0xe   :  { %s2470_s12 = smov [#allocation2]   ;;  %s2471_s14 = smov [#allocation6]  }
   0xf   :  { %s24_s13 = sshll.u32 %s2470_s12, 4  ;;  %s47_s15 = sshll.u32 %s2471_s14, 4  ;;  %s25_s13 = int_to_ptr.vmem [resolvable:$true] %s24_s13  ;;  %s48_s15 = int_to_ptr.vmem [resolvable:$true] %s47_s15 }
  0x10   :  { %s2409_s16 = scalar_lea.vmem %s25_s13, 640  ;;  %p2414_p6 = scmp.lt.s32.totalorder %s25_s13, %s25_s13 }
  0x11   :  { %p2410_p5 = scmp.ne.s32.totalorder %s25_s13, %s2409_s16  ;;  %p2415_p7 = scmp.lt.s32.totalorder %s2409_s16, %s2409_s16 }
  0x13   :  { %p2416_p8 = por %p2415_p7, %p2414_p6 }
  0x15   :  { %p2417_p9 = pnand %p2416_p8, %p2410_p5 }
  0x17   :  { %2420 = shalt.err (!%p2417_p9)
}
  0x18   :  { %27 = dma.hbm_to_vmem [thread:$0]  %s3898_s1, 640, %s25_s13, [#allocation3]  }
  0x19   :  { %s2429_s19 = scalar_lea.vmem %s48_s15, 256  ;;  %p2434_p11 = scmp.lt.s32.totalorder %s48_s15, %s48_s15 }
  0x1a   :  { %p2430_p10 = scmp.ne.s32.totalorder %s48_s15, %s2429_s19  ;;  %p2435_p12 = scmp.lt.s32.totalorder %s2429_s19, %s2429_s19 }
  0x1c   :  { %p2436_p13 = por %p2435_p12, %p2434_p11 }
  0x1e   :  { %p2437_p0 = pnand %p2436_p13, %p2430_p10 }
  0x20   :  { %2440 = shalt.err (!%p2437_p0)
}
  0x21   :  { %53 = dma.hbm_to_vmem [thread:$0]  %s3901_s4, 256, %s48_s15, [#allocation5], %s2468_s30, %s2468_s30, %s2469_s9  }
  0x22   :  { %s2472_s21 = smov [#allocation7]  }
  0x23   :  { %s61_s22 = sshll.u32 %s2472_s21, 4  ;;  %s62_s22 = int_to_ptr.vmem [resolvable:$true] %s61_s22 }
  0x24   :  { %s2449_s23 = scalar_lea.vmem %s62_s22, 384  ;;  %p2454_p2 = scmp.lt.s32.totalorder %s62_s22, %s62_s22 }
  0x25   :  { %p2450_p1 = scmp.ne.s32.totalorder %s62_s22, %s2449_s23  ;;  %p2455_p3 = scmp.lt.s32.totalorder %s2449_s23, %s2449_s23 }
  0x27   :  { %p2456_p4 = por %p2455_p3, %p2454_p2 }
  0x29   :  { %p2457_p5 = pnand %p2456_p4, %p2450_p1 }
  0x2b   :  { %2460 = shalt.err (!%p2457_p5)
}
  0x2c   :  { %67 = dma.hbm_to_vmem [thread:$0]  %s3903_s6, 384, %s62_s22, [#allocation8], %s2468_s30, %s2468_s30, %s2469_s9  }
  0x2d   :  { %2461 = dma.done.wait [#allocation3], 640  }
  0x2e   :  { %2462 = vsyncadd [#allocation3], 4294966656 }
  0x2f   :  { %2463 = dma.done.wait [#allocation5], 512  }
  0x30   :  { %2464 = vsyncadd [#allocation5], 4294966784 }
  0x31   :  { %2465 = dma.done.wait [#allocation8], 384  }
  0x32   :  { %2466 = vsyncadd [#allocation8], 4294966912  ;;  %v2473_v0 = vmov 0.0   ;;  %v3906_v1 = vmov 0   ;;  %v2475_v2 = vmov 1   ;;  %vm118_vm0 = vcmask 1043456  }
  0x33   :  { %198 = vmatprep.mubr.f32.mxu0 %v2473_v0  ;;  %204 = vmatprep.mubr.f32.mxu1 %v2473_v0  ;;  %v95_v3 = vld [vmem:[%s3897_s0 + $0x30] sm:$0xf]  ;;  %v94_v4 = vld [vmem:[%s3897_s0 + $0x28] sm:$0xf]  ;;  %v89_v6 = vld [vmem:[%s3897_s0] sm:$0xff]  ;;  %vm111_vm1 = vcmask 97280   ;;  %v363_v18 = vlaneseq }
  0x34   :  { %2333 = vset.pattern.permute.xlu0 %v3906_v1  ;;  %2334 = vset.pattern.permute.xlu1 %v2475_v2  ;;  %v90_v5 = vld [vmem:[%s3897_s0 + $0x8] sm:$0xff]  ;;  %v88_v8 = vld [vmem:[#allocation4 + $0x8] sm:$0xff]  ;;  %v97_v9 = vld [vmem:[%s3897_s0 + $0x40] sm:$0xf]  ;;  %v3908_v17 = vmov 2   ;;  %vm396_vm2 = vcmask 916480  }
  0x35   :  { %2213 = vmatprep.subr.msk.mxu0 %vm118_vm0, %v95_v3  ;;  %2315 = vmatprep.subr.msk.mxu1 %vm118_vm0, %v95_v3  ;;  %v87_v7 = vld [vmem:[#allocation4] sm:$0xff]  ;;  %v96_v11 = vld [vmem:[%s3897_s0 + $0x38] sm:$0xf]  ;;  %v93_v13 = vld [vmem:[%s3897_s0 + $0x20] sm:$0xff]  ;;  %v2614_v19 = vshrl.u32 %v363_v18, 7  ;;  %s2478_s23 = smov 115  }
  0x36   :  { %2214 = vmatpush1.msk.msra.mxu0 %vm118_vm0, %v94_v4  ;;  %2317 = vmatpush1.msk.msra.mxu1 %vm118_vm0, %v94_v4  ;;  %v98_v10 = vld [vmem:[%s3897_s0 + $0x48] sm:$0xf]  ;;  %v92_v12 = vld [vmem:[%s3897_s0 + $0x18] sm:$0xff]  ;;  %v91_v14 = vld [vmem:[%s3897_s0 + $0x10] sm:$0xff]  ;;  %s2479_s1 = smov 127   ;;  %vm810_vm3 = vcmask 941056  }
  0x37   :  { %164 = vmatprep.subr.mxu0 %v90_v5  ;;  %2316 = vmatprep.subr.mxu1 %v90_v5  ;;  %v2595_v15 = vld [vmem:[%s3900_s3 + $0x8] sm:$0xff]  ;;  %v2605_v16 = vld [vmem:[%s3900_s3] sm:$0xff]  ;;  %v2619_v21 = vsub.s32 0, %v2614_v19  ;;  %v446_v23 = vsub.s32 1, %v2614_v19  ;;  %v2635_v31 = vld [vmem:[#allocation2 + $0x10] sm:$0x3f] }
  0x38   :  { %165 = vmatpush1.msra.mxu0 %v89_v6  ;;  %2318 = vmatpush1.msra.mxu1 %v89_v6  ;;  %v2621_v22 = vld [vmem:[#allocation2] sm:$0x3f]  ;;  %v2624_v24 = vld [vmem:[#allocation2 + $0x8] sm:$0x3f]  ;;  %v2648_v38 = vld [vmem:[#allocation2 + $0x18] sm:$0x3f] }
  0x39   :  { %2215 = vmatmul.mubr.msk.f32.vlgmr.msra.gmra.mxu0 %vm111_vm1, %v87_v7  ;;  %2216 = vmatmul.mubr.msk.f32.vlgmr.msra.gmra.mxu1 %vm111_vm1, %v88_v8  ;;  %v2628_v26 = vrot.slane %v2621_v22, %v2619_v21  ;;  %v2631_v29 = vrot.slane %v2621_v22, %v446_v23  ;;  %v2637_v32 = vld [vmem:[#allocation2 + $0x20] sm:$0x3f]  ;;  %v2640_v33 = vrot.slane %v2624_v24, %v446_v23  ;;  %s2477_s3 = smov 116   ;;  %vm771_vm4 = vcmask 949248  }
  0x3a   :  { %2217 = vmatprep.subr.msk.mxu1 %vm118_vm0, %v97_v9  ;;  %2264 = vmatprep.subr.msk.mxu0 %vm118_vm0, %v98_v10  ;;  %v2644_v34 = vrot.slane %v2624_v24, %v2619_v21  ;;  %v2653_v40 = vrot.slane %v2635_v31, %v446_v23  ;;  %v2656_v41 = vrot.slane %v2637_v32, %v446_v23  ;;  %vm732_vm5 = vcmask 1039360  }
  0x3b   :  { %2218 = vmatpush1.msk.msra.mxu1 %vm118_vm0, %v96_v11  ;;  %2265 = vmatpush3.msk.msra.mxu0 %vm118_vm0, %v98_v10  ;;  %v2664_v44 = vrot.slane %v2635_v31, %v2619_v21  ;;  %v2668_v45 = vrot.slane %v2637_v32, %v2619_v21  ;;  %v2679_v51 = vrot.slane %v2648_v38, %v446_v23  ;;  %vm841_vm6 = vcmask 523264  }
  0x3c   :  { %241 = vmatprep.subr.mxu1 %v92_v12  ;;  %2266 = vmatprep.subr.mxu0 %v93_v13  ;;  %v2683_v52 = vrot.slane %v2648_v38, %v2619_v21  ;;  %vm1110_vm7 = vcmask 785408   ;;  %vm2480_vm8 = vmmov 0   ;;  %vm1802_vm9 = vcmask 654336  }
  0x3d   :  { %242 = vmatpush1.msra.mxu1 %v91_v14  ;;  %275 = vmatprep.mubr.f32.mxu1 %v2473_v0  ;;  %vm1821_vm10 = vcmask 650240  }
  0x3e   :  { %2267 = vmatpush3.msra.mxu0 %v93_v13  ;;  %2268 = vmatprep.mubr.msk.f32.mxu0 %vm111_vm1, %v87_v7 }
  0x3f   :  { %2219 = vmatmul.mubr.msk.f32.vlgmr.msra.gmra.mxu1 %vm111_vm1, %v87_v7  ;;  %2269 = vmatmul.mubr.msk.f32.vlgmr.msra.gmra.mxu0 %vm111_vm1, %v88_v8 }
  0x40   :  { %281 = vmatprep.mubr.f32.mxu1 %v2473_v0  ;;  %108 = vperm.xlu0 %2333, %v2595_v15  }
  0x41   :  { %609 = vperm.xlu1 %2334, %v2595_v15   ;;  %989 = vmatprep.mubr.f32.mxu0 %v2473_v0 }
  0x43   :  { %2220 = vmatmul.mubr.msk.f32.gmra.mxu1 %vm111_vm1, %v88_v8 }
  0x44   :  { %103 = vperm.xlu0 %2333, %v2605_v16   ;;  %912 = vmatprep.mubr.f32.mxu1 %v2473_v0 }
  0x45   :  { %2336 = vset.pattern.permute.xlu1 %v3908_v17 }
  0x48   :  { %2335 = vset.pattern.permute.xlu0 %v2475_v2 }
  0xbb   :  { %v2616_v20 = vpop.permute.xlu0 %108 }
  0xbf   :  { %v104_v25 = vpop.permute.xlu0 %103 }
  0xf9   :  { %v200_v27 = vpop.f32.mrf.mxu0  ;;  %v206_v28 = vpop.f32.mrf.mxu1 }
  0xfa   :  { %v2633_v30 = vadd.f32 %v200_v27, %v104_v25  ;;  %v2673_v47 = vadd.f32 %v206_v28, %v2616_v20 }
  0xfb   :  { %v202_v35 = vpop.f32.mrf.mxu0  ;;  %v208_v36 = vpop.f32.mrf.mxu1 }
  0xfc   :  { %v2646_v37 = vadd.f32 %v202_v35, %v104_v25  ;;  %v383_v39 = vmul.f32 %v2628_v26, %v2633_v30  ;;  %v464_v42 = vmul.f32 %v2631_v29, %v2633_v30  ;;  %v2676_v48 = vadd.f32 %v208_v36, %v2616_v20 }
  0xfd   :  { %v388_v8 = vmul.f32 %v2628_v26, %v2673_v47 }
  0xfe   :  { %v465_v43 = vmul.f32 %v2640_v33, %v2646_v37  ;;  %v384_v46 = vmul.f32 %v2644_v34, %v2646_v37  ;;  %v410_v55 = vmul.f32 %v383_v39, %v2633_v30  ;;  %v490_v60 = vmul.f32 %v464_v42, %v2633_v30 }
  0xff   :  { %v277_v49 = vpop.f32.mrf.mxu1  ;;  %v2270_v50 = vpop.f32.mrf.mxu0  ;;  %v389_v9 = vmul.f32 %v2644_v34, %v2676_v48 }
 0x100   :  { %v2685_v53 = vadd.f32 %v277_v49, %v104_v25  ;;  %v474_v54 = vadd.f32 %v465_v43, %v464_v42  ;;  %v393_v58 = vadd.f32 %v384_v46, %v383_v39  ;;  %v411_v59 = vmul.f32 %v384_v46, %v2646_v37 }
 0x101   :  { %v279_v56 = vpop.f32.mrf.mxu1  ;;  %v354_v57 = vpop.f32.mrf.mxu0  ;;  %v491_v61 = vmul.f32 %v465_v43, %v2646_v37 }
 0x102   :  { %v2691_v62 = vadd.f32 %v279_v56, %v104_v25  ;;  %v2693_v63 = vadd.f32 %v354_v57, %v104_v25  ;;  %v466_v3 = vmul.f32 %v2653_v40, %v2685_v53  ;;  %v385_v4 = vmul.f32 %v2664_v44, %v2685_v53 }
 0x103   :  { %v283_v5 = vpop.f32.mrf.mxu1  ;;  %v420_v6 = vadd.f32 %v411_v59, %v410_v55  ;;  %v500_v7 = vadd.f32 %v491_v61, %v490_v60 }
 0x104   :  { %v2704_v10 = vadd.f32 %v283_v5, %v2616_v20  ;;  %v467_v11 = vmul.f32 %v2679_v51, %v2691_v62  ;;  %v468_v12 = vmul.f32 %v2656_v41, %v2693_v63  ;;  %v475_v13 = vadd.f32 %v474_v54, %v466_v3 }
 0x105   :  { %v285_v14 = vpop.f32.mrf.mxu1  ;;  %v386_v18 = vmul.f32 %v2683_v52, %v2691_v62  ;;  %v387_v23 = vmul.f32 %v2668_v45, %v2693_v63  ;;  %v394_v25 = vadd.f32 %v393_v58, %v385_v4  ;;  %v412_v27 = vmul.f32 %v385_v4, %v2685_v53 }
 0x106   :  { %v2716_v28 = vadd.f32 %v285_v14, %v2616_v20  ;;  %v476_v35 = vadd.f32 %v475_v13, %v467_v11  ;;  %v477_v36 = vsel %vm396_vm2, %v468_v12, 0.0  ;;  %v492_v39 = vmul.f32 %v466_v3, %v2685_v53 }
 0x107   :  { %v395_v42 = vadd.f32 %v394_v25, %v386_v18  ;;  %v397_v43 = vsel %vm396_vm2, %v387_v23, 0.0  ;;  %v413_v46 = vmul.f32 %v386_v18, %v2691_v62  ;;  %v414_v49 = vmul.f32 %v387_v23, %v2693_v63 }
 0x108   :  { %v478_v54 = vadd.f32 %v477_v36, %v476_v35  ;;  %v421_v55 = vadd.f32 %v420_v6, %v412_v27  ;;  %v493_v56 = vmul.f32 %v467_v11, %v2691_v62  ;;  %v494_v57 = vmul.f32 %v468_v12, %v2693_v63 }
 0x109   :  { %v398_v58 = vadd.f32 %v397_v43, %v395_v42  ;;  %v423_v59 = vsel %vm396_vm2, %v414_v49, 0.0  ;;  %v501_v60 = vadd.f32 %v500_v7, %v492_v39  ;;  %v390_v61 = vmul.f32 %v2664_v44, %v2704_v10 }
 0x10a   :  { %479 = vadd.xlane.f32.xlu1 %v478_v54  ;;  %v422_v3 = vadd.f32 %v421_v55, %v413_v46  ;;  %v401_v4 = vadd.f32 %v389_v9, %v388_v8  ;;  %v470_v5 = vmul.f32 %v2640_v33, %v2676_v48  ;;  %v2731_v13 = vadd.f32 %v2270_v50, %v2616_v20 }
 0x10b   :  { %399 = vadd.xlane.f32.xlu0 %v398_v58  ;;  %v391_v6 = vmul.f32 %v2683_v52, %v2716_v28  ;;  %v469_v11 = vmul.f32 %v2631_v29, %v2673_v47  ;;  %v502_v12 = vadd.f32 %v501_v60, %v493_v56  ;;  %v471_v18 = vmul.f32 %v2653_v40, %v2704_v10 }
 0x10c   :  { %v424_v7 = vadd.f32 %v423_v59, %v422_v3  ;;  %v402_v14 = vadd.f32 %v401_v4, %v390_v61  ;;  %v503_v23 = vsel %vm396_vm2, %v494_v57, 0.0  ;;  %v416_v20 = vmul.f32 %v389_v9, %v2676_v48 }
 0x10d   :  { %v481_v25 = vadd.f32 %v470_v5, %v469_v11  ;;  %v392_v50 = vmul.f32 %v2668_v45, %v2731_v13  ;;  %v472_v27 = vmul.f32 %v2679_v51, %v2716_v28  ;;  %v415_v35 = vmul.f32 %v388_v8, %v2673_v47 }
 0x10e   :  { %425 = vadd.xlane.f32.xlu1 %v424_v7  ;;  %v504_v36 = vadd.f32 %v503_v23, %v502_v12  ;;  %v403_v39 = vadd.f32 %v402_v14, %v391_v6  ;;  %v417_v43 = vmul.f32 %v390_v61, %v2704_v10  ;;  %v496_v49 = vmul.f32 %v470_v5, %v2676_v48 }
 0x10f   :  { %v482_v42 = vadd.f32 %v481_v25, %v471_v18  ;;  %v427_v46 = vadd.f32 %v416_v20, %v415_v35  ;;  %v404_v54 = vsel %vm396_vm2, %v392_v50, 0.0  ;;  %v473_v9 = vmul.f32 %v2656_v41, %v2731_v13  ;;  %v2765_v20 = vpop.permute.xlu1 %609 }
 0x110   :  { %v418_v55 = vmul.f32 %v391_v6, %v2716_v28  ;;  %v495_v56 = vmul.f32 %v469_v11, %v2673_v47  ;;  %v405_v57 = vadd.f32 %v404_v54, %v403_v39  ;;  %v497_v59 = vmul.f32 %v471_v18, %v2704_v10 }
 0x111   :  { %v483_v8 = vadd.f32 %v482_v42, %v472_v27  ;;  %v428_v58 = vadd.f32 %v427_v46, %v417_v43  ;;  %v484_v61 = vsel %vm396_vm2, %v473_v9, 0.0  ;;  %v419_v3 = vmul.f32 %v392_v50, %v2731_v13 }
 0x112   :  { %505 = vadd.xlane.f32.xlu1 %v504_v36  ;;  %v507_v60 = vadd.f32 %v496_v49, %v495_v56  ;;  %v498_v7 = vmul.f32 %v472_v27, %v2716_v28  ;;  %v499_v11 = vmul.f32 %v473_v9, %v2731_v13 }
 0x113   :  { %v485_v4 = vadd.f32 %v484_v61, %v483_v8  ;;  %v429_v5 = vadd.f32 %v428_v58, %v418_v55  ;;  %v430_v6 = vsel %vm396_vm2, %v419_v3, 0.0 }
 0x114   :  { %v508_v12 = vadd.f32 %v507_v60, %v497_v59  ;;  %v510_v18 = vsel %vm396_vm2, %v499_v11, 0.0 }
 0x115   :  { %v431_v14 = vadd.f32 %v430_v6, %v429_v5 }
 0x116   :  { %406 = vadd.xlane.f32.xlu1 %v405_v57  ;;  %v509_v23 = vadd.f32 %v508_v12, %v498_v7 }
 0x118   :  { %v511_v25 = vadd.f32 %v510_v18, %v509_v23 }
 0x11a   :  { %486 = vadd.xlane.f32.xlu1 %v485_v4 }
 0x11e   :  { %432 = vadd.xlane.f32.xlu1 %v431_v14 }
 0x121   :  { %605 = vperm.xlu0 %2335, %v2605_v16  }
 0x122   :  { %512 = vadd.xlane.f32.xlu1 %v511_v25 }
 0x125   :  { %2337 = vset.pattern.permute.xlu0 %v3906_v1 }
 0x133   :  { %627 = vperm.xlu1 %2336, %v2595_v15  }
 0x137   :  { %623 = vperm.xlu1 %2336, %v2605_v16  }
 0x13b   :  { %2338 = vset.pattern.permute.xlu1 %v3906_v1 }
 0x193   :  { %v480_v50 = vpop.xlane.xlu1 %479 }
 0x194   :  { %v400_v27 = vpop.xlane.xlu0 %399  ;;  %v2769_v39 = vmul.f32 0.0061728396, %v480_v50 }
 0x195   :  { %v2767_v35 = vmul.f32 0.0061728396, %v400_v27 }
 0x196   :  { %v516_v16 = vmul.f32 %v2769_v39, %v2769_v39  ;;  %v534_v59 = vmul.f32 %v2769_v39, %v2631_v29  ;;  %v535_v12 = vmul.f32 %v2769_v39, %v2640_v33  ;;  %v536_v6 = vmul.f32 %v2769_v39, %v2653_v40 }
 0x197   :  { %v426_v36 = vpop.xlane.xlu1 %425  ;;  %v436_v43 = vmul.f32 %v2767_v35, %v2767_v35  ;;  %v524_v58 = vmul.f32 %v2767_v35, %v2628_v26  ;;  %v525_v5 = vmul.f32 %v2767_v35, %v2644_v34  ;;  %v526_v7 = vmul.f32 %v2767_v35, %v2664_v44 }
 0x198   :  { %v434_v42 = vmul.f32 0.0061728396, %v426_v36  ;;  %v527_v14 = vmul.f32 %v2767_v35, %v2683_v52  ;;  %v537_v23 = vmul.f32 %v2769_v39, %v2679_v51 }
 0x199   :  { %v544_v18 = vadd.f32 %v534_v59, %v524_v58 }
 0x19a   :  { %v438_v46 = vsub.f32 %v434_v42, %v436_v43  ;;  %v545_v43 = vadd.f32 %v535_v12, %v525_v5 }
 0x19b   :  { %v506_v49 = vpop.xlane.xlu1 %505 }
 0x19c   :  { %v440_v15 = vadd.f32 1e-05, %v438_v46  ;;  %v514_v54 = vmul.f32 0.0061728396, %v506_v49  ;;  %v546_v46 = vadd.f32 %v536_v6, %v526_v7  ;;  %v657_v49 = vrot.slane %v2635_v31, 1 }
 0x19d   :  { %v585_v12 = vsub.f32 %v2646_v37, %v545_v43 }
 0x19e   :  { %v518_v9 = vsub.f32 %v514_v54, %v516_v16  ;;  %2348 = vrsqrt.f32 %v440_v15  ;;  %v547_v16 = vadd.f32 %v537_v23, %v527_v14  ;;  %v584_v54 = vsub.f32 %v2633_v30, %v544_v18 }
 0x19f   :  { %v407_v55 = vpop.xlane.xlu1 %406  ;;  %v586_v6 = vsub.f32 %v2685_v53, %v546_v46  ;;  %v655_v53 = vrot.slane %v2621_v22, 1 }
 0x1a0   :  { %v520_v56 = vadd.f32 1e-05, %v518_v9  ;;  %v2775_v8 = vmul.f32 0.0061728396, %v407_v55  ;;  %v656_v9 = vrot.slane %v2624_v24, 1 }
 0x1a2   :  { %2350 = vrsqrt.f32 %v520_v56  ;;  %v437_v3 = vmul.f32 %v2775_v8, %v2775_v8  ;;  %v666_v37 = vadd.f32 %v656_v9, %v2624_v24 }
 0x1a3   :  { %v487_v57 = vpop.xlane.xlu1 %486 }
 0x1a4   :  { %v2781_v61 = vmul.f32 0.0061728396, %v487_v57 }
 0x1a6   :  { %v517_v36 = vmul.f32 %v2781_v61, %v2781_v61 }
 0x1a7   :  { %v433_v60 = vpop.xlane.xlu1 %432 }
 0x1a8   :  { %v435_v4 = vmul.f32 0.0061728396, %v433_v60 }
 0x1aa   :  { %v439_v11 = vsub.f32 %v435_v4, %v437_v3 }
 0x1ab   :  { %v513_v25 = vpop.xlane.xlu1 %512  ;;  %v2797_v50 = vpop.eup %2348 }
 0x1ac   :  { %v441_v27 = vadd.f32 1e-05, %v439_v11  ;;  %v515_v42 = vmul.f32 0.0061728396, %v513_v25  ;;  %v554_v56 = vmul.f32 %v2797_v50, %v2628_v26  ;;  %v555_v57 = vmul.f32 %v2797_v50, %v2644_v34 }
 0x1ad   :  { %v556_v58 = vmul.f32 %v2797_v50, %v2664_v44  ;;  %v557_v5 = vmul.f32 %v2797_v50, %v2683_v52  ;;  %v587_v25 = vsub.f32 %v2691_v62, %v547_v16 }
 0x1ae   :  { %v519_v15 = vsub.f32 %v515_v42, %v517_v36  ;;  %2352 = vrsqrt.f32 %v441_v27  ;;  %v2827_v27 = vpop.permute.xlu0 %605  ;;  %v667_v36 = vadd.f32 %v657_v49, %v2635_v31  ;;  %v658_v42 = vrot.slane %v2648_v38, 1 }
 0x1af   :  { %v2804_v55 = vpop.eup %2350  ;;  %v2818_v4 = vpop.permute.xlu1 %627 }
 0x1b0   :  { %v521_v59 = vadd.f32 1e-05, %v519_v15  ;;  %v564_v60 = vmul.f32 %v2804_v55, %v2631_v29  ;;  %v565_v30 = vmul.f32 %v2804_v55, %v2640_v33  ;;  %v566_v3 = vmul.f32 %v2804_v55, %v2653_v40 }
 0x1b1   :  { %v567_v7 = vmul.f32 %v2804_v55, %v2679_v51  ;;  %v668_v16 = vadd.f32 %v658_v42, %v2648_v38 }
 0x1b2   :  { %2354 = vrsqrt.f32 %v521_v59  ;;  %v574_v11 = vadd.f32 %v564_v60, %v554_v56  ;;  %v575_v14 = vadd.f32 %v565_v30, %v555_v57  ;;  %v576_v23 = vadd.f32 %v566_v3, %v556_v58 }
 0x1b3   :  { %v577_v18 = vadd.f32 %v567_v7, %v557_v5  ;;  %v2835_v57 = vpop.permute.xlu1 %623  ;;  %v2842_v58 = vrot.slane %v667_v36, %v2619_v21  ;;  %v2846_v59 = vrot.slane %v666_v37, %v2619_v21  ;;  %v665_v60 = vadd.f32 %v655_v53, %v2621_v22 }
 0x1b4   :  { %v594_v15 = vmul.f32 %v584_v54, %v574_v11  ;;  %v595_v1 = vmul.f32 %v585_v12, %v575_v14  ;;  %v596_v17 = vmul.f32 %v586_v6, %v576_v23  ;;  %v528_v30 = vmul.f32 %v2767_v35, %v2668_v45 }
 0x1b5   :  { %v597_v43 = vmul.f32 %v587_v25, %v577_v18  ;;  %v538_v3 = vmul.f32 %v2769_v39, %v2656_v41  ;;  %v529_v12 = vmul.f32 %v2775_v8, %v2628_v26  ;;  %v530_v6 = vmul.f32 %v2775_v8, %v2644_v34 }
 0x1b6   :  { %v613_v46 = vmul.f32 %v2827_v27, %v595_v1  ;;  %v614_v56 = vmul.f32 %v2827_v27, %v596_v17  ;;  %v612_v62 = vmul.f32 %v2827_v27, %v594_v15  ;;  %v539_v1 = vmul.f32 %v2781_v61, %v2631_v29 }
 0x1b7   :  { %v615_v49 = vmul.f32 %v2827_v27, %v597_v43  ;;  %v540_v17 = vmul.f32 %v2781_v61, %v2640_v33  ;;  %v2872_v39 = vrot.slane %v668_v16, %v2619_v21  ;;  %v543_v25 = vmul.f32 %v2781_v61, %v2656_v41 }
 0x1b8   :  { %v632_v54 = vadd.f32 %v2835_v57, %v614_v56  ;;  %v631_v9 = vadd.f32 %v2835_v57, %v613_v46  ;;  %v630_v14 = vadd.f32 %v2835_v57, %v612_v62  ;;  %v673_v36 = vrot.slane %v665_v60, %v2619_v21 }
 0x1b9   :  { %v633_v11 = vadd.f32 %v2835_v57, %v615_v49  ;;  %v549_v42 = vadd.f32 %v539_v1, %v529_v12  ;;  %v550_v15 = vadd.f32 %v540_v17, %v530_v6  ;;  %v533_v37 = vmul.f32 %v2775_v8, %v2668_v45 }
 0x1ba   :  { %v642_v5 = vmax.f32 %v632_v54, 0.0  ;;  %v641_v7 = vmax.f32 %v631_v9, 0.0  ;;  %v542_v43 = vmul.f32 %v2781_v61, %v2679_v51  ;;  %v548_v53 = vadd.f32 %v538_v3, %v528_v30 }
 0x1bb   :  { %v2863_v23 = vpop.eup %2352  ;;  %v568_v56 = vmul.f32 %v2804_v55, %v2656_v41  ;;  %v643_v62 = vmax.f32 %v633_v11, 0.0  ;;  %v640_v49 = vmax.f32 %v630_v14, 0.0  ;;  %v553_v60 = vadd.f32 %v543_v25, %v533_v37 }
 0x1bc   :  { %v2866_v18 = vmul.f32 %v2842_v58, %v642_v5  ;;  %v2869_v35 = vmul.f32 %v2846_v59, %v641_v7  ;;  %v559_v16 = vmul.f32 %v2863_v23, %v2628_v26  ;;  %v560_v1 = vmul.f32 %v2863_v23, %v2644_v34 }
 0x1bd   :  { %v558_v30 = vmul.f32 %v2797_v50, %v2668_v45  ;;  %v589_v55 = vsub.f32 %v2673_v47, %v549_v42  ;;  %v590_v3 = vsub.f32 %v2676_v48, %v550_v15  ;;  %v563_v26 = vmul.f32 %v2863_v23, %v2668_v45 }
 0x1be   :  { %755 = vrot.lane.b32.xlu0 %v2866_v18, %s2477_s3  ;;  %792 = vrot.lane.b32.xlu1 %v2869_v35, %s2478_s23  ;;  %v532_v34 = vmul.f32 %v2775_v8, %v2683_v52  ;;  %v2907_v47 = vmul.f32 %v2872_v39, %v643_v62  ;;  %v2909_v48 = vmul.f32 %v673_v36, %v640_v49  ;;  %v659_v49 = vrot.slane %v2637_v32, 1 }
 0x1bf   :  { %v2355_v46 = vpop.eup %2354  ;;  %v593_v12 = vsub.f32 %v2731_v13, %v553_v60  ;;  %v588_v6 = vsub.f32 %v2693_v63, %v548_v53  ;;  %v562_v42 = vmul.f32 %v2863_v23, %v2683_v52  ;;  %v531_v52 = vmul.f32 %v2775_v8, %v2664_v44 }
 0x1c0   :  { %v573_v54 = vmul.f32 %v2355_v46, %v2656_v41  ;;  %v569_v9 = vmul.f32 %v2355_v46, %v2631_v29  ;;  %v570_v17 = vmul.f32 %v2355_v46, %v2640_v33  ;;  %v578_v41 = vadd.f32 %v568_v56, %v558_v30 }
 0x1c1   :  { %v572_v7 = vmul.f32 %v2355_v46, %v2679_v51  ;;  %v552_v11 = vadd.f32 %v542_v43, %v532_v34  ;;  %v541_v43 = vmul.f32 %v2781_v61, %v2653_v40  ;;  %v561_v8 = vmul.f32 %v2863_v23, %v2664_v44 }
 0x1c2   :  { %716 = vrot.lane.b32.xlu0 %v2866_v18, %s2479_s1  ;;  %794 = vrot.lane.b32.xlu1 %v2866_v18, %s2478_s23  ;;  %v579_v29 = vadd.f32 %v569_v9, %v559_v16  ;;  %v580_v33 = vadd.f32 %v570_v17, %v560_v1  ;;  %v583_v50 = vadd.f32 %v573_v54, %v563_v26 }
 0x1c3   :  { %v598_v15 = vmul.f32 %v588_v6, %v578_v41  ;;  %v582_v37 = vadd.f32 %v572_v7, %v562_v42  ;;  %v592_v56 = vsub.f32 %v2716_v28, %v552_v11  ;;  %v571_v16 = vmul.f32 %v2355_v46, %v2653_v40 }
 0x1c4   :  { %v599_v45 = vmul.f32 %v589_v55, %v579_v29  ;;  %v600_v5 = vmul.f32 %v590_v3, %v580_v33  ;;  %v603_v51 = vmul.f32 %v593_v12, %v583_v50  ;;  %v551_v28 = vadd.f32 %v541_v43, %v531_v52 }
 0x1c5   :  { %v616_v62 = vmul.f32 %v2827_v27, %v598_v15  ;;  %v602_v1 = vmul.f32 %v592_v56, %v582_v37  ;;  %v669_v40 = vadd.f32 %v659_v49, %v2637_v32  ;;  %v581_v60 = vadd.f32 %v571_v16, %v561_v8 }
 0x1c6   :  { %796 = vrot.lane.b32.xlu0 %v2907_v47, %s2478_s23  ;;  %790 = vrot.lane.b32.xlu1 %v2909_v48, %s2478_s23  ;;  %v617_v14 = vmul.f32 %v2765_v20, %v599_v45  ;;  %v618_v25 = vmul.f32 %v2765_v20, %v600_v5  ;;  %v621_v61 = vmul.f32 %v2765_v20, %v603_v51 }
 0x1c7   :  { %v634_v27 = vadd.f32 %v2835_v57, %v616_v62  ;;  %v620_v17 = vmul.f32 %v2765_v20, %v602_v1  ;;  %v591_v44 = vsub.f32 %v2704_v10, %v551_v28  ;;  %v689_v57 = vrot.slane %v669_v40, %v2619_v21 }
 0x1c8   :  { %v635_v13 = vadd.f32 %v2818_v4, %v617_v14  ;;  %v636_v63 = vadd.f32 %v2818_v4, %v618_v25  ;;  %v639_v46 = vadd.f32 %v2818_v4, %v621_v61 }
 0x1c9   :  { %v644_v30 = vmax.f32 %v634_v27, 0.0  ;;  %v638_v55 = vadd.f32 %v2818_v4, %v620_v17  ;;  %v601_v3 = vmul.f32 %v591_v44, %v581_v60 }
 0x1ca   :  { %757 = vrot.lane.b32.xlu0 %v2907_v47, %s2477_s3  ;;  %753 = vrot.lane.b32.xlu1 %v2869_v35, %s2477_s3  ;;  %v645_v53 = vmax.f32 %v635_v13, 0.0  ;;  %v646_v9 = vmax.f32 %v636_v63, 0.0  ;;  %v649_v23 = vmax.f32 %v639_v46, 0.0 }
 0x1cb   :  { %v2965_v26 = vmul.f32 %v689_v57, %v644_v30  ;;  %v648_v29 = vmax.f32 %v638_v55, 0.0  ;;  %v619_v10 = vmul.f32 %v2765_v20, %v601_v3 }
 0x1cc   :  { %v2937_v54 = vmul.f32 %v673_v36, %v645_v53  ;;  %v2949_v36 = vmul.f32 %v2846_v59, %v646_v9  ;;  %v2963_v59 = vmul.f32 %v689_v57, %v649_v23 }
 0x1cd   :  { %v2973_v21 = vmul.f32 %v2872_v39, %v648_v29  ;;  %v637_v33 = vadd.f32 %v2818_v4, %v619_v10  ;;  %v3008_v4 = vld [vmem:[%s3902_s5 + $0x8] sm:$0xff] }
 0x1ce   :  { %761 = vrot.lane.b32.xlu0 %v2937_v54, %s2477_s3  ;;  %751 = vrot.lane.b32.xlu1 %v2909_v48, %s2477_s3 }
 0x1cf   :  { %v647_v34 = vmax.f32 %v637_v33, 0.0  ;;  %v700_v33 = vld [vmem:[#allocation6] sm:$0xff] }
 0x1d1   :  { %v2985_v20 = vmul.f32 %v2842_v58, %v647_v34  ;;  %v3016_v58 = vld [vmem:[%s3902_s5] sm:$0xff] }
 0x1d2   :  { %724 = vrot.lane.b32.xlu0 %v2949_v36, %s2479_s1  ;;  %714 = vrot.lane.b32.xlu1 %v2869_v35, %s2479_s1 }
 0x1d6   :  { %722 = vrot.lane.b32.xlu0 %v2937_v54, %s2479_s1  ;;  %712 = vrot.lane.b32.xlu1 %v2909_v48, %s2479_s1 }
 0x1da   :  { %808 = vrot.lane.b32.xlu0 %v2963_v59, %s2478_s23  ;;  %798 = vrot.lane.b32.xlu1 %v2965_v26, %s2478_s23 }
 0x1de   :  { %767 = vrot.lane.b32.xlu0 %v2973_v21, %s2477_s3  ;;  %759 = vrot.lane.b32.xlu1 %v2965_v26, %s2477_s3 }
 0x1e2   :  { %728 = vrot.lane.b32.xlu0 %v2973_v21, %s2479_s1  ;;  %802 = vrot.lane.b32.xlu1 %v2949_v36, %s2478_s23 }
 0x1e6   :  { %718 = vrot.lane.b32.xlu0 %v2907_v47, %s2479_s1  ;;  %804 = vrot.lane.b32.xlu1 %v2985_v20, %s2478_s23 }
 0x1ea   :  { %800 = vrot.lane.b32.xlu1 %v2937_v54, %s2478_s23  ;;  %838 = vperm.xlu0 %2337, %v3008_v4  }
 0x1ee   :  { %763 = vrot.lane.b32.xlu1 %v2949_v36, %s2477_s3  ;;  %2339 = vset.pattern.permute.xlu0 %v2475_v2 }
 0x1f2   :  { %765 = vrot.lane.b32.xlu1 %v2985_v20, %s2477_s3 }
 0x1f6   :  { %726 = vrot.lane.b32.xlu1 %v2985_v20, %s2479_s1 }
 0x1fa   :  { %806 = vrot.lane.b32.xlu1 %v2973_v21, %s2478_s23 }
 0x1fe   :  { %769 = vrot.lane.b32.xlu1 %v2963_v59, %s2477_s3 }
 0x202   :  { %730 = vrot.lane.b32.xlu1 %v2963_v59, %s2479_s1 }
 0x206   :  { %720 = vrot.lane.b32.xlu1 %v2965_v26, %s2479_s1 }
 0x20a   :  { %833 = vperm.xlu1 %2338, %v3016_v58  }
 0x20e   :  { %2340 = vset.pattern.permute.xlu1 %v2475_v2 }
 0x230   :  { %v793_v39 = vpop.permute.xlu1 %792  ;;  %v3021_v45 = vpop.permute.xlu0 %755 }
 0x234   :  { %v795_v41 = vpop.permute.xlu1 %794  ;;  %v3023_v12 = vpop.permute.xlu0 %716 }
 0x235   :  { %v812_v52 = vsel %vm810_vm3, %v793_v39, %v795_v41 }
 0x238   :  { %v791_v50 = vpop.permute.xlu1 %790  ;;  %v797_v11 = vpop.permute.xlu0 %796 }
 0x239   :  { %v811_v62 = vsel %vm810_vm3, %v791_v50, %v793_v39  ;;  %v813_v29 = vsel %vm810_vm3, %v795_v41, %v797_v11 }
 0x23c   :  { %v754_v5 = vpop.permute.xlu1 %753  ;;  %v3027_v42 = vpop.permute.xlu0 %757 }
 0x23d   :  { %v773_v8 = vsel %vm771_vm4, %v754_v5, %v3021_v45  ;;  %v774_v39 = vsel %vm771_vm4, %v3021_v45, %v3027_v42 }
 0x240   :  { %v752_v7 = vpop.permute.xlu1 %751  ;;  %v762_v51 = vpop.permute.xlu0 %761 }
 0x241   :  { %v772_v27 = vsel %vm771_vm4, %v752_v7, %v754_v5  ;;  %v701_v5 = vld [vmem:[#allocation6 + $0x8] sm:$0xff] }
 0x244   :  { %v715_v6 = vpop.permute.xlu1 %714  ;;  %v725_v37 = vpop.permute.xlu0 %724 }
 0x245   :  { %v734_v44 = vsel %vm732_vm5, %v715_v6, %v3023_v12 }
 0x248   :  { %v713_v14 = vpop.permute.xlu1 %712  ;;  %v723_v49 = vpop.permute.xlu0 %722 }
 0x249   :  { %v737_v17 = vsel %vm732_vm5, %v723_v49, %v725_v37  ;;  %v733_v57 = vsel %vm732_vm5, %v713_v14, %v715_v6 }
 0x24c   :  { %v3025_v25 = vpop.permute.xlu1 %798  ;;  %v809_v9 = vpop.permute.xlu0 %808 }
 0x24d   :  { %v814_v3 = vsel %vm810_vm3, %v797_v11, %v3025_v25 }
 0x250   :  { %v3029_v15 = vpop.permute.xlu1 %759  ;;  %v768_v60 = vpop.permute.xlu0 %767 }
 0x254   :  { %v803_v13 = vpop.permute.xlu1 %802  ;;  %v729_v34 = vpop.permute.xlu0 %728 }
 0x258   :  { %v805_v63 = vpop.permute.xlu1 %804  ;;  %v719_v7 = vpop.permute.xlu0 %718 }
 0x259   :  { %v816_v43 = vsel %vm810_vm3, %v803_v13, %v805_v63  ;;  %v735_v11 = vsel %vm732_vm5, %v3023_v12, %v719_v7  ;;  %v1160_v12 = vsub.s32 3, %v2614_v19 }
 0x25a   :  { %864 = vmatprep.subr.mxu1 %v816_v43 }
 0x25b   :  { %v3109_v43 = vrot.slane %v2624_v24, %v1160_v12 }
 0x25c   :  { %v801_v53 = vpop.permute.xlu1 %800 }
 0x25d   :  { %v815_v56 = vsel %vm810_vm3, %v801_v53, %v803_v13 }
 0x25e   :  { %865 = vmatpush1.msra.mxu1 %v815_v56 }
 0x25f   :  { %866 = vmatprep.subr.mxu1 %v812_v52 }
 0x260   :  { %867 = vmatpush1.msra.mxu1 %v811_v62  ;;  %v764_v16 = vpop.permute.xlu1 %763  ;;  %v3118_v62 = vrot.slane %v2635_v31, %v1160_v12 }
 0x261   :  { %v776_v28 = vsel %vm771_vm4, %v762_v51, %v764_v16 }
 0x264   :  { %v766_v61 = vpop.permute.xlu1 %765 }
 0x265   :  { %v777_v1 = vsel %vm771_vm4, %v764_v16, %v766_v61 }
 0x266   :  { %868 = vmatprep.subr.mxu1 %v777_v1 }
 0x267   :  { %869 = vmatpush1.msra.mxu1 %v776_v28 }
 0x268   :  { %870 = vmatprep.subr.mxu1 %v773_v8  ;;  %v727_v40 = vpop.permute.xlu1 %726 }
 0x269   :  { %871 = vmatpush1.msra.mxu1 %v772_v27  ;;  %v738_v46 = vsel %vm732_vm5, %v725_v37, %v727_v40  ;;  %v739_v50 = vsel %vm732_vm5, %v727_v40, %v729_v34 }
 0x26a   :  { %872 = vmatprep.subr.mxu1 %v738_v46  ;;  %v3145_v46 = vrot.slane %v2637_v32, %v1160_v12 }
 0x26b   :  { %873 = vmatpush1.msra.mxu1 %v737_v17 }
 0x26c   :  { %874 = vmatprep.subr.mxu1 %v734_v44  ;;  %v807_v23 = vpop.permute.xlu1 %806 }
 0x26d   :  { %v817_v30 = vsel %vm810_vm3, %v805_v63, %v807_v23  ;;  %875 = vmatpush1.msra.mxu1 %v733_v57  ;;  %v818_v55 = vsel %vm810_vm3, %v807_v23, %v809_v9  ;;  %v3103_v63 = vrot.slane %v2621_v22, %v1160_v12 }
 0x26e   :  { %876 = vmatprep.subr.mxu1 %v2949_v36  ;;  %941 = vmatprep.subr.mxu0 %v818_v55 }
 0x26f   :  { %877 = vmatpush1.msra.mxu1 %v2937_v54  ;;  %942 = vmatpush1.msra.mxu0 %v817_v30  ;;  %v778_v54 = vsel %vm771_vm4, %v766_v61, %v768_v60 }
 0x270   :  { %878 = vmatprep.subr.mxu1 %v2869_v35  ;;  %943 = vmatprep.subr.mxu0 %v814_v3  ;;  %v770_v10 = vpop.permute.xlu1 %769  ;;  %v775_v35 = vsel %vm771_vm4, %v3027_v42, %v3029_v15 }
 0x271   :  { %879 = vmatpush1.msra.mxu1 %v2909_v48  ;;  %944 = vmatpush1.msra.mxu0 %v813_v29  ;;  %v779_v36 = vsel %vm771_vm4, %v768_v60, %v770_v10 }
 0x272   :  { %945 = vmatprep.subr.mxu0 %v779_v36  ;;  %2271 = vmatprep.subr.mxu1 %v809_v9 }
 0x273   :  { %2224 = vmatmul.mubr.msk.f32.vlgmr.msra.gmra.mxu1 %vm841_vm6, %v700_v33  ;;  %946 = vmatpush1.msra.mxu0 %v778_v54 }
 0x274   :  { %2272 = vmatpush3.msra.mxu1 %v809_v9  ;;  %947 = vmatprep.subr.mxu0 %v775_v35  ;;  %v731_v48 = vpop.permute.xlu1 %730 }
 0x275   :  { %2273 = vmatprep.subr.mxu1 %v3025_v25  ;;  %948 = vmatpush1.msra.mxu0 %v774_v39  ;;  %v740_v41 = vsel %vm732_vm5, %v729_v34, %v731_v48 }
 0x276   :  { %2274 = vmatpush3.msra.mxu1 %v3025_v25  ;;  %949 = vmatprep.subr.mxu0 %v740_v41 }
 0x277   :  { %2275 = vmatprep.subr.mxu1 %v770_v10  ;;  %950 = vmatpush1.msra.mxu0 %v739_v50 }
 0x278   :  { %2276 = vmatpush3.msra.mxu1 %v770_v10  ;;  %v721_v6 = vpop.permute.xlu1 %720  ;;  %918 = vmatprep.mubr.f32.mxu1 %v2473_v0 }
 0x279   :  { %2277 = vmatprep.subr.mxu1 %v3029_v15  ;;  %v736_v45 = vsel %vm732_vm5, %v719_v7, %v721_v6  ;;  %2225 = vmatmul.mubr.msk.f32.gmra.mxu1 %vm841_vm6, %v701_v5 }
 0x27a   :  { %2278 = vmatpush3.msra.mxu1 %v3029_v15  ;;  %951 = vmatprep.subr.mxu0 %v736_v45 }
 0x27b   :  { %2279 = vmatprep.subr.mxu1 %v731_v48  ;;  %952 = vmatpush1.msra.mxu0 %v735_v11 }
 0x27c   :  { %2280 = vmatpush3.msra.mxu1 %v731_v48  ;;  %953 = vmatprep.subr.mxu0 %v2973_v21 }
 0x27d   :  { %2281 = vmatprep.subr.mxu1 %v721_v6  ;;  %954 = vmatpush1.msra.mxu0 %v2985_v20  ;;  %v839_v20 = vpop.permute.xlu0 %838 }
 0x27e   :  { %2282 = vmatpush3.msra.mxu1 %v721_v6  ;;  %955 = vmatprep.subr.mxu0 %v2907_v47 }
 0x27f   :  { %2283 = vmatprep.subr.mxu1 %v2963_v59  ;;  %956 = vmatpush1.msra.mxu0 %v2866_v18 }
 0x280   :  { %2284 = vmatpush3.msra.mxu1 %v2963_v59  ;;  %2226 = vmatmul.mubr.msk.f32.vlgmr.msra.gmra.mxu0 %vm841_vm6, %v700_v33  ;;  %v1079_v59 = vsub.s32 2, %v2614_v19 }
 0x281   :  { %2285 = vmatprep.subr.mxu1 %v2965_v26  ;;  %2287 = vmatprep.mubr.msk.f32.mxu1 %vm841_vm6, %v700_v33 }
 0x282   :  { %2286 = vmatpush3.msra.mxu1 %v2965_v26  ;;  %995 = vmatprep.mubr.f32.mxu0 %v2473_v0  ;;  %v3096_v42 = vrot.slane %v2621_v22, %v1079_v59  ;;  %v3106_v37 = vrot.slane %v2624_v24, %v1079_v59  ;;  %v3121_v22 = vrot.slane %v2648_v38, %v1160_v12 }
 0x283   :  { %2288 = vmatmul.mubr.msk.f32.vlgmr.msra.gmra.mxu1 %vm841_vm6, %v701_v5  ;;  %v3124_v49 = vrot.slane %v2635_v31, %v1079_v59  ;;  %v3148_v17 = vrot.slane %v2648_v38, %v1079_v59  ;;  %v3151_v60 = vrot.slane %v2637_v32, %v1079_v59 }
 0x284   :  { %2227 = vmatmul.mubr.msk.f32.gmra.mxu0 %vm841_vm6, %v701_v5  ;;  %1665 = vmatprep.mubr.f32.mxu1 %v2473_v0 }
 0x285   :  { %1582 = vmatprep.mubr.f32.mxu0 %v2473_v0  ;;  %v834_v47 = vpop.permute.xlu1 %833 }
 0x333   :  { %v914_v18 = vpop.f32.mrf.mxu1 }
 0x334   :  { %v3091_v26 = vadd.f32 %v914_v18, %v834_v47 }
 0x335   :  { %v916_v21 = vpop.f32.mrf.mxu1 }
 0x336   :  { %v3098_v51 = vadd.f32 %v916_v21, %v834_v47  ;;  %v1097_v52 = vmul.f32 %v3096_v42, %v3091_v26  ;;  %v3134_v1 = vmul.f32 %v3103_v63, %v3091_v26 }
 0x338   :  { %v1098_v9 = vmul.f32 %v3106_v37, %v3098_v51  ;;  %v3142_v27 = vmul.f32 %v3109_v43, %v3098_v51  ;;  %v1124_v44 = vmul.f32 %v1097_v52, %v3091_v26 }
 0x339   :  { %v920_v14 = vpop.f32.mrf.mxu1 }
 0x33a   :  { %v3093_v25 = vadd.f32 %v920_v14, %v839_v20  ;;  %v1107_v55 = vadd.f32 %v1098_v9, %v1097_v52  ;;  %v1188_v3 = vadd.f32 %v3142_v27, %v3134_v1  ;;  %v1125_v33 = vmul.f32 %v1098_v9, %v3098_v51 }
 0x33b   :  { %v922_v15 = vpop.f32.mrf.mxu1 }
 0x33c   :  { %v3100_v13 = vadd.f32 %v922_v15, %v839_v20  ;;  %v1102_v53 = vmul.f32 %v3096_v42, %v3093_v25  ;;  %v1183_v16 = vmul.f32 %v3103_v63, %v3093_v25 }
 0x33e   :  { %v1103_v56 = vmul.f32 %v3106_v37, %v3100_v13  ;;  %v1184_v61 = vmul.f32 %v3109_v43, %v3100_v13  ;;  %v1129_v31 = vmul.f32 %v1102_v53, %v3093_v25  ;;  %v1209_v38 = vmul.f32 %v1183_v16, %v3093_v25 }
 0x340   :  { %v991_v24 = vpop.f32.mrf.mxu0  ;;  %v1130_v8 = vmul.f32 %v1103_v56, %v3100_v13  ;;  %v1210_v32 = vmul.f32 %v1184_v61, %v3100_v13  ;;  %v1195_v54 = vadd.f32 %v1184_v61, %v1183_v16  ;;  %v1115_v35 = vadd.f32 %v1103_v56, %v1102_v53 }
 0x341   :  { %v3136_v28 = vadd.f32 %v991_v24, %v834_v47 }
 0x342   :  { %v993_v40 = vpop.f32.mrf.mxu0  ;;  %v1141_v39 = vadd.f32 %v1130_v8, %v1129_v31  ;;  %v1221_v21 = vadd.f32 %v1210_v32, %v1209_v38 }
 0x343   :  { %v3154_v57 = vadd.f32 %v993_v40, %v834_v47  ;;  %v2289_v23 = vpop.f32.mrf.mxu1  ;;  %v1099_v30 = vmul.f32 %v3124_v49, %v3136_v28  ;;  %v3173_v7 = vmul.f32 %v3118_v62, %v3136_v28 }
 0x344   :  { %v3160_v29 = vadd.f32 %v2289_v23, %v839_v20  ;;  %v997_v10 = vpop.f32.mrf.mxu0 }
 0x345   :  { %v3165_v34 = vadd.f32 %v997_v10, %v839_v20  ;;  %v1068_v36 = vpop.f32.mrf.mxu1  ;;  %v1100_v50 = vmul.f32 %v3148_v17, %v3154_v57  ;;  %v1108_v5 = vadd.f32 %v1107_v55, %v1099_v30  ;;  %v1189_v16 = vadd.f32 %v1188_v3, %v3173_v7 }
 0x346   :  { %v3167_v48 = vadd.f32 %v1068_v36, %v834_v47  ;;  %v999_v41 = vpop.f32.mrf.mxu0  ;;  %v1187_v11 = vmul.f32 %v3145_v46, %v3160_v29  ;;  %v1106_v47 = vmul.f32 %v3151_v60, %v3160_v29 }
 0x347   :  { %v3175_v6 = vadd.f32 %v999_v41, %v839_v20  ;;  %v1185_v45 = vmul.f32 %v3118_v62, %v3165_v34  ;;  %v1104_v18 = vmul.f32 %v3124_v49, %v3165_v34  ;;  %v1181_v20 = vmul.f32 %v3121_v22, %v3154_v57 }
 0x348   :  { %v1101_v59 = vmul.f32 %v3151_v60, %v3167_v48  ;;  %v1109_v52 = vadd.f32 %v1108_v5, %v1100_v50  ;;  %v1198_v9 = vsel %vm1110_vm7, %v1187_v11, 0.0  ;;  %v1118_v40 = vsel %vm1110_vm7, %v1106_v47, 0.0 }
 0x349   :  { %v1186_v12 = vmul.f32 %v3121_v22, %v3175_v6  ;;  %v1196_v14 = vadd.f32 %v1195_v54, %v1185_v45  ;;  %v1105_v15 = vmul.f32 %v3148_v17, %v3175_v6  ;;  %v1116_v53 = vadd.f32 %v1115_v35, %v1104_v18 }
 0x34a   :  { %v1131_v56 = vmul.f32 %v1104_v18, %v3165_v34  ;;  %v1211_v24 = vmul.f32 %v1185_v45, %v3165_v34  ;;  %v1133_v23 = vmul.f32 %v1106_v47, %v3160_v29  ;;  %v1111_v10 = vsel %vm1110_vm7, %v1101_v59, 0.0 }
 0x34b   :  { %v1197_v61 = vadd.f32 %v1196_v14, %v1186_v12  ;;  %v1117_v31 = vadd.f32 %v1116_v53, %v1105_v15  ;;  %v1132_v8 = vmul.f32 %v1105_v15, %v3175_v6  ;;  %v1212_v36 = vmul.f32 %v1186_v12, %v3175_v6 }
 0x34c   :  { %v1142_v55 = vadd.f32 %v1141_v39, %v1131_v56  ;;  %v1222_v54 = vadd.f32 %v1221_v21, %v1211_v24  ;;  %v1182_v3 = vmul.f32 %v3145_v46, %v3167_v48  ;;  %v1126_v41 = vmul.f32 %v1099_v30, %v3136_v28 }
 0x34d   :  { %v1199_v38 = vadd.f32 %v1198_v9, %v1197_v61  ;;  %v1119_v32 = vadd.f32 %v1118_v40, %v1117_v31  ;;  %v1134_v5 = vadd.f32 %v1125_v33, %v1124_v44  ;;  %v1144_v45 = vsel %vm1110_vm7, %v1133_v23, 0.0 }
 0x34e   :  { %v1143_v35 = vadd.f32 %v1142_v55, %v1132_v8  ;;  %v1112_v18 = vadd.f32 %v1111_v10, %v1109_v52  ;;  %v1213_v39 = vmul.f32 %v1187_v11, %v3160_v29  ;;  %v1190_v47 = vadd.f32 %v1189_v16, %v1181_v20 }
 0x34f   :  { %1200 = vadd.xlane.f32.xlu0 %v1199_v38  ;;  %1120 = vadd.xlane.f32.xlu1 %v1119_v32  ;;  %v1223_v15 = vadd.f32 %v1222_v54, %v1212_v36  ;;  %v1127_v12 = vmul.f32 %v1100_v50, %v3154_v57  ;;  %v1135_v21 = vadd.f32 %v1134_v5, %v1126_v41  ;;  %v1191_v53 = vsel %vm1110_vm7, %v1182_v3, 0.0 }
 0x350   :  { %v1145_v14 = vadd.f32 %v1144_v45, %v1143_v35  ;;  %v1128_v56 = vmul.f32 %v1101_v59, %v3167_v48  ;;  %v1224_v30 = vsel %vm1110_vm7, %v1213_v39, 0.0  ;;  %v1192_v33 = vadd.f32 %v1191_v53, %v1190_v47 }
 0x351   :  { %v1225_v44 = vadd.f32 %v1224_v30, %v1223_v15  ;;  %v1136_v24 = vadd.f32 %v1135_v21, %v1127_v12  ;;  %v3911_v50 = vmov 2   ;;  %v3912_v59 = vmov 0  }
 0x352   :  { %v1137_v52 = vsel %vm1110_vm7, %v1128_v56, 0.0  ;;  %v1204_v16 = vmul.f32 %v3134_v1, %v3091_v26  ;;  %v1205_v61 = vmul.f32 %v3142_v27, %v3098_v51  ;;  %v1206_v9 = vmul.f32 %v3173_v7, %v3136_v28 }
 0x353   :  { %1146 = vadd.xlane.f32.xlu1 %v1145_v14  ;;  %1113 = vadd.xlane.f32.xlu0 %v1112_v18  ;;  %v1138_v11 = vadd.f32 %v1137_v52, %v1136_v24  ;;  %v1207_v8 = vmul.f32 %v1181_v20, %v3154_v57  ;;  %v1208_v23 = vmul.f32 %v1182_v3, %v3167_v48 }
 0x354   :  { %v1214_v31 = vadd.f32 %v1205_v61, %v1204_v16 }
 0x356   :  { %v1215_v40 = vadd.f32 %v1214_v31, %v1206_v9 }
 0x357   :  { %1226 = vadd.xlane.f32.xlu1 %v1225_v44  ;;  %1193 = vadd.xlane.f32.xlu0 %v1192_v33 }
 0x358   :  { %v1216_v55 = vadd.f32 %v1215_v40, %v1207_v8 }
 0x35b   :  { %1139 = vadd.xlane.f32.xlu0 %v1138_v11 }
 0x368   :  { %1319 = vperm.xlu1 %2340, %v3016_v58  }
 0x36c   :  { %2341 = vset.pattern.permute.xlu1 %v3911_v50 }
 0x36d   :  { %1341 = vperm.xlu1 %2341, %v3008_v4  }
 0x371   :  { %1323 = vperm.xlu0 %2339, %v3008_v4   ;;  %v1217_v4 = vsel %vm1110_vm7, %v1208_v23, 0.0 }
 0x372   :  { %v1218_v10 = vadd.f32 %v1217_v4, %v1216_v55 }
 0x375   :  { %2342 = vset.pattern.permute.xlu0 %v3912_v59 }
 0x391   :  { %1219 = vadd.xlane.f32.xlu1 %v1218_v10 }
 0x3a2   :  { %1337 = vperm.xlu1 %2341, %v3016_v58  }
 0x3a6   :  { %2343 = vset.pattern.permute.xlu1 %v3912_v59 }
 0x3d8   :  { %v1121_v1 = vpop.xlane.xlu1 %1120  ;;  %v1201_v38 = vpop.xlane.xlu0 %1200 }
 0x3d9   :  { %v1123_v27 = vmul.f32 0.005, %v1121_v1  ;;  %v1203_v7 = vmul.f32 0.005, %v1201_v38 }
 0x3db   :  { %v1151_v36 = vmul.f32 %v1123_v27, %v1123_v27  ;;  %v1231_v3 = vmul.f32 %v1203_v7, %v1203_v7  ;;  %v1253_v47 = vmul.f32 %v1203_v7, %v3103_v63  ;;  %v1254_v14 = vmul.f32 %v1203_v7, %v3109_v43 }
 0x3dc   :  { %v1147_v32 = vpop.xlane.xlu1 %1146  ;;  %v3228_v39 = vpop.xlane.xlu0 %1113  ;;  %v1243_v15 = vmul.f32 %v1123_v27, %v3096_v42  ;;  %v1244_v12 = vmul.f32 %v1123_v27, %v3106_v37  ;;  %v1255_v21 = vmul.f32 %v1203_v7, %v3118_v62  ;;  %v1245_v53 = vmul.f32 %v1123_v27, %v3124_v49 }
 0x3dd   :  { %v1149_v54 = vmul.f32 0.005, %v1147_v32  ;;  %v1256_v38 = vmul.f32 %v1203_v7, %v3121_v22 }
 0x3de   :  { %v1263_v30 = vadd.f32 %v1253_v47, %v1243_v15  ;;  %v1264_v44 = vadd.f32 %v1254_v14, %v1244_v12  ;;  %v1265_v33 = vadd.f32 %v1255_v21, %v1245_v53 }
 0x3df   :  { %v1153_v20 = vsub.f32 %v1149_v54, %v1151_v36  ;;  %v1246_v36 = vmul.f32 %v1123_v27, %v3148_v17 }
 0x3e0   :  { %v1227_v35 = vpop.xlane.xlu1 %1226  ;;  %v3230_v58 = vpop.xlane.xlu0 %1193  ;;  %v1303_v40 = vsub.f32 %v3093_v25, %v1263_v30  ;;  %v1304_v23 = vsub.f32 %v3100_v13, %v1264_v44  ;;  %v1305_v1 = vsub.f32 %v3165_v34, %v1265_v33  ;;  %v1257_v13 = vmul.f32 %v1203_v7, %v3145_v46 }
 0x3e1   :  { %v1155_v41 = vadd.f32 1e-05, %v1153_v20  ;;  %v1229_v5 = vmul.f32 0.005, %v1227_v35  ;;  %v1266_v47 = vadd.f32 %v1256_v38, %v1246_v36 }
 0x3e3   :  { %v1233_v45 = vsub.f32 %v1229_v5, %v1231_v3  ;;  %2356 = vrsqrt.f32 %v1155_v41 }
 0x3e4   :  { %v1140_v52 = vpop.xlane.xlu0 %1139  ;;  %v3244_v8 = vpop.permute.xlu1 %1319 }
 0x3e5   :  { %v1235_v18 = vadd.f32 1e-05, %v1233_v45 }
 0x3e7   :  { %2358 = vrsqrt.f32 %v1235_v18  ;;  %v1247_v18 = vmul.f32 %v1123_v27, %v3151_v60 }
 0x3e8   :  { %v1342_v45 = vpop.permute.xlu1 %1341 }
 0x3e9   :  { %v1267_v44 = vadd.f32 %v1257_v13, %v1247_v18 }
 0x3ec   :  { %v1324_v32 = vpop.permute.xlu0 %1323 }
 0x3f0   :  { %v2357_v56 = vpop.eup %2356 }
 0x3f1   :  { %v1273_v11 = vmul.f32 %v2357_v56, %v3096_v42  ;;  %v1274_v59 = vmul.f32 %v2357_v56, %v3106_v37  ;;  %v1275_v16 = vmul.f32 %v2357_v56, %v3124_v49  ;;  %v1276_v34 = vmul.f32 %v2357_v56, %v3148_v17 }
 0x3f2   :  { %v1277_v33 = vmul.f32 %v2357_v56, %v3151_v60 }
 0x3f4   :  { %v2359_v24 = vpop.eup %2358 }
 0x3f5   :  { %v1283_v61 = vmul.f32 %v2359_v24, %v3103_v63  ;;  %v1284_v9 = vmul.f32 %v2359_v24, %v3109_v43  ;;  %v1285_v31 = vmul.f32 %v2359_v24, %v3118_v62  ;;  %v1286_v41 = vmul.f32 %v2359_v24, %v3121_v22 }
 0x3f6   :  { %v1287_v15 = vmul.f32 %v2359_v24, %v3145_v46 }
 0x3f7   :  { %v1293_v55 = vadd.f32 %v1283_v61, %v1273_v11  ;;  %v1294_v4 = vadd.f32 %v1284_v9, %v1274_v59  ;;  %v1295_v10 = vadd.f32 %v1285_v31, %v1275_v16  ;;  %v1296_v12 = vadd.f32 %v1286_v41, %v1276_v34 }
 0x3f8   :  { %v1306_v11 = vsub.f32 %v3175_v6, %v1266_v47  ;;  %v1297_v27 = vadd.f32 %v1287_v15, %v1277_v33  ;;  %v1307_v16 = vsub.f32 %v3160_v29, %v1267_v44 }
 0x3f9   :  { %v1313_v54 = vmul.f32 %v1303_v40, %v1293_v55  ;;  %v1314_v20 = vmul.f32 %v1304_v23, %v1294_v4  ;;  %v1315_v35 = vmul.f32 %v1305_v1, %v1295_v10  ;;  %v3284_v40 = vmul.f32 0.005, %v3228_v39 }
 0x3fa   :  { %v1316_v7 = vmul.f32 %v1306_v11, %v1296_v12  ;;  %v1317_v6 = vmul.f32 %v1307_v16, %v1297_v27  ;;  %v1148_v23 = vmul.f32 0.005, %v1140_v52  ;;  %v1202_v10 = vmul.f32 0.005, %v3230_v58 }
 0x3fb   :  { %v1331_v3 = vmul.f32 %v1324_v32, %v1313_v54  ;;  %v1332_v5 = vmul.f32 %v1324_v32, %v1314_v20  ;;  %v1333_v25 = vmul.f32 %v1324_v32, %v1315_v35  ;;  %v1150_v4 = vmul.f32 %v3284_v40, %v3284_v40 }
 0x3fc   :  { %v1334_v56 = vmul.f32 %v1324_v32, %v1316_v7  ;;  %v1335_v61 = vmul.f32 %v1324_v32, %v1317_v6  ;;  %v1230_v38 = vmul.f32 %v1202_v10, %v1202_v10  ;;  %v1250_v20 = vmul.f32 %v1202_v10, %v3118_v62 }
 0x3fd   :  { %v1350_v14 = vadd.f32 %v1342_v45, %v1332_v5  ;;  %v1351_v53 = vadd.f32 %v1342_v45, %v1333_v25  ;;  %v1349_v30 = vadd.f32 %v1342_v45, %v1331_v3  ;;  %v1152_v39 = vsub.f32 %v1148_v23, %v1150_v4 }
 0x3fe   :  { %v1352_v9 = vadd.f32 %v1342_v45, %v1334_v56  ;;  %v1353_v31 = vadd.f32 %v1342_v45, %v1335_v61  ;;  %v1249_v58 = vmul.f32 %v1202_v10, %v3109_v43  ;;  %v1248_v35 = vmul.f32 %v1202_v10, %v3103_v63 }
 0x3ff   :  { %v3256_v21 = vmax.f32 %v1350_v14, 0.0  ;;  %v3264_v59 = vmax.f32 %v1351_v53, 0.0  ;;  %v3266_v24 = vmax.f32 %v1349_v30, 0.0  ;;  %v1154_v52 = vadd.f32 1e-05, %v1152_v39 }
 0x400   :  { %v3281_v29 = vmax.f32 %v1352_v9, 0.0  ;;  %v3290_v55 = vmax.f32 %v1353_v31, 0.0  ;;  %v1240_v41 = vmul.f32 %v3284_v40, %v3124_v49  ;;  %v1239_v3 = vmul.f32 %v3284_v40, %v3106_v37 }
 0x401   :  { %1427 = vrot.lane.b32.xlu0 %v3256_v21, %s2477_s3  ;;  %1465 = vrot.lane.b32.xlu1 %v3256_v21, %s2478_s23  ;;  %2360 = vrsqrt.f32 %v1154_v52  ;;  %v1238_v5 = vmul.f32 %v3284_v40, %v3096_v42  ;;  %v1251_v15 = vmul.f32 %v1202_v10, %v3121_v22 }
 0x402   :  { %v1260_v45 = vadd.f32 %v1250_v20, %v1240_v41  ;;  %v1259_v13 = vadd.f32 %v1249_v58, %v1239_v3  ;;  %v3388_v3 = vld [vmem:[%s3904_s7 + $0x10] sm:$0xf] }
 0x403   :  { %v1258_v18 = vadd.f32 %v1248_v35, %v1238_v5  ;;  %v3395_v5 = vld [vmem:[%s3904_s7 + $0x8] sm:$0xff] }
 0x404   :  { %v1300_v33 = vsub.f32 %v3136_v28, %v1260_v45  ;;  %v1299_v11 = vsub.f32 %v3098_v51, %v1259_v13 }
 0x405   :  { %1467 = vrot.lane.b32.xlu1 %v3264_v59, %s2478_s23  ;;  %1425 = vrot.lane.b32.xlu0 %v3266_v24, %s2477_s3  ;;  %v1298_v27 = vsub.f32 %v3091_v26, %v1258_v18 }
 0x409   :  { %1389 = vrot.lane.b32.xlu0 %v3256_v21, %s2479_s1  ;;  %1463 = vrot.lane.b32.xlu1 %v3266_v24, %s2478_s23 }
 0x40d   :  { %1387 = vrot.lane.b32.xlu0 %v3266_v24, %s2479_s1  ;;  %1429 = vrot.lane.b32.xlu1 %v3264_v59, %s2477_s3 }
 0x40e   :  { %v2361_v25 = vpop.eup %2360 }
 0x40f   :  { %v1270_v34 = vmul.f32 %v2361_v25, %v3124_v49  ;;  %v1269_v14 = vmul.f32 %v2361_v25, %v3106_v37  ;;  %v1268_v30 = vmul.f32 %v2361_v25, %v3096_v42  ;;  %v1241_v49 = vmul.f32 %v3284_v40, %v3148_v17 }
 0x410   :  { %v1272_v20 = vmul.f32 %v2361_v25, %v3151_v60 }
 0x411   :  { %1469 = vrot.lane.b32.xlu0 %v3281_v29, %s2478_s23  ;;  %1391 = vrot.lane.b32.xlu1 %v3264_v59, %s2479_s1  ;;  %v1261_v6 = vadd.f32 %v1251_v15, %v1241_v49 }
 0x413   :  { %v1301_v4 = vsub.f32 %v3154_v57, %v1261_v6  ;;  %v1242_v57 = vmul.f32 %v3284_v40, %v3151_v60 }
 0x415   :  { %1431 = vrot.lane.b32.xlu0 %v3281_v29, %s2477_s3  ;;  %1471 = vrot.lane.b32.xlu1 %v3290_v55, %s2478_s23 }
 0x419   :  { %1393 = vrot.lane.b32.xlu0 %v3281_v29, %s2479_s1  ;;  %1433 = vrot.lane.b32.xlu1 %v3290_v55, %s2477_s3 }
 0x41a   :  { %v1220_v1 = vpop.xlane.xlu1 %1219 }
 0x41b   :  { %v1228_v32 = vmul.f32 0.005, %v1220_v1 }
 0x41d   :  { %v1232_v36 = vsub.f32 %v1228_v32, %v1230_v38  ;;  %1395 = vrot.lane.b32.xlu1 %v3290_v55, %s2479_s1 }
 0x41e   :  { %v1338_v9 = vpop.permute.xlu1 %1337 }
 0x41f   :  { %v1234_v54 = vadd.f32 1e-05, %v1232_v36 }
 0x421   :  { %2362 = vrsqrt.f32 %v1234_v54 }
 0x42e   :  { %v2363_v47 = vpop.eup %2362 }
 0x42f   :  { %v1280_v12 = vmul.f32 %v2363_v47, %v3118_v62  ;;  %v1279_v53 = vmul.f32 %v2363_v47, %v3109_v43  ;;  %v1278_v44 = vmul.f32 %v2363_v47, %v3103_v63  ;;  %v1281_v62 = vmul.f32 %v2363_v47, %v3121_v22 }
 0x430   :  { %v1271_v63 = vmul.f32 %v2361_v25, %v3148_v17  ;;  %v1252_v17 = vmul.f32 %v1202_v10, %v3145_v46  ;;  %v1282_v36 = vmul.f32 %v2363_v47, %v3145_v46 }
 0x431   :  { %v1290_v37 = vadd.f32 %v1280_v12, %v1270_v34  ;;  %v1289_v7 = vadd.f32 %v1279_v53, %v1269_v14  ;;  %v1288_v16 = vadd.f32 %v1278_v44, %v1268_v30 }
 0x432   :  { %v1291_v61 = vadd.f32 %v1281_v62, %v1271_v63  ;;  %v1262_v54 = vadd.f32 %v1252_v17, %v1242_v57  ;;  %v1292_v10 = vadd.f32 %v1282_v36, %v1272_v20 }
 0x433   :  { %v1310_v43 = vmul.f32 %v1300_v33, %v1290_v37  ;;  %v1309_v56 = vmul.f32 %v1299_v11, %v1289_v7  ;;  %v1308_v42 = vmul.f32 %v1298_v27, %v1288_v16 }
 0x434   :  { %v1311_v1 = vmul.f32 %v1301_v4, %v1291_v61  ;;  %v1302_v40 = vsub.f32 %v3167_v48, %v1262_v54  ;;  %v1364_v54 = vld [vmem:[#allocation7] sm:$0xff] }
 0x435   :  { %v1328_v28 = vmul.f32 %v3244_v8, %v1310_v43  ;;  %v1327_v51 = vmul.f32 %v3244_v8, %v1309_v56  ;;  %v1326_v26 = vmul.f32 %v3244_v8, %v1308_v42 }
 0x436   :  { %v1329_v32 = vmul.f32 %v3244_v8, %v1311_v1  ;;  %v1312_v35 = vmul.f32 %v1302_v40, %v1292_v10 }
 0x437   :  { %v1346_v31 = vadd.f32 %v1338_v9, %v1328_v28  ;;  %v1345_v23 = vadd.f32 %v1338_v9, %v1327_v51  ;;  %v1344_v52 = vadd.f32 %v1338_v9, %v1326_v26 }
 0x438   :  { %v1347_v58 = vadd.f32 %v1338_v9, %v1329_v32  ;;  %v1330_v60 = vmul.f32 %v3244_v8, %v1312_v35  ;;  %v3383_v8 = vld [vmem:[%s3904_s7] sm:$0xff] }
 0x439   :  { %v3332_v39 = vmax.f32 %v1346_v31, 0.0  ;;  %v3334_v22 = vmax.f32 %v1345_v23, 0.0  ;;  %v3341_v38 = vmax.f32 %v1344_v52, 0.0 }
 0x43a   :  { %v3357_v46 = vmax.f32 %v1347_v58, 0.0  ;;  %v1348_v41 = vadd.f32 %v1338_v9, %v1330_v60 }
 0x43b   :  { %1457 = vrot.lane.b32.xlu0 %v3332_v39, %s2478_s23  ;;  %1455 = vrot.lane.b32.xlu1 %v3334_v22, %s2478_s23 }
 0x43c   :  { %v3372_v48 = vmax.f32 %v1348_v41, 0.0 }
 0x43f   :  { %1419 = vrot.lane.b32.xlu0 %v3332_v39, %s2477_s3  ;;  %1453 = vrot.lane.b32.xlu1 %v3341_v38, %s2478_s23 }
 0x443   :  { %1381 = vrot.lane.b32.xlu0 %v3332_v39, %s2479_s1  ;;  %1417 = vrot.lane.b32.xlu1 %v3334_v22, %s2477_s3 }
 0x447   :  { %1459 = vrot.lane.b32.xlu0 %v3357_v46, %s2478_s23  ;;  %1415 = vrot.lane.b32.xlu1 %v3341_v38, %s2477_s3 }
 0x44b   :  { %1421 = vrot.lane.b32.xlu0 %v3357_v46, %s2477_s3  ;;  %1379 = vrot.lane.b32.xlu1 %v3334_v22, %s2479_s1 }
 0x44f   :  { %1383 = vrot.lane.b32.xlu0 %v3357_v46, %s2479_s1  ;;  %1377 = vrot.lane.b32.xlu1 %v3341_v38, %s2479_s1 }
 0x453   :  { %1461 = vrot.lane.b32.xlu1 %v3372_v48, %s2478_s23  ;;  %1506 = vperm.xlu0 %2342, %v3388_v3  }
 0x457   :  { %1423 = vrot.lane.b32.xlu1 %v3372_v48, %s2477_s3  ;;  %2345 = vset.pattern.permute.xlu0 %v2475_v2 }
 0x45b   :  { %1385 = vrot.lane.b32.xlu1 %v3372_v48, %s2479_s1 }
 0x45f   :  { %1496 = vperm.xlu1 %2343, %v3383_v8  }
 0x463   :  { %1501 = vperm.xlu1 %2343, %v3395_v5  }
 0x467   :  { %2344 = vset.pattern.permute.xlu1 %v2475_v2 }
 0x473   :  { %v1428_v25 = vpop.permute.xlu0 %1427  ;;  %v1466_v45 = vpop.permute.xlu1 %1465 }
 0x477   :  { %v1426_v13 = vpop.permute.xlu0 %1425  ;;  %v1468_v18 = vpop.permute.xlu1 %1467 }
 0x478   :  { %v1478_v47 = vsel %vm810_vm3, %v1466_v45, %v1468_v18  ;;  %v1439_v63 = vsel %vm771_vm4, %v1426_v13, %v1428_v25 }
 0x479   :  { %1534 = vmatprep.subr.mxu0 %v1478_v47 }
 0x47b   :  { %v1390_v34 = vpop.permute.xlu0 %1389  ;;  %v1464_v14 = vpop.permute.xlu1 %1463 }
 0x47c   :  { %v1477_v15 = vsel %vm810_vm3, %v1464_v14, %v1466_v45 }
 0x47d   :  { %1535 = vmatpush1.msra.mxu0 %v1477_v15 }
 0x47f   :  { %v1430_v12 = vpop.permute.xlu1 %1429  ;;  %v1388_v53 = vpop.permute.xlu0 %1387 }
 0x480   :  { %v1440_v42 = vsel %vm771_vm4, %v1428_v25, %v1430_v12  ;;  %v1401_v4 = vsel %vm732_vm5, %v1388_v53, %v1390_v34  ;;  %v2377_v53 = vld [vmem:[#allocation2] sm:$0x3f] }
 0x483   :  { %v3402_v30 = vpop.permute.xlu1 %1391  ;;  %v1470_v44 = vpop.permute.xlu0 %1469 }
 0x484   :  { %v1479_v11 = vsel %vm810_vm3, %v1468_v18, %v1470_v44  ;;  %v1402_v23 = vsel %vm732_vm5, %v1390_v34, %v3402_v30  ;;  %v1366_v18 = vld [vmem:[#allocation7 + $0x10] sm:$0xf] }
 0x487   :  { %v1472_v33 = vpop.permute.xlu1 %1471  ;;  %v1432_v27 = vpop.permute.xlu0 %1431 }
 0x488   :  { %v1480_v2 = vsel %vm810_vm3, %v1470_v44, %v1472_v33 }
 0x489   :  { %1617 = vmatprep.subr.mxu1 %v1480_v2 }
 0x48a   :  { %1618 = vmatpush1.msra.mxu1 %v1479_v11 }
 0x48b   :  { %v3406_v49 = vpop.permute.xlu1 %1433  ;;  %v3408_v37 = vpop.permute.xlu0 %1393 }
 0x48c   :  { %v1403_v45 = vsel %vm732_vm5, %v3402_v30, %v3408_v37 }
 0x48f   :  { %v3410_v7 = vpop.permute.xlu1 %1395 }
 0x490   :  { %v1404_v41 = vsel %vm732_vm5, %v3408_v37, %v3410_v7 }
 0x4ad   :  { %v1458_v16 = vpop.permute.xlu0 %1457  ;;  %v1456_v62 = vpop.permute.xlu1 %1455 }
 0x4ae   :  { %v1474_v6 = vsel %vm810_vm3, %v1456_v62, %v1458_v16 }
 0x4af   :  { %1536 = vmatprep.subr.mxu0 %v1474_v6 }
 0x4b1   :  { %v1454_v43 = vpop.permute.xlu1 %1453  ;;  %v1420_v28 = vpop.permute.xlu0 %1419 }
 0x4b2   :  { %v1473_v56 = vsel %vm810_vm3, %v1454_v43, %v1456_v62  ;;  %v2379_v43 = vld [vmem:[#allocation2 + $0x18] sm:$0x3f] }
 0x4b3   :  { %1537 = vmatpush1.msra.mxu0 %v1473_v56 }
 0x4b4   :  { %1538 = vmatprep.subr.mxu0 %v1440_v42 }
 0x4b5   :  { %1539 = vmatpush1.msra.mxu0 %v1439_v63  ;;  %v1418_v51 = vpop.permute.xlu1 %1417  ;;  %v1382_v31 = vpop.permute.xlu0 %1381 }
 0x4b6   :  { %v1436_v26 = vsel %vm771_vm4, %v1418_v51, %v1420_v28 }
 0x4b7   :  { %1540 = vmatprep.subr.mxu0 %v1436_v26 }
 0x4b9   :  { %v1416_v61 = vpop.permute.xlu1 %1415  ;;  %v1460_v17 = vpop.permute.xlu0 %1459 }
 0x4ba   :  { %v1435_v9 = vsel %vm771_vm4, %v1416_v61, %v1418_v51  ;;  %v1475_v58 = vsel %vm810_vm3, %v1458_v16, %v1460_v17 }
 0x4bb   :  { %1541 = vmatpush1.msra.mxu0 %v1435_v9 }
 0x4bc   :  { %1542 = vmatprep.subr.mxu0 %v1402_v23 }
 0x4bd   :  { %1543 = vmatpush1.msra.mxu0 %v1401_v4  ;;  %v1380_v52 = vpop.permute.xlu1 %1379  ;;  %v1422_v10 = vpop.permute.xlu0 %1421 }
 0x4be   :  { %v1398_v1 = vsel %vm732_vm5, %v1380_v52, %v1382_v31  ;;  %v1437_v35 = vsel %vm771_vm4, %v1420_v28, %v1422_v10  ;;  %v2380_v28 = vld [vmem:[#allocation2 + $0x20] sm:$0x3f] }
 0x4bf   :  { %1544 = vmatprep.subr.mxu0 %v1398_v1 }
 0x4c1   :  { %v1378_v32 = vpop.permute.xlu1 %1377  ;;  %v1384_v60 = vpop.permute.xlu0 %1383 }
 0x4c2   :  { %v1397_v57 = vsel %vm732_vm5, %v1378_v32, %v1380_v52  ;;  %v1399_v47 = vsel %vm732_vm5, %v1382_v31, %v1384_v60 }
 0x4c3   :  { %1545 = vmatpush1.msra.mxu0 %v1397_v57 }
 0x4c4   :  { %1546 = vmatprep.subr.mxu0 %v3256_v21  ;;  %v1442_v21 = vsel %vm771_vm4, %v1432_v27, %v3406_v49 }
 0x4c5   :  { %1547 = vmatpush1.msra.mxu0 %v3266_v24  ;;  %v1462_v36 = vpop.permute.xlu1 %1461  ;;  %v1441_v24 = vsel %vm771_vm4, %v1430_v12, %v1432_v27 }
 0x4c6   :  { %1548 = vmatprep.subr.mxu0 %v3334_v22  ;;  %v1476_v20 = vsel %vm810_vm3, %v1460_v17, %v1462_v36 }
 0x4c7   :  { %1549 = vmatpush1.msra.mxu0 %v3341_v38  ;;  %1619 = vmatprep.subr.mxu1 %v1476_v20  ;;  %v1365_v38 = vld [vmem:[#allocation7 + $0x8] sm:$0xff] }
 0x4c8   :  { %2230 = vmatmul.mubr.msk.f32.vlgmr.msra.gmra.mxu0 %vm841_vm6, %v1364_v54  ;;  %1620 = vmatpush1.msra.mxu1 %v1475_v58 }
 0x4c9   :  { %2290 = vmatprep.subr.mxu0 %v2473_v0  ;;  %1621 = vmatprep.subr.mxu1 %v1442_v21  ;;  %v1424_v22 = vpop.permute.xlu1 %1423 }
 0x4ca   :  { %2291 = vmatpush3.msra.mxu0 %v1472_v33  ;;  %1622 = vmatpush1.msra.mxu1 %v1441_v24  ;;  %v1438_v40 = vsel %vm771_vm4, %v1422_v10, %v1424_v22 }
 0x4cb   :  { %2292 = vmatprep.subr.mxu0 %v2473_v0  ;;  %1623 = vmatprep.subr.mxu1 %v1438_v40 }
 0x4cc   :  { %2293 = vmatpush3.msra.mxu0 %v1462_v36  ;;  %1588 = vmatprep.mubr.f32.mxu0 %v2473_v0 }
 0x4cd   :  { %1624 = vmatpush1.msra.mxu1 %v1437_v35  ;;  %2294 = vmatprep.subr.mxu0 %v2473_v0  ;;  %v1386_v25 = vpop.permute.xlu1 %1385 }
 0x4ce   :  { %2231 = vmatmul.mubr.msk.f32.gmra.mxu0 %vm841_vm6, %v1365_v38  ;;  %1625 = vmatprep.subr.mxu1 %v1404_v41  ;;  %v1400_v13 = vsel %vm732_vm5, %v1384_v60, %v1386_v25  ;;  %v3510_v6 = vpop.permute.xlu0 %1506 }
 0x4cf   :  { %2295 = vmatpush3.msra.mxu0 %v3406_v49  ;;  %1626 = vmatpush1.msra.mxu1 %v1403_v45  ;;  %v2378_v49 = vld [vmem:[#allocation2 + $0x10] sm:$0x3f] }
 0x4d0   :  { %2296 = vmatprep.subr.mxu0 %v2473_v0  ;;  %1627 = vmatprep.subr.mxu1 %v1400_v13 }
 0x4d1   :  { %2297 = vmatpush3.msra.mxu0 %v1424_v22  ;;  %1594 = vmatprep.mubr.f32.mxu0 %v2473_v0 }
 0x4d2   :  { %1628 = vmatpush1.msra.mxu1 %v1399_v47  ;;  %2298 = vmatprep.subr.mxu0 %v2473_v0 }
 0x4d3   :  { %2232 = vmatmul.mubr.msk.f32.gmra.mxu0 %vm841_vm6, %v1366_v18  ;;  %1629 = vmatprep.subr.mxu1 %v3281_v29 }
 0x4d4   :  { %2299 = vmatpush3.msra.mxu0 %v3410_v7  ;;  %1630 = vmatpush1.msra.mxu1 %v3264_v59 }
 0x4d5   :  { %2300 = vmatprep.subr.mxu0 %v2473_v0  ;;  %1631 = vmatprep.subr.mxu1 %v3357_v46 }
 0x4d6   :  { %2301 = vmatpush3.msra.mxu0 %v1386_v25  ;;  %1632 = vmatpush1.msra.mxu1 %v3332_v39  ;;  %v1886_v39 = vsub.s32 5, %v2614_v19 }
 0x4d7   :  { %2302 = vmatprep.subr.mxu0 %v2473_v0  ;;  %2233 = vmatmul.mubr.msk.f32.vlgmr.msra.gmra.mxu1 %vm841_vm6, %v1364_v54 }
 0x4d8   :  { %2303 = vmatpush3.msra.mxu0 %v3290_v55  ;;  %2306 = vmatprep.mubr.msk.f32.mxu0 %vm2480_vm8, %v2473_v0  ;;  %v1766_v55 = vsub.s32 4, %v2614_v19  ;;  %v3492_v44 = vrot.slane %v2377_v53, %v1886_v39  ;;  %v3521_v61 = vrot.slane %v2378_v49, %v1886_v39  ;;  %v3523_v9 = vrot.slane %v2379_v43, %v1886_v39 }
 0x4d9   :  { %2304 = vmatprep.subr.mxu0 %v2473_v0  ;;  %1671 = vmatprep.mubr.f32.mxu1 %v2473_v0  ;;  %v3525_v23 = vrot.slane %v2380_v28, %v1886_v39 }
 0x4da   :  { %2305 = vmatpush3.msra.mxu0 %v3372_v48  ;;  %v3474_v29 = vpop.permute.xlu1 %1496  ;;  %v2376_v48 = vld [vmem:[#allocation2 + $0x8] sm:$0x3f]  ;;  %v3490_v30 = vrot.slane %v2377_v53, %v1766_v55  ;;  %v3501_v37 = vrot.slane %v2378_v49, %v1766_v55  ;;  %v3512_v56 = vrot.slane %v2379_v43, %v1766_v55  ;;  %v3518_v51 = vrot.slane %v2380_v28, %v1766_v55 }
 0x4db   :  { %2307 = vmatmul.mubr.msk.f32.vlgmr.msra.gmra.mxu0 %vm841_vm6, %v1364_v54  ;;  %2234 = vmatmul.mubr.msk.f32.gmra.mxu1 %vm841_vm6, %v1365_v38  ;;  %v3478_v34 = vrot.slane %v2376_v48, %v1766_v55  ;;  %v3483_v15 = vrot.slane %v2376_v48, %v1886_v39 }
 0x4dc   :  { %2309 = vmatprep.mubr.msk.f32.mxu0 %vm2480_vm8, %v2473_v0  ;;  %1677 = vmatprep.mubr.f32.mxu1 %v2473_v0 }
 0x4de   :  { %v3488_v12 = vpop.permute.xlu1 %1501 }
 0x4df   :  { %2310 = vmatmul.mubr.msk.f32.gmra.mxu0 %vm841_vm6, %v1365_v38  ;;  %2235 = vmatmul.mubr.msk.f32.gmra.mxu1 %vm841_vm6, %v1366_v18 }
 0x4e0   :  { %2312 = vmatprep.mubr.msk.f32.mxu0 %vm2480_vm8, %v2473_v0 }
 0x4e3   :  { %2313 = vmatmul.mubr.msk.f32.gmra.mxu0 %vm841_vm6, %v1366_v18 }
 0x588   :  { %v1584_v59 = vpop.f32.mrf.mxu0 }
 0x589   :  { %v3486_v0 = vadd.f32 %v1584_v59, %v3474_v29 }
 0x58a   :  { %v1586_v46 = vpop.f32.mrf.mxu0 }
 0x58b   :  { %v3481_v14 = vadd.f32 %v1586_v46, %v3474_v29  ;;  %v1784_v7 = vmul.f32 %v3490_v30, %v3486_v0  ;;  %v1904_v16 = vmul.f32 %v3492_v44, %v3486_v0 }
 0x58d   :  { %v1785_v33 = vmul.f32 %v3478_v34, %v3481_v14  ;;  %v1905_v11 = vmul.f32 %v3483_v15, %v3481_v14  ;;  %v1829_v57 = vmul.f32 %v1784_v7, %v3486_v0  ;;  %v1947_v36 = vmul.f32 %v1904_v16, %v3486_v0 }
 0x58e   :  { %v1590_v19 = vpop.f32.mrf.mxu0 }
 0x58f   :  { %v3497_v2 = vadd.f32 %v1590_v19, %v3488_v12  ;;  %v1830_v26 = vmul.f32 %v1785_v33, %v3481_v14  ;;  %v1948_v52 = vmul.f32 %v1905_v11, %v3481_v14  ;;  %v1799_v32 = vadd.f32 %v1785_v33, %v1784_v7 }
 0x590   :  { %v1592_v27 = vpop.f32.mrf.mxu0  ;;  %v1919_v40 = vadd.f32 %v1905_v11, %v1904_v16 }
 0x591   :  { %v3508_v62 = vadd.f32 %v1592_v27, %v3488_v12  ;;  %v1789_v42 = vmul.f32 %v3490_v30, %v3497_v2  ;;  %v1909_v63 = vmul.f32 %v3492_v44, %v3497_v2  ;;  %v1844_v22 = vadd.f32 %v1830_v26, %v1829_v57 }
 0x592   :  { %v3546_v41 = vadd.f32 %v1948_v52, %v1947_v36 }
 0x593   :  { %v1596_v31 = vpop.f32.mrf.mxu0  ;;  %v1790_v4 = vmul.f32 %v3478_v34, %v3508_v62  ;;  %v1910_v1 = vmul.f32 %v3483_v15, %v3508_v62  ;;  %v1834_v20 = vmul.f32 %v1789_v42, %v3497_v2  ;;  %v1952_v10 = vmul.f32 %v1909_v63, %v3497_v2 }
 0x594   :  { %v3533_v17 = vadd.f32 %v1596_v31, %v3510_v6 }
 0x595   :  { %v1598_v54 = vpop.f32.mrf.mxu0  ;;  %v1835_v58 = vmul.f32 %v1790_v4, %v3508_v62  ;;  %v1953_v21 = vmul.f32 %v1910_v1, %v3508_v62  ;;  %v1807_v60 = vadd.f32 %v1790_v4, %v1789_v42  ;;  %v3548_v25 = vadd.f32 %v1910_v1, %v1909_v63 }
 0x596   :  { %v3542_v24 = vadd.f32 %v1598_v54, %v3510_v6  ;;  %v1794_v38 = vmul.f32 %v3490_v30, %v3533_v17  ;;  %v1914_v45 = vmul.f32 %v3492_v44, %v3533_v17 }
 0x597   :  { %v1667_v35 = vpop.f32.mrf.mxu1  ;;  %v3559_v39 = vadd.f32 %v1835_v58, %v1834_v20  ;;  %v3561_v46 = vadd.f32 %v1953_v21, %v1952_v10 }
 0x598   :  { %v3553_v13 = vadd.f32 %v1667_v35, %v3474_v29  ;;  %v1795_v18 = vmul.f32 %v3478_v34, %v3542_v24  ;;  %v1814_v47 = vsel %vm118_vm0, %v1794_v38, 0.0  ;;  %v1839_v59 = vmul.f32 %v1794_v38, %v3533_v17 }
 0x599   :  { %v1669_v55 = vpop.f32.mrf.mxu1  ;;  %v3565_v48 = vmul.f32 %v3483_v15, %v3542_v24  ;;  %v3568_v53 = vsel %vm118_vm0, %v1914_v45, 0.0  ;;  %v3587_v63 = vmul.f32 %v1914_v45, %v3533_v17 }
 0x59a   :  { %v3571_v19 = vadd.f32 %v1669_v55, %v3474_v29  ;;  %v1786_v33 = vmul.f32 %v3501_v37, %v3553_v13  ;;  %v1906_v11 = vmul.f32 %v3521_v61, %v3553_v13  ;;  %v1815_v27 = vsel %vm118_vm0, %v1795_v18, 0.0 }
 0x59b   :  { %v1750_v49 = vpop.f32.mrf.mxu0  ;;  %v1673_v7 = vpop.f32.mrf.mxu1  ;;  %v3578_v16 = vadd.f32 %v1815_v27, %v1814_v47  ;;  %v3581_v43 = vmul.f32 %v1795_v18, %v3542_v24  ;;  %v3584_v42 = vsel %vm118_vm0, %v1839_v59, 0.0 }
 0x59c   :  { %v3590_v28 = vadd.f32 %v1750_v49, %v3474_v29  ;;  %v3593_v26 = vadd.f32 %v1673_v7, %v3488_v12  ;;  %v1787_v31 = vmul.f32 %v3512_v56, %v3571_v19  ;;  %v1800_v4 = vadd.f32 %v1799_v32, %v1786_v33 }
 0x59d   :  { %v2308_v52 = vpop.f32.mrf.mxu0  ;;  %v1675_v1 = vpop.f32.mrf.mxu1  ;;  %v1831_v57 = vmul.f32 %v1786_v33, %v3553_v13  ;;  %v1907_v36 = vmul.f32 %v3523_v9, %v3571_v19  ;;  %v1920_v54 = vadd.f32 %v1919_v40, %v1906_v11  ;;  %v1949_v20 = vmul.f32 %v1906_v11, %v3553_v13 }
 0x59e   :  { %v3602_v29 = vadd.f32 %v1675_v1, %v3488_v12  ;;  %v1788_v58 = vmul.f32 %v3518_v51, %v3590_v28  ;;  %v1801_v10 = vadd.f32 %v1800_v4, %v1787_v31  ;;  %v1832_v21 = vmul.f32 %v1787_v31, %v3571_v19 }
 0x59f   :  { %v1755_v32 = vpop.f32.mrf.mxu0  ;;  %v1679_v38 = vpop.f32.mrf.mxu1  ;;  %v1845_v35 = vadd.f32 %v1844_v22, %v1831_v57  ;;  %v1908_v45 = vmul.f32 %v3525_v23, %v3590_v28  ;;  %v1921_v18 = vadd.f32 %v1920_v54, %v1907_v36  ;;  %v1791_v40 = vmul.f32 %v3501_v37, %v3593_v26 }
 0x5a0   :  { %v3612_v47 = vadd.f32 %v1755_v32, %v3488_v12  ;;  %v3615_v59 = vadd.f32 %v1679_v38, %v3510_v6  ;;  %v1803_v55 = vsel %vm1802_vm9, %v1788_v58, 0.0  ;;  %v1833_v33 = vmul.f32 %v1788_v58, %v3590_v28 }
 0x5a1   :  { %v1681_v11 = vpop.f32.mrf.mxu1  ;;  %v2311_v27 = vpop.f32.mrf.mxu0  ;;  %v1804_v22 = vadd.f32 %v1803_v55, %v1801_v10  ;;  %v1846_v49 = vadd.f32 %v1845_v35, %v1832_v21  ;;  %v1922_v7 = vsel %vm1802_vm9, %v1908_v45, 0.0  ;;  %v1792_v31 = vmul.f32 %v3512_v56, %v3602_v29 }
 0x5a2   :  { %v3623_v4 = vadd.f32 %v1681_v11, %v3510_v6  ;;  %v1847_v12 = vsel %vm1802_vm9, %v1833_v33, 0.0  ;;  %v1923_v52 = vadd.f32 %v1922_v7, %v1921_v18  ;;  %v1793_v1 = vmul.f32 %v3518_v51, %v3612_v47 }
 0x5a3   :  { %1805 = vadd.xlane.f32.xlu0 %v1804_v22  ;;  %v1760_v57 = vpop.f32.mrf.mxu0  ;;  %v1848_v54 = vadd.f32 %v1847_v12, %v1846_v49  ;;  %v1808_v58 = vadd.f32 %v1807_v60, %v1791_v40  ;;  %v1950_v10 = vmul.f32 %v1907_v36, %v3571_v19  ;;  %v1951_v21 = vmul.f32 %v1908_v45, %v3590_v28 }
 0x5a4   :  { %v3631_v32 = vadd.f32 %v1760_v57, %v3510_v6  ;;  %v1810_v38 = vsel %vm1802_vm9, %v1793_v1, 0.0  ;;  %v1963_v35 = vadd.f32 %v3546_v41, %v1949_v20  ;;  %v1911_v18 = vmul.f32 %v3521_v61, %v3593_v26 }
 0x5a5   :  { %1849 = vadd.xlane.f32.xlu1 %v1848_v54  ;;  %v1809_v55 = vadd.f32 %v1808_v58, %v1792_v31  ;;  %v1965_v33 = vsel %vm1802_vm9, %v1951_v21, 0.0  ;;  %v2314_v11 = vpop.f32.mrf.mxu0  ;;  %v1912_v60 = vmul.f32 %v3523_v9, %v3602_v29  ;;  %v1913_v36 = vmul.f32 %v3525_v23, %v3612_v47 }
 0x5a6   :  { %v1964_v6 = vadd.f32 %v1963_v35, %v1950_v10  ;;  %v1927_v45 = vadd.f32 %v3548_v25, %v1911_v18  ;;  %v1836_v27 = vmul.f32 %v1791_v40, %v3593_v26  ;;  %v1837_v41 = vmul.f32 %v1792_v31, %v3602_v29 }
 0x5a7   :  { %1924 = vadd.xlane.f32.xlu0 %v1923_v52  ;;  %v1811_v20 = vadd.f32 %v1810_v38, %v1809_v55  ;;  %v1929_v22 = vsel %vm1802_vm9, %v1913_v36, 0.0  ;;  %v1838_v49 = vmul.f32 %v1793_v1, %v3612_v47  ;;  %v1954_v7 = vmul.f32 %v1911_v18, %v3593_v26 }
 0x5a8   :  { %v1966_v12 = vadd.f32 %v1965_v33, %v1964_v6  ;;  %v1928_v57 = vadd.f32 %v1927_v45, %v1912_v60  ;;  %v1852_v54 = vadd.f32 %v3559_v39, %v1836_v27  ;;  %v1955_v58 = vmul.f32 %v1912_v60, %v3602_v29 }
 0x5a9   :  { %1812 = vadd.xlane.f32.xlu1 %v1811_v20  ;;  %v1854_v25 = vsel %vm1802_vm9, %v1838_v49, 0.0  ;;  %v1956_v40 = vmul.f32 %v1913_v36, %v3612_v47  ;;  %v1970_v31 = vadd.f32 %v3561_v46, %v1954_v7  ;;  %v1796_v52 = vmul.f32 %v3501_v37, %v3615_v59 }
 0x5aa   :  { %v1853_v10 = vadd.f32 %v1852_v54, %v1837_v41  ;;  %v1797_v1 = vmul.f32 %v3512_v56, %v3623_v4  ;;  %v1798_v21 = vmul.f32 %v3518_v51, %v3631_v32  ;;  %v1934_v39 = vsel %vm118_vm0, %v3565_v48, 0.0 }
 0x5ab   :  { %1967 = vadd.xlane.f32.xlu0 %v1966_v12  ;;  %v1930_v38 = vadd.f32 %v1929_v22, %v1928_v57  ;;  %v1971_v35 = vadd.f32 %v1970_v31, %v1955_v58  ;;  %v1817_v18 = vsel %vm118_vm0, %v1796_v52, 0.0  ;;  %v1841_v46 = vmul.f32 %v1796_v52, %v3615_v59 }
 0x5ac   :  { %v1855_v55 = vadd.f32 %v1854_v25, %v1853_v10  ;;  %v1972_v33 = vsel %vm1802_vm9, %v1956_v40, 0.0  ;;  %v1818_v11 = vadd.f32 %v1817_v18, %v3578_v16  ;;  %v1819_v60 = vsel %vm118_vm0, %v1797_v1, 0.0 }
 0x5ad   :  { %1931 = vadd.xlane.f32.xlu1 %v1930_v38  ;;  %v1822_v36 = vsel %vm1821_vm10, %v1798_v21, 0.0  ;;  %v1842_v6 = vmul.f32 %v1797_v1, %v3623_v4  ;;  %v1843_v45 = vmul.f32 %v1798_v21, %v3631_v32  ;;  %v1859_v27 = vsel %vm118_vm0, %v3581_v43, 0.0 }
 0x5ae   :  { %v1820_v41 = vadd.f32 %v1819_v60, %v1818_v11  ;;  %v1860_v20 = vadd.f32 %v1859_v27, %v3584_v42  ;;  %v1861_v22 = vsel %vm118_vm0, %v1841_v46, 0.0  ;;  %v1916_v16 = vmul.f32 %v3521_v61, %v3615_v59 }
 0x5af   :  { %1856 = vadd.xlane.f32.xlu0 %v1855_v55  ;;  %v1973_v49 = vadd.f32 %v1972_v33, %v1971_v35  ;;  %v1863_v7 = vsel %vm118_vm0, %v1842_v6, 0.0  ;;  %v1917_v12 = vmul.f32 %v3523_v9, %v3623_v4  ;;  %v1918_v57 = vmul.f32 %v3525_v23, %v3631_v32 }
 0x5b0   :  { %v1862_v54 = vadd.f32 %v1861_v22, %v1860_v20  ;;  %v1865_v43 = vsel %vm1821_vm10, %v1843_v45, 0.0  ;;  %v1935_v42 = vadd.f32 %v1934_v39, %v3568_v53  ;;  %v1936_v58 = vsel %vm118_vm0, %v1916_v16, 0.0 }
 0x5b1   :  { %1974 = vadd.xlane.f32.xlu1 %v1973_v49  ;;  %v1823_v25 = vadd.f32 %v1822_v36, %v1820_v41  ;;  %v1938_v40 = vsel %vm118_vm0, %v1917_v12, 0.0  ;;  %v1958_v31 = vmul.f32 %v3565_v48, %v3542_v24  ;;  %v1959_v52 = vmul.f32 %v1916_v16, %v3615_v59 }
 0x5b2   :  { %v1864_v10 = vadd.f32 %v1863_v7, %v1862_v54  ;;  %v1937_v1 = vadd.f32 %v1936_v58, %v1935_v42  ;;  %v1940_v21 = vsel %vm1821_vm10, %v1918_v57, 0.0  ;;  %v1960_v38 = vmul.f32 %v1917_v12, %v3623_v4 }
 0x5b3   :  { %1824 = vadd.xlane.f32.xlu0 %v1823_v25  ;;  %v1961_v53 = vmul.f32 %v1918_v57, %v3631_v32  ;;  %v1976_v39 = vsel %vm118_vm0, %v3587_v63, 0.0  ;;  %v1977_v35 = vsel %vm118_vm0, %v1958_v31, 0.0  ;;  %v1979_v18 = vsel %vm118_vm0, %v1959_v52, 0.0 }
 0x5b4   :  { %v1866_v46 = vadd.f32 %v1865_v43, %v1864_v10  ;;  %v1939_v48 = vadd.f32 %v1938_v40, %v1937_v1  ;;  %v1978_v55 = vadd.f32 %v1977_v35, %v1976_v39  ;;  %v1981_v33 = vsel %vm118_vm0, %v1960_v38, 0.0 }
 0x5b5   :  { %v1983_v36 = vsel %vm1821_vm10, %v1961_v53, 0.0 }
 0x5b6   :  { %1867 = vadd.xlane.f32.xlu1 %v1866_v46  ;;  %v1941_v11 = vadd.f32 %v1940_v21, %v1939_v48  ;;  %v1980_v60 = vadd.f32 %v1979_v18, %v1978_v55 }
 0x5b8   :  { %1942 = vadd.xlane.f32.xlu0 %v1941_v11  ;;  %v1982_v6 = vadd.f32 %v1981_v33, %v1980_v60 }
 0x5ba   :  { %v1984_v45 = vadd.f32 %v1983_v36, %v1982_v6 }
 0x5bc   :  { %1985 = vadd.xlane.f32.xlu0 %v1984_v45 }
 0x5c7   :  { %2123 = vperm.xlu1 %2344, %v3383_v8  }
 0x5cb   :  { %2131 = vperm.xlu1 %2344, %v3388_v3  }
 0x5cf   :  { %2346 = vset.pattern.permute.xlu1 %v3911_v50 }
 0x5d0   :  { %2150 = vperm.xlu1 %2346, %v3383_v8  }
 0x5d2   :  { %2127 = vperm.xlu0 %2345, %v3395_v5  }
 0x5d4   :  { %2154 = vperm.xlu1 %2346, %v3395_v5  }
 0x5d6   :  { %2347 = vset.pattern.permute.xlu0 %v3911_v50 }
 0x5d8   :  { %2158 = vperm.xlu1 %2346, %v3388_v3  }
 0x62c   :  { %v1806_v63 = vpop.xlane.xlu0 %1805 }
 0x62d   :  { %v1826_v27 = vmul.f32 0.0061728396, %v1806_v63 }
 0x62e   :  { %v1850_v41 = vpop.xlane.xlu1 %1849 }
 0x62f   :  { %v1872_v20 = vmul.f32 %v1826_v27, %v1826_v27  ;;  %v1869_v22 = vmul.f32 0.0061728396, %v1850_v41  ;;  %v2002_v40 = vmul.f32 %v1826_v27, %v3490_v30  ;;  %v2003_v52 = vmul.f32 %v1826_v27, %v3478_v34 }
 0x630   :  { %v1925_v16 = vpop.xlane.xlu0 %1924  ;;  %v2004_v10 = vmul.f32 %v1826_v27, %v3501_v37  ;;  %v2005_v1 = vmul.f32 %v1826_v27, %v3512_v56  ;;  %v2006_v21 = vmul.f32 %v1826_v27, %v3518_v51 }
 0x631   :  { %v1875_v49 = vsub.f32 %v1869_v22, %v1872_v20  ;;  %v1944_v7 = vmul.f32 0.0061728396, %v1925_v16 }
 0x632   :  { %v1813_v12 = vpop.xlane.xlu1 %1812 }
 0x633   :  { %v1878_v57 = vadd.f32 1e-05, %v1875_v49  ;;  %v1827_v54 = vmul.f32 0.0061728396, %v1813_v12  ;;  %v2017_v8 = vmul.f32 %v1944_v7, %v3492_v44  ;;  %v2018_v5 = vmul.f32 %v1944_v7, %v3483_v15 }
 0x634   :  { %v1968_v43 = vpop.xlane.xlu0 %1967  ;;  %v2019_v50 = vmul.f32 %v1944_v7, %v3521_v61  ;;  %v2020_v3 = vmul.f32 %v1944_v7, %v3523_v9  ;;  %v2021_v42 = vmul.f32 %v1944_v7, %v3525_v23  ;;  %v1990_v58 = vmul.f32 %v1944_v7, %v1944_v7 }
 0x635   :  { %2364 = vrsqrt.f32 %v1878_v57  ;;  %v1987_v25 = vmul.f32 0.0061728396, %v1968_v43  ;;  %v1873_v39 = vmul.f32 %v1827_v54, %v1827_v54  ;;  %v3714_v35 = vadd.f32 %v2017_v8, %v2002_v40 }
 0x636   :  { %v1932_v31 = vpop.xlane.xlu1 %1931  ;;  %v3716_v46 = vadd.f32 %v2018_v5, %v2003_v52  ;;  %v3718_v48 = vadd.f32 %v2019_v50, %v2004_v10  ;;  %v3720_v55 = vadd.f32 %v2020_v3, %v2005_v1  ;;  %v3722_v33 = vadd.f32 %v2021_v42, %v2006_v21 }
 0x637   :  { %v1993_v38 = vsub.f32 %v1987_v25, %v1990_v58  ;;  %v1945_v53 = vmul.f32 0.0061728396, %v1932_v31  ;;  %v2007_v6 = vmul.f32 %v1827_v54, %v3490_v30  ;;  %v2008_v63 = vmul.f32 %v1827_v54, %v3478_v34 }
 0x638   :  { %v1857_v18 = vpop.xlane.xlu0 %1856  ;;  %v2009_v27 = vmul.f32 %v1827_v54, %v3501_v37  ;;  %v2010_v41 = vmul.f32 %v1827_v54, %v3512_v56  ;;  %v2011_v12 = vmul.f32 %v1827_v54, %v3518_v51  ;;  %v2092_v21 = vsub.f32 %v3486_v0, %v3714_v35 }
 0x639   :  { %v1996_v11 = vadd.f32 1e-05, %v1993_v38  ;;  %v1870_v60 = vmul.f32 0.0061728396, %v1857_v18  ;;  %v1991_v36 = vmul.f32 %v1945_v53, %v1945_v53  ;;  %v2022_v20 = vmul.f32 %v1945_v53, %v3492_v44 }
 0x63a   :  { %v1975_v45 = vpop.xlane.xlu1 %1974  ;;  %v2023_v49 = vmul.f32 %v1945_v53, %v3483_v15  ;;  %v2024_v57 = vmul.f32 %v1945_v53, %v3521_v61  ;;  %v2025_v8 = vmul.f32 %v1945_v53, %v3523_v9  ;;  %v2026_v43 = vmul.f32 %v1945_v53, %v3525_v23 }
 0x63b   :  { %2366 = vrsqrt.f32 %v1996_v11  ;;  %v1876_v22 = vsub.f32 %v1870_v60, %v1873_v39  ;;  %v1988_v16 = vmul.f32 0.0061728396, %v1975_v45  ;;  %v3734_v42 = vadd.f32 %v2022_v20, %v2007_v6 }
 0x63c   :  { %v1825_v7 = vpop.xlane.xlu0 %1824  ;;  %v3736_v58 = vadd.f32 %v2023_v49, %v2008_v63  ;;  %v3738_v25 = vadd.f32 %v2024_v57, %v2009_v27  ;;  %v3740_v40 = vadd.f32 %v2025_v8, %v2010_v41  ;;  %v3742_v10 = vadd.f32 %v2026_v43, %v2011_v12 }
 0x63d   :  { %v1879_v5 = vadd.f32 1e-05, %v1876_v22  ;;  %v1994_v50 = vsub.f32 %v1988_v16, %v1991_v36  ;;  %v1828_v3 = vmul.f32 0.0061728396, %v1825_v7  ;;  %v2093_v38 = vsub.f32 %v3481_v14, %v3716_v46 }
 0x63e   :  { %v2094_v53 = vsub.f32 %v3553_v13, %v3718_v48  ;;  %v2095_v18 = vsub.f32 %v3571_v19, %v3720_v55  ;;  %v2096_v11 = vsub.f32 %v3590_v28, %v3722_v33 }
 0x63f   :  { %2368 = vrsqrt.f32 %v1879_v5  ;;  %v1997_v31 = vadd.f32 1e-05, %v1994_v50  ;;  %v1874_v54 = vmul.f32 %v1828_v3, %v1828_v3  ;;  %v1868_v52 = vpop.xlane.xlu1 %1867  ;;  %v2012_v28 = vmul.f32 %v1828_v3, %v3490_v30 }
 0x640   :  { %v1871_v1 = vmul.f32 0.0061728396, %v1868_v52  ;;  %v2013_v48 = vmul.f32 %v1828_v3, %v3478_v34  ;;  %v2014_v33 = vmul.f32 %v1828_v3, %v3501_v37  ;;  %v2015_v45 = vmul.f32 %v1828_v3, %v3512_v56 }
 0x641   :  { %2370 = vrsqrt.f32 %v1997_v31  ;;  %v1943_v39 = vpop.xlane.xlu0 %1942  ;;  %v2016_v22 = vmul.f32 %v1828_v3, %v3518_v51 }
 0x642   :  { %v2365_v36 = vpop.eup %2364  ;;  %v1877_v6 = vsub.f32 %v1871_v1, %v1874_v54  ;;  %v1946_v0 = vmul.f32 0.0061728396, %v1943_v39 }
 0x643   :  { %v2124_v35 = vpop.permute.xlu1 %2123  ;;  %v2047_v41 = vmul.f32 %v2365_v36, %v3490_v30  ;;  %v2048_v20 = vmul.f32 %v2365_v36, %v3478_v34  ;;  %v2049_v8 = vmul.f32 %v2365_v36, %v3501_v37  ;;  %v2050_v43 = vmul.f32 %v2365_v36, %v3512_v56 }
 0x644   :  { %v1880_v55 = vadd.f32 1e-05, %v1877_v6  ;;  %v2027_v63 = vmul.f32 %v1946_v0, %v3492_v44  ;;  %v2028_v16 = vmul.f32 %v1946_v0, %v3483_v15  ;;  %v1992_v49 = vmul.f32 %v1946_v0, %v1946_v0 }
 0x645   :  { %v1986_v27 = vpop.xlane.xlu0 %1985  ;;  %v2029_v12 = vmul.f32 %v1946_v0, %v3521_v61  ;;  %v2030_v57 = vmul.f32 %v1946_v0, %v3523_v9  ;;  %v2051_v5 = vmul.f32 %v2365_v36, %v3518_v51  ;;  %v2031_v3 = vmul.f32 %v1946_v0, %v3525_v23 }
 0x646   :  { %v1989_v7 = vmul.f32 0.0061728396, %v1986_v27  ;;  %2372 = vrsqrt.f32 %v1880_v55  ;;  %v3781_v52 = vadd.f32 %v2027_v63, %v2012_v28  ;;  %v3783_v1 = vadd.f32 %v2028_v16, %v2013_v48 }
 0x647   :  { %v3778_v54 = vpop.permute.xlu1 %2131  ;;  %v3794_v13 = vadd.f32 %v2031_v3, %v2016_v22 }
 0x648   :  { %v2367_v50 = vpop.eup %2366  ;;  %v1995_v31 = vsub.f32 %v1989_v7, %v1992_v49  ;;  %3913 = vst [vmem:[#allocation12_spill] sm:$0xff] %v3778_v54  ;;  %v3790_v49 = vadd.f32 %v2029_v12, %v2014_v33  ;;  %v3792_v7 = vadd.f32 %v2030_v57, %v2015_v45  ;;  %v2102_v14 = vsub.f32 %v3533_v17, %v3781_v52 }
 0x649   :  { %v2062_v39 = vmul.f32 %v2367_v50, %v3492_v44  ;;  %v2063_v6 = vmul.f32 %v2367_v50, %v3483_v15  ;;  %v2064_v55 = vmul.f32 %v2367_v50, %v3521_v61  ;;  %v2065_v27 = vmul.f32 %v2367_v50, %v3523_v9 }
 0x64a   :  { %v1998_v19 = vadd.f32 1e-05, %v1995_v31  ;;  %v2066_v36 = vmul.f32 %v2367_v50, %v3525_v23 }
 0x64b   :  { %v2077_v0 = vadd.f32 %v2062_v39, %v2047_v41  ;;  %v2078_v28 = vadd.f32 %v2063_v6, %v2048_v20  ;;  %v2079_v63 = vadd.f32 %v2064_v55, %v2049_v8  ;;  %v2080_v48 = vadd.f32 %v2065_v27, %v2050_v43  ;;  %v2151_v45 = vpop.permute.xlu1 %2150 }
 0x64c   :  { %v2369_v16 = vpop.eup %2368  ;;  %2374 = vrsqrt.f32 %v1998_v19  ;;  %v2081_v46 = vadd.f32 %v2066_v36, %v2051_v5 }
 0x64d   :  { %v2107_v60 = vmul.f32 %v2092_v21, %v2077_v0  ;;  %v2108_v31 = vmul.f32 %v2093_v38, %v2078_v28  ;;  %v2109_v54 = vmul.f32 %v2094_v53, %v2079_v63  ;;  %v2110_v50 = vmul.f32 %v2095_v18, %v2080_v48 }
 0x64e   :  { %v2371_v33 = vpop.eup %2370  ;;  %v2111_v12 = vmul.f32 %v2096_v11, %v2081_v46  ;;  %v2052_v41 = vmul.f32 %v2369_v16, %v3490_v30  ;;  %v2053_v20 = vmul.f32 %v2369_v16, %v3478_v34  ;;  %v2054_v57 = vmul.f32 %v2369_v16, %v3501_v37 }
 0x64f   :  { %v2134_v19 = vmul.f32 %v2124_v35, %v2107_v60  ;;  %v2135_v8 = vmul.f32 %v2124_v35, %v2108_v31  ;;  %v2136_v22 = vmul.f32 %v2124_v35, %v2109_v54  ;;  %v2137_v43 = vmul.f32 %v2124_v35, %v2110_v50  ;;  %v2128_v31 = vpop.permute.xlu0 %2127 }
 0x650   :  { %v2138_v5 = vmul.f32 %v2124_v35, %v2111_v12  ;;  %v2055_v3 = vmul.f32 %v2369_v16, %v3512_v56  ;;  %v2056_v21 = vmul.f32 %v2369_v16, %v3518_v51  ;;  %v2067_v38 = vmul.f32 %v2371_v33, %v3492_v44 }
 0x651   :  { %v2161_v53 = vadd.f32 %v2151_v45, %v2134_v19  ;;  %v2162_v18 = vadd.f32 %v2151_v45, %v2135_v8  ;;  %v2163_v11 = vadd.f32 %v2151_v45, %v2136_v22  ;;  %v2164_v46 = vadd.f32 %v2151_v45, %v2137_v43 }
 0x652   :  { %v2165_v39 = vadd.f32 %v2151_v45, %v2138_v5  ;;  %v2068_v6 = vmul.f32 %v2371_v33, %v3483_v15  ;;  %v2069_v55 = vmul.f32 %v2371_v33, %v3521_v61  ;;  %v2070_v60 = vmul.f32 %v2371_v33, %v3523_v9 }
 0x653   :  { %v2176_v54 = vmax.f32 %v2161_v53, 0.0  ;;  %v2177_v27 = vmax.f32 %v2162_v18, 0.0  ;;  %v2178_v35 = vmax.f32 %v2163_v11, 0.0  ;;  %v2179_v36 = vmax.f32 %v2164_v46, 0.0  ;;  %v2373_v0 = vpop.eup %2372 }
 0x654   :  { %v2180_v28 = vmax.f32 %v2165_v39, 0.0  ;;  %v2071_v63 = vmul.f32 %v2371_v33, %v3525_v23  ;;  %v2082_v48 = vadd.f32 %v2067_v38, %v2052_v41  ;;  %v2083_v16 = vadd.f32 %v2068_v6, %v2053_v20 }
 0x655   :  { %2191 = vst [vmem:[%s3905_s8] sm:$0xff] %v2176_v54  ;;  %2192 = vst [vmem:[%s3905_s8 + $0x8] sm:$0xff] %v2177_v27  ;;  %v2084_v50 = vadd.f32 %v2069_v55, %v2054_v57  ;;  %v2085_v33 = vadd.f32 %v2070_v60, %v2055_v3  ;;  %v2103_v12 = vsub.f32 %v3542_v24, %v3783_v1 }
 0x656   :  { %2193 = vst [vmem:[%s3905_s8 + $0x10] sm:$0xff] %v2178_v35  ;;  %2194 = vst [vmem:[%s3905_s8 + $0x18] sm:$0xff] %v2179_v36  ;;  %v2104_v45 = vsub.f32 %v3615_v59, %v3790_v49  ;;  %v2086_v41 = vadd.f32 %v2071_v63, %v2056_v21  ;;  %v3914_v20 = vsub.f32 %v3497_v2, %v3734_v42 }
 0x657   :  { %2195 = vst.msk [vmem:[%s3905_s8 + $0x20] sm:$0xff] %vm1802_vm9, %v2180_v28  ;;  %v3915_v57 = vsub.f32 %v3508_v62, %v3736_v58  ;;  %v2105_v24 = vsub.f32 %v3623_v4, %v3792_v7  ;;  %v3916_v59 = vsub.f32 %v3593_v26, %v3738_v25  ;;  %v3917_v49 = vsub.f32 %v3602_v29, %v3740_v40  ;;  %v2155_v25 = vpop.permute.xlu1 %2154  ;;  %v3919_v28 = vld [vmem:[#allocation12_spill] sm:$0xff] }
 0x658   :  { %v2112_v19 = vmul.f32 %v3914_v20, %v2082_v48  ;;  %v2057_v43 = vmul.f32 %v2373_v0, %v3490_v30  ;;  %v2058_v2 = vmul.f32 %v2373_v0, %v3478_v34  ;;  %v3918_v42 = vsub.f32 %v3612_v47, %v3742_v10 }
 0x659   :  { %v2113_v8 = vmul.f32 %v3915_v57, %v2083_v16  ;;  %v2114_v1 = vmul.f32 %v3916_v59, %v2084_v50  ;;  %v2115_v22 = vmul.f32 %v3917_v49, %v2085_v33  ;;  %v2059_v4 = vmul.f32 %v2373_v0, %v3501_v37  ;;  %v2375_v7 = vpop.eup %2374 }
 0x65a   :  { %v2116_v62 = vmul.f32 %v3918_v42, %v2086_v41  ;;  %v2139_v58 = vmul.f32 %v2128_v31, %v2112_v19  ;;  %v2060_v21 = vmul.f32 %v2373_v0, %v3512_v56  ;;  %v2061_v29 = vmul.f32 %v2373_v0, %v3518_v51 }
 0x65b   :  { %v2140_v5 = vmul.f32 %v2128_v31, %v2113_v8  ;;  %v2141_v3 = vmul.f32 %v2128_v31, %v2114_v1  ;;  %v2142_v26 = vmul.f32 %v2128_v31, %v2115_v22  ;;  %v2072_v34 = vmul.f32 %v2375_v7, %v3492_v44 }
 0x65c   :  { %v2143_v40 = vmul.f32 %v2128_v31, %v2116_v62  ;;  %v2166_v30 = vadd.f32 %v2155_v25, %v2139_v58  ;;  %v2073_v10 = vmul.f32 %v2375_v7, %v3483_v15  ;;  %v2074_v18 = vmul.f32 %v2375_v7, %v3521_v61 }
 0x65d   :  { %v2167_v38 = vadd.f32 %v2155_v25, %v2140_v5  ;;  %v2168_v53 = vadd.f32 %v2155_v25, %v2141_v3  ;;  %v2169_v47 = vadd.f32 %v2155_v25, %v2142_v26  ;;  %v2075_v39 = vmul.f32 %v2375_v7, %v3523_v9 }
 0x65e   :  { %v2170_v37 = vadd.f32 %v2155_v25, %v2143_v40  ;;  %v2181_v11 = vmax.f32 %v2166_v30, 0.0  ;;  %v2076_v51 = vmul.f32 %v2375_v7, %v3525_v23  ;;  %v2087_v55 = vadd.f32 %v2072_v34, %v2057_v43 }
 0x65f   :  { %v2182_v46 = vmax.f32 %v2167_v38, 0.0  ;;  %v2183_v6 = vmax.f32 %v2168_v53, 0.0  ;;  %v2184_v56 = vmax.f32 %v2169_v47, 0.0  ;;  %v2088_v15 = vadd.f32 %v2073_v10, %v2058_v2 }
 0x660   :  { %v2185_v60 = vmax.f32 %v2170_v37, 0.0  ;;  %2196 = vst [vmem:[%s3905_s8 + $0x28] sm:$0xff] %v2181_v11  ;;  %v2089_v44 = vadd.f32 %v2074_v18, %v2059_v4  ;;  %v2090_v61 = vadd.f32 %v2075_v39, %v2060_v21  ;;  %v2091_v9 = vadd.f32 %v2076_v51, %v2061_v29 }
 0x661   :  { %2197 = vst [vmem:[%s3905_s8 + $0x30] sm:$0xff] %v2182_v46  ;;  %2198 = vst [vmem:[%s3905_s8 + $0x38] sm:$0xff] %v2183_v6  ;;  %v2106_v23 = vsub.f32 %v3631_v32, %v3794_v13  ;;  %v2117_v54 = vmul.f32 %v2102_v14, %v2087_v55  ;;  %v2118_v27 = vmul.f32 %v2103_v12, %v2088_v15  ;;  %v2159_v13 = vpop.permute.xlu1 %2158 }
 0x662   :  { %2199 = vst [vmem:[%s3905_s8 + $0x40] sm:$0xff] %v2184_v56  ;;  %2200 = vst.msk [vmem:[%s3905_s8 + $0x48] sm:$0xff] %vm1802_vm9, %v2185_v60  ;;  %v2119_v35 = vmul.f32 %v2104_v45, %v2089_v44  ;;  %v2120_v36 = vmul.f32 %v2105_v24, %v2090_v61 }
 0x663   :  { %v2121_v0 = vmul.f32 %v2106_v23, %v2091_v9  ;;  %v2144_v63 = vmul.f32 %v3919_v28, %v2117_v54  ;;  %v2145_v48 = vmul.f32 %v3919_v28, %v2118_v27 }
 0x664   :  { %v2146_v16 = vmul.f32 %v3919_v28, %v2119_v35  ;;  %v2147_v32 = vmul.f32 %v3919_v28, %v2120_v36 }
 0x665   :  { %v2148_v17 = vmul.f32 %v3919_v28, %v2121_v0  ;;  %v2171_v14 = vadd.f32 %v2159_v13, %v2144_v63  ;;  %v2172_v52 = vadd.f32 %v2159_v13, %v2145_v48 }
 0x666   :  { %v2173_v31 = vadd.f32 %v2159_v13, %v2146_v16  ;;  %v2174_v50 = vadd.f32 %v2159_v13, %v2147_v32 }
 0x667   :  { %v2175_v33 = vadd.f32 %v2159_v13, %v2148_v17  ;;  %v2186_v12 = vmax.f32 %v2171_v14, 0.0  ;;  %v2187_v45 = vmax.f32 %v2172_v52, 0.0 }
 0x668   :  { %v2188_v41 = vmax.f32 %v2173_v31, 0.0  ;;  %v2189_v20 = vmax.f32 %v2174_v50, 0.0 }
 0x669   :  { %v2190_v19 = vmax.f32 %v2175_v33, 0.0  ;;  %2201 = vst [vmem:[%s3905_s8 + $0x50] sm:$0xf] %v2186_v12  ;;  %2202 = vst [vmem:[%s3905_s8 + $0x58] sm:$0xf] %v2187_v45 }
 0x66a   :  { %2203 = vst [vmem:[%s3905_s8 + $0x60] sm:$0xf] %v2188_v41  ;;  %2204 = vst [vmem:[%s3905_s8 + $0x68] sm:$0xf] %v2189_v20 }
 0x66b   :  { %2205 = vst.msk [vmem:[%s3905_s8 + $0x70] sm:$0xf] %vm1821_vm10, %v2190_v19 }
 0x66c   :  { %2210 = vsyncpa [#allocation3], 1 }
 0x66d   :  { %2211 = vsyncpa [#allocation5], 1 }
 0x66e   :  { %2212 = vsyncpa [#allocation8], 1 }

// kernel: custom-call.10
= control target key start
LH: loop header
LB: loop body
LE: loop exit
PB: predicated region body
PF: predicated region fallthrough
CT: control target
= control target key end

     0   :  { %s6_s0 = inlined_call_operand.vmem [shape: f32[10,2,16], index: 0, kind: output, shape index: {}]  }

// kernel: custom-call.11
= control target key start
LH: loop header
LB: loop body
LE: loop exit
PB: predicated region body
PF: predicated region fallthrough
CT: control target
= control target key end

     0   :  { %s6_s0 = inlined_call_operand.vmem [shape: f32[10,1,16], index: 0, kind: output, shape index: {}]  }

// kernel: neg.29
= control target key start
LH: loop header
LB: loop body
LE: loop exit
PB: predicated region body
PF: predicated region fallthrough
CT: control target
= control target key end

     0   :  { %s40_s0 = inlined_call_operand.vmem [shape: f32[10,2], index: 0, kind: input, shape index: {}]   ;;  %s41_s1 = inlined_call_operand.vmem [shape: f32[10,2], index: 1, kind: output, shape index: {}]  }
   0x1   :  { %v2_v0 = vld [vmem:[%s40_s0] sm:$0xff]  ;;  %v16_v1 = vld [vmem:[%s40_s0 + $0x8] sm:$0xff] }
   0x2   :  { %v5_v2 = vxor.u32 2147483648, %v2_v0  ;;  %v12_v3 = vxor.u32 2147483648, %v16_v1 }
   0x4   :  { %7 = vst [vmem:[%s41_s1] sm:$0xff] %v5_v2  ;;  %17 = vst [vmem:[%s41_s1 + $0x8] sm:$0xff] %v12_v3 }

// kernel: net_forward.3
= control target key start
LH: loop header
LB: loop body
LE: loop exit
PB: predicated region body
PF: predicated region fallthrough
CT: control target
= control target key end

     0   :  { %vm911_vm0 = vcmask 1043456   ;;  %vm908_vm1 = vcmask 687104   ;;  %vm1948_vm2 = vcmask 125952   ;;  %vm2275_vm3 = vcmask 130048   ;;  %s5702_s2 = inlined_call_operand.vmem [shape: f32[1620,400], index: 2, kind: input, shape index: {}]   ;;  %s5703_s0 = inlined_call_operand.vmem [shape: f32[4,1620], index: 0, kind: input, shape index: {}]   ;;  %s5704_s1 = inlined_call_operand.vmem [shape: f32[4,2], index: 1, kind: input, shape index: {}]   ;;  %s5705_s3 = inlined_call_operand.vmem [shape: f32[3,400], index: 3, kind: input, shape index: {}]   ;;  %s5706_s4 = inlined_call_operand.vmem [shape: f32[400,50], index: 4, kind: input, shape index: {}]   ;;  %s5707_s6 = inlined_call_operand.vmem [shape: f32[50,16], index: 6, kind: input, shape index: {}]   ;;  %s5708_s5 = inlined_call_operand.vmem [shape: f32[3,50], index: 5, kind: input, shape index: {}]   ;;  %s5709_s7 = inlined_call_operand.vmem [shape: f32[3,16], index: 7, kind: input, shape index: {}]   ;;  %s5710_s8 = inlined_call_operand.vmem [shape: f32[4,16], index: 8, kind: output, shape index: {}]  }
   0x1   :  { %v98_v0 = vld [vmem:[%s5702_s2 + $0x1e8] sm:$0xff]  ;;  %v97_v2 = vld [vmem:[%s5702_s2 + $0x1e0] sm:$0xff]  ;;  %vm2499_vm4 = vcmask 1041408   ;;  %vm2756_vm5 = vmmov 0   ;;  %vm2420_vm6 = vcmask 404480   ;;  %vm2495_vm7 = vcmask 408576  }
   0x2   :  { %v226_v1 = vld [vmem:[%s5702_s2 + $0x5e8] sm:$0xff]  ;;  %924 = vmatprep.subr.mxu0 %v98_v0  ;;  %v225_v3 = vld [vmem:[%s5702_s2 + $0x5e0] sm:$0xff] }
   0x3   :  { %995 = vmatprep.subr.mxu1 %v226_v1  ;;  %v94_v4 = vld [vmem:[%s5702_s2 + $0x1c8] sm:$0xff]  ;;  %925 = vmatpush1.msra.mxu0 %v97_v2  ;;  %v93_v6 = vld [vmem:[%s5702_s2 + $0x1c0] sm:$0xff] }
   0x4   :  { %v222_v5 = vld [vmem:[%s5702_s2 + $0x5c8] sm:$0xff]  ;;  %996 = vmatpush1.msra.mxu1 %v225_v3  ;;  %v221_v7 = vld [vmem:[%s5702_s2 + $0x5c0] sm:$0xff]  ;;  %926 = vmatprep.subr.mxu0 %v94_v4 }
   0x5   :  { %v90_v8 = vld [vmem:[%s5702_s2 + $0x1a8] sm:$0xff]  ;;  %997 = vmatprep.subr.mxu1 %v222_v5  ;;  %v89_v10 = vld [vmem:[%s5702_s2 + $0x1a0] sm:$0xff]  ;;  %927 = vmatpush1.msra.mxu0 %v93_v6 }
   0x6   :  { %v218_v9 = vld [vmem:[%s5702_s2 + $0x5a8] sm:$0xff]  ;;  %v217_v11 = vld [vmem:[%s5702_s2 + $0x5a0] sm:$0xff]  ;;  %998 = vmatpush1.msra.mxu1 %v221_v7  ;;  %928 = vmatprep.subr.mxu0 %v90_v8 }
   0x7   :  { %v86_v12 = vld [vmem:[%s5702_s2 + $0x188] sm:$0xff]  ;;  %999 = vmatprep.subr.mxu1 %v218_v9  ;;  %v85_v14 = vld [vmem:[%s5702_s2 + $0x180] sm:$0xff]  ;;  %929 = vmatpush1.msra.mxu0 %v89_v10 }
   0x8   :  { %v214_v13 = vld [vmem:[%s5702_s2 + $0x588] sm:$0xff]  ;;  %v213_v15 = vld [vmem:[%s5702_s2 + $0x580] sm:$0xff]  ;;  %1000 = vmatpush1.msra.mxu1 %v217_v11  ;;  %930 = vmatprep.subr.mxu0 %v86_v12 }
   0x9   :  { %v82_v16 = vld [vmem:[%s5702_s2 + $0x168] sm:$0xff]  ;;  %1001 = vmatprep.subr.mxu1 %v214_v13  ;;  %v81_v18 = vld [vmem:[%s5702_s2 + $0x160] sm:$0xff]  ;;  %931 = vmatpush1.msra.mxu0 %v85_v14 }
   0xa   :  { %v210_v17 = vld [vmem:[%s5702_s2 + $0x568] sm:$0xff]  ;;  %v209_v19 = vld [vmem:[%s5702_s2 + $0x560] sm:$0xff]  ;;  %1002 = vmatpush1.msra.mxu1 %v213_v15  ;;  %932 = vmatprep.subr.mxu0 %v82_v16 }
   0xb   :  { %v78_v20 = vld [vmem:[%s5702_s2 + $0x148] sm:$0xff]  ;;  %1003 = vmatprep.subr.mxu1 %v210_v17  ;;  %v77_v22 = vld [vmem:[%s5702_s2 + $0x140] sm:$0xff]  ;;  %933 = vmatpush1.msra.mxu0 %v81_v18 }
   0xc   :  { %v206_v21 = vld [vmem:[%s5702_s2 + $0x548] sm:$0xff]  ;;  %v205_v23 = vld [vmem:[%s5702_s2 + $0x540] sm:$0xff]  ;;  %1004 = vmatpush1.msra.mxu1 %v209_v19  ;;  %934 = vmatprep.subr.mxu0 %v78_v20 }
   0xd   :  { %v74_v24 = vld [vmem:[%s5702_s2 + $0x128] sm:$0xff]  ;;  %1005 = vmatprep.subr.mxu1 %v206_v21  ;;  %v73_v26 = vld [vmem:[%s5702_s2 + $0x120] sm:$0xff]  ;;  %935 = vmatpush1.msra.mxu0 %v77_v22 }
   0xe   :  { %v202_v25 = vld [vmem:[%s5702_s2 + $0x528] sm:$0xff]  ;;  %v201_v27 = vld [vmem:[%s5702_s2 + $0x520] sm:$0xff]  ;;  %1006 = vmatpush1.msra.mxu1 %v205_v23  ;;  %936 = vmatprep.subr.mxu0 %v74_v24 }
   0xf   :  { %v70_v28 = vld [vmem:[%s5702_s2 + $0x108] sm:$0xff]  ;;  %1007 = vmatprep.subr.mxu1 %v202_v25  ;;  %v69_v30 = vld [vmem:[%s5702_s2 + $0x100] sm:$0xff]  ;;  %937 = vmatpush1.msra.mxu0 %v73_v26 }
  0x10   :  { %v198_v29 = vld [vmem:[%s5702_s2 + $0x508] sm:$0xff]  ;;  %v197_v31 = vld [vmem:[%s5702_s2 + $0x500] sm:$0xff]  ;;  %1008 = vmatpush1.msra.mxu1 %v201_v27  ;;  %938 = vmatprep.subr.mxu0 %v70_v28 }
  0x11   :  { %v66_v32 = vld [vmem:[%s5702_s2 + $0xe8] sm:$0xff]  ;;  %1009 = vmatprep.subr.mxu1 %v198_v29  ;;  %v65_v34 = vld [vmem:[%s5702_s2 + $0xe0] sm:$0xff]  ;;  %939 = vmatpush1.msra.mxu0 %v69_v30 }
  0x12   :  { %v194_v33 = vld [vmem:[%s5702_s2 + $0x4e8] sm:$0xff]  ;;  %v193_v35 = vld [vmem:[%s5702_s2 + $0x4e0] sm:$0xff]  ;;  %1010 = vmatpush1.msra.mxu1 %v197_v31  ;;  %940 = vmatprep.subr.mxu0 %v66_v32 }
  0x13   :  { %v62_v36 = vld [vmem:[%s5702_s2 + $0xc8] sm:$0xff]  ;;  %1011 = vmatprep.subr.mxu1 %v194_v33  ;;  %v61_v38 = vld [vmem:[%s5702_s2 + $0xc0] sm:$0xff]  ;;  %941 = vmatpush1.msra.mxu0 %v65_v34 }
  0x14   :  { %v190_v37 = vld [vmem:[%s5702_s2 + $0x4c8] sm:$0xff]  ;;  %v189_v39 = vld [vmem:[%s5702_s2 + $0x4c0] sm:$0xff]  ;;  %1012 = vmatpush1.msra.mxu1 %v193_v35  ;;  %942 = vmatprep.subr.mxu0 %v62_v36 }
  0x15   :  { %v58_v40 = vld [vmem:[%s5702_s2 + $0xa8] sm:$0xff]  ;;  %1013 = vmatprep.subr.mxu1 %v190_v37  ;;  %v57_v42 = vld [vmem:[%s5702_s2 + $0xa0] sm:$0xff]  ;;  %943 = vmatpush1.msra.mxu0 %v61_v38 }
  0x16   :  { %v186_v41 = vld [vmem:[%s5702_s2 + $0x4a8] sm:$0xff]  ;;  %v185_v43 = vld [vmem:[%s5702_s2 + $0x4a0] sm:$0xff]  ;;  %1014 = vmatpush1.msra.mxu1 %v189_v39  ;;  %944 = vmatprep.subr.mxu0 %v58_v40 }
  0x17   :  { %v54_v44 = vld [vmem:[%s5702_s2 + $0x88] sm:$0xff]  ;;  %1015 = vmatprep.subr.mxu1 %v186_v41  ;;  %v53_v46 = vld [vmem:[%s5702_s2 + $0x80] sm:$0xff]  ;;  %945 = vmatpush1.msra.mxu0 %v57_v42 }
  0x18   :  { %v182_v45 = vld [vmem:[%s5702_s2 + $0x488] sm:$0xff]  ;;  %v181_v47 = vld [vmem:[%s5702_s2 + $0x480] sm:$0xff]  ;;  %1016 = vmatpush1.msra.mxu1 %v185_v43  ;;  %946 = vmatprep.subr.mxu0 %v54_v44 }
  0x19   :  { %v50_v48 = vld [vmem:[%s5702_s2 + $0x68] sm:$0xff]  ;;  %1017 = vmatprep.subr.mxu1 %v182_v45  ;;  %v49_v50 = vld [vmem:[%s5702_s2 + $0x60] sm:$0xff]  ;;  %947 = vmatpush1.msra.mxu0 %v53_v46 }
  0x1a   :  { %v178_v49 = vld [vmem:[%s5702_s2 + $0x468] sm:$0xff]  ;;  %v177_v51 = vld [vmem:[%s5702_s2 + $0x460] sm:$0xff]  ;;  %1018 = vmatpush1.msra.mxu1 %v181_v47  ;;  %948 = vmatprep.subr.mxu0 %v50_v48 }
  0x1b   :  { %v46_v52 = vld [vmem:[%s5702_s2 + $0x48] sm:$0xff]  ;;  %1019 = vmatprep.subr.mxu1 %v178_v49  ;;  %v45_v54 = vld [vmem:[%s5702_s2 + $0x40] sm:$0xff]  ;;  %949 = vmatpush1.msra.mxu0 %v49_v50 }
  0x1c   :  { %v174_v53 = vld [vmem:[%s5702_s2 + $0x448] sm:$0xff]  ;;  %v173_v55 = vld [vmem:[%s5702_s2 + $0x440] sm:$0xff]  ;;  %1020 = vmatpush1.msra.mxu1 %v177_v51  ;;  %950 = vmatprep.subr.mxu0 %v46_v52 }
  0x1d   :  { %v42_v56 = vld [vmem:[%s5702_s2 + $0x28] sm:$0xff]  ;;  %1021 = vmatprep.subr.mxu1 %v174_v53  ;;  %v41_v58 = vld [vmem:[%s5702_s2 + $0x20] sm:$0xff]  ;;  %951 = vmatpush1.msra.mxu0 %v45_v54 }
  0x1e   :  { %v170_v57 = vld [vmem:[%s5702_s2 + $0x428] sm:$0xff]  ;;  %v169_v59 = vld [vmem:[%s5702_s2 + $0x420] sm:$0xff]  ;;  %1022 = vmatpush1.msra.mxu1 %v173_v55  ;;  %952 = vmatprep.subr.mxu0 %v42_v56 }
  0x1f   :  { %v38_v60 = vld [vmem:[%s5702_s2 + $0x8] sm:$0xff]  ;;  %1023 = vmatprep.subr.mxu1 %v170_v57  ;;  %v37_v62 = vld [vmem:[%s5702_s2] sm:$0xff]  ;;  %953 = vmatpush1.msra.mxu0 %v41_v58 }
  0x20   :  { %v166_v61 = vld [vmem:[%s5702_s2 + $0x408] sm:$0xff]  ;;  %v165_v63 = vld [vmem:[%s5702_s2 + $0x400] sm:$0xff]  ;;  %1024 = vmatpush1.msra.mxu1 %v169_v59  ;;  %954 = vmatprep.subr.mxu0 %v38_v60 }
  0x21   :  { %v162_v0 = vld [vmem:[%s5702_s2 + $0x3e8] sm:$0xff]  ;;  %1025 = vmatprep.subr.mxu1 %v166_v61  ;;  %v161_v2 = vld [vmem:[%s5702_s2 + $0x3e0] sm:$0xff]  ;;  %955 = vmatpush1.msra.mxu0 %v37_v62 }
  0x22   :  { %v290_v1 = vld [vmem:[%s5702_s2 + $0x7e8] sm:$0xff]  ;;  %v289_v3 = vld [vmem:[%s5702_s2 + $0x7e0] sm:$0xff]  ;;  %1026 = vmatpush1.msra.mxu1 %v165_v63  ;;  %956 = vmatprep.subr.mxu0 %v162_v0 }
  0x23   :  { %v158_v4 = vld [vmem:[%s5702_s2 + $0x3c8] sm:$0xff]  ;;  %1027 = vmatprep.subr.mxu1 %v290_v1  ;;  %v157_v6 = vld [vmem:[%s5702_s2 + $0x3c0] sm:$0xff]  ;;  %957 = vmatpush2.msra.mxu0 %v161_v2 }
  0x24   :  { %v286_v5 = vld [vmem:[%s5702_s2 + $0x7c8] sm:$0xff]  ;;  %v285_v7 = vld [vmem:[%s5702_s2 + $0x7c0] sm:$0xff]  ;;  %1028 = vmatpush2.msra.mxu1 %v289_v3  ;;  %958 = vmatprep.subr.mxu0 %v158_v4 }
  0x25   :  { %v154_v8 = vld [vmem:[%s5702_s2 + $0x3a8] sm:$0xff]  ;;  %1029 = vmatprep.subr.mxu1 %v286_v5  ;;  %v153_v10 = vld [vmem:[%s5702_s2 + $0x3a0] sm:$0xff]  ;;  %959 = vmatpush2.msra.mxu0 %v157_v6 }
  0x26   :  { %v282_v9 = vld [vmem:[%s5702_s2 + $0x7a8] sm:$0xff]  ;;  %v281_v11 = vld [vmem:[%s5702_s2 + $0x7a0] sm:$0xff]  ;;  %1030 = vmatpush2.msra.mxu1 %v285_v7  ;;  %960 = vmatprep.subr.mxu0 %v154_v8 }
  0x27   :  { %v150_v12 = vld [vmem:[%s5702_s2 + $0x388] sm:$0xff]  ;;  %1031 = vmatprep.subr.mxu1 %v282_v9  ;;  %v149_v14 = vld [vmem:[%s5702_s2 + $0x380] sm:$0xff]  ;;  %961 = vmatpush2.msra.mxu0 %v153_v10 }
  0x28   :  { %v278_v13 = vld [vmem:[%s5702_s2 + $0x788] sm:$0xff]  ;;  %v277_v15 = vld [vmem:[%s5702_s2 + $0x780] sm:$0xff]  ;;  %1032 = vmatpush2.msra.mxu1 %v281_v11  ;;  %962 = vmatprep.subr.mxu0 %v150_v12 }
  0x29   :  { %v146_v16 = vld [vmem:[%s5702_s2 + $0x368] sm:$0xff]  ;;  %1033 = vmatprep.subr.mxu1 %v278_v13  ;;  %v145_v18 = vld [vmem:[%s5702_s2 + $0x360] sm:$0xff]  ;;  %963 = vmatpush2.msra.mxu0 %v149_v14 }
  0x2a   :  { %v274_v17 = vld [vmem:[%s5702_s2 + $0x768] sm:$0xff]  ;;  %v273_v19 = vld [vmem:[%s5702_s2 + $0x760] sm:$0xff]  ;;  %1034 = vmatpush2.msra.mxu1 %v277_v15  ;;  %964 = vmatprep.subr.mxu0 %v146_v16 }
  0x2b   :  { %v142_v20 = vld [vmem:[%s5702_s2 + $0x348] sm:$0xff]  ;;  %1035 = vmatprep.subr.mxu1 %v274_v17  ;;  %v141_v22 = vld [vmem:[%s5702_s2 + $0x340] sm:$0xff]  ;;  %965 = vmatpush2.msra.mxu0 %v145_v18 }
  0x2c   :  { %v270_v21 = vld [vmem:[%s5702_s2 + $0x748] sm:$0xff]  ;;  %v269_v23 = vld [vmem:[%s5702_s2 + $0x740] sm:$0xff]  ;;  %1036 = vmatpush2.msra.mxu1 %v273_v19  ;;  %966 = vmatprep.subr.mxu0 %v142_v20 }
  0x2d   :  { %v138_v24 = vld [vmem:[%s5702_s2 + $0x328] sm:$0xff]  ;;  %1037 = vmatprep.subr.mxu1 %v270_v21  ;;  %v137_v26 = vld [vmem:[%s5702_s2 + $0x320] sm:$0xff]  ;;  %967 = vmatpush2.msra.mxu0 %v141_v22 }
  0x2e   :  { %v266_v25 = vld [vmem:[%s5702_s2 + $0x728] sm:$0xff]  ;;  %v265_v27 = vld [vmem:[%s5702_s2 + $0x720] sm:$0xff]  ;;  %1038 = vmatpush2.msra.mxu1 %v269_v23  ;;  %968 = vmatprep.subr.mxu0 %v138_v24 }
  0x2f   :  { %v134_v28 = vld [vmem:[%s5702_s2 + $0x308] sm:$0xff]  ;;  %1039 = vmatprep.subr.mxu1 %v266_v25  ;;  %v133_v30 = vld [vmem:[%s5702_s2 + $0x300] sm:$0xff]  ;;  %969 = vmatpush2.msra.mxu0 %v137_v26 }
  0x30   :  { %v262_v29 = vld [vmem:[%s5702_s2 + $0x708] sm:$0xff]  ;;  %v261_v31 = vld [vmem:[%s5702_s2 + $0x700] sm:$0xff]  ;;  %1040 = vmatpush2.msra.mxu1 %v265_v27  ;;  %970 = vmatprep.subr.mxu0 %v134_v28 }
  0x31   :  { %v130_v32 = vld [vmem:[%s5702_s2 + $0x2e8] sm:$0xff]  ;;  %1041 = vmatprep.subr.mxu1 %v262_v29  ;;  %v129_v34 = vld [vmem:[%s5702_s2 + $0x2e0] sm:$0xff]  ;;  %971 = vmatpush2.msra.mxu0 %v133_v30 }
  0x32   :  { %v258_v33 = vld [vmem:[%s5702_s2 + $0x6e8] sm:$0xff]  ;;  %v257_v35 = vld [vmem:[%s5702_s2 + $0x6e0] sm:$0xff]  ;;  %1042 = vmatpush2.msra.mxu1 %v261_v31  ;;  %972 = vmatprep.subr.mxu0 %v130_v32 }
  0x33   :  { %v126_v36 = vld [vmem:[%s5702_s2 + $0x2c8] sm:$0xff]  ;;  %1043 = vmatprep.subr.mxu1 %v258_v33  ;;  %v125_v38 = vld [vmem:[%s5702_s2 + $0x2c0] sm:$0xff]  ;;  %973 = vmatpush2.msra.mxu0 %v129_v34 }
  0x34   :  { %v254_v37 = vld [vmem:[%s5702_s2 + $0x6c8] sm:$0xff]  ;;  %v253_v39 = vld [vmem:[%s5702_s2 + $0x6c0] sm:$0xff]  ;;  %1044 = vmatpush2.msra.mxu1 %v257_v35  ;;  %974 = vmatprep.subr.mxu0 %v126_v36 }
  0x35   :  { %v122_v40 = vld [vmem:[%s5702_s2 + $0x2a8] sm:$0xff]  ;;  %1045 = vmatprep.subr.mxu1 %v254_v37  ;;  %v121_v42 = vld [vmem:[%s5702_s2 + $0x2a0] sm:$0xff]  ;;  %975 = vmatpush2.msra.mxu0 %v125_v38 }
  0x36   :  { %v250_v41 = vld [vmem:[%s5702_s2 + $0x6a8] sm:$0xff]  ;;  %v249_v43 = vld [vmem:[%s5702_s2 + $0x6a0] sm:$0xff]  ;;  %1046 = vmatpush2.msra.mxu1 %v253_v39  ;;  %976 = vmatprep.subr.mxu0 %v122_v40 }
  0x37   :  { %v118_v44 = vld [vmem:[%s5702_s2 + $0x288] sm:$0xff]  ;;  %1047 = vmatprep.subr.mxu1 %v250_v41  ;;  %v117_v46 = vld [vmem:[%s5702_s2 + $0x280] sm:$0xff]  ;;  %977 = vmatpush2.msra.mxu0 %v121_v42 }
  0x38   :  { %v246_v45 = vld [vmem:[%s5702_s2 + $0x688] sm:$0xff]  ;;  %v245_v47 = vld [vmem:[%s5702_s2 + $0x680] sm:$0xff]  ;;  %1048 = vmatpush2.msra.mxu1 %v249_v43  ;;  %978 = vmatprep.subr.mxu0 %v118_v44 }
  0x39   :  { %v114_v48 = vld [vmem:[%s5702_s2 + $0x268] sm:$0xff]  ;;  %1049 = vmatprep.subr.mxu1 %v246_v45  ;;  %v113_v50 = vld [vmem:[%s5702_s2 + $0x260] sm:$0xff]  ;;  %979 = vmatpush2.msra.mxu0 %v117_v46 }
  0x3a   :  { %v242_v49 = vld [vmem:[%s5702_s2 + $0x668] sm:$0xff]  ;;  %v241_v51 = vld [vmem:[%s5702_s2 + $0x660] sm:$0xff]  ;;  %1050 = vmatpush2.msra.mxu1 %v245_v47  ;;  %980 = vmatprep.subr.mxu0 %v114_v48 }
  0x3b   :  { %v110_v52 = vld [vmem:[%s5702_s2 + $0x248] sm:$0xff]  ;;  %1051 = vmatprep.subr.mxu1 %v242_v49  ;;  %v109_v54 = vld [vmem:[%s5702_s2 + $0x240] sm:$0xff]  ;;  %981 = vmatpush2.msra.mxu0 %v113_v50 }
  0x3c   :  { %v238_v53 = vld [vmem:[%s5702_s2 + $0x648] sm:$0xff]  ;;  %v237_v55 = vld [vmem:[%s5702_s2 + $0x640] sm:$0xff]  ;;  %1052 = vmatpush2.msra.mxu1 %v241_v51  ;;  %982 = vmatprep.subr.mxu0 %v110_v52 }
  0x3d   :  { %v30_v56 = vld [vmem:[%s5703_s0] sm:$0xff]  ;;  %v106_v57 = vld [vmem:[%s5702_s2 + $0x228] sm:$0xff]  ;;  %1053 = vmatprep.subr.mxu1 %v238_v53  ;;  %983 = vmatpush2.msra.mxu0 %v109_v54 }
  0x3e   :  { %v234_v58 = vld [vmem:[%s5702_s2 + $0x628] sm:$0xff]  ;;  %v105_v59 = vld [vmem:[%s5702_s2 + $0x220] sm:$0xff]  ;;  %1054 = vmatpush2.msra.mxu1 %v237_v55  ;;  %v3186_v0 = vcombine.high %v30_v56, %v30_v56  ;;  %984 = vmatprep.subr.mxu0 %v106_v57 }
  0x3f   :  { %v233_v60 = vld [vmem:[%s5702_s2 + $0x620] sm:$0xff]  ;;  %v31_v61 = vld [vmem:[%s5703_s0 + $0x8] sm:$0xff]  ;;  %1055 = vmatprep.subr.mxu1 %v234_v58  ;;  %985 = vmatpush2.msra.mxu0 %v105_v59 }
  0x40   :  { %v102_v62 = vld [vmem:[%s5702_s2 + $0x208] sm:$0xff]  ;;  %v101_v1 = vld [vmem:[%s5702_s2 + $0x200] sm:$0xff]  ;;  %1056 = vmatpush2.msra.mxu1 %v233_v60  ;;  %v3194_v3 = vcombine.high %v31_v61, %v31_v61  ;;  %988 = vmatprep.mubr.f32.mxu0 %v3186_v0 }
  0x41   :  { %v230_v63 = vld [vmem:[%s5702_s2 + $0x608] sm:$0xff]  ;;  %v229_v2 = vld [vmem:[%s5702_s2 + $0x600] sm:$0xff]  ;;  %986 = vmatprep.subr.mxu0 %v102_v62 }
  0x42   :  { %1057 = vmatprep.subr.mxu1 %v230_v63  ;;  %v354_v4 = vld [vmem:[%s5702_s2 + $0x9e8] sm:$0xff]  ;;  %987 = vmatpush2.msra.mxu0 %v101_v1  ;;  %v353_v6 = vld [vmem:[%s5702_s2 + $0x9e0] sm:$0xff] }
  0x43   :  { %v482_v5 = vld [vmem:[%s5702_s2 + $0xde8] sm:$0xff]  ;;  %1058 = vmatpush2.msra.mxu1 %v229_v2  ;;  %989 = vmatmul.mubr.f32.vlgmr.msra.gmra.mxu0 %v30_v56  ;;  %v481_v7 = vld [vmem:[%s5702_s2 + $0xde0] sm:$0xff] }
  0x44   :  { %1059 = vmatprep.mubr.f32.mxu1 %v3194_v3  ;;  %1066 = vmatprep.subr.mxu0 %v354_v4  ;;  %v350_v8 = vld [vmem:[%s5702_s2 + $0x9c8] sm:$0xff]  ;;  %v349_v10 = vld [vmem:[%s5702_s2 + $0x9c0] sm:$0xff] }
  0x45   :  { %v478_v9 = vld [vmem:[%s5702_s2 + $0xdc8] sm:$0xff]  ;;  %1137 = vmatprep.subr.mxu1 %v482_v5  ;;  %1060 = vmatmul.mubr.f32.vlgmr.msra.gmra.mxu1 %v31_v61  ;;  %v477_v11 = vld [vmem:[%s5702_s2 + $0xdc0] sm:$0xff] }
  0x46   :  { %1067 = vmatpush1.msra.mxu0 %v353_v6  ;;  %1138 = vmatpush1.msra.mxu1 %v481_v7  ;;  %v346_v12 = vld [vmem:[%s5702_s2 + $0x9a8] sm:$0xff]  ;;  %v345_v14 = vld [vmem:[%s5702_s2 + $0x9a0] sm:$0xff] }
  0x47   :  { %v474_v13 = vld [vmem:[%s5702_s2 + $0xda8] sm:$0xff]  ;;  %1068 = vmatprep.subr.mxu0 %v350_v8  ;;  %1139 = vmatprep.subr.mxu1 %v478_v9  ;;  %v473_v15 = vld [vmem:[%s5702_s2 + $0xda0] sm:$0xff] }
  0x48   :  { %1069 = vmatpush1.msra.mxu0 %v349_v10  ;;  %1140 = vmatpush1.msra.mxu1 %v477_v11  ;;  %v342_v16 = vld [vmem:[%s5702_s2 + $0x988] sm:$0xff]  ;;  %v341_v18 = vld [vmem:[%s5702_s2 + $0x980] sm:$0xff] }
  0x49   :  { %v470_v17 = vld [vmem:[%s5702_s2 + $0xd88] sm:$0xff]  ;;  %1070 = vmatprep.subr.mxu0 %v346_v12  ;;  %1141 = vmatprep.subr.mxu1 %v474_v13  ;;  %v469_v19 = vld [vmem:[%s5702_s2 + $0xd80] sm:$0xff] }
  0x4a   :  { %1071 = vmatpush1.msra.mxu0 %v345_v14  ;;  %1142 = vmatpush1.msra.mxu1 %v473_v15  ;;  %v338_v20 = vld [vmem:[%s5702_s2 + $0x968] sm:$0xff]  ;;  %v337_v22 = vld [vmem:[%s5702_s2 + $0x960] sm:$0xff] }
  0x4b   :  { %v466_v21 = vld [vmem:[%s5702_s2 + $0xd68] sm:$0xff]  ;;  %1072 = vmatprep.subr.mxu0 %v342_v16  ;;  %1143 = vmatprep.subr.mxu1 %v470_v17  ;;  %v465_v23 = vld [vmem:[%s5702_s2 + $0xd60] sm:$0xff] }
  0x4c   :  { %1073 = vmatpush1.msra.mxu0 %v341_v18  ;;  %1144 = vmatpush1.msra.mxu1 %v469_v19  ;;  %v334_v24 = vld [vmem:[%s5702_s2 + $0x948] sm:$0xff]  ;;  %v333_v26 = vld [vmem:[%s5702_s2 + $0x940] sm:$0xff] }
  0x4d   :  { %v462_v25 = vld [vmem:[%s5702_s2 + $0xd48] sm:$0xff]  ;;  %1074 = vmatprep.subr.mxu0 %v338_v20  ;;  %1145 = vmatprep.subr.mxu1 %v466_v21  ;;  %v461_v27 = vld [vmem:[%s5702_s2 + $0xd40] sm:$0xff] }
  0x4e   :  { %1075 = vmatpush1.msra.mxu0 %v337_v22  ;;  %1146 = vmatpush1.msra.mxu1 %v465_v23  ;;  %v330_v28 = vld [vmem:[%s5702_s2 + $0x928] sm:$0xff]  ;;  %v329_v30 = vld [vmem:[%s5702_s2 + $0x920] sm:$0xff] }
  0x4f   :  { %v458_v29 = vld [vmem:[%s5702_s2 + $0xd28] sm:$0xff]  ;;  %1076 = vmatprep.subr.mxu0 %v334_v24  ;;  %1147 = vmatprep.subr.mxu1 %v462_v25  ;;  %v457_v31 = vld [vmem:[%s5702_s2 + $0xd20] sm:$0xff] }
  0x50   :  { %1077 = vmatpush1.msra.mxu0 %v333_v26  ;;  %1148 = vmatpush1.msra.mxu1 %v461_v27  ;;  %v326_v32 = vld [vmem:[%s5702_s2 + $0x908] sm:$0xff]  ;;  %v325_v34 = vld [vmem:[%s5702_s2 + $0x900] sm:$0xff] }
  0x51   :  { %v454_v33 = vld [vmem:[%s5702_s2 + $0xd08] sm:$0xff]  ;;  %1078 = vmatprep.subr.mxu0 %v330_v28  ;;  %1149 = vmatprep.subr.mxu1 %v458_v29  ;;  %v453_v35 = vld [vmem:[%s5702_s2 + $0xd00] sm:$0xff] }
  0x52   :  { %1079 = vmatpush1.msra.mxu0 %v329_v30  ;;  %1150 = vmatpush1.msra.mxu1 %v457_v31  ;;  %v322_v36 = vld [vmem:[%s5702_s2 + $0x8e8] sm:$0xff]  ;;  %v321_v38 = vld [vmem:[%s5702_s2 + $0x8e0] sm:$0xff] }
  0x53   :  { %v450_v37 = vld [vmem:[%s5702_s2 + $0xce8] sm:$0xff]  ;;  %1080 = vmatprep.subr.mxu0 %v326_v32  ;;  %1151 = vmatprep.subr.mxu1 %v454_v33  ;;  %v449_v39 = vld [vmem:[%s5702_s2 + $0xce0] sm:$0xff] }
  0x54   :  { %1081 = vmatpush1.msra.mxu0 %v325_v34  ;;  %1152 = vmatpush1.msra.mxu1 %v453_v35  ;;  %v318_v40 = vld [vmem:[%s5702_s2 + $0x8c8] sm:$0xff]  ;;  %v317_v42 = vld [vmem:[%s5702_s2 + $0x8c0] sm:$0xff] }
  0x55   :  { %v446_v41 = vld [vmem:[%s5702_s2 + $0xcc8] sm:$0xff]  ;;  %1082 = vmatprep.subr.mxu0 %v322_v36  ;;  %1153 = vmatprep.subr.mxu1 %v450_v37  ;;  %v445_v43 = vld [vmem:[%s5702_s2 + $0xcc0] sm:$0xff] }
  0x56   :  { %1083 = vmatpush1.msra.mxu0 %v321_v38  ;;  %1154 = vmatpush1.msra.mxu1 %v449_v39  ;;  %v314_v44 = vld [vmem:[%s5702_s2 + $0x8a8] sm:$0xff]  ;;  %v313_v46 = vld [vmem:[%s5702_s2 + $0x8a0] sm:$0xff] }
  0x57   :  { %v442_v45 = vld [vmem:[%s5702_s2 + $0xca8] sm:$0xff]  ;;  %1084 = vmatprep.subr.mxu0 %v318_v40  ;;  %1155 = vmatprep.subr.mxu1 %v446_v41  ;;  %v441_v47 = vld [vmem:[%s5702_s2 + $0xca0] sm:$0xff] }
  0x58   :  { %1085 = vmatpush1.msra.mxu0 %v317_v42  ;;  %1156 = vmatpush1.msra.mxu1 %v445_v43  ;;  %v310_v48 = vld [vmem:[%s5702_s2 + $0x888] sm:$0xff]  ;;  %v309_v50 = vld [vmem:[%s5702_s2 + $0x880] sm:$0xff] }
  0x59   :  { %v438_v49 = vld [vmem:[%s5702_s2 + $0xc88] sm:$0xff]  ;;  %1086 = vmatprep.subr.mxu0 %v314_v44  ;;  %1157 = vmatprep.subr.mxu1 %v442_v45  ;;  %v437_v51 = vld [vmem:[%s5702_s2 + $0xc80] sm:$0xff] }
  0x5a   :  { %1087 = vmatpush1.msra.mxu0 %v313_v46  ;;  %1158 = vmatpush1.msra.mxu1 %v441_v47  ;;  %v306_v52 = vld [vmem:[%s5702_s2 + $0x868] sm:$0xff]  ;;  %v305_v54 = vld [vmem:[%s5702_s2 + $0x860] sm:$0xff] }
  0x5b   :  { %v434_v53 = vld [vmem:[%s5702_s2 + $0xc68] sm:$0xff]  ;;  %1088 = vmatprep.subr.mxu0 %v310_v48  ;;  %1159 = vmatprep.subr.mxu1 %v438_v49  ;;  %v433_v55 = vld [vmem:[%s5702_s2 + $0xc60] sm:$0xff] }
  0x5c   :  { %1089 = vmatpush1.msra.mxu0 %v309_v50  ;;  %1160 = vmatpush1.msra.mxu1 %v437_v51  ;;  %v302_v56 = vld [vmem:[%s5702_s2 + $0x848] sm:$0xff]  ;;  %v301_v58 = vld [vmem:[%s5702_s2 + $0x840] sm:$0xff] }
  0x5d   :  { %v430_v57 = vld [vmem:[%s5702_s2 + $0xc48] sm:$0xff]  ;;  %1090 = vmatprep.subr.mxu0 %v306_v52  ;;  %1161 = vmatprep.subr.mxu1 %v434_v53  ;;  %v429_v59 = vld [vmem:[%s5702_s2 + $0xc40] sm:$0xff] }
  0x5e   :  { %1091 = vmatpush1.msra.mxu0 %v305_v54  ;;  %1162 = vmatpush1.msra.mxu1 %v433_v55  ;;  %v298_v60 = vld [vmem:[%s5702_s2 + $0x828] sm:$0xff]  ;;  %v297_v62 = vld [vmem:[%s5702_s2 + $0x820] sm:$0xff] }
  0x5f   :  { %v426_v61 = vld [vmem:[%s5702_s2 + $0xc28] sm:$0xff]  ;;  %1092 = vmatprep.subr.mxu0 %v302_v56  ;;  %1163 = vmatprep.subr.mxu1 %v430_v57  ;;  %v425_v63 = vld [vmem:[%s5702_s2 + $0xc20] sm:$0xff] }
  0x60   :  { %1093 = vmatpush1.msra.mxu0 %v301_v58  ;;  %1164 = vmatpush1.msra.mxu1 %v429_v59  ;;  %v294_v1 = vld [vmem:[%s5702_s2 + $0x808] sm:$0xff]  ;;  %v293_v4 = vld [vmem:[%s5702_s2 + $0x800] sm:$0xff] }
  0x61   :  { %v422_v2 = vld [vmem:[%s5702_s2 + $0xc08] sm:$0xff]  ;;  %1094 = vmatprep.subr.mxu0 %v298_v60  ;;  %1165 = vmatprep.subr.mxu1 %v426_v61  ;;  %v421_v5 = vld [vmem:[%s5702_s2 + $0xc00] sm:$0xff] }
  0x62   :  { %1095 = vmatpush1.msra.mxu0 %v297_v62  ;;  %1166 = vmatpush1.msra.mxu1 %v425_v63  ;;  %v418_v6 = vld [vmem:[%s5702_s2 + $0xbe8] sm:$0xff]  ;;  %v417_v8 = vld [vmem:[%s5702_s2 + $0xbe0] sm:$0xff]  ;;  %v32_v62 = vld [vmem:[%s5703_s0 + $0x10] sm:$0xff] }
  0x63   :  { %v546_v7 = vld [vmem:[%s5702_s2 + $0xfe8] sm:$0xff]  ;;  %1096 = vmatprep.subr.mxu0 %v294_v1  ;;  %1167 = vmatprep.subr.mxu1 %v422_v2  ;;  %v545_v9 = vld [vmem:[%s5702_s2 + $0xfe0] sm:$0xff] }
  0x64   :  { %1097 = vmatpush1.msra.mxu0 %v293_v4  ;;  %1168 = vmatpush1.msra.mxu1 %v421_v5  ;;  %v414_v10 = vld [vmem:[%s5702_s2 + $0xbc8] sm:$0xff]  ;;  %v413_v12 = vld [vmem:[%s5702_s2 + $0xbc0] sm:$0xff]  ;;  %v33_v5 = vld [vmem:[%s5703_s0 + $0x18] sm:$0xff] }
  0x65   :  { %v542_v11 = vld [vmem:[%s5702_s2 + $0xfc8] sm:$0xff]  ;;  %1098 = vmatprep.subr.mxu0 %v418_v6  ;;  %1169 = vmatprep.subr.mxu1 %v546_v7  ;;  %v541_v13 = vld [vmem:[%s5702_s2 + $0xfc0] sm:$0xff] }
  0x66   :  { %1099 = vmatpush2.msra.mxu0 %v417_v8  ;;  %1170 = vmatpush2.msra.mxu1 %v545_v9  ;;  %v410_v14 = vld [vmem:[%s5702_s2 + $0xba8] sm:$0xff]  ;;  %v409_v16 = vld [vmem:[%s5702_s2 + $0xba0] sm:$0xff]  ;;  %v3582_v8 = vcombine.high %v32_v62, %v32_v62 }
  0x67   :  { %v538_v15 = vld [vmem:[%s5702_s2 + $0xfa8] sm:$0xff]  ;;  %1100 = vmatprep.subr.mxu0 %v414_v10  ;;  %1171 = vmatprep.subr.mxu1 %v542_v11  ;;  %v537_v17 = vld [vmem:[%s5702_s2 + $0xfa0] sm:$0xff]  ;;  %v3590_v11 = vcombine.high %v33_v5, %v33_v5 }
  0x68   :  { %1101 = vmatpush2.msra.mxu0 %v413_v12  ;;  %1172 = vmatpush2.msra.mxu1 %v541_v13  ;;  %v406_v18 = vld [vmem:[%s5702_s2 + $0xb88] sm:$0xff]  ;;  %v405_v20 = vld [vmem:[%s5702_s2 + $0xb80] sm:$0xff] }
  0x69   :  { %v534_v19 = vld [vmem:[%s5702_s2 + $0xf88] sm:$0xff]  ;;  %1102 = vmatprep.subr.mxu0 %v410_v14  ;;  %1173 = vmatprep.subr.mxu1 %v538_v15  ;;  %v533_v21 = vld [vmem:[%s5702_s2 + $0xf80] sm:$0xff] }
  0x6a   :  { %1103 = vmatpush2.msra.mxu0 %v409_v16  ;;  %1174 = vmatpush2.msra.mxu1 %v537_v17  ;;  %v402_v22 = vld [vmem:[%s5702_s2 + $0xb68] sm:$0xff]  ;;  %v401_v24 = vld [vmem:[%s5702_s2 + $0xb60] sm:$0xff] }
  0x6b   :  { %v530_v23 = vld [vmem:[%s5702_s2 + $0xf68] sm:$0xff]  ;;  %1104 = vmatprep.subr.mxu0 %v406_v18  ;;  %1175 = vmatprep.subr.mxu1 %v534_v19  ;;  %v529_v25 = vld [vmem:[%s5702_s2 + $0xf60] sm:$0xff] }
  0x6c   :  { %1105 = vmatpush2.msra.mxu0 %v405_v20  ;;  %1176 = vmatpush2.msra.mxu1 %v533_v21  ;;  %v398_v26 = vld [vmem:[%s5702_s2 + $0xb48] sm:$0xff]  ;;  %v397_v28 = vld [vmem:[%s5702_s2 + $0xb40] sm:$0xff] }
  0x6d   :  { %v526_v27 = vld [vmem:[%s5702_s2 + $0xf48] sm:$0xff]  ;;  %1106 = vmatprep.subr.mxu0 %v402_v22  ;;  %1177 = vmatprep.subr.mxu1 %v530_v23  ;;  %v525_v29 = vld [vmem:[%s5702_s2 + $0xf40] sm:$0xff] }
  0x6e   :  { %1107 = vmatpush2.msra.mxu0 %v401_v24  ;;  %1178 = vmatpush2.msra.mxu1 %v529_v25  ;;  %v394_v30 = vld [vmem:[%s5702_s2 + $0xb28] sm:$0xff]  ;;  %v393_v32 = vld [vmem:[%s5702_s2 + $0xb20] sm:$0xff] }
  0x6f   :  { %v522_v31 = vld [vmem:[%s5702_s2 + $0xf28] sm:$0xff]  ;;  %1108 = vmatprep.subr.mxu0 %v398_v26  ;;  %1179 = vmatprep.subr.mxu1 %v526_v27  ;;  %v521_v33 = vld [vmem:[%s5702_s2 + $0xf20] sm:$0xff] }
  0x70   :  { %1109 = vmatpush2.msra.mxu0 %v397_v28  ;;  %1180 = vmatpush2.msra.mxu1 %v525_v29  ;;  %v390_v34 = vld [vmem:[%s5702_s2 + $0xb08] sm:$0xff]  ;;  %v389_v36 = vld [vmem:[%s5702_s2 + $0xb00] sm:$0xff] }
  0x71   :  { %v518_v35 = vld [vmem:[%s5702_s2 + $0xf08] sm:$0xff]  ;;  %1110 = vmatprep.subr.mxu0 %v394_v30  ;;  %1181 = vmatprep.subr.mxu1 %v522_v31  ;;  %v517_v37 = vld [vmem:[%s5702_s2 + $0xf00] sm:$0xff] }
  0x72   :  { %1111 = vmatpush2.msra.mxu0 %v393_v32  ;;  %1182 = vmatpush2.msra.mxu1 %v521_v33  ;;  %v386_v38 = vld [vmem:[%s5702_s2 + $0xae8] sm:$0xff]  ;;  %v385_v40 = vld [vmem:[%s5702_s2 + $0xae0] sm:$0xff] }
  0x73   :  { %v514_v39 = vld [vmem:[%s5702_s2 + $0xee8] sm:$0xff]  ;;  %1112 = vmatprep.subr.mxu0 %v390_v34  ;;  %1183 = vmatprep.subr.mxu1 %v518_v35  ;;  %v513_v41 = vld [vmem:[%s5702_s2 + $0xee0] sm:$0xff] }
  0x74   :  { %1113 = vmatpush2.msra.mxu0 %v389_v36  ;;  %1184 = vmatpush2.msra.mxu1 %v517_v37  ;;  %v382_v42 = vld [vmem:[%s5702_s2 + $0xac8] sm:$0xff]  ;;  %v381_v44 = vld [vmem:[%s5702_s2 + $0xac0] sm:$0xff] }
  0x75   :  { %v510_v43 = vld [vmem:[%s5702_s2 + $0xec8] sm:$0xff]  ;;  %1114 = vmatprep.subr.mxu0 %v386_v38  ;;  %1185 = vmatprep.subr.mxu1 %v514_v39  ;;  %v509_v45 = vld [vmem:[%s5702_s2 + $0xec0] sm:$0xff] }
  0x76   :  { %1115 = vmatpush2.msra.mxu0 %v385_v40  ;;  %1186 = vmatpush2.msra.mxu1 %v513_v41  ;;  %v378_v46 = vld [vmem:[%s5702_s2 + $0xaa8] sm:$0xff]  ;;  %v377_v48 = vld [vmem:[%s5702_s2 + $0xaa0] sm:$0xff] }
  0x77   :  { %v506_v47 = vld [vmem:[%s5702_s2 + $0xea8] sm:$0xff]  ;;  %1116 = vmatprep.subr.mxu0 %v382_v42  ;;  %1187 = vmatprep.subr.mxu1 %v510_v43  ;;  %v505_v49 = vld [vmem:[%s5702_s2 + $0xea0] sm:$0xff] }
  0x78   :  { %1117 = vmatpush2.msra.mxu0 %v381_v44  ;;  %1188 = vmatpush2.msra.mxu1 %v509_v45  ;;  %v374_v50 = vld [vmem:[%s5702_s2 + $0xa88] sm:$0xff]  ;;  %v373_v52 = vld [vmem:[%s5702_s2 + $0xa80] sm:$0xff] }
  0x79   :  { %v502_v51 = vld [vmem:[%s5702_s2 + $0xe88] sm:$0xff]  ;;  %1118 = vmatprep.subr.mxu0 %v378_v46  ;;  %1189 = vmatprep.subr.mxu1 %v506_v47  ;;  %v501_v53 = vld [vmem:[%s5702_s2 + $0xe80] sm:$0xff] }
  0x7a   :  { %1119 = vmatpush2.msra.mxu0 %v377_v48  ;;  %1190 = vmatpush2.msra.mxu1 %v505_v49  ;;  %v370_v54 = vld [vmem:[%s5702_s2 + $0xa68] sm:$0xff]  ;;  %v369_v56 = vld [vmem:[%s5702_s2 + $0xa60] sm:$0xff] }
  0x7b   :  { %v498_v55 = vld [vmem:[%s5702_s2 + $0xe68] sm:$0xff]  ;;  %1120 = vmatprep.subr.mxu0 %v374_v50  ;;  %1191 = vmatprep.subr.mxu1 %v502_v51  ;;  %v497_v57 = vld [vmem:[%s5702_s2 + $0xe60] sm:$0xff] }
  0x7c   :  { %1121 = vmatpush2.msra.mxu0 %v373_v52  ;;  %1192 = vmatpush2.msra.mxu1 %v501_v53  ;;  %v366_v58 = vld [vmem:[%s5702_s2 + $0xa48] sm:$0xff]  ;;  %v365_v60 = vld [vmem:[%s5702_s2 + $0xa40] sm:$0xff] }
  0x7d   :  { %v494_v59 = vld [vmem:[%s5702_s2 + $0xe48] sm:$0xff]  ;;  %1122 = vmatprep.subr.mxu0 %v370_v54  ;;  %1193 = vmatprep.subr.mxu1 %v498_v55  ;;  %v493_v61 = vld [vmem:[%s5702_s2 + $0xe40] sm:$0xff] }
  0x7e   :  { %1123 = vmatpush2.msra.mxu0 %v369_v56  ;;  %1194 = vmatpush2.msra.mxu1 %v497_v57  ;;  %v362_v63 = vld [vmem:[%s5702_s2 + $0xa28] sm:$0xff]  ;;  %v361_v2 = vld [vmem:[%s5702_s2 + $0xa20] sm:$0xff] }
  0x7f   :  { %v490_v1 = vld [vmem:[%s5702_s2 + $0xe28] sm:$0xff]  ;;  %1124 = vmatprep.subr.mxu0 %v366_v58  ;;  %1195 = vmatprep.subr.mxu1 %v494_v59  ;;  %v489_v4 = vld [vmem:[%s5702_s2 + $0xe20] sm:$0xff] }
  0x80   :  { %1125 = vmatpush2.msra.mxu0 %v365_v60  ;;  %1196 = vmatpush2.msra.mxu1 %v493_v61  ;;  %v358_v6 = vld [vmem:[%s5702_s2 + $0xa08] sm:$0xff]  ;;  %v357_v9 = vld [vmem:[%s5702_s2 + $0xa00] sm:$0xff] }
  0x81   :  { %v486_v7 = vld [vmem:[%s5702_s2 + $0xe08] sm:$0xff]  ;;  %1126 = vmatprep.subr.mxu0 %v362_v63  ;;  %1197 = vmatprep.subr.mxu1 %v490_v1  ;;  %v485_v10 = vld [vmem:[%s5702_s2 + $0xe00] sm:$0xff] }
  0x82   :  { %1127 = vmatpush2.msra.mxu0 %v361_v2  ;;  %1198 = vmatpush2.msra.mxu1 %v489_v4  ;;  %v610_v12 = vld [vmem:[%s5702_s2 + $0x11e8] sm:$0xff]  ;;  %v609_v14 = vld [vmem:[%s5702_s2 + $0x11e0] sm:$0xff] }
  0x83   :  { %1128 = vmatprep.subr.mxu0 %v358_v6  ;;  %1199 = vmatprep.subr.mxu1 %v486_v7  ;;  %v738_v13 = vld [vmem:[%s5702_s2 + $0x15e8] sm:$0xff]  ;;  %v737_v15 = vld [vmem:[%s5702_s2 + $0x15e0] sm:$0xff] }
  0x84   :  { %1129 = vmatpush2.msra.mxu0 %v357_v9  ;;  %1130 = vmatprep.mubr.f32.mxu0 %v3582_v8  ;;  %v606_v16 = vld [vmem:[%s5702_s2 + $0x11c8] sm:$0xff]  ;;  %v605_v18 = vld [vmem:[%s5702_s2 + $0x11c0] sm:$0xff] }
  0x85   :  { %1200 = vmatpush2.msra.mxu1 %v485_v10  ;;  %1131 = vmatmul.mubr.f32.vlgmr.msra.gmra.mxu0 %v32_v62  ;;  %v734_v17 = vld [vmem:[%s5702_s2 + $0x15c8] sm:$0xff]  ;;  %v733_v19 = vld [vmem:[%s5702_s2 + $0x15c0] sm:$0xff] }
  0x86   :  { %1201 = vmatprep.mubr.f32.mxu1 %v3590_v11  ;;  %1208 = vmatprep.subr.mxu0 %v610_v12  ;;  %v602_v20 = vld [vmem:[%s5702_s2 + $0x11a8] sm:$0xff]  ;;  %v601_v22 = vld [vmem:[%s5702_s2 + $0x11a0] sm:$0xff] }
  0x87   :  { %1279 = vmatprep.subr.mxu1 %v738_v13  ;;  %1202 = vmatmul.mubr.f32.vlgmr.msra.gmra.mxu1 %v33_v5  ;;  %v730_v21 = vld [vmem:[%s5702_s2 + $0x15a8] sm:$0xff]  ;;  %v729_v23 = vld [vmem:[%s5702_s2 + $0x15a0] sm:$0xff] }
  0x88   :  { %1209 = vmatpush1.msra.mxu0 %v609_v14  ;;  %1280 = vmatpush1.msra.mxu1 %v737_v15  ;;  %v598_v24 = vld [vmem:[%s5702_s2 + $0x1188] sm:$0xff]  ;;  %v597_v26 = vld [vmem:[%s5702_s2 + $0x1180] sm:$0xff] }
  0x89   :  { %1210 = vmatprep.subr.mxu0 %v606_v16  ;;  %1281 = vmatprep.subr.mxu1 %v734_v17  ;;  %v726_v25 = vld [vmem:[%s5702_s2 + $0x1588] sm:$0xff]  ;;  %v725_v27 = vld [vmem:[%s5702_s2 + $0x1580] sm:$0xff] }
  0x8a   :  { %1211 = vmatpush1.msra.mxu0 %v605_v18  ;;  %1282 = vmatpush1.msra.mxu1 %v733_v19  ;;  %v594_v28 = vld [vmem:[%s5702_s2 + $0x1168] sm:$0xff]  ;;  %v593_v30 = vld [vmem:[%s5702_s2 + $0x1160] sm:$0xff] }
  0x8b   :  { %1212 = vmatprep.subr.mxu0 %v602_v20  ;;  %1283 = vmatprep.subr.mxu1 %v730_v21  ;;  %v722_v29 = vld [vmem:[%s5702_s2 + $0x1568] sm:$0xff]  ;;  %v721_v31 = vld [vmem:[%s5702_s2 + $0x1560] sm:$0xff] }
  0x8c   :  { %1213 = vmatpush1.msra.mxu0 %v601_v22  ;;  %1284 = vmatpush1.msra.mxu1 %v729_v23  ;;  %v590_v32 = vld [vmem:[%s5702_s2 + $0x1148] sm:$0xff]  ;;  %v589_v34 = vld [vmem:[%s5702_s2 + $0x1140] sm:$0xff] }
  0x8d   :  { %1214 = vmatprep.subr.mxu0 %v598_v24  ;;  %1285 = vmatprep.subr.mxu1 %v726_v25  ;;  %v718_v33 = vld [vmem:[%s5702_s2 + $0x1548] sm:$0xff]  ;;  %v717_v35 = vld [vmem:[%s5702_s2 + $0x1540] sm:$0xff] }
  0x8e   :  { %1215 = vmatpush1.msra.mxu0 %v597_v26  ;;  %1286 = vmatpush1.msra.mxu1 %v725_v27  ;;  %v586_v36 = vld [vmem:[%s5702_s2 + $0x1128] sm:$0xff]  ;;  %v585_v38 = vld [vmem:[%s5702_s2 + $0x1120] sm:$0xff] }
  0x8f   :  { %1216 = vmatprep.subr.mxu0 %v594_v28  ;;  %1287 = vmatprep.subr.mxu1 %v722_v29  ;;  %v714_v37 = vld [vmem:[%s5702_s2 + $0x1528] sm:$0xff]  ;;  %v713_v39 = vld [vmem:[%s5702_s2 + $0x1520] sm:$0xff] }
  0x90   :  { %1217 = vmatpush1.msra.mxu0 %v593_v30  ;;  %1288 = vmatpush1.msra.mxu1 %v721_v31  ;;  %v582_v40 = vld [vmem:[%s5702_s2 + $0x1108] sm:$0xff]  ;;  %v581_v42 = vld [vmem:[%s5702_s2 + $0x1100] sm:$0xff] }
  0x91   :  { %1218 = vmatprep.subr.mxu0 %v590_v32  ;;  %1289 = vmatprep.subr.mxu1 %v718_v33  ;;  %v710_v41 = vld [vmem:[%s5702_s2 + $0x1508] sm:$0xff]  ;;  %v709_v43 = vld [vmem:[%s5702_s2 + $0x1500] sm:$0xff] }
  0x92   :  { %1219 = vmatpush1.msra.mxu0 %v589_v34  ;;  %1290 = vmatpush1.msra.mxu1 %v717_v35  ;;  %v578_v44 = vld [vmem:[%s5702_s2 + $0x10e8] sm:$0xff]  ;;  %v577_v46 = vld [vmem:[%s5702_s2 + $0x10e0] sm:$0xff] }
  0x93   :  { %1220 = vmatprep.subr.mxu0 %v586_v36  ;;  %1291 = vmatprep.subr.mxu1 %v714_v37  ;;  %v706_v45 = vld [vmem:[%s5702_s2 + $0x14e8] sm:$0xff]  ;;  %v705_v47 = vld [vmem:[%s5702_s2 + $0x14e0] sm:$0xff] }
  0x94   :  { %1221 = vmatpush1.msra.mxu0 %v585_v38  ;;  %1292 = vmatpush1.msra.mxu1 %v713_v39  ;;  %v574_v48 = vld [vmem:[%s5702_s2 + $0x10c8] sm:$0xff]  ;;  %v573_v50 = vld [vmem:[%s5702_s2 + $0x10c0] sm:$0xff] }
  0x95   :  { %1222 = vmatprep.subr.mxu0 %v582_v40  ;;  %1293 = vmatprep.subr.mxu1 %v710_v41  ;;  %v702_v49 = vld [vmem:[%s5702_s2 + $0x14c8] sm:$0xff]  ;;  %v701_v51 = vld [vmem:[%s5702_s2 + $0x14c0] sm:$0xff] }
  0x96   :  { %1223 = vmatpush1.msra.mxu0 %v581_v42  ;;  %1294 = vmatpush1.msra.mxu1 %v709_v43  ;;  %v570_v52 = vld [vmem:[%s5702_s2 + $0x10a8] sm:$0xff]  ;;  %v569_v54 = vld [vmem:[%s5702_s2 + $0x10a0] sm:$0xff] }
  0x97   :  { %1224 = vmatprep.subr.mxu0 %v578_v44  ;;  %1295 = vmatprep.subr.mxu1 %v706_v45  ;;  %v698_v53 = vld [vmem:[%s5702_s2 + $0x14a8] sm:$0xff]  ;;  %v697_v55 = vld [vmem:[%s5702_s2 + $0x14a0] sm:$0xff] }
  0x98   :  { %1225 = vmatpush1.msra.mxu0 %v577_v46  ;;  %1296 = vmatpush1.msra.mxu1 %v705_v47  ;;  %v566_v56 = vld [vmem:[%s5702_s2 + $0x1088] sm:$0xff]  ;;  %v565_v58 = vld [vmem:[%s5702_s2 + $0x1080] sm:$0xff] }
  0x99   :  { %1226 = vmatprep.subr.mxu0 %v574_v48  ;;  %1297 = vmatprep.subr.mxu1 %v702_v49  ;;  %v694_v57 = vld [vmem:[%s5702_s2 + $0x1488] sm:$0xff]  ;;  %v693_v59 = vld [vmem:[%s5702_s2 + $0x1480] sm:$0xff] }
  0x9a   :  { %1227 = vmatpush1.msra.mxu0 %v573_v50  ;;  %1298 = vmatpush1.msra.mxu1 %v701_v51  ;;  %v562_v60 = vld [vmem:[%s5702_s2 + $0x1068] sm:$0xff]  ;;  %v561_v62 = vld [vmem:[%s5702_s2 + $0x1060] sm:$0xff] }
  0x9b   :  { %1228 = vmatprep.subr.mxu0 %v570_v52  ;;  %1299 = vmatprep.subr.mxu1 %v698_v53  ;;  %v690_v61 = vld [vmem:[%s5702_s2 + $0x1468] sm:$0xff]  ;;  %v689_v63 = vld [vmem:[%s5702_s2 + $0x1460] sm:$0xff] }
  0x9c   :  { %1229 = vmatpush1.msra.mxu0 %v569_v54  ;;  %1300 = vmatpush1.msra.mxu1 %v697_v55  ;;  %v558_v1 = vld [vmem:[%s5702_s2 + $0x1048] sm:$0xff]  ;;  %v557_v4 = vld [vmem:[%s5702_s2 + $0x1040] sm:$0xff] }
  0x9d   :  { %1230 = vmatprep.subr.mxu0 %v566_v56  ;;  %1301 = vmatprep.subr.mxu1 %v694_v57  ;;  %v686_v2 = vld [vmem:[%s5702_s2 + $0x1448] sm:$0xff]  ;;  %v685_v5 = vld [vmem:[%s5702_s2 + $0x1440] sm:$0xff] }
  0x9e   :  { %1231 = vmatpush1.msra.mxu0 %v565_v58  ;;  %1302 = vmatpush1.msra.mxu1 %v693_v59  ;;  %v554_v6 = vld [vmem:[%s5702_s2 + $0x1028] sm:$0xff]  ;;  %v553_v9 = vld [vmem:[%s5702_s2 + $0x1020] sm:$0xff] }
  0x9f   :  { %1232 = vmatprep.subr.mxu0 %v562_v60  ;;  %1303 = vmatprep.subr.mxu1 %v690_v61  ;;  %v682_v7 = vld [vmem:[%s5702_s2 + $0x1428] sm:$0xff]  ;;  %v681_v10 = vld [vmem:[%s5702_s2 + $0x1420] sm:$0xff] }
  0xa0   :  { %1233 = vmatpush1.msra.mxu0 %v561_v62  ;;  %1304 = vmatpush1.msra.mxu1 %v689_v63  ;;  %v550_v12 = vld [vmem:[%s5702_s2 + $0x1008] sm:$0xff]  ;;  %v549_v14 = vld [vmem:[%s5702_s2 + $0x1000] sm:$0xff] }
  0xa1   :  { %1234 = vmatprep.subr.mxu0 %v558_v1  ;;  %1305 = vmatprep.subr.mxu1 %v686_v2  ;;  %v678_v13 = vld [vmem:[%s5702_s2 + $0x1408] sm:$0xff]  ;;  %v677_v15 = vld [vmem:[%s5702_s2 + $0x1400] sm:$0xff] }
  0xa2   :  { %1235 = vmatpush1.msra.mxu0 %v557_v4  ;;  %1306 = vmatpush1.msra.mxu1 %v685_v5  ;;  %v674_v16 = vld [vmem:[%s5702_s2 + $0x13e8] sm:$0xff]  ;;  %v673_v18 = vld [vmem:[%s5702_s2 + $0x13e0] sm:$0xff] }
  0xa3   :  { %1236 = vmatprep.subr.mxu0 %v554_v6  ;;  %1307 = vmatprep.subr.mxu1 %v682_v7  ;;  %v802_v17 = vld [vmem:[%s5702_s2 + $0x17e8] sm:$0xff]  ;;  %v801_v19 = vld [vmem:[%s5702_s2 + $0x17e0] sm:$0xff] }
  0xa4   :  { %1237 = vmatpush1.msra.mxu0 %v553_v9  ;;  %1308 = vmatpush1.msra.mxu1 %v681_v10  ;;  %v670_v20 = vld [vmem:[%s5702_s2 + $0x13c8] sm:$0xff]  ;;  %v669_v22 = vld [vmem:[%s5702_s2 + $0x13c0] sm:$0xff] }
  0xa5   :  { %1238 = vmatprep.subr.mxu0 %v550_v12  ;;  %1309 = vmatprep.subr.mxu1 %v678_v13  ;;  %v798_v21 = vld [vmem:[%s5702_s2 + $0x17c8] sm:$0xff]  ;;  %v797_v23 = vld [vmem:[%s5702_s2 + $0x17c0] sm:$0xff] }
  0xa6   :  { %1239 = vmatpush1.msra.mxu0 %v549_v14  ;;  %1310 = vmatpush1.msra.mxu1 %v677_v15  ;;  %v666_v24 = vld [vmem:[%s5702_s2 + $0x13a8] sm:$0xff]  ;;  %v665_v26 = vld [vmem:[%s5702_s2 + $0x13a0] sm:$0xff] }
  0xa7   :  { %1240 = vmatprep.subr.mxu0 %v674_v16  ;;  %1311 = vmatprep.subr.mxu1 %v802_v17  ;;  %v794_v25 = vld [vmem:[%s5702_s2 + $0x17a8] sm:$0xff]  ;;  %v793_v27 = vld [vmem:[%s5702_s2 + $0x17a0] sm:$0xff] }
  0xa8   :  { %1241 = vmatpush2.msra.mxu0 %v673_v18  ;;  %1312 = vmatpush2.msra.mxu1 %v801_v19  ;;  %v662_v28 = vld [vmem:[%s5702_s2 + $0x1388] sm:$0xff]  ;;  %v661_v30 = vld [vmem:[%s5702_s2 + $0x1380] sm:$0xff] }
  0xa9   :  { %1242 = vmatprep.subr.mxu0 %v670_v20  ;;  %1313 = vmatprep.subr.mxu1 %v798_v21  ;;  %v790_v29 = vld [vmem:[%s5702_s2 + $0x1788] sm:$0xff]  ;;  %v789_v31 = vld [vmem:[%s5702_s2 + $0x1780] sm:$0xff] }
  0xaa   :  { %1243 = vmatpush2.msra.mxu0 %v669_v22  ;;  %1314 = vmatpush2.msra.mxu1 %v797_v23  ;;  %v658_v32 = vld [vmem:[%s5702_s2 + $0x1368] sm:$0xff]  ;;  %v657_v34 = vld [vmem:[%s5702_s2 + $0x1360] sm:$0xff] }
  0xab   :  { %1244 = vmatprep.subr.mxu0 %v666_v24  ;;  %1315 = vmatprep.subr.mxu1 %v794_v25  ;;  %v786_v33 = vld [vmem:[%s5702_s2 + $0x1768] sm:$0xff]  ;;  %v785_v35 = vld [vmem:[%s5702_s2 + $0x1760] sm:$0xff]  ;;  %v100_v25 = vld [vmem:[%s5702_s2 + $0x1f8] sm:$0xff] }
  0xac   :  { %1245 = vmatpush2.msra.mxu0 %v665_v26  ;;  %1316 = vmatpush2.msra.mxu1 %v793_v27  ;;  %v654_v36 = vld [vmem:[%s5702_s2 + $0x1348] sm:$0xff]  ;;  %v653_v38 = vld [vmem:[%s5702_s2 + $0x1340] sm:$0xff]  ;;  %v99_v27 = vld [vmem:[%s5702_s2 + $0x1f0] sm:$0xff] }
  0xad   :  { %1246 = vmatprep.subr.mxu0 %v662_v28  ;;  %1317 = vmatprep.subr.mxu1 %v790_v29  ;;  %v782_v37 = vld [vmem:[%s5702_s2 + $0x1748] sm:$0xff]  ;;  %v781_v39 = vld [vmem:[%s5702_s2 + $0x1740] sm:$0xff]  ;;  %v96_v29 = vld [vmem:[%s5702_s2 + $0x1d8] sm:$0xff] }
  0xae   :  { %1247 = vmatpush2.msra.mxu0 %v661_v30  ;;  %1318 = vmatpush2.msra.mxu1 %v789_v31  ;;  %v650_v40 = vld [vmem:[%s5702_s2 + $0x1328] sm:$0xff]  ;;  %v649_v42 = vld [vmem:[%s5702_s2 + $0x1320] sm:$0xff]  ;;  %v95_v31 = vld [vmem:[%s5702_s2 + $0x1d0] sm:$0xff] }
  0xaf   :  { %1248 = vmatprep.subr.mxu0 %v658_v32  ;;  %1319 = vmatprep.subr.mxu1 %v786_v33  ;;  %v778_v41 = vld [vmem:[%s5702_s2 + $0x1728] sm:$0xff]  ;;  %v777_v43 = vld [vmem:[%s5702_s2 + $0x1720] sm:$0xff]  ;;  %v92_v33 = vld [vmem:[%s5702_s2 + $0x1b8] sm:$0xff] }
  0xb0   :  { %1249 = vmatpush2.msra.mxu0 %v657_v34  ;;  %1320 = vmatpush2.msra.mxu1 %v785_v35  ;;  %v646_v44 = vld [vmem:[%s5702_s2 + $0x1308] sm:$0xff]  ;;  %v645_v46 = vld [vmem:[%s5702_s2 + $0x1300] sm:$0xff]  ;;  %v91_v35 = vld [vmem:[%s5702_s2 + $0x1b0] sm:$0xff] }
  0xb1   :  { %1250 = vmatprep.subr.mxu0 %v654_v36  ;;  %1321 = vmatprep.subr.mxu1 %v782_v37  ;;  %v774_v45 = vld [vmem:[%s5702_s2 + $0x1708] sm:$0xff]  ;;  %v773_v47 = vld [vmem:[%s5702_s2 + $0x1700] sm:$0xff]  ;;  %v88_v37 = vld [vmem:[%s5702_s2 + $0x198] sm:$0xff] }
  0xb2   :  { %1251 = vmatpush2.msra.mxu0 %v653_v38  ;;  %1322 = vmatpush2.msra.mxu1 %v781_v39  ;;  %v642_v48 = vld [vmem:[%s5702_s2 + $0x12e8] sm:$0xff]  ;;  %v641_v50 = vld [vmem:[%s5702_s2 + $0x12e0] sm:$0xff]  ;;  %v87_v39 = vld [vmem:[%s5702_s2 + $0x190] sm:$0xff] }
  0xb3   :  { %1252 = vmatprep.subr.mxu0 %v650_v40  ;;  %1323 = vmatprep.subr.mxu1 %v778_v41  ;;  %v770_v49 = vld [vmem:[%s5702_s2 + $0x16e8] sm:$0xff]  ;;  %v769_v51 = vld [vmem:[%s5702_s2 + $0x16e0] sm:$0xff]  ;;  %v84_v41 = vld [vmem:[%s5702_s2 + $0x178] sm:$0xff] }
  0xb4   :  { %1253 = vmatpush2.msra.mxu0 %v649_v42  ;;  %1324 = vmatpush2.msra.mxu1 %v777_v43  ;;  %v638_v52 = vld [vmem:[%s5702_s2 + $0x12c8] sm:$0xff]  ;;  %v637_v54 = vld [vmem:[%s5702_s2 + $0x12c0] sm:$0xff]  ;;  %v83_v43 = vld [vmem:[%s5702_s2 + $0x170] sm:$0xff] }
  0xb5   :  { %1254 = vmatprep.subr.mxu0 %v646_v44  ;;  %1325 = vmatprep.subr.mxu1 %v774_v45  ;;  %v766_v53 = vld [vmem:[%s5702_s2 + $0x16c8] sm:$0xff]  ;;  %v765_v55 = vld [vmem:[%s5702_s2 + $0x16c0] sm:$0xff]  ;;  %v80_v45 = vld [vmem:[%s5702_s2 + $0x158] sm:$0xff] }
  0xb6   :  { %1255 = vmatpush2.msra.mxu0 %v645_v46  ;;  %1326 = vmatpush2.msra.mxu1 %v773_v47  ;;  %v634_v56 = vld [vmem:[%s5702_s2 + $0x12a8] sm:$0xff]  ;;  %v633_v58 = vld [vmem:[%s5702_s2 + $0x12a0] sm:$0xff]  ;;  %v79_v47 = vld [vmem:[%s5702_s2 + $0x150] sm:$0xff] }
  0xb7   :  { %1256 = vmatprep.subr.mxu0 %v642_v48  ;;  %1327 = vmatprep.subr.mxu1 %v770_v49  ;;  %v762_v57 = vld [vmem:[%s5702_s2 + $0x16a8] sm:$0xff]  ;;  %v761_v59 = vld [vmem:[%s5702_s2 + $0x16a0] sm:$0xff]  ;;  %v76_v49 = vld [vmem:[%s5702_s2 + $0x138] sm:$0xff] }
  0xb8   :  { %1257 = vmatpush2.msra.mxu0 %v641_v50  ;;  %1328 = vmatpush2.msra.mxu1 %v769_v51  ;;  %v630_v60 = vld [vmem:[%s5702_s2 + $0x1288] sm:$0xff]  ;;  %v629_v62 = vld [vmem:[%s5702_s2 + $0x1280] sm:$0xff]  ;;  %v75_v51 = vld [vmem:[%s5702_s2 + $0x130] sm:$0xff] }
  0xb9   :  { %1258 = vmatprep.subr.mxu0 %v638_v52  ;;  %1329 = vmatprep.subr.mxu1 %v766_v53  ;;  %v758_v61 = vld [vmem:[%s5702_s2 + $0x1688] sm:$0xff]  ;;  %v757_v63 = vld [vmem:[%s5702_s2 + $0x1680] sm:$0xff]  ;;  %v72_v53 = vld [vmem:[%s5702_s2 + $0x118] sm:$0xff] }
  0xba   :  { %1259 = vmatpush2.msra.mxu0 %v637_v54  ;;  %1330 = vmatpush2.msra.mxu1 %v765_v55  ;;  %v626_v1 = vld [vmem:[%s5702_s2 + $0x1268] sm:$0xff]  ;;  %v625_v4 = vld [vmem:[%s5702_s2 + $0x1260] sm:$0xff]  ;;  %v71_v55 = vld [vmem:[%s5702_s2 + $0x110] sm:$0xff] }
  0xbb   :  { %1260 = vmatprep.subr.mxu0 %v634_v56  ;;  %1331 = vmatprep.subr.mxu1 %v762_v57  ;;  %v754_v2 = vld [vmem:[%s5702_s2 + $0x1668] sm:$0xff]  ;;  %v753_v5 = vld [vmem:[%s5702_s2 + $0x1660] sm:$0xff]  ;;  %v68_v57 = vld [vmem:[%s5702_s2 + $0xf8] sm:$0xff] }
  0xbc   :  { %1261 = vmatpush2.msra.mxu0 %v633_v58  ;;  %1332 = vmatpush2.msra.mxu1 %v761_v59  ;;  %v622_v6 = vld [vmem:[%s5702_s2 + $0x1248] sm:$0xff]  ;;  %v621_v9 = vld [vmem:[%s5702_s2 + $0x1240] sm:$0xff]  ;;  %v67_v59 = vld [vmem:[%s5702_s2 + $0xf0] sm:$0xff] }
  0xbd   :  { %1262 = vmatprep.subr.mxu0 %v630_v60  ;;  %1333 = vmatprep.subr.mxu1 %v758_v61  ;;  %v750_v7 = vld [vmem:[%s5702_s2 + $0x1648] sm:$0xff]  ;;  %v749_v10 = vld [vmem:[%s5702_s2 + $0x1640] sm:$0xff]  ;;  %v64_v61 = vld [vmem:[%s5702_s2 + $0xd8] sm:$0xff] }
  0xbe   :  { %1263 = vmatpush2.msra.mxu0 %v629_v62  ;;  %1334 = vmatpush2.msra.mxu1 %v757_v63  ;;  %v34_v12 = vld [vmem:[%s5703_s0 + $0x20] sm:$0xff]  ;;  %v618_v13 = vld [vmem:[%s5702_s2 + $0x1228] sm:$0xff]  ;;  %v63_v63 = vld [vmem:[%s5702_s2 + $0xd0] sm:$0xff] }
  0xbf   :  { %1264 = vmatprep.subr.mxu0 %v626_v1  ;;  %1335 = vmatprep.subr.mxu1 %v754_v2  ;;  %v746_v14 = vld [vmem:[%s5702_s2 + $0x1628] sm:$0xff]  ;;  %v617_v15 = vld [vmem:[%s5702_s2 + $0x1220] sm:$0xff]  ;;  %v3978_v20 = vcombine.high %v34_v12, %v34_v12  ;;  %v60_v2 = vld [vmem:[%s5702_s2 + $0xb8] sm:$0xff] }
  0xc0   :  { %1265 = vmatpush2.msra.mxu0 %v625_v4  ;;  %1336 = vmatpush2.msra.mxu1 %v753_v5  ;;  %v745_v16 = vld [vmem:[%s5702_s2 + $0x1620] sm:$0xff]  ;;  %v35_v17 = vld [vmem:[%s5703_s0 + $0x28] sm:$0xff]  ;;  %v59_v5 = vld [vmem:[%s5702_s2 + $0xb0] sm:$0xff] }
  0xc1   :  { %1266 = vmatprep.subr.mxu0 %v622_v6  ;;  %1337 = vmatprep.subr.mxu1 %v750_v7  ;;  %v614_v18 = vld [vmem:[%s5702_s2 + $0x1208] sm:$0xff]  ;;  %v613_v21 = vld [vmem:[%s5702_s2 + $0x1200] sm:$0xff]  ;;  %v3986_v23 = vcombine.high %v35_v17, %v35_v17  ;;  %v36_v6 = vld [vmem:[%s5703_s0 + $0x30] sm:$0xf] }
  0xc2   :  { %1267 = vmatpush2.msra.mxu0 %v621_v9  ;;  %1338 = vmatpush2.msra.mxu1 %v749_v10  ;;  %v742_v19 = vld [vmem:[%s5702_s2 + $0x1608] sm:$0xff]  ;;  %v741_v22 = vld [vmem:[%s5702_s2 + $0x1600] sm:$0xff]  ;;  %v56_v7 = vld [vmem:[%s5702_s2 + $0x98] sm:$0xff]  ;;  %v2753_v10 = vmov 0.0  }
  0xc3   :  { %1268 = vmatprep.subr.mxu0 %v618_v13  ;;  %1339 = vmatprep.subr.mxu1 %v746_v14  ;;  %v846_v24 = vld [vmem:[%s5702_s2 + $0x1948] sm:$0xf]  ;;  %v845_v26 = vld [vmem:[%s5702_s2 + $0x1940] sm:$0xf]  ;;  %v228_v9 = vld [vmem:[%s5702_s2 + $0x5f8] sm:$0xff] }
  0xc4   :  { %1269 = vmatpush2.msra.mxu0 %v617_v15  ;;  %1340 = vmatpush2.msra.mxu1 %v745_v16  ;;  %v842_v28 = vld [vmem:[%s5702_s2 + $0x1928] sm:$0xff]  ;;  %v841_v30 = vld [vmem:[%s5702_s2 + $0x1920] sm:$0xff]  ;;  %v227_v13 = vld [vmem:[%s5702_s2 + $0x5f0] sm:$0xff] }
  0xc5   :  { %1270 = vmatprep.subr.mxu0 %v614_v18  ;;  %1341 = vmatprep.subr.mxu1 %v742_v19  ;;  %v838_v32 = vld [vmem:[%s5702_s2 + $0x1908] sm:$0xff]  ;;  %v837_v34 = vld [vmem:[%s5702_s2 + $0x1900] sm:$0xff]  ;;  %v52_v14 = vld [vmem:[%s5702_s2 + $0x78] sm:$0xff] }
  0xc6   :  { %1271 = vmatpush2.msra.mxu0 %v613_v21  ;;  %1272 = vmatprep.mubr.f32.mxu0 %v3978_v20  ;;  %v834_v36 = vld [vmem:[%s5702_s2 + $0x18e8] sm:$0xff]  ;;  %v833_v38 = vld [vmem:[%s5702_s2 + $0x18e0] sm:$0xff]  ;;  %v224_v15 = vld [vmem:[%s5702_s2 + $0x5d8] sm:$0xff] }
  0xc7   :  { %1342 = vmatpush2.msra.mxu1 %v741_v22  ;;  %1273 = vmatmul.mubr.f32.vlgmr.msra.gmra.mxu0 %v34_v12  ;;  %v830_v40 = vld [vmem:[%s5702_s2 + $0x18c8] sm:$0xff]  ;;  %v829_v42 = vld [vmem:[%s5702_s2 + $0x18c0] sm:$0xff]  ;;  %v55_v12 = vld [vmem:[%s5702_s2 + $0x90] sm:$0xff] }
  0xc8   :  { %1343 = vmatprep.mubr.f32.mxu1 %v3986_v23  ;;  %2641 = vmatprep.subr.msk.mxu0 %vm911_vm0, %v846_v24  ;;  %v826_v44 = vld [vmem:[%s5702_s2 + $0x18a8] sm:$0xff]  ;;  %v825_v46 = vld [vmem:[%s5702_s2 + $0x18a0] sm:$0xff]  ;;  %v51_v16 = vld [vmem:[%s5702_s2 + $0x70] sm:$0xff] }
  0xc9   :  { %1421 = vmatprep.subr.mxu1 %v100_v25  ;;  %1344 = vmatmul.mubr.f32.vlgmr.msra.gmra.mxu1 %v35_v17  ;;  %v822_v48 = vld [vmem:[%s5702_s2 + $0x1888] sm:$0xff]  ;;  %v821_v50 = vld [vmem:[%s5702_s2 + $0x1880] sm:$0xff]  ;;  %v223_v17 = vld [vmem:[%s5702_s2 + $0x5d0] sm:$0xff] }
  0xca   :  { %2642 = vmatpush1.msk.msra.mxu0 %vm911_vm0, %v845_v26  ;;  %1422 = vmatpush1.msra.mxu1 %v99_v27  ;;  %v818_v52 = vld [vmem:[%s5702_s2 + $0x1868] sm:$0xff]  ;;  %v817_v54 = vld [vmem:[%s5702_s2 + $0x1860] sm:$0xff]  ;;  %v48_v18 = vld [vmem:[%s5702_s2 + $0x58] sm:$0xff] }
  0xcb   :  { %1362 = vmatprep.subr.mxu0 %v842_v28  ;;  %1423 = vmatprep.subr.mxu1 %v96_v29  ;;  %v814_v56 = vld [vmem:[%s5702_s2 + $0x1848] sm:$0xff]  ;;  %v813_v58 = vld [vmem:[%s5702_s2 + $0x1840] sm:$0xff]  ;;  %v220_v19 = vld [vmem:[%s5702_s2 + $0x5b8] sm:$0xff] }
  0xcc   :  { %1363 = vmatpush1.msra.mxu0 %v841_v30  ;;  %1424 = vmatpush1.msra.mxu1 %v95_v31  ;;  %v810_v60 = vld [vmem:[%s5702_s2 + $0x1828] sm:$0xff]  ;;  %v809_v62 = vld [vmem:[%s5702_s2 + $0x1820] sm:$0xff]  ;;  %v47_v21 = vld [vmem:[%s5702_s2 + $0x50] sm:$0xff] }
  0xcd   :  { %1364 = vmatprep.subr.mxu0 %v838_v32  ;;  %1425 = vmatprep.subr.mxu1 %v92_v33  ;;  %v806_v1 = vld [vmem:[%s5702_s2 + $0x1808] sm:$0xff]  ;;  %v805_v4 = vld [vmem:[%s5702_s2 + $0x1800] sm:$0xff]  ;;  %v219_v22 = vld [vmem:[%s5702_s2 + $0x5b0] sm:$0xff] }
  0xce   :  { %1365 = vmatpush1.msra.mxu0 %v837_v34  ;;  %1426 = vmatpush1.msra.mxu1 %v91_v35  ;;  %v44_v24 = vld [vmem:[%s5702_s2 + $0x38] sm:$0xff]  ;;  %v43_v26 = vld [vmem:[%s5702_s2 + $0x30] sm:$0xff] }
  0xcf   :  { %1366 = vmatprep.subr.mxu0 %v834_v36  ;;  %1427 = vmatprep.subr.mxu1 %v88_v37  ;;  %v216_v25 = vld [vmem:[%s5702_s2 + $0x598] sm:$0xff]  ;;  %v215_v27 = vld [vmem:[%s5702_s2 + $0x590] sm:$0xff] }
  0xd0   :  { %1367 = vmatpush1.msra.mxu0 %v833_v38  ;;  %1428 = vmatpush1.msra.mxu1 %v87_v39  ;;  %v40_v28 = vld [vmem:[%s5702_s2 + $0x18] sm:$0xff]  ;;  %v39_v30 = vld [vmem:[%s5702_s2 + $0x10] sm:$0xff] }
  0xd1   :  { %1368 = vmatprep.subr.mxu0 %v830_v40  ;;  %1429 = vmatprep.subr.mxu1 %v84_v41  ;;  %v212_v29 = vld [vmem:[%s5702_s2 + $0x578] sm:$0xff]  ;;  %v211_v31 = vld [vmem:[%s5702_s2 + $0x570] sm:$0xff] }
  0xd2   :  { %1369 = vmatpush1.msra.mxu0 %v829_v42  ;;  %1430 = vmatpush1.msra.mxu1 %v83_v43  ;;  %v164_v32 = vld [vmem:[%s5702_s2 + $0x3f8] sm:$0xff]  ;;  %v163_v34 = vld [vmem:[%s5702_s2 + $0x3f0] sm:$0xff] }
  0xd3   :  { %1370 = vmatprep.subr.mxu0 %v826_v44  ;;  %1431 = vmatprep.subr.mxu1 %v80_v45  ;;  %v208_v33 = vld [vmem:[%s5702_s2 + $0x558] sm:$0xff]  ;;  %v207_v35 = vld [vmem:[%s5702_s2 + $0x550] sm:$0xff] }
  0xd4   :  { %1371 = vmatpush1.msra.mxu0 %v825_v46  ;;  %1432 = vmatpush1.msra.mxu1 %v79_v47  ;;  %v160_v36 = vld [vmem:[%s5702_s2 + $0x3d8] sm:$0xff]  ;;  %v159_v38 = vld [vmem:[%s5702_s2 + $0x3d0] sm:$0xff] }
  0xd5   :  { %1372 = vmatprep.subr.mxu0 %v822_v48  ;;  %1433 = vmatprep.subr.mxu1 %v76_v49  ;;  %v204_v37 = vld [vmem:[%s5702_s2 + $0x538] sm:$0xff]  ;;  %v203_v39 = vld [vmem:[%s5702_s2 + $0x530] sm:$0xff] }
  0xd6   :  { %1373 = vmatpush1.msra.mxu0 %v821_v50  ;;  %1434 = vmatpush1.msra.mxu1 %v75_v51  ;;  %v156_v40 = vld [vmem:[%s5702_s2 + $0x3b8] sm:$0xff]  ;;  %v155_v42 = vld [vmem:[%s5702_s2 + $0x3b0] sm:$0xff] }
  0xd7   :  { %1374 = vmatprep.subr.mxu0 %v818_v52  ;;  %1435 = vmatprep.subr.mxu1 %v72_v53  ;;  %v200_v41 = vld [vmem:[%s5702_s2 + $0x518] sm:$0xff]  ;;  %v199_v43 = vld [vmem:[%s5702_s2 + $0x510] sm:$0xff] }
  0xd8   :  { %1375 = vmatpush1.msra.mxu0 %v817_v54  ;;  %1436 = vmatpush1.msra.mxu1 %v71_v55  ;;  %v152_v44 = vld [vmem:[%s5702_s2 + $0x398] sm:$0xff]  ;;  %v151_v46 = vld [vmem:[%s5702_s2 + $0x390] sm:$0xff] }
  0xd9   :  { %1376 = vmatprep.subr.mxu0 %v814_v56  ;;  %1437 = vmatprep.subr.mxu1 %v68_v57  ;;  %v196_v45 = vld [vmem:[%s5702_s2 + $0x4f8] sm:$0xff]  ;;  %v195_v47 = vld [vmem:[%s5702_s2 + $0x4f0] sm:$0xff] }
  0xda   :  { %1377 = vmatpush1.msra.mxu0 %v813_v58  ;;  %1438 = vmatpush1.msra.mxu1 %v67_v59  ;;  %v148_v48 = vld [vmem:[%s5702_s2 + $0x378] sm:$0xff]  ;;  %v147_v50 = vld [vmem:[%s5702_s2 + $0x370] sm:$0xff] }
  0xdb   :  { %1378 = vmatprep.subr.mxu0 %v810_v60  ;;  %1439 = vmatprep.subr.mxu1 %v64_v61  ;;  %v192_v49 = vld [vmem:[%s5702_s2 + $0x4d8] sm:$0xff]  ;;  %v191_v51 = vld [vmem:[%s5702_s2 + $0x4d0] sm:$0xff] }
  0xdc   :  { %1379 = vmatpush1.msra.mxu0 %v809_v62  ;;  %1440 = vmatpush1.msra.mxu1 %v63_v63  ;;  %v144_v52 = vld [vmem:[%s5702_s2 + $0x358] sm:$0xff]  ;;  %v143_v54 = vld [vmem:[%s5702_s2 + $0x350] sm:$0xff] }
  0xdd   :  { %1380 = vmatprep.subr.mxu0 %v806_v1  ;;  %1441 = vmatprep.subr.mxu1 %v60_v2  ;;  %v188_v53 = vld [vmem:[%s5702_s2 + $0x4b8] sm:$0xff]  ;;  %v187_v55 = vld [vmem:[%s5702_s2 + $0x4b0] sm:$0xff] }
  0xde   :  { %1381 = vmatpush1.msra.mxu0 %v805_v4  ;;  %1414 = vmatprep.mubr.f32.mxu0 %v2753_v10  ;;  %v140_v56 = vld [vmem:[%s5702_s2 + $0x338] sm:$0xff]  ;;  %v139_v58 = vld [vmem:[%s5702_s2 + $0x330] sm:$0xff] }
  0xdf   :  { %1442 = vmatpush1.msra.mxu1 %v59_v5  ;;  %2643 = vmatmul.mubr.msk.f32.vlgmr.msra.gmra.mxu0 %vm908_vm1, %v36_v6  ;;  %v184_v57 = vld [vmem:[%s5702_s2 + $0x498] sm:$0xff]  ;;  %v183_v59 = vld [vmem:[%s5702_s2 + $0x490] sm:$0xff] }
  0xe0   :  { %1443 = vmatprep.subr.mxu1 %v56_v7  ;;  %1492 = vmatprep.subr.mxu0 %v228_v9  ;;  %v136_v60 = vld [vmem:[%s5702_s2 + $0x318] sm:$0xff]  ;;  %v135_v62 = vld [vmem:[%s5702_s2 + $0x310] sm:$0xff] }
  0xe1   :  { %1444 = vmatpush1.msra.mxu1 %v55_v12  ;;  %1493 = vmatpush1.msra.mxu0 %v227_v13  ;;  %v180_v61 = vld [vmem:[%s5702_s2 + $0x478] sm:$0xff]  ;;  %v179_v63 = vld [vmem:[%s5702_s2 + $0x470] sm:$0xff] }
  0xe2   :  { %1445 = vmatprep.subr.mxu1 %v52_v14  ;;  %1494 = vmatprep.subr.mxu0 %v224_v15  ;;  %v132_v1 = vld [vmem:[%s5702_s2 + $0x2f8] sm:$0xff]  ;;  %v131_v4 = vld [vmem:[%s5702_s2 + $0x2f0] sm:$0xff] }
  0xe3   :  { %1446 = vmatpush1.msra.mxu1 %v51_v16  ;;  %1495 = vmatpush1.msra.mxu0 %v223_v17  ;;  %v176_v2 = vld [vmem:[%s5702_s2 + $0x458] sm:$0xff]  ;;  %v175_v5 = vld [vmem:[%s5702_s2 + $0x450] sm:$0xff] }
  0xe4   :  { %1447 = vmatprep.subr.mxu1 %v48_v18  ;;  %1496 = vmatprep.subr.mxu0 %v220_v19  ;;  %v128_v6 = vld [vmem:[%s5702_s2 + $0x2d8] sm:$0xff]  ;;  %v127_v9 = vld [vmem:[%s5702_s2 + $0x2d0] sm:$0xff] }
  0xe5   :  { %1448 = vmatpush1.msra.mxu1 %v47_v21  ;;  %1497 = vmatpush1.msra.mxu0 %v219_v22  ;;  %v172_v7 = vld [vmem:[%s5702_s2 + $0x438] sm:$0xff]  ;;  %v171_v12 = vld [vmem:[%s5702_s2 + $0x430] sm:$0xff] }
  0xe6   :  { %1449 = vmatprep.subr.mxu1 %v44_v24  ;;  %1498 = vmatprep.subr.mxu0 %v216_v25  ;;  %v124_v13 = vld [vmem:[%s5702_s2 + $0x2b8] sm:$0xff]  ;;  %v123_v15 = vld [vmem:[%s5702_s2 + $0x2b0] sm:$0xff] }
  0xe7   :  { %1450 = vmatpush1.msra.mxu1 %v43_v26  ;;  %1499 = vmatpush1.msra.mxu0 %v215_v27  ;;  %v168_v14 = vld [vmem:[%s5702_s2 + $0x418] sm:$0xff]  ;;  %v167_v16 = vld [vmem:[%s5702_s2 + $0x410] sm:$0xff] }
  0xe8   :  { %1451 = vmatprep.subr.mxu1 %v40_v28  ;;  %1500 = vmatprep.subr.mxu0 %v212_v29  ;;  %v120_v17 = vld [vmem:[%s5702_s2 + $0x298] sm:$0xff]  ;;  %v119_v19 = vld [vmem:[%s5702_s2 + $0x290] sm:$0xff] }
  0xe9   :  { %1452 = vmatpush1.msra.mxu1 %v39_v30  ;;  %1501 = vmatpush1.msra.mxu0 %v211_v31  ;;  %v292_v18 = vld [vmem:[%s5702_s2 + $0x7f8] sm:$0xff]  ;;  %v291_v21 = vld [vmem:[%s5702_s2 + $0x7f0] sm:$0xff] }
  0xea   :  { %1453 = vmatprep.subr.mxu1 %v164_v32  ;;  %1502 = vmatprep.subr.mxu0 %v208_v33  ;;  %v116_v22 = vld [vmem:[%s5702_s2 + $0x278] sm:$0xff]  ;;  %v115_v25 = vld [vmem:[%s5702_s2 + $0x270] sm:$0xff] }
  0xeb   :  { %1454 = vmatpush2.msra.mxu1 %v163_v34  ;;  %1503 = vmatpush1.msra.mxu0 %v207_v35  ;;  %v288_v24 = vld [vmem:[%s5702_s2 + $0x7d8] sm:$0xff]  ;;  %v287_v26 = vld [vmem:[%s5702_s2 + $0x7d0] sm:$0xff] }
  0xec   :  { %1455 = vmatprep.subr.mxu1 %v160_v36  ;;  %1504 = vmatprep.subr.mxu0 %v204_v37  ;;  %v112_v27 = vld [vmem:[%s5702_s2 + $0x258] sm:$0xff]  ;;  %v111_v29 = vld [vmem:[%s5702_s2 + $0x250] sm:$0xff] }
  0xed   :  { %1456 = vmatpush2.msra.mxu1 %v159_v38  ;;  %1505 = vmatpush1.msra.mxu0 %v203_v39  ;;  %v284_v28 = vld [vmem:[%s5702_s2 + $0x7b8] sm:$0xff]  ;;  %v283_v30 = vld [vmem:[%s5702_s2 + $0x7b0] sm:$0xff] }
  0xee   :  { %1457 = vmatprep.subr.mxu1 %v156_v40  ;;  %1506 = vmatprep.subr.mxu0 %v200_v41  ;;  %v108_v31 = vld [vmem:[%s5702_s2 + $0x238] sm:$0xff]  ;;  %v107_v33 = vld [vmem:[%s5702_s2 + $0x230] sm:$0xff] }
  0xef   :  { %1458 = vmatpush2.msra.mxu1 %v155_v42  ;;  %1507 = vmatpush1.msra.mxu0 %v199_v43  ;;  %v280_v32 = vld [vmem:[%s5702_s2 + $0x798] sm:$0xff]  ;;  %v279_v34 = vld [vmem:[%s5702_s2 + $0x790] sm:$0xff] }
  0xf0   :  { %1459 = vmatprep.subr.mxu1 %v152_v44  ;;  %1508 = vmatprep.subr.mxu0 %v196_v45  ;;  %v104_v35 = vld [vmem:[%s5702_s2 + $0x218] sm:$0xff]  ;;  %v103_v37 = vld [vmem:[%s5702_s2 + $0x210] sm:$0xff]  ;;  %v2746_v45 = vld [vmem:[%s5703_s0] sm:$0xff] }
  0xf1   :  { %1460 = vmatpush2.msra.mxu1 %v151_v46  ;;  %1509 = vmatpush1.msra.mxu0 %v195_v47  ;;  %v276_v36 = vld [vmem:[%s5702_s2 + $0x778] sm:$0xff]  ;;  %v275_v38 = vld [vmem:[%s5702_s2 + $0x770] sm:$0xff] }
  0xf2   :  { %1461 = vmatprep.subr.mxu1 %v148_v48  ;;  %1510 = vmatprep.subr.mxu0 %v192_v49  ;;  %v272_v39 = vld [vmem:[%s5702_s2 + $0x758] sm:$0xff]  ;;  %v271_v41 = vld [vmem:[%s5702_s2 + $0x750] sm:$0xff] }
  0xf3   :  { %1462 = vmatpush2.msra.mxu1 %v147_v50  ;;  %1511 = vmatpush1.msra.mxu0 %v191_v51  ;;  %v356_v40 = vld [vmem:[%s5702_s2 + $0x9f8] sm:$0xff]  ;;  %v355_v42 = vld [vmem:[%s5702_s2 + $0x9f0] sm:$0xff] }
  0xf4   :  { %1463 = vmatprep.subr.mxu1 %v144_v52  ;;  %1512 = vmatprep.subr.mxu0 %v188_v53  ;;  %v268_v43 = vld [vmem:[%s5702_s2 + $0x738] sm:$0xff]  ;;  %v267_v46 = vld [vmem:[%s5702_s2 + $0x730] sm:$0xff] }
  0xf5   :  { %1464 = vmatpush2.msra.mxu1 %v143_v54  ;;  %1513 = vmatpush1.msra.mxu0 %v187_v55  ;;  %v352_v44 = vld [vmem:[%s5702_s2 + $0x9d8] sm:$0xff]  ;;  %v263_v49 = vld [vmem:[%s5702_s2 + $0x710] sm:$0xff] }
  0xf6   :  { %1465 = vmatprep.subr.mxu1 %v140_v56  ;;  %1514 = vmatprep.subr.mxu0 %v184_v57  ;;  %v264_v47 = vld [vmem:[%s5702_s2 + $0x718] sm:$0xff]  ;;  %v347_v50 = vld [vmem:[%s5702_s2 + $0x9b0] sm:$0xff] }
  0xf7   :  { %1466 = vmatpush2.msra.mxu1 %v139_v58  ;;  %1515 = vmatpush1.msra.mxu0 %v183_v59  ;;  %v348_v48 = vld [vmem:[%s5702_s2 + $0x9b8] sm:$0xff]  ;;  %v259_v53 = vld [vmem:[%s5702_s2 + $0x6f0] sm:$0xff] }
  0xf8   :  { %1467 = vmatprep.subr.mxu1 %v136_v60  ;;  %1516 = vmatprep.subr.mxu0 %v180_v61  ;;  %v260_v51 = vld [vmem:[%s5702_s2 + $0x6f8] sm:$0xff]  ;;  %v343_v54 = vld [vmem:[%s5702_s2 + $0x990] sm:$0xff] }
  0xf9   :  { %1468 = vmatpush2.msra.mxu1 %v135_v62  ;;  %1517 = vmatpush1.msra.mxu0 %v179_v63  ;;  %v344_v52 = vld [vmem:[%s5702_s2 + $0x998] sm:$0xff]  ;;  %v255_v57 = vld [vmem:[%s5702_s2 + $0x6d0] sm:$0xff] }
  0xfa   :  { %1469 = vmatprep.subr.mxu1 %v132_v1  ;;  %1518 = vmatprep.subr.mxu0 %v176_v2  ;;  %v256_v55 = vld [vmem:[%s5702_s2 + $0x6d8] sm:$0xff]  ;;  %v339_v58 = vld [vmem:[%s5702_s2 + $0x970] sm:$0xff] }
  0xfb   :  { %1470 = vmatpush2.msra.mxu1 %v131_v4  ;;  %1519 = vmatpush1.msra.mxu0 %v175_v5  ;;  %v340_v56 = vld [vmem:[%s5702_s2 + $0x978] sm:$0xff]  ;;  %v251_v61 = vld [vmem:[%s5702_s2 + $0x6b0] sm:$0xff] }
  0xfc   :  { %1471 = vmatprep.subr.mxu1 %v128_v6  ;;  %1520 = vmatprep.subr.mxu0 %v172_v7  ;;  %v252_v59 = vld [vmem:[%s5702_s2 + $0x6b8] sm:$0xff]  ;;  %v335_v62 = vld [vmem:[%s5702_s2 + $0x950] sm:$0xff] }
  0xfd   :  { %1472 = vmatpush2.msra.mxu1 %v127_v9  ;;  %1521 = vmatpush1.msra.mxu0 %v171_v12  ;;  %v336_v60 = vld [vmem:[%s5702_s2 + $0x958] sm:$0xff]  ;;  %v247_v2 = vld [vmem:[%s5702_s2 + $0x690] sm:$0xff] }
  0xfe   :  { %1473 = vmatprep.subr.mxu1 %v124_v13  ;;  %1522 = vmatprep.subr.mxu0 %v168_v14  ;;  %v248_v63 = vld [vmem:[%s5702_s2 + $0x698] sm:$0xff]  ;;  %v331_v4 = vld [vmem:[%s5702_s2 + $0x930] sm:$0xff] }
  0xff   :  { %1474 = vmatpush2.msra.mxu1 %v123_v15  ;;  %1523 = vmatpush1.msra.mxu0 %v167_v16  ;;  %v332_v1 = vld [vmem:[%s5702_s2 + $0x938] sm:$0xff]  ;;  %v243_v7 = vld [vmem:[%s5702_s2 + $0x670] sm:$0xff] }
 0x100   :  { %1475 = vmatprep.subr.mxu1 %v120_v17  ;;  %1524 = vmatprep.subr.mxu0 %v292_v18  ;;  %v244_v5 = vld [vmem:[%s5702_s2 + $0x678] sm:$0xff]  ;;  %v327_v9 = vld [vmem:[%s5702_s2 + $0x910] sm:$0xff] }
 0x101   :  { %1476 = vmatpush2.msra.mxu1 %v119_v19  ;;  %1525 = vmatpush2.msra.mxu0 %v291_v21  ;;  %v328_v6 = vld [vmem:[%s5702_s2 + $0x918] sm:$0xff]  ;;  %v239_v14 = vld [vmem:[%s5702_s2 + $0x650] sm:$0xff] }
 0x102   :  { %1477 = vmatprep.subr.mxu1 %v116_v22  ;;  %1526 = vmatprep.subr.mxu0 %v288_v24  ;;  %v240_v12 = vld [vmem:[%s5702_s2 + $0x658] sm:$0xff]  ;;  %v323_v15 = vld [vmem:[%s5702_s2 + $0x8f0] sm:$0xff] }
 0x103   :  { %1478 = vmatpush2.msra.mxu1 %v115_v25  ;;  %1527 = vmatpush2.msra.mxu0 %v287_v26  ;;  %v324_v13 = vld [vmem:[%s5702_s2 + $0x8f8] sm:$0xff]  ;;  %v235_v18 = vld [vmem:[%s5702_s2 + $0x630] sm:$0xff] }
 0x104   :  { %1479 = vmatprep.subr.mxu1 %v112_v27  ;;  %1528 = vmatprep.subr.mxu0 %v284_v28  ;;  %v236_v16 = vld [vmem:[%s5702_s2 + $0x638] sm:$0xff]  ;;  %v319_v19 = vld [vmem:[%s5702_s2 + $0x8d0] sm:$0xff] }
 0x105   :  { %1480 = vmatpush2.msra.mxu1 %v111_v29  ;;  %1529 = vmatpush2.msra.mxu0 %v283_v30  ;;  %v320_v17 = vld [vmem:[%s5702_s2 + $0x8d8] sm:$0xff]  ;;  %v231_v24 = vld [vmem:[%s5702_s2 + $0x610] sm:$0xff]  ;;  %v2747_v29 = vld [vmem:[%s5703_s0 + $0x8] sm:$0xff] }
 0x106   :  { %1481 = vmatprep.subr.mxu1 %v108_v31  ;;  %1530 = vmatprep.subr.mxu0 %v280_v32  ;;  %v232_v21 = vld [vmem:[%s5702_s2 + $0x618] sm:$0xff]  ;;  %v315_v25 = vld [vmem:[%s5702_s2 + $0x8b0] sm:$0xff]  ;;  %v29_v31 = vld [vmem:[%s5704_s1] sm:$0xf] }
 0x107   :  { %1482 = vmatpush2.msra.mxu1 %v107_v33  ;;  %1531 = vmatpush2.msra.mxu0 %v279_v34  ;;  %v316_v22 = vld [vmem:[%s5702_s2 + $0x8b8] sm:$0xff]  ;;  %v311_v28 = vld [vmem:[%s5702_s2 + $0x890] sm:$0xff]  ;;  %v2754_v33 = vmov 0  }
 0x108   :  { %1483 = vmatprep.subr.mxu1 %v104_v35  ;;  %1532 = vmatprep.subr.mxu0 %v276_v36  ;;  %v312_v26 = vld [vmem:[%s5702_s2 + $0x898] sm:$0xff]  ;;  %v483_v30 = vld [vmem:[%s5702_s2 + $0xdf0] sm:$0xff] }
 0x109   :  { %1484 = vmatpush2.msra.mxu1 %v103_v37  ;;  %1533 = vmatpush2.msra.mxu0 %v275_v38  ;;  %v484_v27 = vld [vmem:[%s5702_s2 + $0xdf8] sm:$0xff]  ;;  %v307_v34 = vld [vmem:[%s5702_s2 + $0x870] sm:$0xff] }
 0x10a   :  { %1485 = vmatprep.mubr.f32.mxu1 %v3186_v0  ;;  %1534 = vmatprep.subr.mxu0 %v272_v39  ;;  %v351_v0 = vld [vmem:[%s5702_s2 + $0x9d0] sm:$0xff]  ;;  %v480_v32 = vld [vmem:[%s5702_s2 + $0xdd8] sm:$0xff] }
 0x10b   :  { %1563 = vmatprep.subr.mxu1 %v356_v40  ;;  %1486 = vmatmul.mubr.f32.vlgmr.msra.gmra.mxu1 %v2746_v45  ;;  %v479_v35 = vld [vmem:[%s5702_s2 + $0xdd0] sm:$0xff]  ;;  %v304_v36 = vld [vmem:[%s5702_s2 + $0x858] sm:$0xff] }
 0x10c   :  { %1535 = vmatpush2.msra.mxu0 %v271_v41  ;;  %1564 = vmatpush1.msra.mxu1 %v355_v42  ;;  %v476_v37 = vld [vmem:[%s5702_s2 + $0xdb8] sm:$0xff]  ;;  %v303_v38 = vld [vmem:[%s5702_s2 + $0x850] sm:$0xff] }
 0x10d   :  { %1536 = vmatprep.subr.mxu0 %v268_v43  ;;  %1565 = vmatprep.subr.mxu1 %v352_v44  ;;  %v475_v39 = vld [vmem:[%s5702_s2 + $0xdb0] sm:$0xff]  ;;  %v300_v40 = vld [vmem:[%s5702_s2 + $0x838] sm:$0xff]  ;;  %v2755_v44 = vmov 1  }
 0x10e   :  { %1537 = vmatpush2.msra.mxu0 %v267_v46  ;;  %1566 = vmatpush1.msra.mxu1 %v351_v0  ;;  %v472_v41 = vld [vmem:[%s5702_s2 + $0xd98] sm:$0xff]  ;;  %v299_v42 = vld [vmem:[%s5702_s2 + $0x830] sm:$0xff] }
 0x10f   :  { %1538 = vmatprep.subr.mxu0 %v264_v47  ;;  %1567 = vmatprep.subr.mxu1 %v348_v48  ;;  %v471_v43 = vld [vmem:[%s5702_s2 + $0xd90] sm:$0xff]  ;;  %v296_v45 = vld [vmem:[%s5702_s2 + $0x818] sm:$0xff] }
 0x110   :  { %1539 = vmatpush2.msra.mxu0 %v263_v49  ;;  %1568 = vmatpush1.msra.mxu1 %v347_v50  ;;  %v468_v46 = vld [vmem:[%s5702_s2 + $0xd78] sm:$0xff]  ;;  %v295_v0 = vld [vmem:[%s5702_s2 + $0x810] sm:$0xff] }
 0x111   :  { %1540 = vmatprep.subr.mxu0 %v260_v51  ;;  %1569 = vmatprep.subr.mxu1 %v344_v52  ;;  %v467_v47 = vld [vmem:[%s5702_s2 + $0xd70] sm:$0xff]  ;;  %v420_v48 = vld [vmem:[%s5702_s2 + $0xbf8] sm:$0xff] }
 0x112   :  { %1541 = vmatpush2.msra.mxu0 %v259_v53  ;;  %1570 = vmatpush1.msra.mxu1 %v343_v54  ;;  %v464_v49 = vld [vmem:[%s5702_s2 + $0xd58] sm:$0xff]  ;;  %v419_v50 = vld [vmem:[%s5702_s2 + $0xbf0] sm:$0xff] }
 0x113   :  { %1542 = vmatprep.subr.mxu0 %v256_v55  ;;  %1571 = vmatprep.subr.mxu1 %v340_v56  ;;  %v463_v51 = vld [vmem:[%s5702_s2 + $0xd50] sm:$0xff]  ;;  %v416_v52 = vld [vmem:[%s5702_s2 + $0xbd8] sm:$0xff] }
 0x114   :  { %1543 = vmatpush2.msra.mxu0 %v255_v57  ;;  %1572 = vmatpush1.msra.mxu1 %v339_v58  ;;  %v460_v53 = vld [vmem:[%s5702_s2 + $0xd38] sm:$0xff]  ;;  %v415_v54 = vld [vmem:[%s5702_s2 + $0xbd0] sm:$0xff] }
 0x115   :  { %1544 = vmatprep.subr.mxu0 %v252_v59  ;;  %1573 = vmatprep.subr.mxu1 %v336_v60  ;;  %v459_v55 = vld [vmem:[%s5702_s2 + $0xd30] sm:$0xff]  ;;  %v412_v56 = vld [vmem:[%s5702_s2 + $0xbb8] sm:$0xff] }
 0x116   :  { %1545 = vmatpush2.msra.mxu0 %v251_v61  ;;  %1574 = vmatpush1.msra.mxu1 %v335_v62  ;;  %v456_v57 = vld [vmem:[%s5702_s2 + $0xd18] sm:$0xff]  ;;  %v411_v58 = vld [vmem:[%s5702_s2 + $0xbb0] sm:$0xff] }
 0x117   :  { %1546 = vmatprep.subr.mxu0 %v248_v63  ;;  %1575 = vmatprep.subr.mxu1 %v332_v1  ;;  %v455_v59 = vld [vmem:[%s5702_s2 + $0xd10] sm:$0xff]  ;;  %v408_v60 = vld [vmem:[%s5702_s2 + $0xb98] sm:$0xff] }
 0x118   :  { %1547 = vmatpush2.msra.mxu0 %v247_v2  ;;  %1576 = vmatpush1.msra.mxu1 %v331_v4  ;;  %v452_v61 = vld [vmem:[%s5702_s2 + $0xcf8] sm:$0xff]  ;;  %v407_v62 = vld [vmem:[%s5702_s2 + $0xb90] sm:$0xff] }
 0x119   :  { %1548 = vmatprep.subr.mxu0 %v244_v5  ;;  %1577 = vmatprep.subr.mxu1 %v328_v6  ;;  %v451_v63 = vld [vmem:[%s5702_s2 + $0xcf0] sm:$0xff]  ;;  %v404_v1 = vld [vmem:[%s5702_s2 + $0xb78] sm:$0xff] }
 0x11a   :  { %1549 = vmatpush2.msra.mxu0 %v243_v7  ;;  %1578 = vmatpush1.msra.mxu1 %v327_v9  ;;  %v448_v2 = vld [vmem:[%s5702_s2 + $0xcd8] sm:$0xff]  ;;  %v403_v4 = vld [vmem:[%s5702_s2 + $0xb70] sm:$0xff] }
 0x11b   :  { %1550 = vmatprep.subr.mxu0 %v240_v12  ;;  %1579 = vmatprep.subr.mxu1 %v324_v13  ;;  %v447_v5 = vld [vmem:[%s5702_s2 + $0xcd0] sm:$0xff]  ;;  %v400_v6 = vld [vmem:[%s5702_s2 + $0xb58] sm:$0xff] }
 0x11c   :  { %1551 = vmatpush2.msra.mxu0 %v239_v14  ;;  %1580 = vmatpush1.msra.mxu1 %v323_v15  ;;  %v444_v7 = vld [vmem:[%s5702_s2 + $0xcb8] sm:$0xff]  ;;  %v399_v9 = vld [vmem:[%s5702_s2 + $0xb50] sm:$0xff] }
 0x11d   :  { %1552 = vmatprep.subr.mxu0 %v236_v16  ;;  %1581 = vmatprep.subr.mxu1 %v320_v17  ;;  %v443_v12 = vld [vmem:[%s5702_s2 + $0xcb0] sm:$0xff]  ;;  %v396_v13 = vld [vmem:[%s5702_s2 + $0xb38] sm:$0xff] }
 0x11e   :  { %1553 = vmatpush2.msra.mxu0 %v235_v18  ;;  %1582 = vmatpush1.msra.mxu1 %v319_v19  ;;  %v440_v14 = vld [vmem:[%s5702_s2 + $0xc98] sm:$0xff]  ;;  %v395_v15 = vld [vmem:[%s5702_s2 + $0xb30] sm:$0xff] }
 0x11f   :  { %1554 = vmatprep.subr.mxu0 %v232_v21  ;;  %1583 = vmatprep.subr.mxu1 %v316_v22  ;;  %v439_v16 = vld [vmem:[%s5702_s2 + $0xc90] sm:$0xff]  ;;  %v392_v17 = vld [vmem:[%s5702_s2 + $0xb18] sm:$0xff] }
 0x120   :  { %1555 = vmatpush2.msra.mxu0 %v231_v24  ;;  %1556 = vmatprep.mubr.f32.mxu0 %v3194_v3  ;;  %v308_v3 = vld [vmem:[%s5702_s2 + $0x878] sm:$0xff]  ;;  %v391_v19 = vld [vmem:[%s5702_s2 + $0xb10] sm:$0xff] }
 0x121   :  { %1584 = vmatpush1.msra.mxu1 %v315_v25  ;;  %1557 = vmatmul.mubr.f32.vlgmr.msra.gmra.mxu0 %v2747_v29  ;;  %v436_v18 = vld [vmem:[%s5702_s2 + $0xc78] sm:$0xff]  ;;  %v435_v21 = vld [vmem:[%s5702_s2 + $0xc70] sm:$0xff] }
 0x122   :  { %1585 = vmatprep.subr.mxu1 %v312_v26  ;;  %1634 = vmatprep.subr.mxu0 %v484_v27  ;;  %v388_v22 = vld [vmem:[%s5702_s2 + $0xaf8] sm:$0xff]  ;;  %v387_v25 = vld [vmem:[%s5702_s2 + $0xaf0] sm:$0xff] }
 0x123   :  { %2714 = vset.pattern.permute.xlu0 %v2754_v33  ;;  %1586 = vmatpush1.msra.mxu1 %v311_v28  ;;  %v432_v24 = vld [vmem:[%s5702_s2 + $0xc58] sm:$0xff]  ;;  %v431_v26 = vld [vmem:[%s5702_s2 + $0xc50] sm:$0xff] }
 0x124   :  { %1635 = vmatpush1.msra.mxu0 %v483_v30  ;;  %1920 = vperm.xlu0 %2714, %v29_v31   ;;  %v384_v27 = vld [vmem:[%s5702_s2 + $0xad8] sm:$0xff]  ;;  %v383_v29 = vld [vmem:[%s5702_s2 + $0xad0] sm:$0xff] }
 0x125   :  { %1587 = vmatprep.subr.mxu1 %v308_v3  ;;  %1636 = vmatprep.subr.mxu0 %v480_v32  ;;  %v428_v28 = vld [vmem:[%s5702_s2 + $0xc38] sm:$0xff]  ;;  %v427_v30 = vld [vmem:[%s5702_s2 + $0xc30] sm:$0xff] }
 0x126   :  { %1588 = vmatpush1.msra.mxu1 %v307_v34  ;;  %1637 = vmatpush1.msra.mxu0 %v479_v35  ;;  %v424_v3 = vld [vmem:[%s5702_s2 + $0xc18] sm:$0xff]  ;;  %v379_v32 = vld [vmem:[%s5702_s2 + $0xab0] sm:$0xff] }
 0x127   :  { %1589 = vmatprep.subr.mxu1 %v304_v36  ;;  %1638 = vmatprep.subr.mxu0 %v476_v37  ;;  %v423_v33 = vld [vmem:[%s5702_s2 + $0xc10] sm:$0xff]  ;;  %v376_v34 = vld [vmem:[%s5702_s2 + $0xa98] sm:$0xff] }
 0x128   :  { %1590 = vmatpush1.msra.mxu1 %v303_v38  ;;  %1639 = vmatpush1.msra.mxu0 %v475_v39  ;;  %v548_v35 = vld [vmem:[%s5702_s2 + $0xff8] sm:$0xff]  ;;  %v375_v36 = vld [vmem:[%s5702_s2 + $0xa90] sm:$0xff] }
 0x129   :  { %2715 = vset.pattern.permute.xlu0 %v2755_v44  ;;  %1591 = vmatprep.subr.mxu1 %v300_v40  ;;  %v547_v37 = vld [vmem:[%s5702_s2 + $0xff0] sm:$0xff]  ;;  %v372_v38 = vld [vmem:[%s5702_s2 + $0xa78] sm:$0xff] }
 0x12a   :  { %1640 = vmatprep.subr.mxu0 %v472_v41  ;;  %2013 = vperm.xlu0 %2715, %v29_v31   ;;  %v380_v31 = vld [vmem:[%s5702_s2 + $0xab8] sm:$0xff]  ;;  %v371_v40 = vld [vmem:[%s5702_s2 + $0xa70] sm:$0xff] }
 0x12b   :  { %1592 = vmatpush1.msra.mxu1 %v299_v42  ;;  %1641 = vmatpush1.msra.mxu0 %v471_v43  ;;  %v544_v39 = vld [vmem:[%s5702_s2 + $0xfd8] sm:$0xff]  ;;  %v543_v41 = vld [vmem:[%s5702_s2 + $0xfd0] sm:$0xff] }
 0x12c   :  { %1593 = vmatprep.subr.mxu1 %v296_v45  ;;  %1642 = vmatprep.subr.mxu0 %v468_v46  ;;  %v368_v42 = vld [vmem:[%s5702_s2 + $0xa58] sm:$0xff]  ;;  %v367_v44 = vld [vmem:[%s5702_s2 + $0xa50] sm:$0xff] }
 0x12d   :  { %1594 = vmatpush1.msra.mxu1 %v295_v0  ;;  %1643 = vmatpush1.msra.mxu0 %v467_v47  ;;  %v540_v43 = vld [vmem:[%s5702_s2 + $0xfb8] sm:$0xff]  ;;  %v539_v45 = vld [vmem:[%s5702_s2 + $0xfb0] sm:$0xff] }
 0x12e   :  { %1595 = vmatprep.subr.mxu1 %v420_v48  ;;  %1644 = vmatprep.subr.mxu0 %v464_v49  ;;  %v364_v46 = vld [vmem:[%s5702_s2 + $0xa38] sm:$0xff]  ;;  %v363_v47 = vld [vmem:[%s5702_s2 + $0xa30] sm:$0xff] }
 0x12f   :  { %1596 = vmatpush2.msra.mxu1 %v419_v50  ;;  %1645 = vmatpush1.msra.mxu0 %v463_v51  ;;  %v536_v0 = vld [vmem:[%s5702_s2 + $0xf98] sm:$0xff]  ;;  %v535_v48 = vld [vmem:[%s5702_s2 + $0xf90] sm:$0xff] }
 0x130   :  { %1597 = vmatprep.subr.mxu1 %v416_v52  ;;  %1646 = vmatprep.subr.mxu0 %v460_v53  ;;  %v360_v49 = vld [vmem:[%s5702_s2 + $0xa18] sm:$0xff]  ;;  %v359_v51 = vld [vmem:[%s5702_s2 + $0xa10] sm:$0xff] }
 0x131   :  { %1598 = vmatpush2.msra.mxu1 %v415_v54  ;;  %1647 = vmatpush1.msra.mxu0 %v459_v55  ;;  %v532_v50 = vld [vmem:[%s5702_s2 + $0xf78] sm:$0xff]  ;;  %v531_v52 = vld [vmem:[%s5702_s2 + $0xf70] sm:$0xff] }
 0x132   :  { %1599 = vmatprep.subr.mxu1 %v412_v56  ;;  %1648 = vmatprep.subr.mxu0 %v456_v57  ;;  %v528_v53 = vld [vmem:[%s5702_s2 + $0xf58] sm:$0xff]  ;;  %v527_v55 = vld [vmem:[%s5702_s2 + $0xf50] sm:$0xff] }
 0x133   :  { %1600 = vmatpush2.msra.mxu1 %v411_v58  ;;  %1649 = vmatpush1.msra.mxu0 %v455_v59  ;;  %v612_v54 = vld [vmem:[%s5702_s2 + $0x11f8] sm:$0xff]  ;;  %v611_v56 = vld [vmem:[%s5702_s2 + $0x11f0] sm:$0xff] }
 0x134   :  { %1601 = vmatprep.subr.mxu1 %v408_v60  ;;  %1650 = vmatprep.subr.mxu0 %v452_v61  ;;  %v2748_v57 = vld [vmem:[%s5703_s0 + $0x10] sm:$0xff]  ;;  %v524_v58 = vld [vmem:[%s5702_s2 + $0xf38] sm:$0xff] }
 0x135   :  { %1602 = vmatpush2.msra.mxu1 %v407_v62  ;;  %1651 = vmatpush1.msra.mxu0 %v451_v63  ;;  %v523_v59 = vld [vmem:[%s5702_s2 + $0xf30] sm:$0xff]  ;;  %v520_v61 = vld [vmem:[%s5702_s2 + $0xf18] sm:$0xff] }
 0x136   :  { %1603 = vmatprep.subr.mxu1 %v404_v1  ;;  %1652 = vmatprep.subr.mxu0 %v448_v2  ;;  %v607_v60 = vld [vmem:[%s5702_s2 + $0x11d0] sm:$0xff]  ;;  %v604_v62 = vld [vmem:[%s5702_s2 + $0x11b8] sm:$0xff] }
 0x137   :  { %1604 = vmatpush2.msra.mxu1 %v403_v4  ;;  %1653 = vmatpush1.msra.mxu0 %v447_v5  ;;  %v519_v63 = vld [vmem:[%s5702_s2 + $0xf10] sm:$0xff]  ;;  %v516_v2 = vld [vmem:[%s5702_s2 + $0xef8] sm:$0xff] }
 0x138   :  { %1605 = vmatprep.subr.mxu1 %v400_v6  ;;  %1654 = vmatprep.subr.mxu0 %v444_v7  ;;  %v603_v1 = vld [vmem:[%s5702_s2 + $0x11b0] sm:$0xff]  ;;  %v600_v4 = vld [vmem:[%s5702_s2 + $0x1198] sm:$0xff] }
 0x139   :  { %1606 = vmatpush2.msra.mxu1 %v399_v9  ;;  %1655 = vmatpush1.msra.mxu0 %v443_v12  ;;  %v515_v5 = vld [vmem:[%s5702_s2 + $0xef0] sm:$0xff]  ;;  %v512_v7 = vld [vmem:[%s5702_s2 + $0xed8] sm:$0xff] }
 0x13a   :  { %1607 = vmatprep.subr.mxu1 %v396_v13  ;;  %1656 = vmatprep.subr.mxu0 %v440_v14  ;;  %v599_v6 = vld [vmem:[%s5702_s2 + $0x1190] sm:$0xff]  ;;  %v596_v9 = vld [vmem:[%s5702_s2 + $0x1178] sm:$0xff] }
 0x13b   :  { %1608 = vmatpush2.msra.mxu1 %v395_v15  ;;  %1657 = vmatpush1.msra.mxu0 %v439_v16  ;;  %v511_v12 = vld [vmem:[%s5702_s2 + $0xed0] sm:$0xff]  ;;  %v508_v14 = vld [vmem:[%s5702_s2 + $0xeb8] sm:$0xff] }
 0x13c   :  { %1609 = vmatprep.subr.mxu1 %v392_v17  ;;  %1658 = vmatprep.subr.mxu0 %v436_v18  ;;  %v595_v13 = vld [vmem:[%s5702_s2 + $0x1170] sm:$0xff]  ;;  %v592_v15 = vld [vmem:[%s5702_s2 + $0x1158] sm:$0xff] }
 0x13d   :  { %1610 = vmatpush2.msra.mxu1 %v391_v19  ;;  %1659 = vmatpush1.msra.mxu0 %v435_v21  ;;  %v507_v16 = vld [vmem:[%s5702_s2 + $0xeb0] sm:$0xff]  ;;  %v504_v18 = vld [vmem:[%s5702_s2 + $0xe98] sm:$0xff] }
 0x13e   :  { %1611 = vmatprep.subr.mxu1 %v388_v22  ;;  %1660 = vmatprep.subr.mxu0 %v432_v24  ;;  %v591_v17 = vld [vmem:[%s5702_s2 + $0x1150] sm:$0xff]  ;;  %v588_v19 = vld [vmem:[%s5702_s2 + $0x1138] sm:$0xff] }
 0x13f   :  { %1612 = vmatpush2.msra.mxu1 %v387_v25  ;;  %1661 = vmatpush1.msra.mxu0 %v431_v26  ;;  %v503_v21 = vld [vmem:[%s5702_s2 + $0xe90] sm:$0xff]  ;;  %v500_v24 = vld [vmem:[%s5702_s2 + $0xe78] sm:$0xff] }
 0x140   :  { %1613 = vmatprep.subr.mxu1 %v384_v27  ;;  %1662 = vmatprep.subr.mxu0 %v428_v28  ;;  %v587_v22 = vld [vmem:[%s5702_s2 + $0x1130] sm:$0xff]  ;;  %v584_v25 = vld [vmem:[%s5702_s2 + $0x1118] sm:$0xff] }
 0x141   :  { %1614 = vmatpush2.msra.mxu1 %v383_v29  ;;  %1663 = vmatpush1.msra.mxu0 %v427_v30  ;;  %v499_v26 = vld [vmem:[%s5702_s2 + $0xe70] sm:$0xff]  ;;  %v496_v28 = vld [vmem:[%s5702_s2 + $0xe58] sm:$0xff] }
 0x142   :  { %1615 = vmatprep.subr.mxu1 %v380_v31  ;;  %1664 = vmatprep.subr.mxu0 %v424_v3  ;;  %v583_v27 = vld [vmem:[%s5702_s2 + $0x1110] sm:$0xff]  ;;  %v580_v29 = vld [vmem:[%s5702_s2 + $0x10f8] sm:$0xff] }
 0x143   :  { %1616 = vmatpush2.msra.mxu1 %v379_v32  ;;  %1665 = vmatpush1.msra.mxu0 %v423_v33  ;;  %v495_v30 = vld [vmem:[%s5702_s2 + $0xe50] sm:$0xff]  ;;  %v492_v3 = vld [vmem:[%s5702_s2 + $0xe38] sm:$0xff] }
 0x144   :  { %1617 = vmatprep.subr.mxu1 %v376_v34  ;;  %1666 = vmatprep.subr.mxu0 %v548_v35  ;;  %v579_v31 = vld [vmem:[%s5702_s2 + $0x10f0] sm:$0xff]  ;;  %v576_v32 = vld [vmem:[%s5702_s2 + $0x10d8] sm:$0xff] }
 0x145   :  { %1618 = vmatpush2.msra.mxu1 %v375_v36  ;;  %1667 = vmatpush2.msra.mxu0 %v547_v37  ;;  %v491_v33 = vld [vmem:[%s5702_s2 + $0xe30] sm:$0xff]  ;;  %v488_v35 = vld [vmem:[%s5702_s2 + $0xe18] sm:$0xff] }
 0x146   :  { %1619 = vmatprep.subr.mxu1 %v372_v38  ;;  %1668 = vmatprep.subr.mxu0 %v544_v39  ;;  %v575_v34 = vld [vmem:[%s5702_s2 + $0x10d0] sm:$0xff]  ;;  %v572_v36 = vld [vmem:[%s5702_s2 + $0x10b8] sm:$0xff] }
 0x147   :  { %1620 = vmatpush2.msra.mxu1 %v371_v40  ;;  %1669 = vmatpush2.msra.mxu0 %v543_v41  ;;  %v487_v37 = vld [vmem:[%s5702_s2 + $0xe10] sm:$0xff]  ;;  %v568_v39 = vld [vmem:[%s5702_s2 + $0x1098] sm:$0xff] }
 0x148   :  { %1621 = vmatprep.subr.mxu1 %v368_v42  ;;  %1670 = vmatprep.subr.mxu0 %v540_v43  ;;  %v571_v38 = vld [vmem:[%s5702_s2 + $0x10b0] sm:$0xff]  ;;  %v740_v40 = vld [vmem:[%s5702_s2 + $0x15f8] sm:$0xff] }
 0x149   :  { %1622 = vmatpush2.msra.mxu1 %v367_v44  ;;  %1671 = vmatpush2.msra.mxu0 %v539_v45  ;;  %v567_v41 = vld [vmem:[%s5702_s2 + $0x1090] sm:$0xff]  ;;  %v2749_v43 = vld [vmem:[%s5703_s0 + $0x18] sm:$0xff] }
 0x14a   :  { %1623 = vmatprep.subr.mxu1 %v364_v46  ;;  %1672 = vmatprep.subr.mxu0 %v536_v0  ;;  %v739_v42 = vld [vmem:[%s5702_s2 + $0x15f0] sm:$0xff]  ;;  %v564_v44 = vld [vmem:[%s5702_s2 + $0x1078] sm:$0xff] }
 0x14b   :  { %1624 = vmatpush2.msra.mxu1 %v363_v47  ;;  %1673 = vmatpush2.msra.mxu0 %v535_v48  ;;  %v563_v45 = vld [vmem:[%s5702_s2 + $0x1070] sm:$0xff]  ;;  %v560_v0 = vld [vmem:[%s5702_s2 + $0x1058] sm:$0xff] }
 0x14c   :  { %1625 = vmatprep.subr.mxu1 %v360_v49  ;;  %1674 = vmatprep.subr.mxu0 %v532_v50  ;;  %v735_v46 = vld [vmem:[%s5702_s2 + $0x15d0] sm:$0xff]  ;;  %v732_v47 = vld [vmem:[%s5702_s2 + $0x15b8] sm:$0xff] }
 0x14d   :  { %1626 = vmatpush2.msra.mxu1 %v359_v51  ;;  %1627 = vmatprep.mubr.f32.mxu1 %v3582_v8  ;;  %v608_v8 = vld [vmem:[%s5702_s2 + $0x11d8] sm:$0xff]  ;;  %v559_v48 = vld [vmem:[%s5702_s2 + $0x1050] sm:$0xff] }
 0x14e   :  { %1675 = vmatpush2.msra.mxu0 %v531_v52  ;;  %1628 = vmatmul.mubr.f32.vlgmr.msra.gmra.mxu1 %v2748_v57  ;;  %v731_v49 = vld [vmem:[%s5702_s2 + $0x15b0] sm:$0xff]  ;;  %v556_v50 = vld [vmem:[%s5702_s2 + $0x1038] sm:$0xff] }
 0x14f   :  { %1676 = vmatprep.subr.mxu0 %v528_v53  ;;  %1705 = vmatprep.subr.mxu1 %v612_v54  ;;  %v728_v51 = vld [vmem:[%s5702_s2 + $0x1598] sm:$0xff]  ;;  %v555_v52 = vld [vmem:[%s5702_s2 + $0x1030] sm:$0xff] }
 0x150   :  { %1677 = vmatpush2.msra.mxu0 %v527_v55  ;;  %1706 = vmatpush1.msra.mxu1 %v611_v56  ;;  %v727_v53 = vld [vmem:[%s5702_s2 + $0x1590] sm:$0xff]  ;;  %v552_v54 = vld [vmem:[%s5702_s2 + $0x1018] sm:$0xff] }
 0x151   :  { %1678 = vmatprep.subr.mxu0 %v524_v58  ;;  %1707 = vmatprep.subr.mxu1 %v608_v8  ;;  %v724_v55 = vld [vmem:[%s5702_s2 + $0x1578] sm:$0xff]  ;;  %v551_v56 = vld [vmem:[%s5702_s2 + $0x1010] sm:$0xff] }
 0x152   :  { %1679 = vmatpush2.msra.mxu0 %v523_v59  ;;  %1708 = vmatpush1.msra.mxu1 %v607_v60  ;;  %v723_v57 = vld [vmem:[%s5702_s2 + $0x1570] sm:$0xff]  ;;  %v676_v58 = vld [vmem:[%s5702_s2 + $0x13f8] sm:$0xff] }
 0x153   :  { %1680 = vmatprep.subr.mxu0 %v520_v61  ;;  %1709 = vmatprep.subr.mxu1 %v604_v62  ;;  %v720_v8 = vld [vmem:[%s5702_s2 + $0x1558] sm:$0xff]  ;;  %v675_v59 = vld [vmem:[%s5702_s2 + $0x13f0] sm:$0xff] }
 0x154   :  { %1681 = vmatpush2.msra.mxu0 %v519_v63  ;;  %1710 = vmatpush1.msra.mxu1 %v603_v1  ;;  %v719_v60 = vld [vmem:[%s5702_s2 + $0x1550] sm:$0xff]  ;;  %v672_v61 = vld [vmem:[%s5702_s2 + $0x13d8] sm:$0xff] }
 0x155   :  { %1682 = vmatprep.subr.mxu0 %v516_v2  ;;  %1711 = vmatprep.subr.mxu1 %v600_v4  ;;  %v716_v62 = vld [vmem:[%s5702_s2 + $0x1538] sm:$0xff]  ;;  %v671_v63 = vld [vmem:[%s5702_s2 + $0x13d0] sm:$0xff] }
 0x156   :  { %1683 = vmatpush2.msra.mxu0 %v515_v5  ;;  %1712 = vmatpush1.msra.mxu1 %v599_v6  ;;  %v715_v1 = vld [vmem:[%s5702_s2 + $0x1530] sm:$0xff]  ;;  %v668_v2 = vld [vmem:[%s5702_s2 + $0x13b8] sm:$0xff] }
 0x157   :  { %1684 = vmatprep.subr.mxu0 %v512_v7  ;;  %1713 = vmatprep.subr.mxu1 %v596_v9  ;;  %v712_v4 = vld [vmem:[%s5702_s2 + $0x1518] sm:$0xff]  ;;  %v667_v5 = vld [vmem:[%s5702_s2 + $0x13b0] sm:$0xff] }
 0x158   :  { %1685 = vmatpush2.msra.mxu0 %v511_v12  ;;  %1714 = vmatpush1.msra.mxu1 %v595_v13  ;;  %v711_v6 = vld [vmem:[%s5702_s2 + $0x1510] sm:$0xff]  ;;  %v664_v7 = vld [vmem:[%s5702_s2 + $0x1398] sm:$0xff] }
 0x159   :  { %1686 = vmatprep.subr.mxu0 %v508_v14  ;;  %1715 = vmatprep.subr.mxu1 %v592_v15  ;;  %v708_v9 = vld [vmem:[%s5702_s2 + $0x14f8] sm:$0xff]  ;;  %v663_v12 = vld [vmem:[%s5702_s2 + $0x1390] sm:$0xff] }
 0x15a   :  { %1687 = vmatpush2.msra.mxu0 %v507_v16  ;;  %1716 = vmatpush1.msra.mxu1 %v591_v17  ;;  %v707_v13 = vld [vmem:[%s5702_s2 + $0x14f0] sm:$0xff]  ;;  %v660_v14 = vld [vmem:[%s5702_s2 + $0x1378] sm:$0xff] }
 0x15b   :  { %1688 = vmatprep.subr.mxu0 %v504_v18  ;;  %1717 = vmatprep.subr.mxu1 %v588_v19  ;;  %v704_v15 = vld [vmem:[%s5702_s2 + $0x14d8] sm:$0xff]  ;;  %v659_v16 = vld [vmem:[%s5702_s2 + $0x1370] sm:$0xff] }
 0x15c   :  { %1689 = vmatpush2.msra.mxu0 %v503_v21  ;;  %1718 = vmatpush1.msra.mxu1 %v587_v22  ;;  %v703_v17 = vld [vmem:[%s5702_s2 + $0x14d0] sm:$0xff]  ;;  %v656_v18 = vld [vmem:[%s5702_s2 + $0x1358] sm:$0xff] }
 0x15d   :  { %1690 = vmatprep.subr.mxu0 %v500_v24  ;;  %1719 = vmatprep.subr.mxu1 %v584_v25  ;;  %v700_v19 = vld [vmem:[%s5702_s2 + $0x14b8] sm:$0xff]  ;;  %v655_v21 = vld [vmem:[%s5702_s2 + $0x1350] sm:$0xff] }
 0x15e   :  { %1691 = vmatpush2.msra.mxu0 %v499_v26  ;;  %1720 = vmatpush1.msra.mxu1 %v583_v27  ;;  %v699_v22 = vld [vmem:[%s5702_s2 + $0x14b0] sm:$0xff]  ;;  %v652_v24 = vld [vmem:[%s5702_s2 + $0x1338] sm:$0xff]  ;;  %v853_v26 = vlaneseq }
 0x15f   :  { %1692 = vmatprep.subr.mxu0 %v496_v28  ;;  %1721 = vmatprep.subr.mxu1 %v580_v29  ;;  %v696_v25 = vld [vmem:[%s5702_s2 + $0x1498] sm:$0xff]  ;;  %v651_v27 = vld [vmem:[%s5702_s2 + $0x1330] sm:$0xff] }
 0x160   :  { %1693 = vmatpush2.msra.mxu0 %v495_v30  ;;  %1722 = vmatpush1.msra.mxu1 %v579_v31  ;;  %v695_v28 = vld [vmem:[%s5702_s2 + $0x1490] sm:$0xff]  ;;  %v648_v29 = vld [vmem:[%s5702_s2 + $0x1318] sm:$0xff] }
 0x161   :  { %1694 = vmatprep.subr.mxu0 %v492_v3  ;;  %1723 = vmatprep.subr.mxu1 %v576_v32  ;;  %v692_v30 = vld [vmem:[%s5702_s2 + $0x1478] sm:$0xff]  ;;  %v647_v31 = vld [vmem:[%s5702_s2 + $0x1310] sm:$0xff] }
 0x162   :  { %1695 = vmatpush2.msra.mxu0 %v491_v33  ;;  %1724 = vmatpush1.msra.mxu1 %v575_v34  ;;  %v691_v3 = vld [vmem:[%s5702_s2 + $0x1470] sm:$0xff]  ;;  %v644_v32 = vld [vmem:[%s5702_s2 + $0x12f8] sm:$0xff]  ;;  %v5078_v34 = vshrl.u32 %v853_v26, 7 }
 0x163   :  { %1696 = vmatprep.subr.mxu0 %v488_v35  ;;  %1725 = vmatprep.subr.mxu1 %v572_v36  ;;  %v688_v33 = vld [vmem:[%s5702_s2 + $0x1458] sm:$0xff]  ;;  %v643_v35 = vld [vmem:[%s5702_s2 + $0x12f0] sm:$0xff] }
 0x164   :  { %1697 = vmatpush2.msra.mxu0 %v487_v37  ;;  %1698 = vmatprep.mubr.f32.mxu0 %v3590_v11  ;;  %v736_v11 = vld [vmem:[%s5702_s2 + $0x15d8] sm:$0xff]  ;;  %v687_v36 = vld [vmem:[%s5702_s2 + $0x1450] sm:$0xff] }
 0x165   :  { %1726 = vmatpush1.msra.mxu1 %v571_v38  ;;  %1699 = vmatmul.mubr.f32.vlgmr.msra.gmra.mxu0 %v2749_v43  ;;  %v640_v37 = vld [vmem:[%s5702_s2 + $0x12d8] sm:$0xff]  ;;  %v5105_v43 = vsub.s32 0, %v5078_v34  ;;  %v843_v26 = vld [vmem:[%s5702_s2 + $0x1930] sm:$0xff] }
 0x166   :  { %1727 = vmatprep.subr.mxu1 %v568_v39  ;;  %1776 = vmatprep.subr.mxu0 %v740_v40  ;;  %v684_v38 = vld [vmem:[%s5702_s2 + $0x1438] sm:$0xff]  ;;  %v639_v39 = vld [vmem:[%s5702_s2 + $0x12d0] sm:$0xff] }
 0x167   :  { %1728 = vmatpush1.msra.mxu1 %v567_v41  ;;  %1777 = vmatpush1.msra.mxu0 %v739_v42  ;;  %v683_v40 = vld [vmem:[%s5702_s2 + $0x1430] sm:$0xff]  ;;  %v636_v41 = vld [vmem:[%s5702_s2 + $0x12b8] sm:$0xff] }
 0x168   :  { %1729 = vmatprep.subr.mxu1 %v564_v44  ;;  %1778 = vmatprep.subr.mxu0 %v736_v11  ;;  %v680_v42 = vld [vmem:[%s5702_s2 + $0x1418] sm:$0xff]  ;;  %v635_v44 = vld [vmem:[%s5702_s2 + $0x12b0] sm:$0xff] }
 0x169   :  { %1730 = vmatpush1.msra.mxu1 %v563_v45  ;;  %1779 = vmatpush1.msra.mxu0 %v735_v46  ;;  %v679_v11 = vld [vmem:[%s5702_s2 + $0x1410] sm:$0xff]  ;;  %v5116_v45 = vld [vmem:[%s5705_s3] sm:$0x77]  ;;  %v632_v46 = vld [vmem:[%s5702_s2 + $0x1298] sm:$0xff] }
 0x16a   :  { %1731 = vmatprep.subr.mxu1 %v560_v0  ;;  %1780 = vmatprep.subr.mxu0 %v732_v47  ;;  %v804_v0 = vld [vmem:[%s5702_s2 + $0x17f8] sm:$0xff]  ;;  %v859_v47 = vsub.s32 4, %v5078_v34 }
 0x16b   :  { %1732 = vmatpush1.msra.mxu1 %v559_v48  ;;  %1781 = vmatpush1.msra.mxu0 %v731_v49  ;;  %v631_v48 = vld [vmem:[%s5702_s2 + $0x1290] sm:$0xff] }
 0x16c   :  { %1733 = vmatprep.subr.mxu1 %v556_v50  ;;  %1782 = vmatprep.subr.mxu0 %v728_v51  ;;  %v803_v49 = vld [vmem:[%s5702_s2 + $0x17f0] sm:$0xff]  ;;  %v628_v50 = vld [vmem:[%s5702_s2 + $0x1278] sm:$0xff] }
 0x16d   :  { %1734 = vmatpush1.msra.mxu1 %v555_v52  ;;  %1783 = vmatpush1.msra.mxu0 %v727_v53  ;;  %v800_v51 = vld [vmem:[%s5702_s2 + $0x17d8] sm:$0xff]  ;;  %v856_v52 = vrot.slane %v5116_v45, %v5105_v43  ;;  %v627_v53 = vld [vmem:[%s5702_s2 + $0x1270] sm:$0xff] }
 0x16e   :  { %1735 = vmatprep.subr.mxu1 %v552_v54  ;;  %1784 = vmatprep.subr.mxu0 %v724_v55  ;;  %v799_v54 = vld [vmem:[%s5702_s2 + $0x17d0] sm:$0xff]  ;;  %v624_v55 = vld [vmem:[%s5702_s2 + $0x1258] sm:$0xff] }
 0x16f   :  { %1736 = vmatpush1.msra.mxu1 %v551_v56  ;;  %1785 = vmatpush1.msra.mxu0 %v723_v57  ;;  %v796_v56 = vld [vmem:[%s5702_s2 + $0x17b8] sm:$0xff]  ;;  %v860_v57 = vrot.slane %v5116_v45, %v859_v47 }
 0x170   :  { %1737 = vmatprep.subr.mxu1 %v676_v58  ;;  %1786 = vmatprep.subr.mxu0 %v720_v8  ;;  %v623_v58 = vld [vmem:[%s5702_s2 + $0x1250] sm:$0xff] }
 0x171   :  { %1738 = vmatpush2.msra.mxu1 %v675_v59  ;;  %1787 = vmatpush1.msra.mxu0 %v719_v60  ;;  %v795_v8 = vld [vmem:[%s5702_s2 + $0x17b0] sm:$0xff]  ;;  %v990_v59 = vpop.f32.mrf.mxu0  ;;  %v620_v60 = vld [vmem:[%s5702_s2 + $0x1238] sm:$0xff] }
 0x172   :  { %1739 = vmatprep.subr.mxu1 %v672_v61  ;;  %1788 = vmatprep.subr.mxu0 %v716_v62  ;;  %v792_v61 = vld [vmem:[%s5702_s2 + $0x1798] sm:$0xff]  ;;  %v876_v62 = vrot.slane %v856_v52, %v5105_v43 }
 0x173   :  { %1740 = vmatpush2.msra.mxu1 %v671_v63  ;;  %1789 = vmatpush1.msra.mxu0 %v715_v1  ;;  %v619_v63 = vld [vmem:[%s5702_s2 + $0x1230] sm:$0xff] }
 0x174   :  { %1741 = vmatprep.subr.mxu1 %v668_v2  ;;  %1790 = vmatprep.subr.mxu0 %v712_v4  ;;  %v791_v1 = vld [vmem:[%s5702_s2 + $0x1790] sm:$0xff]  ;;  %v616_v2 = vld [vmem:[%s5702_s2 + $0x1218] sm:$0xff] }
 0x175   :  { %1742 = vmatpush2.msra.mxu1 %v667_v5  ;;  %1791 = vmatpush1.msra.mxu0 %v711_v6  ;;  %v788_v4 = vld [vmem:[%s5702_s2 + $0x1778] sm:$0xff]  ;;  %v880_v5 = vrot.slane %v860_v57, %v5105_v43  ;;  %v615_v6 = vld [vmem:[%s5702_s2 + $0x1210] sm:$0xff] }
 0x176   :  { %1743 = vmatprep.subr.mxu1 %v664_v7  ;;  %1792 = vmatprep.subr.mxu0 %v708_v9  ;;  %v1061_v7 = vpop.f32.mrf.mxu1  ;;  %v992_v9 = vpop.f32.mrf.mxu0  ;;  %v760_v57 = vld [vmem:[%s5702_s2 + $0x1698] sm:$0xff] }
 0x177   :  { %1744 = vmatpush2.msra.mxu1 %v663_v12  ;;  %1793 = vmatpush1.msra.mxu0 %v707_v13  ;;  %v787_v12 = vld [vmem:[%s5702_s2 + $0x1770] sm:$0xff]  ;;  %v991_v13 = vadd.f32 %v990_v59, %v876_v62  ;;  %v820_v62 = vld [vmem:[%s5702_s2 + $0x1878] sm:$0xff] }
 0x178   :  { %1745 = vmatprep.subr.mxu1 %v660_v14  ;;  %1794 = vmatprep.subr.mxu0 %v704_v15  ;;  %v784_v14 = vld [vmem:[%s5702_s2 + $0x1758] sm:$0xff]  ;;  %v823_v59 = vld [vmem:[%s5702_s2 + $0x1890] sm:$0xff] }
 0x179   :  { %1746 = vmatpush2.msra.mxu1 %v659_v16  ;;  %1795 = vmatpush1.msra.mxu0 %v703_v17  ;;  %v848_v15 = vld [vmem:[%s5702_s2 + $0x1958] sm:$0xf]  ;;  %v1132_v16 = vpop.f32.mrf.mxu0  ;;  %v783_v17 = vld [vmem:[%s5702_s2 + $0x1750] sm:$0xff] }
 0x17a   :  { %1747 = vmatprep.subr.mxu1 %v656_v18  ;;  %1796 = vmatprep.subr.mxu0 %v700_v19  ;;  %v847_v18 = vld [vmem:[%s5702_s2 + $0x1950] sm:$0xf]  ;;  %v993_v19 = vadd.f32 %v992_v9, %v880_v5  ;;  %v752_v5 = vld [vmem:[%s5702_s2 + $0x1658] sm:$0xff] }
 0x17b   :  { %1748 = vmatpush2.msra.mxu1 %v655_v21  ;;  %1797 = vmatpush1.msra.mxu0 %v699_v22  ;;  %v2750_v21 = vld [vmem:[%s5703_s0 + $0x20] sm:$0xff]  ;;  %v780_v22 = vld [vmem:[%s5702_s2 + $0x1738] sm:$0xff]  ;;  %v815_v9 = vld [vmem:[%s5702_s2 + $0x1850] sm:$0xff] }
 0x17c   :  { %1749 = vmatprep.subr.mxu1 %v652_v24  ;;  %1798 = vmatprep.subr.mxu0 %v696_v25  ;;  %v1063_v24 = vpop.f32.mrf.mxu1  ;;  %v779_v25 = vld [vmem:[%s5702_s2 + $0x1730] sm:$0xff] }
 0x17d   :  { %1750 = vmatpush2.msra.mxu1 %v651_v27  ;;  %1799 = vmatpush1.msra.mxu0 %v695_v28  ;;  %v1062_v27 = vadd.f32 %v1061_v7, %v991_v13  ;;  %v776_v28 = vld [vmem:[%s5702_s2 + $0x1718] sm:$0xff]  ;;  %v751_v7 = vld [vmem:[%s5702_s2 + $0x1650] sm:$0xff] }
 0x17e   :  { %1751 = vmatprep.subr.mxu1 %v648_v29  ;;  %1800 = vmatprep.subr.mxu0 %v692_v30  ;;  %v840_v29 = vld [vmem:[%s5702_s2 + $0x1918] sm:$0xff]  ;;  %v1203_v30 = vpop.f32.mrf.mxu1 }
 0x17f   :  { %1752 = vmatpush2.msra.mxu1 %v647_v31  ;;  %1801 = vmatpush1.msra.mxu0 %v691_v3  ;;  %v1134_v31 = vpop.f32.mrf.mxu0  ;;  %v775_v3 = vld [vmem:[%s5702_s2 + $0x1710] sm:$0xff] }
 0x180   :  { %1753 = vmatprep.subr.mxu1 %v644_v32  ;;  %1802 = vmatprep.subr.mxu0 %v688_v33  ;;  %v839_v32 = vld [vmem:[%s5702_s2 + $0x1910] sm:$0xff]  ;;  %v1064_v33 = vadd.f32 %v1063_v24, %v993_v19 }
 0x181   :  { %1754 = vmatpush2.msra.mxu1 %v643_v35  ;;  %1803 = vmatpush1.msra.mxu0 %v687_v36  ;;  %v1133_v35 = vadd.f32 %v1132_v16, %v1062_v27  ;;  %v772_v36 = vld [vmem:[%s5702_s2 + $0x16f8] sm:$0xff]  ;;  %v811_v19 = vld [vmem:[%s5702_s2 + $0x1830] sm:$0xff] }
 0x182   :  { %1755 = vmatprep.subr.mxu1 %v640_v37  ;;  %1804 = vmatprep.subr.mxu0 %v684_v38  ;;  %v836_v37 = vld [vmem:[%s5702_s2 + $0x18f8] sm:$0xff]  ;;  %v807_v27 = vld [vmem:[%s5702_s2 + $0x1810] sm:$0xff] }
 0x183   :  { %1756 = vmatpush2.msra.mxu1 %v639_v39  ;;  %1805 = vmatpush1.msra.mxu0 %v683_v40  ;;  %v771_v39 = vld [vmem:[%s5702_s2 + $0x16f0] sm:$0xff]  ;;  %v812_v16 = vld [vmem:[%s5702_s2 + $0x1838] sm:$0xff] }
 0x184   :  { %1757 = vmatprep.subr.mxu1 %v636_v41  ;;  %1806 = vmatprep.subr.mxu0 %v680_v42  ;;  %v835_v40 = vld [vmem:[%s5702_s2 + $0x18f0] sm:$0xff]  ;;  %v1135_v41 = vadd.f32 %v1134_v31, %v1064_v33  ;;  %v768_v42 = vld [vmem:[%s5702_s2 + $0x16d8] sm:$0xff] }
 0x185   :  { %1758 = vmatpush2.msra.mxu1 %v635_v44  ;;  %1807 = vmatpush1.msra.mxu0 %v679_v11  ;;  %v832_v44 = vld [vmem:[%s5702_s2 + $0x18d8] sm:$0xff]  ;;  %v1205_v11 = vpop.f32.mrf.mxu1 }
 0x186   :  { %1759 = vmatprep.subr.mxu1 %v632_v46  ;;  %1808 = vmatprep.subr.mxu0 %v804_v0  ;;  %v767_v46 = vld [vmem:[%s5702_s2 + $0x16d0] sm:$0xff] }
 0x187   :  { %1760 = vmatpush2.msra.mxu1 %v631_v48  ;;  %1809 = vmatpush2.msra.mxu0 %v803_v49  ;;  %v1274_v38 = vpop.f32.mrf.mxu0  ;;  %v831_v0 = vld [vmem:[%s5702_s2 + $0x18d0] sm:$0xff]  ;;  %v1204_v48 = vadd.f32 %v1203_v30, %v1133_v35  ;;  %v764_v49 = vld [vmem:[%s5702_s2 + $0x16b8] sm:$0xff] }
 0x188   :  { %1761 = vmatprep.subr.mxu1 %v628_v50  ;;  %1810 = vmatprep.subr.mxu0 %v800_v51  ;;  %v828_v50 = vld [vmem:[%s5702_s2 + $0x18b8] sm:$0xff] }
 0x189   :  { %1762 = vmatpush2.msra.mxu1 %v627_v53  ;;  %1811 = vmatpush2.msra.mxu0 %v799_v54  ;;  %v1345_v51 = vpop.f32.mrf.mxu1  ;;  %v1276_v52 = vpop.f32.mrf.mxu0  ;;  %v763_v53 = vld [vmem:[%s5702_s2 + $0x16b0] sm:$0xff] }
 0x18a   :  { %1763 = vmatprep.subr.mxu1 %v624_v55  ;;  %1812 = vmatprep.subr.mxu0 %v796_v56  ;;  %v827_v54 = vld [vmem:[%s5702_s2 + $0x18b0] sm:$0xff]  ;;  %v1206_v55 = vadd.f32 %v1205_v11, %v1135_v41  ;;  %v1275_v56 = vadd.f32 %v1274_v38, %v1204_v48 }
 0x18b   :  { %1764 = vmatpush2.msra.mxu1 %v623_v58  ;;  %1813 = vmatpush2.msra.mxu0 %v795_v8  ;;  %v824_v58 = vld [vmem:[%s5702_s2 + $0x1898] sm:$0xff]  ;;  %v759_v8 = vld [vmem:[%s5702_s2 + $0x1690] sm:$0xff] }
 0x18c   :  { %1765 = vmatprep.subr.mxu1 %v620_v60  ;;  %1814 = vmatprep.subr.mxu0 %v792_v61  ;;  %v1277_v60 = vadd.f32 %v1276_v52, %v1206_v55  ;;  %v756_v61 = vld [vmem:[%s5702_s2 + $0x1678] sm:$0xff]  ;;  %v2250_v48 = vld [vmem:[%s5706_s4 + $0xf0] sm:$0xff] }
 0x18d   :  { %1766 = vmatpush2.msra.mxu1 %v619_v63  ;;  %1815 = vmatpush2.msra.mxu0 %v791_v1  ;;  %v1347_v63 = vpop.f32.mrf.mxu1  ;;  %v755_v1 = vld [vmem:[%s5702_s2 + $0x1670] sm:$0xff] }
 0x18e   :  { %1767 = vmatprep.subr.mxu1 %v616_v2  ;;  %1816 = vmatprep.subr.mxu0 %v788_v4  ;;  %v819_v2 = vld [vmem:[%s5702_s2 + $0x1870] sm:$0xff]  ;;  %v1346_v4 = vadd.f32 %v1345_v51, %v1275_v56  ;;  %v2249_v56 = vld [vmem:[%s5706_s4 + $0xe8] sm:$0xff] }
 0x18f   :  { %1768 = vmatpush2.msra.mxu1 %v615_v6  ;;  %1769 = vmatprep.mubr.f32.mxu1 %v3978_v20  ;;  %v844_v20 = vld [vmem:[%s5702_s2 + $0x1938] sm:$0xff] }
 0x190   :  { %1817 = vmatpush2.msra.mxu0 %v787_v12  ;;  %1770 = vmatmul.mubr.f32.vlgmr.msra.gmra.mxu1 %v2750_v21  ;;  %v816_v6 = vld [vmem:[%s5702_s2 + $0x1858] sm:$0xff] }
 0x191   :  { %1818 = vmatprep.subr.mxu0 %v784_v14  ;;  %2644 = vmatprep.subr.msk.mxu1 %vm911_vm0, %v848_v15  ;;  %v1348_v14 = vadd.f32 %v1347_v63, %v1277_v60  ;;  %v748_v15 = vld [vmem:[%s5702_s2 + $0x1638] sm:$0xff] }
 0x192   :  { %1819 = vmatpush2.msra.mxu0 %v783_v17  ;;  %2645 = vmatpush1.msk.msra.mxu1 %vm911_vm0, %v847_v18  ;;  %v747_v18 = vld [vmem:[%s5702_s2 + $0x1630] sm:$0xff] }
 0x193   :  { %1820 = vmatprep.subr.mxu0 %v780_v22  ;;  %1859 = vmatprep.subr.mxu1 %v844_v20  ;;  %v744_v22 = vld [vmem:[%s5702_s2 + $0x1618] sm:$0xff] }
 0x194   :  { %1821 = vmatpush2.msra.mxu0 %v779_v25  ;;  %1860 = vmatpush1.msra.mxu1 %v843_v26  ;;  %v808_v20 = vld [vmem:[%s5702_s2 + $0x1818] sm:$0xff]  ;;  %v743_v26 = vld [vmem:[%s5702_s2 + $0x1610] sm:$0xff] }
 0x195   :  { %1822 = vmatprep.subr.mxu0 %v776_v28  ;;  %1861 = vmatprep.subr.mxu1 %v840_v29 }
 0x196   :  { %1823 = vmatpush2.msra.mxu0 %v775_v3  ;;  %1862 = vmatpush1.msra.mxu1 %v839_v32 }
 0x197   :  { %1824 = vmatprep.subr.mxu0 %v772_v36  ;;  %1863 = vmatprep.subr.mxu1 %v836_v37  ;;  %v2251_v37 = vld [vmem:[%s5706_s4 + $0xf8] sm:$0xff] }
 0x198   :  { %1825 = vmatpush2.msra.mxu0 %v771_v39  ;;  %1864 = vmatpush1.msra.mxu1 %v835_v40 }
 0x199   :  { %1826 = vmatprep.subr.mxu0 %v768_v42  ;;  %1865 = vmatprep.subr.mxu1 %v832_v44  ;;  %v2751_v42 = vld [vmem:[%s5703_s0 + $0x28] sm:$0xff]  ;;  %v2752_v44 = vld [vmem:[%s5703_s0 + $0x30] sm:$0xf] }
 0x19a   :  { %1827 = vmatpush2.msra.mxu0 %v767_v46  ;;  %1866 = vmatpush1.msra.mxu1 %v831_v0 }
 0x19b   :  { %1828 = vmatprep.subr.mxu0 %v764_v49  ;;  %1867 = vmatprep.subr.mxu1 %v828_v50 }
 0x19c   :  { %1829 = vmatpush2.msra.mxu0 %v763_v53  ;;  %1868 = vmatpush1.msra.mxu1 %v827_v54  ;;  %v2234_v53 = vld [vmem:[%s5706_s4 + $0x70] sm:$0xff] }
 0x19d   :  { %1830 = vmatprep.subr.mxu0 %v760_v57  ;;  %1869 = vmatprep.subr.mxu1 %v824_v58 }
 0x19e   :  { %1831 = vmatpush2.msra.mxu0 %v759_v8  ;;  %1870 = vmatpush1.msra.mxu1 %v823_v59 }
 0x19f   :  { %1832 = vmatprep.subr.mxu0 %v756_v61  ;;  %1871 = vmatprep.subr.mxu1 %v820_v62  ;;  %v5300_v12 = vpop.permute.xlu0 %1920  ;;  %v1416_v13 = vpop.f32.mrf.mxu0  ;;  %v2233_v62 = vld [vmem:[%s5706_s4 + $0x68] sm:$0xff] }
 0x1a0   :  { %1833 = vmatpush2.msra.mxu0 %v755_v1  ;;  %1872 = vmatpush1.msra.mxu1 %v819_v2  ;;  %v5308_v17 = vadd.f32 %v1416_v13, %v1346_v4  ;;  %v2248_v2 = vld [vmem:[%s5706_s4 + $0xe0] sm:$0xff] }
 0x1a1   :  { %1834 = vmatprep.subr.mxu0 %v752_v5  ;;  %1873 = vmatprep.subr.mxu1 %v816_v6  ;;  %v1418_v21 = vpop.f32.mrf.mxu0 }
 0x1a2   :  { %1835 = vmatpush2.msra.mxu0 %v751_v7  ;;  %1874 = vmatpush1.msra.mxu1 %v815_v9  ;;  %v1923_v24 = vmul.f32 %v5300_v12, %v5308_v17  ;;  %v5324_v25 = vadd.f32 %v1418_v21, %v1348_v14  ;;  %v2232_v14 = vld [vmem:[%s5706_s4 + $0x60] sm:$0xff] }
 0x1a3   :  { %1836 = vmatprep.subr.mxu0 %v748_v15  ;;  %1875 = vmatprep.subr.mxu1 %v812_v16 }
 0x1a4   :  { %1837 = vmatpush2.msra.mxu0 %v747_v18  ;;  %1876 = vmatpush1.msra.mxu1 %v811_v19  ;;  %v1927_v28 = vsel %vm911_vm0, %v1923_v24, 0.0  ;;  %v1960_v29 = vmul.f32 %v1923_v24, %v5308_v17  ;;  %v1924_v30 = vmul.f32 %v5300_v12, %v5324_v25  ;;  %v2247_v18 = vld [vmem:[%s5706_s4 + $0xd8] sm:$0xff] }
 0x1a5   :  { %1838 = vmatprep.subr.mxu0 %v744_v22  ;;  %1877 = vmatprep.subr.mxu1 %v808_v20  ;;  %v1928_v31 = vrot.slane %v1927_v28, 4  ;;  %v5336_v3 = vpop.permute.xlu0 %2013 }
 0x1a6   :  { %1839 = vmatpush2.msra.mxu0 %v743_v26  ;;  %1840 = vmatprep.mubr.f32.mxu0 %v3986_v23  ;;  %v1964_v32 = vsel %vm911_vm0, %v1960_v29, 0.0  ;;  %v1934_v33 = vsel %vm911_vm0, %v1924_v30, 0.0  ;;  %v1961_v35 = vmul.f32 %v1924_v30, %v5324_v25  ;;  %v2017_v36 = vmul.f32 %v5336_v3, %v5324_v25  ;;  %v2235_v23 = vld [vmem:[%s5706_s4 + $0x78] sm:$0xff]  ;;  %v2246_v30 = vld [vmem:[%s5706_s4 + $0xd0] sm:$0xff] }
 0x1a7   :  { %1878 = vmatpush1.msra.mxu1 %v807_v27  ;;  %1911 = vmatprep.mubr.f32.mxu1 %v2753_v10  ;;  %v1929_v38 = vadd.f32 %v1928_v31, %v1927_v28  ;;  %v1965_v39 = vrot.slane %v1964_v32, 4  ;;  %v1935_v40 = vrot.slane %v1934_v33, 4  ;;  %v2016_v41 = vmul.f32 %v5336_v3, %v5308_v17  ;;  %v2231_v26 = vld [vmem:[%s5706_s4 + $0x58] sm:$0xff] }
 0x1a8   :  { %1841 = vmatmul.mubr.f32.vlgmr.msra.gmra.mxu0 %v2751_v42  ;;  %2646 = vmatmul.mubr.msk.f32.vlgmr.msra.gmra.mxu1 %vm908_vm1, %v2752_v44  ;;  %v1971_v11 = vsel %vm911_vm0, %v1961_v35, 0.0  ;;  %v2027_v46 = vsel %vm911_vm0, %v2017_v36, 0.0  ;;  %v2053_v0 = vmul.f32 %v2017_v36, %v5324_v25  ;;  %v2230_v36 = vld [vmem:[%s5706_s4 + $0x50] sm:$0xff] }
 0x1a9   :  { %v1930_v49 = vrot.slane %v1929_v38, 2  ;;  %v1966_v50 = vadd.f32 %v1965_v39, %v1964_v32  ;;  %v1936_v51 = vadd.f32 %v1935_v40, %v1934_v33  ;;  %v1972_v52 = vrot.slane %v1971_v11, 4  ;;  %2650 = vmatprep.subr.mxu0 %v2251_v37  ;;  %2349 = vmatprep.subr.mxu1 %v2753_v10  ;;  %v2245_v40 = vld [vmem:[%s5706_s4 + $0xc8] sm:$0xff] }
 0x1aa   :  { %v2028_v54 = vrot.slane %v2027_v46, 4  ;;  %v2063_v55 = vsel %vm911_vm0, %v2053_v0, 0.0  ;;  %2651 = vmatpush3.msra.mxu0 %v2235_v23  ;;  %v2020_v57 = vsel %vm911_vm0, %v2016_v41, 0.0  ;;  %v2052_v58 = vmul.f32 %v2016_v41, %v5308_v17 }
 0x1ab   :  { %v1931_v8 = vadd.f32 %v1930_v49, %v1929_v38  ;;  %v1967_v59 = vrot.slane %v1966_v50, 2  ;;  %v1937_v60 = vrot.slane %v1936_v51, 2  ;;  %v1973_v61 = vadd.f32 %v1972_v52, %v1971_v11  ;;  %2652 = vmatprep.subr.mxu0 %v2250_v48 }
 0x1ac   :  { %v2029_v63 = vadd.f32 %v2028_v54, %v2027_v46  ;;  %v2064_v1 = vrot.slane %v2063_v55, 4  ;;  %2653 = vmatpush3.msra.mxu0 %v2234_v53  ;;  %v2021_v4 = vrot.slane %v2020_v57, 4  ;;  %v2056_v5 = vsel %vm911_vm0, %v2052_v58, 0.0  ;;  %v2229_v46 = vld [vmem:[%s5706_s4 + $0x48] sm:$0xff] }
 0x1ad   :  { %v1932_v6 = vrot.slane %v1931_v8, 1  ;;  %v1968_v7 = vadd.f32 %v1967_v59, %v1966_v50  ;;  %v1938_v9 = vadd.f32 %v1937_v60, %v1936_v51  ;;  %v1974_v13 = vrot.slane %v1973_v61, 2  ;;  %2654 = vmatprep.subr.mxu0 %v2249_v56  ;;  %v2244_v50 = vld [vmem:[%s5706_s4 + $0xc0] sm:$0xff] }
 0x1ae   :  { %v2030_v15 = vrot.slane %v2029_v63, 2  ;;  %v2065_v16 = vadd.f32 %v2064_v1, %v2063_v55  ;;  %2655 = vmatpush3.msra.mxu0 %v2233_v62  ;;  %v2022_v19 = vadd.f32 %v2021_v4, %v2020_v57  ;;  %v2057_v21 = vrot.slane %v2056_v5, 4  ;;  %v2228_v55 = vld [vmem:[%s5706_s4 + $0x40] sm:$0xff]  ;;  %v2227_v62 = vld [vmem:[%s5706_s4 + $0x38] sm:$0xff] }
 0x1af   :  { %v1933_v22 = vadd.f32 %v1932_v6, %v1931_v8  ;;  %v1969_v20 = vrot.slane %v1968_v7, 1  ;;  %v1975_v24 = vadd.f32 %v1974_v13, %v1973_v61  ;;  %2656 = vmatprep.subr.mxu0 %v2248_v2  ;;  %v1939_v27 = vrot.slane %v1938_v9, 1  ;;  %v2243_v8 = vld [vmem:[%s5706_s4 + $0xb8] sm:$0xff]  ;;  %v2242_v2 = vld [vmem:[%s5706_s4 + $0xb0] sm:$0xff] }
 0x1b0   :  { %v2031_v28 = vadd.f32 %v2030_v15, %v2029_v63  ;;  %v2066_v29 = vrot.slane %v2065_v16, 2  ;;  %2657 = vmatpush3.msra.mxu0 %v2232_v14  ;;  %v2023_v31 = vrot.slane %v2022_v19, 2  ;;  %v2058_v32 = vadd.f32 %v2057_v21, %v2056_v5  ;;  %v2226_v6 = vld [vmem:[%s5706_s4 + $0x30] sm:$0xff]  ;;  %v2241_v14 = vld [vmem:[%s5706_s4 + $0xa8] sm:$0xff]  ;;  %v2240_v21 = vld [vmem:[%s5706_s4 + $0xa0] sm:$0xff] }
 0x1b1   :  { %v1970_v33 = vadd.f32 %v1969_v20, %v1968_v7  ;;  %v1976_v35 = vrot.slane %v1975_v24, 1  ;;  %2658 = vmatprep.subr.mxu0 %v2247_v18  ;;  %v1940_v37 = vadd.f32 %v1939_v27, %v1938_v9  ;;  %v5398_v38 = vmul.f32 0.5, %v1933_v22  ;;  %v2225_v18 = vld [vmem:[%s5706_s4 + $0x28] sm:$0xff]  ;;  %v2224_v20 = vld [vmem:[%s5706_s4 + $0x20] sm:$0xff]  ;;  %v2223_v27 = vld [vmem:[%s5706_s4 + $0x18] sm:$0xff] }
 0x1b2   :  { %v2067_v39 = vadd.f32 %v2066_v29, %v2065_v16  ;;  %2659 = vmatpush3.msra.mxu0 %v2231_v26  ;;  %v2032_v23 = vrot.slane %v2031_v28, 1  ;;  %v2024_v41 = vadd.f32 %v2023_v31, %v2022_v19  ;;  %v2059_v42 = vrot.slane %v2058_v32, 2  ;;  %v2239_v26 = vld [vmem:[%s5706_s4 + $0x98] sm:$0xff]  ;;  %v2238_v29 = vld [vmem:[%s5706_s4 + $0x90] sm:$0xff]  ;;  %v2237_v31 = vld [vmem:[%s5706_s4 + $0x88] sm:$0xff] }
 0x1b3   :  { %v1992_v44 = vmul.f32 0.5, %v1970_v33  ;;  %v1977_v11 = vadd.f32 %v1976_v35, %v1975_v24  ;;  %2660 = vmatprep.subr.mxu0 %v2246_v30  ;;  %v5406_v0 = vmul.f32 0.5, %v1940_v37  ;;  %v1996_v48 = vmul.f32 %v5398_v38, %v5398_v38  ;;  %v2222_v30 = vld [vmem:[%s5706_s4 + $0x10] sm:$0xff]  ;;  %v2236_v33 = vld [vmem:[%s5706_s4 + $0x80] sm:$0xff] }
 0x1b4   :  { %v2068_v49 = vrot.slane %v2067_v39, 1  ;;  %2661 = vmatpush3.msra.mxu0 %v2230_v36  ;;  %v2033_v51 = vadd.f32 %v2032_v23, %v2031_v28  ;;  %v2025_v52 = vrot.slane %v2024_v41, 1  ;;  %v2060_v53 = vadd.f32 %v2059_v42, %v2058_v32  ;;  %v2221_v32 = vld [vmem:[%s5706_s4 + $0x8] sm:$0xff]  ;;  %v2220_v35 = vld [vmem:[%s5706_s4] sm:$0xff] }
 0x1b5   :  { %v1993_v54 = vmul.f32 0.5, %v1977_v11  ;;  %2662 = vmatprep.subr.mxu0 %v2245_v40  ;;  %v1997_v56 = vmul.f32 %v5406_v0, %v5406_v0  ;;  %v2000_v57 = vsub.f32 %v1992_v44, %v1996_v48  ;;  %v2105_v36 = vmul.f32 %v5406_v0, %v5300_v12 }
 0x1b6   :  { %v2069_v58 = vadd.f32 %v2068_v49, %v2067_v39  ;;  %2663 = vmatpush3.msra.mxu0 %v2229_v46  ;;  %v2049_v59 = vmul.f32 0.5, %v2033_v51  ;;  %v2026_v60 = vadd.f32 %v2025_v52, %v2024_v41  ;;  %v2061_v61 = vrot.slane %v2060_v53, 1 }
 0x1b7   :  { %2664 = vmatprep.subr.mxu0 %v2244_v50  ;;  %v2001_v63 = vsub.f32 %v1993_v54, %v1997_v56  ;;  %v2004_v9 = vadd.f32 1e-05, %v2000_v57  ;;  %v2142_v39 = vsub.s32 5, %v5078_v34  ;;  %v2182_v23 = vsub.s32 6, %v5078_v34 }
 0x1b8   :  { %v2085_v1 = vmul.f32 0.5, %v2069_v58  ;;  %2665 = vmatpush3.msra.mxu0 %v2228_v55  ;;  %v2089_v4 = vmul.f32 %v2049_v59, %v2049_v59  ;;  %v2048_v5 = vmul.f32 0.5, %v2026_v60  ;;  %v2062_v13 = vadd.f32 %v2061_v61, %v2060_v53 }
 0x1b9   :  { %2666 = vmatprep.subr.mxu0 %v2243_v8  ;;  %v2005_v7 = vadd.f32 1e-05, %v2001_v63  ;;  %v2109_v37 = vmul.f32 %v2049_v59, %v5336_v3  ;;  %v5472_v41 = vsub.s32 1, %v5078_v34  ;;  %v2104_v42 = vmul.f32 %v5398_v38, %v5300_v12 }
 0x1ba   :  { %2667 = vmatpush3.msra.mxu0 %v2227_v62  ;;  %v2093_v15 = vsub.f32 %v2085_v1, %v2089_v4  ;;  %v2088_v16 = vmul.f32 %v2048_v5, %v2048_v5  ;;  %v2084_v19 = vmul.f32 0.5, %v2062_v13  ;;  %v2108_v44 = vmul.f32 %v2048_v5, %v5336_v3 }
 0x1bb   :  { %2668 = vmatprep.subr.mxu0 %v2242_v2  ;;  %2722 = vrsqrt.f32 %v2005_v7  ;;  %v2113_v46 = vadd.f32 %v2109_v37, %v2105_v36  ;;  %v2143_v48 = vrot.slane %v5116_v45, %v2142_v39  ;;  %v5483_v50 = vsub.s32 2, %v5078_v34  ;;  %v2489_v34 = vld [vmem:[%s5707_s6 + $0x30] sm:$0x3] }
 0x1bc   :  { %2669 = vmatpush3.msra.mxu0 %v2226_v6  ;;  %v2097_v22 = vadd.f32 1e-05, %v2093_v15  ;;  %2724 = vrsqrt.f32 %v2004_v9  ;;  %v2092_v24 = vsub.f32 %v2084_v19, %v2088_v16  ;;  %v2183_v38 = vrot.slane %v5116_v45, %v2182_v23  ;;  %v2264_v15 = vld [vmem:[%s5706_s4 + $0x160] sm:$0xff]  ;;  %v2263_v16 = vld [vmem:[%s5706_s4 + $0x158] sm:$0xff]  ;;  %v2261_v19 = vld [vmem:[%s5706_s4 + $0x148] sm:$0xff] }
 0x1bd   :  { %2670 = vmatprep.subr.mxu0 %v2241_v14  ;;  %v2112_v52 = vadd.f32 %v2108_v44, %v2104_v42  ;;  %v2139_v54 = vrot.slane %v5116_v45, %v5472_v41  ;;  %v2129_v57 = vsub.f32 %v5324_v25, %v2113_v46  ;;  %v2163_v58 = vrot.slane %v2143_v48, %v5472_v41  ;;  %v2265_v14 = vld [vmem:[%s5706_s4 + $0x168] sm:$0xff] }
 0x1be   :  { %2671 = vmatpush3.msra.mxu0 %v2225_v18  ;;  %2726 = vrsqrt.f32 %v2097_v22  ;;  %v2096_v28 = vadd.f32 1e-05, %v2092_v24  ;;  %v2179_v59 = vrot.slane %v5116_v45, %v5483_v50  ;;  %v2203_v61 = vrot.slane %v2183_v38, %v5483_v50  ;;  %v2267_v45 = vld [vmem:[%s5706_s4 + $0x178] sm:$0xff]  ;;  %v2262_v18 = vld [vmem:[%s5706_s4 + $0x150] sm:$0xff]  ;;  %v2257_v24 = vld [vmem:[%s5706_s4 + $0x128] sm:$0xff] }
 0x1bf   :  { %2672 = vmatprep.subr.mxu0 %v2240_v21  ;;  %v2128_v63 = vsub.f32 %v5308_v17, %v2112_v52  ;;  %v2159_v1 = vrot.slane %v2139_v54, %v5472_v41  ;;  %2350 = vmatpush1.msra.mxu1 %v2267_v45  ;;  %v2266_v17 = vld [vmem:[%s5706_s4 + $0x170] sm:$0xff]  ;;  %v2260_v21 = vld [vmem:[%s5706_s4 + $0x140] sm:$0xff]  ;;  %v2259_v22 = vld [vmem:[%s5706_s4 + $0x138] sm:$0xff] }
 0x1c0   :  { %2673 = vmatpush3.msra.mxu0 %v2224_v20  ;;  %2728 = vrsqrt.f32 %v2096_v28  ;;  %v2199_v5 = vrot.slane %v2179_v59, %v5483_v50  ;;  %2351 = vmatprep.subr.mxu1 %v2753_v10  ;;  %v2258_v20 = vld [vmem:[%s5706_s4 + $0x130] sm:$0xff] }
 0x1c1   :  { %2674 = vmatprep.subr.mxu0 %v2239_v26  ;;  %2352 = vmatpush1.msra.mxu1 %v2266_v17  ;;  %v2256_v26 = vld [vmem:[%s5706_s4 + $0x120] sm:$0xff]  ;;  %v2254_v28 = vld [vmem:[%s5706_s4 + $0x110] sm:$0xff] }
 0x1c2   :  { %2675 = vmatpush3.msra.mxu0 %v2223_v27  ;;  %2353 = vmatprep.subr.mxu1 %v2753_v10  ;;  %v2255_v27 = vld [vmem:[%s5706_s4 + $0x118] sm:$0xff] }
 0x1c3   :  { %2676 = vmatprep.subr.mxu0 %v2238_v29  ;;  %2354 = vmatpush1.msra.mxu1 %v2265_v14  ;;  %v2253_v29 = vld [vmem:[%s5706_s4 + $0x108] sm:$0xff] }
 0x1c4   :  { %2677 = vmatpush3.msra.mxu0 %v2222_v30  ;;  %2355 = vmatprep.subr.mxu1 %v2753_v10  ;;  %v2252_v30 = vld [vmem:[%s5706_s4 + $0x100] sm:$0xff] }
 0x1c5   :  { %2678 = vmatprep.subr.mxu0 %v2237_v31  ;;  %2356 = vmatpush1.msra.mxu1 %v2264_v15  ;;  %v2269_v31 = vld [vmem:[%s5706_s4 + $0x188] sm:$0xff] }
 0x1c6   :  { %2679 = vmatpush3.msra.mxu0 %v2221_v32  ;;  %2357 = vmatprep.subr.mxu1 %v2753_v10  ;;  %v2268_v32 = vld [vmem:[%s5706_s4 + $0x180] sm:$0xff] }
 0x1c7   :  { %2680 = vmatprep.subr.mxu0 %v2236_v33  ;;  %2358 = vmatpush1.msra.mxu1 %v2263_v16  ;;  %v5575_v33 = vld [vmem:[%s5705_s3 + $0x8] sm:$0x77] }
 0x1c8   :  { %v2723_v40 = vpop.eup %2722  ;;  %2681 = vmatpush3.msra.mxu0 %v2220_v35  ;;  %2359 = vmatprep.subr.mxu1 %v2753_v10  ;;  %v864_v36 = vrot.slane %v5575_v33, %v5105_v43  ;;  %v868_v37 = vrot.slane %v5575_v33, %v859_v47 }
 0x1c9   :  { %2693 = vmatprep.subr.mxu0 %v2753_v10  ;;  %v2725_v11 = vpop.eup %2724  ;;  %v2117_v0 = vmul.f32 %v2723_v40, %v5300_v12  ;;  %2360 = vmatpush1.msra.mxu1 %v2262_v18 }
 0x1ca   :  { %v2116_v53 = vmul.f32 %v2725_v11, %v5300_v12  ;;  %2361 = vmatprep.subr.mxu1 %v2753_v10  ;;  %v884_v44 = vrot.slane %v864_v36, %v5105_v43  ;;  %v888_v46 = vrot.slane %v868_v37, %v5105_v43 }
 0x1cb   :  { %v2727_v49 = vpop.eup %2726  ;;  %2362 = vmatpush1.msra.mxu1 %v2261_v19  ;;  %v1487_v35 = vpop.f32.mrf.mxu1 }
 0x1cc   :  { %v2121_v51 = vmul.f32 %v2727_v49, %v5336_v3  ;;  %2363 = vmatprep.subr.mxu1 %v2753_v10  ;;  %v1488_v48 = vadd.f32 %v1487_v35, %v884_v44 }
 0x1cd   :  { %v2729_v55 = vpop.eup %2728  ;;  %2364 = vmatpush1.msra.mxu1 %v2260_v21  ;;  %v1489_v40 = vpop.f32.mrf.mxu1 }
 0x1ce   :  { %v2125_v56 = vadd.f32 %v2121_v51, %v2117_v0  ;;  %v2120_v8 = vmul.f32 %v2729_v55, %v5336_v3  ;;  %2365 = vmatprep.subr.mxu1 %v2753_v10  ;;  %v1490_v38 = vadd.f32 %v1489_v40, %v888_v46 }
 0x1cf   :  { %2366 = vmatpush1.msra.mxu1 %v2259_v22 }
 0x1d0   :  { %v2133_v60 = vmul.f32 %v2129_v57, %v2125_v56  ;;  %v2124_v62 = vadd.f32 %v2120_v8, %v2116_v53  ;;  %2367 = vmatprep.subr.mxu1 %v2753_v10 }
 0x1d1   :  { %2368 = vmatpush1.msra.mxu1 %v2258_v20 }
 0x1d2   :  { %v2173_v2 = vmul.f32 %v2163_v58, %v2133_v60  ;;  %v2132_v4 = vmul.f32 %v2128_v63, %v2124_v62  ;;  %2369 = vmatprep.subr.mxu1 %v2753_v10 }
 0x1d3   :  { %2370 = vmatpush1.msra.mxu1 %v2257_v24 }
 0x1d4   :  { %v2213_v25 = vadd.f32 %v2203_v61, %v2173_v2  ;;  %v2172_v6 = vmul.f32 %v2159_v1, %v2132_v4  ;;  %2371 = vmatprep.subr.mxu1 %v2753_v10 }
 0x1d5   :  { %2372 = vmatpush1.msra.mxu1 %v2256_v26 }
 0x1d6   :  { %v2217_v7 = vmax.f32 %v2213_v25, 0.0  ;;  %v2212_v9 = vadd.f32 %v2199_v5, %v2172_v6  ;;  %2373 = vmatprep.subr.mxu1 %v2753_v10 }
 0x1d7   :  { %2374 = vmatpush1.msra.mxu1 %v2255_v27 }
 0x1d8   :  { %2343 = vmatprep.mubr.f32.mxu0 %v2217_v7  ;;  %v2216_v13 = vmax.f32 %v2212_v9, 0.0  ;;  %2375 = vmatprep.subr.mxu1 %v2753_v10 }
 0x1d9   :  { %2376 = vmatpush1.msra.mxu1 %v2254_v28 }
 0x1da   :  { %2344 = vmatmul.mubr.f32.vlgmr.msra.gmra.mxu0 %v2216_v13  ;;  %2377 = vmatprep.subr.mxu1 %v2753_v10 }
 0x1db   :  { %2378 = vmatpush1.msra.mxu1 %v2253_v29  ;;  %2694 = vmatpush3.msk.msra.mxu0 %vm2499_vm4, %v2489_v34 }
 0x1dc   :  { %2379 = vmatprep.subr.mxu1 %v2753_v10  ;;  %2695 = vmatprep.subr.mxu0 %v2753_v10 }
 0x1dd   :  { %2380 = vmatpush1.msra.mxu1 %v2252_v30  ;;  %2707 = vmatprep.mubr.msk.f32.mxu0 %vm2756_vm5, %v2753_v10 }
 0x1de   :  { %2409 = vmatprep.subr.mxu1 %v2753_v10 }
 0x1df   :  { %2410 = vmatpush2.msra.mxu1 %v2269_v31 }
 0x1e0   :  { %2411 = vmatprep.subr.mxu1 %v2753_v10 }
 0x1e1   :  { %2412 = vmatpush2.msra.mxu1 %v2268_v32  ;;  %v1558_v42 = vpop.f32.mrf.mxu0 }
 0x1e2   :  { %v1559_v52 = vadd.f32 %v1558_v42, %v1488_v48 }
 0x1e3   :  { %v1560_v0 = vpop.f32.mrf.mxu0 }
 0x1e4   :  { %v1561_v54 = vadd.f32 %v1560_v0, %v1490_v38 }
 0x20e   :  { %v1629_v11 = vpop.f32.mrf.mxu1 }
 0x20f   :  { %v1630_v55 = vadd.f32 %v1629_v11, %v1559_v52 }
 0x210   :  { %v1631_v49 = vpop.f32.mrf.mxu1 }
 0x211   :  { %v1632_v57 = vadd.f32 %v1631_v49, %v1561_v54 }
 0x225   :  { %v1700_v51 = vpop.f32.mrf.mxu0 }
 0x226   :  { %v1701_v58 = vadd.f32 %v1700_v51, %v1630_v55 }
 0x227   :  { %v1702_v56 = vpop.f32.mrf.mxu0 }
 0x228   :  { %v1703_v8 = vadd.f32 %v1702_v56, %v1632_v57 }
 0x250   :  { %v1771_v53 = vpop.f32.mrf.mxu1 }
 0x251   :  { %v1772_v59 = vadd.f32 %v1771_v53, %v1701_v58 }
 0x252   :  { %v1773_v47 = vpop.f32.mrf.mxu1 }
 0x253   :  { %v1774_v62 = vadd.f32 %v1773_v47, %v1703_v8 }
 0x268   :  { %v1842_v60 = vpop.f32.mrf.mxu0  ;;  %v1913_v61 = vpop.f32.mrf.mxu1 }
 0x269   :  { %v1843_v63 = vadd.f32 %v1842_v60, %v1772_v59 }
 0x26a   :  { %v1844_v1 = vpop.f32.mrf.mxu0  ;;  %v1915_v5 = vpop.f32.mrf.mxu1 }
 0x26b   :  { %v5584_v2 = vadd.f32 %v1913_v61, %v1843_v63  ;;  %v1845_v4 = vadd.f32 %v1844_v1, %v1774_v62 }
 0x26d   :  { %v1925_v25 = vmul.f32 %v5300_v12, %v5584_v2  ;;  %v2018_v6 = vmul.f32 %v5336_v3, %v5584_v2  ;;  %v5590_v7 = vadd.f32 %v1915_v5, %v1845_v4 }
 0x26f   :  { %v1941_v9 = vsel %vm911_vm0, %v1925_v25, 0.0  ;;  %v1962_v13 = vmul.f32 %v1925_v25, %v5584_v2  ;;  %v2034_v45 = vsel %vm911_vm0, %v2018_v6, 0.0  ;;  %v2054_v17 = vmul.f32 %v2018_v6, %v5584_v2 }
 0x270   :  { %v1942_v14 = vrot.slane %v1941_v9, 4  ;;  %v2035_v15 = vrot.slane %v2034_v45, 4  ;;  %v1926_v16 = vmul.f32 %v5300_v12, %v5590_v7  ;;  %v2019_v18 = vmul.f32 %v5336_v3, %v5590_v7 }
 0x271   :  { %v1978_v19 = vsel %vm911_vm0, %v1962_v13, 0.0  ;;  %v2070_v21 = vsel %vm911_vm0, %v2054_v17, 0.0 }
 0x272   :  { %v1943_v22 = vadd.f32 %v1942_v14, %v1941_v9  ;;  %v1979_v20 = vrot.slane %v1978_v19, 4  ;;  %v2036_v24 = vadd.f32 %v2035_v15, %v2034_v45  ;;  %v2071_v26 = vrot.slane %v2070_v21, 4 }
 0x273   :  { %v1949_v27 = vsel %vm1948_vm2, %v1926_v16, 0.0  ;;  %v1963_v28 = vmul.f32 %v1926_v16, %v5590_v7  ;;  %v2041_v29 = vsel %vm1948_vm2, %v2019_v18, 0.0  ;;  %v2055_v30 = vmul.f32 %v2019_v18, %v5590_v7 }
 0x274   :  { %v1944_v31 = vrot.slane %v1943_v22, 2  ;;  %v1980_v32 = vadd.f32 %v1979_v20, %v1978_v19  ;;  %v2037_v35 = vrot.slane %v2036_v24, 2  ;;  %v2072_v36 = vadd.f32 %v2071_v26, %v2070_v21 }
 0x275   :  { %v1950_v37 = vrot.slane %v1949_v27, 4  ;;  %v1985_v40 = vsel %vm1948_vm2, %v1963_v28, 0.0  ;;  %v2042_v42 = vrot.slane %v2041_v29, 4  ;;  %v2077_v44 = vsel %vm1948_vm2, %v2055_v30, 0.0 }
 0x276   :  { %v1945_v11 = vadd.f32 %v1944_v31, %v1943_v22  ;;  %v1981_v46 = vrot.slane %v1980_v32, 2  ;;  %v2038_v0 = vadd.f32 %v2037_v35, %v2036_v24  ;;  %v2073_v48 = vrot.slane %v2072_v36, 2 }
 0x277   :  { %v1951_v49 = vadd.f32 %v1950_v37, %v1949_v27  ;;  %v1986_v51 = vrot.slane %v1985_v40, 4  ;;  %v2043_v38 = vadd.f32 %v2042_v42, %v2041_v29  ;;  %v2078_v52 = vrot.slane %v2077_v44, 4 }
 0x278   :  { %v1946_v53 = vrot.slane %v1945_v11, 1  ;;  %v1982_v54 = vadd.f32 %v1981_v46, %v1980_v32  ;;  %v2039_v55 = vrot.slane %v2038_v0, 1  ;;  %v2074_v56 = vadd.f32 %v2073_v48, %v2072_v36 }
 0x279   :  { %v1952_v57 = vrot.slane %v1951_v49, 2  ;;  %v1987_v58 = vadd.f32 %v1986_v51, %v1985_v40  ;;  %v2044_v47 = vrot.slane %v2043_v38, 2  ;;  %v2079_v8 = vadd.f32 %v2078_v52, %v2077_v44 }
 0x27a   :  { %v1947_v59 = vadd.f32 %v1946_v53, %v1945_v11  ;;  %v1983_v60 = vrot.slane %v1982_v54, 1  ;;  %v2040_v61 = vadd.f32 %v2039_v55, %v2038_v0  ;;  %v2075_v62 = vrot.slane %v2074_v56, 1 }
 0x27b   :  { %v1953_v63 = vadd.f32 %v1952_v57, %v1951_v49  ;;  %v1988_v1 = vrot.slane %v1987_v58, 2  ;;  %v2045_v4 = vadd.f32 %v2044_v47, %v2043_v38  ;;  %v2080_v5 = vrot.slane %v2079_v8, 2 }
 0x27c   :  { %v1958_v25 = vmul.f32 0.5, %v1947_v59  ;;  %v1984_v6 = vadd.f32 %v1983_v60, %v1982_v54  ;;  %v2050_v9 = vmul.f32 0.5, %v2040_v61  ;;  %v2076_v13 = vadd.f32 %v2075_v62, %v2074_v56 }
 0x27d   :  { %v1954_v45 = vrot.slane %v1953_v63, 1  ;;  %v1989_v17 = vadd.f32 %v1988_v1, %v1987_v58  ;;  %v2046_v14 = vrot.slane %v2045_v4, 1  ;;  %v2081_v15 = vadd.f32 %v2080_v5, %v2079_v8 }
 0x27e   :  { %v1994_v16 = vmul.f32 0.5, %v1984_v6  ;;  %v1998_v18 = vmul.f32 %v1958_v25, %v1958_v25  ;;  %v2086_v19 = vmul.f32 0.5, %v2076_v13  ;;  %v2090_v21 = vmul.f32 %v2050_v9, %v2050_v9 }
 0x27f   :  { %v1955_v22 = vadd.f32 %v1954_v45, %v1953_v63  ;;  %v1990_v20 = vrot.slane %v1989_v17, 1  ;;  %v2047_v27 = vadd.f32 %v2046_v14, %v2045_v4  ;;  %v2082_v28 = vrot.slane %v2081_v15, 1 }
 0x280   :  { %v2002_v24 = vsub.f32 %v1994_v16, %v1998_v18  ;;  %v2094_v26 = vsub.f32 %v2086_v19, %v2090_v21  ;;  %v2106_v49 = vmul.f32 %v1958_v25, %v5300_v12  ;;  %v2110_v51 = vmul.f32 %v2050_v9, %v5336_v3 }
 0x281   :  { %v1959_v29 = vmul.f32 0.5, %v1955_v22  ;;  %v1991_v30 = vadd.f32 %v1990_v20, %v1989_v17  ;;  %v2051_v35 = vmul.f32 0.5, %v2047_v27  ;;  %v2083_v36 = vadd.f32 %v2082_v28, %v2081_v15  ;;  %v2485_v22 = vld [vmem:[%s5707_s6 + $0x10] sm:$0xff]  ;;  %v2484_v20 = vld [vmem:[%s5707_s6 + $0x8] sm:$0xff]  ;;  %v5663_v28 = vld [vmem:[%s5708_s5] sm:$0x7] }
 0x282   :  { %v2006_v31 = vadd.f32 1e-05, %v2002_v24  ;;  %v2098_v32 = vadd.f32 1e-05, %v2094_v26  ;;  %v2114_v52 = vadd.f32 %v2110_v51, %v2106_v49  ;;  %v2147_v58 = vrot.slane %v5575_v33, %v5472_v41  ;;  %v2483_v24 = vld [vmem:[%s5707_s6] sm:$0xff] }
 0x283   :  { %v1995_v37 = vmul.f32 0.5, %v1991_v30  ;;  %v1999_v40 = vmul.f32 %v1959_v29, %v1959_v29  ;;  %v2087_v42 = vmul.f32 0.5, %v2083_v36  ;;  %v2091_v44 = vmul.f32 %v2051_v35, %v2051_v35 }
 0x284   :  { %2730 = vrsqrt.f32 %v2006_v31  ;;  %v2107_v54 = vmul.f32 %v1959_v29, %v5300_v12  ;;  %v2111_v55 = vmul.f32 %v2051_v35, %v5336_v3  ;;  %v2130_v47 = vsub.f32 %v5584_v2, %v2114_v52 }
 0x285   :  { %2732 = vrsqrt.f32 %v2098_v32  ;;  %v2003_v11 = vsub.f32 %v1995_v37, %v1999_v40  ;;  %v2095_v46 = vsub.f32 %v2087_v42, %v2091_v44  ;;  %v2151_v61 = vrot.slane %v5575_v33, %v2142_v39 }
 0x286   :  { %v2115_v60 = vadd.f32 %v2111_v55, %v2107_v54  ;;  %v2167_v4 = vrot.slane %v2147_v58, %v5472_v41  ;;  %v2187_v5 = vrot.slane %v5575_v33, %v5483_v50  ;;  %v2191_v2 = vrot.slane %v5575_v33, %v2182_v23  ;;  %v2488_v23 = vld [vmem:[%s5707_s6 + $0x28] sm:$0xff]  ;;  %v2487_v33 = vld [vmem:[%s5707_s6 + $0x20] sm:$0xff] }
 0x287   :  { %v2007_v0 = vadd.f32 1e-05, %v2003_v11  ;;  %v2099_v48 = vadd.f32 1e-05, %v2095_v46  ;;  %v2171_v39 = vrot.slane %v2151_v61, %v5472_v41  ;;  %2696 = vmatpush3.msra.mxu0 %v2488_v23  ;;  %v2274_v30 = vrot.slane %v5663_v28, %v5105_v43 }
 0x288   :  { %v2131_v6 = vsub.f32 %v5590_v7, %v2115_v60  ;;  %v2207_v45 = vrot.slane %v2187_v5, %v5483_v50  ;;  %v2211_v14 = vrot.slane %v2191_v2, %v5483_v50  ;;  %2697 = vmatprep.subr.mxu0 %v2753_v10  ;;  %v2486_v7 = vld [vmem:[%s5707_s6 + $0x18] sm:$0xff] }
 0x289   :  { %2734 = vrsqrt.f32 %v2007_v0  ;;  %2698 = vmatpush3.msra.mxu0 %v2487_v33 }
 0x28a   :  { %2736 = vrsqrt.f32 %v2099_v48  ;;  %2699 = vmatprep.subr.mxu0 %v2753_v10 }
 0x28b   :  { %2700 = vmatpush3.msra.mxu0 %v2486_v7 }
 0x28c   :  { %2701 = vmatprep.subr.mxu0 %v2753_v10 }
 0x28d   :  { %2702 = vmatpush3.msra.mxu0 %v2485_v22 }
 0x28e   :  { %2703 = vmatprep.subr.mxu0 %v2753_v10 }
 0x28f   :  { %2704 = vmatpush3.msra.mxu0 %v2484_v20 }
 0x290   :  { %2705 = vmatprep.subr.mxu0 %v2753_v10 }
 0x291   :  { %v2731_v38 = vpop.eup %2730  ;;  %2706 = vmatpush3.msra.mxu0 %v2483_v24 }
 0x292   :  { %v2733_v53 = vpop.eup %2732  ;;  %v2118_v56 = vmul.f32 %v2731_v38, %v5300_v12 }
 0x293   :  { %v2122_v57 = vmul.f32 %v2733_v53, %v5336_v3 }
 0x295   :  { %v2126_v8 = vadd.f32 %v2122_v57, %v2118_v56 }
 0x296   :  { %v2735_v59 = vpop.eup %2734 }
 0x297   :  { %v2737_v62 = vpop.eup %2736  ;;  %v2119_v63 = vmul.f32 %v2735_v59, %v5300_v12  ;;  %v2134_v1 = vmul.f32 %v2130_v47, %v2126_v8 }
 0x298   :  { %v2123_v25 = vmul.f32 %v2737_v62, %v5336_v3 }
 0x299   :  { %v2174_v13 = vmul.f32 %v2167_v4, %v2134_v1 }
 0x29a   :  { %v2127_v9 = vadd.f32 %v2123_v25, %v2119_v63  ;;  %v2682_v26 = vpop.f32.mrf.mxu0 }
 0x29b   :  { %v2214_v16 = vadd.f32 %v2207_v45, %v2174_v13 }
 0x29c   :  { %v2135_v17 = vmul.f32 %v2131_v6, %v2127_v9  ;;  %v2683_v27 = vpop.f32.mrf.mxu0 }
 0x29d   :  { %v2218_v21 = vmax.f32 %v2214_v16, 0.0  ;;  %v2684_v29 = vadd.f32 %v2683_v27, %v2682_v26  ;;  %v2475_v27 = vrot.slane %v5663_v28, %v5472_v41 }
 0x29e   :  { %v2175_v15 = vmul.f32 %v2171_v39, %v2135_v17 }
 0x29f   :  { %v2346_v31 = vadd.f32 %v2684_v29, %v2274_v30  ;;  %v2480_v30 = vrot.slane %v5663_v28, %v5483_v50 }
 0x2a0   :  { %v2215_v18 = vadd.f32 %v2211_v14, %v2175_v15 }
 0x2a2   :  { %v2219_v19 = vmax.f32 %v2215_v18, 0.0 }
 0x2a4   :  { %2647 = vmatprep.mubr.msk.f32.mxu1 %vm2275_vm3, %v2219_v19 }
 0x2a5   :  { %2414 = vmatmul.mubr.f32.vlgmr.msra.gmra.mxu1 %v2218_v21 }
 0x365   :  { %v2415_v32 = vpop.f32.mrf.mxu1 }
 0x366   :  { %v2416_v35 = vadd.f32 %v2415_v32, %v2346_v31 }
 0x367   :  { %v2417_v36 = vpop.f32.mrf.mxu1 }
 0x368   :  { %v2419_v37 = vmul.f32 %v2416_v35, %v5300_v12  ;;  %v2442_v10 = vmul.f32 %v2416_v35, %v5336_v3 }
 0x36a   :  { %v2421_v40 = vsel %vm2420_vm6, %v2419_v37, 0.0  ;;  %v2429_v42 = vmul.f32 %v2419_v37, %v2416_v35  ;;  %v2443_v44 = vsel %vm2420_vm6, %v2442_v10, 0.0  ;;  %v2451_v11 = vmul.f32 %v2442_v10, %v2416_v35  ;;  %v5680_v37 = vld [vmem:[%s5709_s7] sm:$0x7] }
 0x36b   :  { %v2422_v46 = vrot.slane %v2421_v40, 4  ;;  %v2444_v0 = vrot.slane %v2443_v44, 4 }
 0x36c   :  { %v2430_v48 = vsel %vm2420_vm6, %v2429_v42, 0.0  ;;  %v2452_v49 = vsel %vm2420_vm6, %v2451_v11, 0.0 }
 0x36d   :  { %v2423_v51 = vadd.f32 %v2422_v46, %v2421_v40  ;;  %v2431_v38 = vrot.slane %v2430_v48, 4  ;;  %v2445_v52 = vadd.f32 %v2444_v0, %v2443_v44  ;;  %v2453_v53 = vrot.slane %v2452_v49, 4 }
 0x36f   :  { %v2424_v54 = vrot.slane %v2423_v51, 2  ;;  %v2432_v55 = vadd.f32 %v2431_v38, %v2430_v48  ;;  %v2446_v56 = vrot.slane %v2445_v52, 2  ;;  %v2454_v57 = vadd.f32 %v2453_v53, %v2452_v49 }
 0x371   :  { %v2425_v58 = vadd.f32 %v2424_v54, %v2423_v51  ;;  %v2433_v47 = vrot.slane %v2432_v55, 2  ;;  %v2447_v8 = vadd.f32 %v2446_v56, %v2445_v52  ;;  %v2455_v59 = vrot.slane %v2454_v57, 2 }
 0x373   :  { %v2426_v60 = vrot.slane %v2425_v58, 1  ;;  %v2434_v61 = vadd.f32 %v2433_v47, %v2432_v55  ;;  %v2448_v62 = vrot.slane %v2447_v8, 1  ;;  %v2456_v63 = vadd.f32 %v2455_v59, %v2454_v57 }
 0x375   :  { %v2427_v1 = vadd.f32 %v2426_v60, %v2425_v58  ;;  %v2435_v4 = vrot.slane %v2434_v61, 1  ;;  %v2449_v5 = vadd.f32 %v2448_v62, %v2447_v8  ;;  %v2457_v25 = vrot.slane %v2456_v63, 1 }
 0x377   :  { %v2428_v2 = vmul.f32 0.5, %v2427_v1  ;;  %v2436_v6 = vadd.f32 %v2435_v4, %v2434_v61  ;;  %v2450_v9 = vmul.f32 0.5, %v2449_v5  ;;  %v2458_v39 = vadd.f32 %v2457_v25, %v2456_v63 }
 0x379   :  { %v2437_v13 = vmul.f32 0.5, %v2436_v6  ;;  %v2438_v45 = vmul.f32 %v2428_v2, %v2428_v2  ;;  %v2459_v17 = vmul.f32 0.5, %v2458_v39  ;;  %v2460_v14 = vmul.f32 %v2450_v9, %v2450_v9 }
 0x37a   :  { %v2464_v21 = vmul.f32 %v2428_v2, %v5300_v12  ;;  %v2465_v34 = vmul.f32 %v2450_v9, %v5336_v3 }
 0x37b   :  { %v2439_v15 = vsub.f32 %v2437_v13, %v2438_v45  ;;  %v2461_v16 = vsub.f32 %v2459_v17, %v2460_v14 }
 0x37c   :  { %v2466_v33 = vadd.f32 %v2465_v34, %v2464_v21 }
 0x37d   :  { %v2440_v18 = vadd.f32 1e-05, %v2439_v15  ;;  %v2462_v19 = vadd.f32 1e-05, %v2461_v16 }
 0x37e   :  { %v2470_v26 = vsub.f32 %v2416_v35, %v2466_v33  ;;  %v2494_v35 = vrot.slane %v5680_v37, %v5105_v43 }
 0x37f   :  { %2738 = vrsqrt.f32 %v2440_v18 }
 0x380   :  { %2740 = vrsqrt.f32 %v2462_v19 }
 0x38c   :  { %v2739_v23 = vpop.eup %2738 }
 0x38d   :  { %v2741_v7 = vpop.eup %2740  ;;  %v2467_v22 = vmul.f32 %v2739_v23, %v5300_v12 }
 0x38e   :  { %v2468_v20 = vmul.f32 %v2741_v7, %v5336_v3 }
 0x390   :  { %v2469_v24 = vadd.f32 %v2468_v20, %v2467_v22 }
 0x392   :  { %v2471_v29 = vmul.f32 %v2470_v26, %v2469_v24 }
 0x394   :  { %v2476_v31 = vmul.f32 %v2475_v27, %v2471_v29 }
 0x396   :  { %v2481_v32 = vadd.f32 %v2480_v30, %v2476_v31  ;;  %v2628_v30 = vrot.slane %v5680_v37, %v5472_v41 }
 0x398   :  { %v2482_v36 = vmax.f32 %v2481_v32, 0.0  ;;  %v2633_v32 = vrot.slane %v5680_v37, %v5483_v50 }
 0x39a   :  { %2708 = vmatmul.mubr.msk.f32.vlgmr.msra.gmra.mxu0 %vm2495_vm7, %v2482_v36 }
 0x45a   :  { %v2569_v10 = vpop.f32.mrf.mxu0 }
 0x45b   :  { %v2570_v40 = vadd.f32 %v2569_v10, %v2494_v35 }
 0x45c   :  { %v2709_v42 = vpop.f32.mrf.mxu0 }
 0x45d   :  { %v2573_v44 = vmul.f32 %v2570_v40, %v5300_v12  ;;  %v2595_v28 = vmul.f32 %v2570_v40, %v5336_v3 }
 0x45f   :  { %v2574_v11 = vsel %vm1948_vm2, %v2573_v44, 0.0  ;;  %v2582_v46 = vmul.f32 %v2573_v44, %v2570_v40  ;;  %v2596_v0 = vsel %vm1948_vm2, %v2595_v28, 0.0  ;;  %v2604_v48 = vmul.f32 %v2595_v28, %v2570_v40 }
 0x460   :  { %v2575_v49 = vrot.slane %v2574_v11, 4  ;;  %v2597_v51 = vrot.slane %v2596_v0, 4 }
 0x461   :  { %v2583_v38 = vsel %vm1948_vm2, %v2582_v46, 0.0  ;;  %v2605_v52 = vsel %vm1948_vm2, %v2604_v48, 0.0 }
 0x462   :  { %v2576_v43 = vadd.f32 %v2575_v49, %v2574_v11  ;;  %v2584_v53 = vrot.slane %v2583_v38, 4  ;;  %v2598_v54 = vadd.f32 %v2597_v51, %v2596_v0  ;;  %v2606_v55 = vrot.slane %v2605_v52, 4 }
 0x464   :  { %v2577_v56 = vrot.slane %v2576_v43, 2  ;;  %v2585_v57 = vadd.f32 %v2584_v53, %v2583_v38  ;;  %v2599_v58 = vrot.slane %v2598_v54, 2  ;;  %v2607_v47 = vadd.f32 %v2606_v55, %v2605_v52 }
 0x466   :  { %v2578_v8 = vadd.f32 %v2577_v56, %v2576_v43  ;;  %v2586_v59 = vrot.slane %v2585_v57, 2  ;;  %v2600_v60 = vadd.f32 %v2599_v58, %v2598_v54  ;;  %v2608_v61 = vrot.slane %v2607_v47, 2 }
 0x468   :  { %v2579_v62 = vrot.slane %v2578_v8, 1  ;;  %v2587_v63 = vadd.f32 %v2586_v59, %v2585_v57  ;;  %v2601_v1 = vrot.slane %v2600_v60, 1  ;;  %v2609_v4 = vadd.f32 %v2608_v61, %v2607_v47 }
 0x46a   :  { %v2580_v5 = vadd.f32 %v2579_v62, %v2578_v8  ;;  %v2588_v25 = vrot.slane %v2587_v63, 1  ;;  %v2602_v2 = vadd.f32 %v2601_v1, %v2600_v60  ;;  %v2610_v6 = vrot.slane %v2609_v4, 1 }
 0x46c   :  { %v2581_v9 = vmul.f32 0.5, %v2580_v5  ;;  %v2589_v39 = vadd.f32 %v2588_v25, %v2587_v63  ;;  %v2603_v13 = vmul.f32 0.5, %v2602_v2  ;;  %v2611_v45 = vadd.f32 %v2610_v6, %v2609_v4 }
 0x46e   :  { %v2590_v17 = vmul.f32 0.5, %v2589_v39  ;;  %v2591_v14 = vmul.f32 %v2581_v9, %v2581_v9  ;;  %v2612_v15 = vmul.f32 0.5, %v2611_v45  ;;  %v2613_v16 = vmul.f32 %v2603_v13, %v2603_v13 }
 0x46f   :  { %v2617_v23 = vmul.f32 %v2581_v9, %v5300_v12  ;;  %v2618_v33 = vmul.f32 %v2603_v13, %v5336_v3 }
 0x470   :  { %v2592_v18 = vsub.f32 %v2590_v17, %v2591_v14  ;;  %v2614_v19 = vsub.f32 %v2612_v15, %v2613_v16 }
 0x471   :  { %v2619_v22 = vadd.f32 %v2618_v33, %v2617_v23 }
 0x472   :  { %v2593_v21 = vadd.f32 1e-05, %v2592_v18  ;;  %v2615_v34 = vadd.f32 1e-05, %v2614_v19 }
 0x473   :  { %v2623_v29 = vsub.f32 %v2570_v40, %v2619_v22 }
 0x474   :  { %2742 = vrsqrt.f32 %v2593_v21 }
 0x475   :  { %2744 = vrsqrt.f32 %v2615_v34 }
 0x481   :  { %v2743_v7 = vpop.eup %2742 }
 0x482   :  { %v2745_v20 = vpop.eup %2744  ;;  %v2620_v24 = vmul.f32 %v2743_v7, %v5300_v12 }
 0x483   :  { %v2621_v26 = vmul.f32 %v2745_v20, %v5336_v3 }
 0x485   :  { %v2622_v27 = vadd.f32 %v2621_v26, %v2620_v24 }
 0x487   :  { %v2624_v31 = vmul.f32 %v2623_v29, %v2622_v27 }
 0x489   :  { %v2629_v36 = vmul.f32 %v2628_v30, %v2624_v31 }
 0x48b   :  { %v2634_v35 = vadd.f32 %v2633_v32, %v2629_v36 }
 0x48d   :  { %v2635_v10 = vmax.f32 %v2634_v35, 0.0 }
 0x48f   :  { %2636 = vst.msk [vmem:[%s5710_s8] sm:$0xf] %vm1948_vm2, %v2635_v10 }

</bundles_post_ra>
